<compile_context>
chip_gen: v7x
topology: tpu7x:2x2x1
jax: 0.10.0
libtpu: 0.0.40
codegen_flags: <defaults>
</compile_context>

<pallas_src>
import functools
import math

import jax
import jax.numpy as jnp
from jax import lax
from jax.experimental import pallas as pl
from jax.experimental.pallas import tpu as pltpu

# ----------------------------- config (small) -------------------------------
D_MODEL = 32      # config.d_model
D_EMBED = 16      # config.d_embed  (visual feature dim)
E_MODEL = 16      # config.e_model  (event feature dim)
VOCAB   = 64      # config.vocab
HEADS   = 4       # config.heads
D_FF    = 64      # feed-forward hidden dim
VIS_LAYERS = 1    # config.vis_layers
TXT_LAYERS = 1    # config.txt_layers
N_LAYERS   = 1    # config.n_layers (cross encoder)
MAX_LEN = 64
EPS     = 1e-6
NEG_INF = -1e9

BATCH_BLOCK = 2   # batch elements folded into one grid step

assert D_MODEL % HEADS == 0
assert D_EMBED == E_MODEL  # packed together into one embed-weight slab

# ------------------------ packed parameter row layout ------------------------
N_TOTAL = VIS_LAYERS + TXT_LAYERS + TXT_LAYERS + N_LAYERS   # vis|txt|ent|cross
LAYER_ROWS = 6
ROW_N1S, ROW_N1B, ROW_N2S, ROW_N2B, ROW_BOUT, ROW_BFF2 = range(6)
FINAL_BASE = N_TOTAL * LAYER_ROWS        # 8 rows: (scale, bias) x 4 streams
MODE_BASE = FINAL_BASE + 8               # 3 rows: mode 0 (vis) / 1 (txt) / 2 (ent)
VIS_B_ROW = MODE_BASE + 3
ENT_B_ROW = VIS_B_ROW + 1
BFF1_BASE = ENT_B_ROW + 1                # N_TOTAL rows (D_FF lanes used)
HEADB_ROW = BFF1_BASE + N_TOTAL          # 1 row (OUT_PAD lanes used)
PE_BASE = HEADB_ROW + 1                  # PE_ROWS rows (D_MODEL lanes used)
PE_ROWS = 16
VEC_ROWS = PE_BASE + PE_ROWS
VEC_LANES = 128

OUT_PAD = 128                            # lane-dense fused-head width
BIAS_LANES = 128                         # lane width of the attn-bias slab
assert VOCAB + D_EMBED <= OUT_PAD


# ------------------------------- fused kernel --------------------------------
def fused_forward_kernel(
    # per-batch-block data
    vft_ref, temb_ref, ent_ref, bias_ref,
    # packed weights
    wqkv_ref, wo_ref, w1_ref, w2_ref, embw_ref, headw_ref, bqkv_ref, vecp_ref,
    # output + scratch
    out_ref, x_scr,
    *, heads, stack_sizes, bb):
    f32 = jnp.float32
    bf16 = jnp.bfloat16

    D = wo_ref.shape[-1]
    dk = D // heads
    dff = w1_ref.shape[-1]
    scale = 1.0 / math.sqrt(dk)
    sqrt_d = math.sqrt(D)

    n_vis, n_txt, n_ent, n_cross = stack_sizes
    off_txt = n_vis
    off_ent = n_vis + n_txt
    off_cross = off_ent + n_ent

    Lv = vft_ref.shape[1]
    Lt = temb_ref.shape[1]
    Le = ent_ref.shape[1]
    Ltot = Lv + Le + Lt

    # additive mask-bias slab for this batch block, reused by all heads/layers
    bias_mat = bias_ref[...]                        # (bb, 8, 128) f32

    def vec(row, width):
        return vecp_ref[row:row + 1, 0:width]       # (1, width) f32

    def norm(x, row):
        # TODO(synk): Norm module source not provided; assumed the usual custom
        #   alpha * (x - mean) / (x.std(unbiased=True) + eps) + bias.
        mu = jnp.mean(x, axis=-1, keepdims=True)
        xc = x - mu
        var = jnp.sum(xc * xc, axis=-1, keepdims=True) * (1.0 / (D - 1))
        inv = 1.0 / (jnp.sqrt(var) + EPS)           # exact reciprocal (parity)
        return vec(row, D) * (xc * inv) + vec(row + 1, D)

    def encoder_layer(x, L, bias_row, li):
        """x: (bb*L, D) f32.  Pre-LN: x += MHA(N1(x)); x += FFN(N2(x))."""
        base = li * LAYER_ROWS
        x2 = norm(x, base + ROW_N1S).astype(bf16)
        acc = [jnp.zeros((L, D), f32) for _ in range(bb)]
        for h in range(heads):                      # static unroll (tiny)
            def proj(which):
                idx = (li * 3 + which) * heads + h
                w = wqkv_ref[idx]                   # (D, dk) bf16
                b = bqkv_ref[idx:idx + 1, :]        # (1, dk) f32
                return jnp.dot(x2, w, preferred_element_type=f32) + b
            q = proj(0).astype(bf16)
            k = proj(1).astype(bf16)
            v = proj(2).astype(bf16)
            wo_h = wo_ref[li * heads + h]           # (dk, D) bf16
            for b in range(bb):
                r0 = b * L
                # scores: contract last axes -> transpose absorbed into MXU
                s = lax.dot_general(q[r0:r0 + L], k[r0:r0 + L],
                                    (((1,), (1,)), ((), ())),
                                    preferred_element_type=f32) * scale
                s = s + bias_mat[b, bias_row:bias_row + 1, 0:L]
                s = s - jnp.max(s, axis=-1, keepdims=True)
                p = jnp.exp(s)
                p = p * pl.reciprocal(jnp.sum(p, axis=-1, keepdims=True),
                                      approx=True)
                ctx = jnp.dot(p.astype(bf16), v[r0:r0 + L],
                              preferred_element_type=f32)
                # distribute W_o per head: no lane concat of head outputs
                acc[b] = acc[b] + jnp.dot(ctx.astype(bf16), wo_h,
                                          preferred_element_type=f32)
        x = x + jnp.concatenate(acc, axis=0) + vec(base + ROW_BOUT, D)
        # --- feed forward ---
        x2 = norm(x, base + ROW_N2S).astype(bf16)
        h1 = jnp.maximum(
            jnp.dot(x2, w1_ref[li], preferred_element_type=f32)
            + vec(BFF1_BASE + li, dff), 0.0)
        ff = (jnp.dot(h1.astype(bf16), w2_ref[li], preferred_element_type=f32)
              + vec(base + ROW_BFF2, D))
        return x + ff

    def run_stack(x, L, bias_row, lo, n, stream_idx):
        # TODO(synk): stacks are 1 layer deep here; switch to lax.fori_loop with
        # dynamic weight indexing if layer counts grow (bounded live ranges).
        for li in range(lo, lo + n):
            x = encoder_layer(x, L, bias_row, li)
        return norm(x, FINAL_BASE + 2 * stream_idx)

    def add_pos(y, mode_idx, L):
        # TODO(synk): VISEncoder / Encoder / EntEncoder internals not provided;
        # assumed embed -> x*sqrt(d) + PE + mode_emb -> layers -> Norm.
        pe = vecp_ref[PE_BASE:PE_BASE + L, 0:D] + vec(MODE_BASE + mode_idx, D)
        return y * sqrt_d + jnp.tile(pe, (bb, 1))

    # --- vis encoder ---
    v = (jnp.dot(vft_ref[...].reshape(bb * Lv, -1).astype(bf16), embw_ref[0],
                 preferred_element_type=f32) + vec(VIS_B_ROW, D))
    v = run_stack(add_pos(v, 0, Lv), Lv, 0, 0, n_vis, 0)

    # --- txt encoder (embedding gather done outside the kernel) ---
    t = add_pos(temb_ref[...].reshape(bb * Lt, D), 1, Lt)
    t = run_stack(t, Lt, 1, off_txt, n_txt, 1)

    # --- event encoder ---
    e = (jnp.dot(ent_ref[...].reshape(bb * Le, -1).astype(bf16), embw_ref[1],
                 preferred_element_type=f32) + vec(ENT_B_ROW, D))
    e = run_stack(add_pos(e, 2, Le), Le, 2, off_ent, n_ent, 2)

    # --- cross encoder: scatter streams into VMEM scratch (no concatenate) ---
    for b in range(bb):
        r = b * Ltot
        x_scr[r:r + Lv, :] = v[b * Lv:(b + 1) * Lv]
        x_scr[r + Lv:r + Lv + Le, :] = e[b * Le:(b + 1) * Le]
        x_scr[r + Lv + Le:r + Ltot, :] = t[b * Lt:(b + 1) * Lt]
    x = x_scr[...]
    for li in range(off_cross, off_cross + n_cross):
        x = encoder_layer(x, Ltot, 3, li)
    x = norm(x, FINAL_BASE + 2 * 3)

    # --- fused, lane-dense output head: [tied logit | MVM regression | pad] ---
    fused = (jnp.dot(x.astype(bf16), headw_ref[...],
                     preferred_element_type=f32)
             + vecp_ref[HEADB_ROW:HEADB_ROW + 1, :])
    out_ref[...] = fused.reshape(bb, Ltot, fused.shape[-1])


# --------------------------- parameter construction --------------------------
def sinusoidal_pe(max_len, d_model):
    pos = jnp.arange(max_len, dtype=jnp.float32)[:, None]
    div = jnp.exp(jnp.arange(0, d_model, 2, dtype=jnp.float32)
                  * (-math.log(10000.0) / d_model))
    pe = jnp.zeros((max_len, d_model), jnp.float32)
    pe = pe.at[:, 0::2].set(jnp.sin(pos * div))
    pe = pe.at[:, 1::2].set(jnp.cos(pos * div))
    return pe


def make_params(key):
    k_vis, k_ent, k_txt, k_mode, k_layers = jax.random.split(key, 5)
    dk = D_MODEL // HEADS

    def lin(k, din, dout):
        limit = math.sqrt(6.0 / (din + dout))
        return jax.random.uniform(k, (din, dout), jnp.float32, -limit, limit)

    # per-head weight slabs (split ONCE on the host, never per forward)
    wqkv_h, wo_h, w1, w2 = [], [], [], []
    for lk in jax.random.split(k_layers, N_TOTAL):
        sub = jax.random.split(lk, 6)
        wq, wk, wv = (lin(sub[0], D_MODEL, D_MODEL),
                      lin(sub[1], D_MODEL, D_MODEL),
                      lin(sub[2], D_MODEL, D_MODEL))
        wo = lin(sub[3], D_MODEL, D_MODEL)
        for w in (wq, wk, wv):                               # which = 0,1,2
            for h in range(HEADS):
                wqkv_h.append(w[:, h * dk:(h + 1) * dk])     # (D, dk)
        for h in range(HEADS):
            wo_h.append(wo[h * dk:(h + 1) * dk, :])          # (dk, D)
        w1.append(lin(sub[4], D_MODEL, D_FF))
        w2.append(lin(sub[5], D_FF, D_MODEL))

    vis_w_in = lin(k_vis, D_EMBED, D_MODEL)      # torch vis_embed.weight.T
    ent_w_in = lin(k_ent, E_MODEL, D_MODEL)      # torch event_embed.weight.T
    txt_embed_w = lin(k_txt, VOCAB, D_MODEL)     # nn.Embedding weight (tied)
    mode_emb = lin(k_mode, 4, D_MODEL)
    pe = sinusoidal_pe(MAX_LEN, D_MODEL)

    # one f32 slab for all small vector parameters (see row layout above)
    vecp = jnp.zeros((VEC_ROWS, VEC_LANES), jnp.float32)
    for li in range(N_TOTAL):
        base = li * LAYER_ROWS
        vecp = vecp.at[base + ROW_N1S, :D_MODEL].set(1.0)    # norm scales = 1
        vecp = vecp.at[base + ROW_N2S, :D_MODEL].set(1.0)
    for s in range(4):
        vecp = vecp.at[FINAL_BASE + 2 * s, :D_MODEL].set(1.0)
    vecp = vecp.at[MODE_BASE:MODE_BASE + 3, :D_MODEL].set(mode_emb[:3])
    vecp = vecp.at[PE_BASE:PE_BASE + PE_ROWS, :D_MODEL].set(pe[:PE_ROWS])
    # (b_out, b_ff1, b_ff2, vis_b, ent_b, head_b rows stay zero-initialized)

    # fused, zero-padded output head:  logit = x @ E^T (tied); mvm = x @ W_vis
    head_w = jnp.zeros((D_MODEL, OUT_PAD), jnp.float32)
    head_w = head_w.at[:, :VOCAB].set(txt_embed_w.T)
    head_w = head_w.at[:, VOCAB:VOCAB + D_EMBED].set(vis_w_in.T)

    bf16 = jnp.bfloat16
    return {
        "txt_embed_w": txt_embed_w,                              # f32, XLA gather
        "wqkv_h": jnp.stack(wqkv_h).astype(bf16),                # (N*3*H, D, dk)
        "wo_h": jnp.stack(wo_h).astype(bf16),                    # (N*H, dk, D)
        "w1": jnp.stack(w1).astype(bf16),                        # (N, D, D_FF)
        "w2": jnp.stack(w2).astype(bf16),                        # (N, D_FF, D)
        "embw": jnp.stack([vis_w_in, ent_w_in]).astype(bf16),    # (2, D_EMBED, D)
        "head_w": head_w.astype(bf16),                           # (D, OUT_PAD)
        "bqkv": jnp.zeros((N_TOTAL * 3 * HEADS, D_MODEL // HEADS), jnp.float32),
        "vecp": vecp,                                            # (VEC_ROWS, 128)
    }


# ------------------------------- model wrapper --------------------------------
_WEIGHT_KEYS = ("wqkv_h", "wo_h", "w1", "w2", "embw", "head_w", "bqkv", "vecp")


def transformer_forward_vc(params, vft, trg, trg_mask, vft_mask, ent, ent_mask):
    """forward_vc_event_model with cpt=None and trg_mask of query-size 1."""
    B, Lv, _ = vft.shape
    Lt = trg.shape[1]
    Le = ent.shape[1]
    Ltot = Lv + Le + Lt
    assert max(Lv, Lt, Le) <= PE_ROWS and Ltot <= BIAS_LANES

    bb = BATCH_BLOCK if B % BATCH_BLOCK == 0 else 1

    # embedding gather stays in XLA; everything else is one fused kernel
    t_emb = jnp.take(params["txt_embed_w"], trg, axis=0)

    # additive attention-bias slab (one per-batch DMA; no in-kernel where/concat)
    def to_bias(m):                                   # (B, 1, L) -> (B, L)
        return jnp.where(m[:, 0] == 0, NEG_INF, 0.0).astype(jnp.float32)
    vb, tb, eb = to_bias(vft_mask), to_bias(trg_mask), to_bias(ent_mask)
    bias = jnp.zeros((B, 8, BIAS_LANES), jnp.float32)
    bias = bias.at[:, 0, :Lv].set(vb)
    bias = bias.at[:, 1, :Lt].set(tb)
    bias = bias.at[:, 2, :Le].set(eb)
    bias = bias.at[:, 3, :Ltot].set(jnp.concatenate([vb, eb, tb], axis=-1))

    per_batch = [vft, t_emb, ent, bias]
    weights = [params[k] for k in _WEIGHT_KEYS]

    def batch_spec(a):
        nd = a.ndim
        return pl.BlockSpec((bb,) + a.shape[1:],
                            lambda i, _n=nd: (i,) + (0,) * (_n - 1))

    def full_spec(a):
        nd = a.ndim
        return pl.BlockSpec(a.shape, lambda i, _n=nd: (0,) * _n)

    in_specs = [batch_spec(a) for a in per_batch] + [full_spec(w) for w in weights]
    out_shape = jax.ShapeDtypeStruct((B, Ltot, OUT_PAD), jnp.float32)
    out_specs = pl.BlockSpec((bb, Ltot, OUT_PAD), lambda i: (i, 0, 0))

    kernel = functools.partial(
        fused_forward_kernel, heads=HEADS,
        stack_sizes=(VIS_LAYERS, TXT_LAYERS, TXT_LAYERS, N_LAYERS), bb=bb)

    fused = pl.pallas_call(
        kernel,
        grid=(B // bb,),
        in_specs=in_specs,
        out_specs=out_specs,
        out_shape=out_shape,
        scratch_shapes=[pltpu.VMEM((bb * Ltot, D_MODEL), jnp.float32)],
        compiler_params=pltpu.CompilerParams(
            dimension_semantics=("parallel",),
            vmem_limit_bytes=32 * 1024 * 1024),
    )(*per_batch, *weights)

    # lane-dense kernel output; split logits / mvm with plain XLA slices
    output = fused[:, :, :VOCAB]
    output_mvm = fused[:, :, VOCAB:VOCAB + D_EMBED]
    return output, output_mvm


# ---------------------------------- main --------------------------------------
if __name__ == "__main__":
    key = jax.random.PRNGKey(0)
    pkey, k_vft, k_trg, k_ent = jax.random.split(key, 4)
    params = make_params(pkey)

    B, Lv, Lt, Le = 2, 8, 8, 8
    vft = jax.random.normal(k_vft, (B, Lv, D_EMBED), jnp.float32)
    trg = jax.random.randint(k_trg, (B, Lt), 0, VOCAB, jnp.int32)
    ent = jax.random.normal(k_ent, (B, Le, E_MODEL), jnp.float32)
    vft_mask = jnp.ones((B, 1, Lv), jnp.float32)
    trg_mask = jnp.ones((B, 1, Lt), jnp.float32)   # trg_mask.size(1) == 1 branch
    ent_mask = jnp.ones((B, 1, Le), jnp.float32)

    fwd = jax.jit(transformer_forward_vc)
    output, output_mvm = fwd(params, vft, trg, trg_mask, vft_mask, ent, ent_mask)
    output, output_mvm = jax.block_until_ready((output, output_mvm))

    Ltot = Lv + Le + Lt
    assert output.shape == (B, Ltot, VOCAB), output.shape
    assert output_mvm.shape == (B, Ltot, D_EMBED), output_mvm.shape
    assert bool(jnp.all(jnp.isfinite(output))) and bool(jnp.all(jnp.isfinite(output_mvm)))
    print("KERNEL_OK")
</pallas_src>

<mosaic_0001>
module attributes {stable_mosaic.version = 11 : i64} {
  func.func @fused_forward_kernel(%arg0: i32, %arg1: memref<2x8x16xf32, #tpu.memory_space<vmem>>, %arg2: memref<2x8x32xf32, #tpu.memory_space<vmem>>, %arg3: memref<2x8x16xf32, #tpu.memory_space<vmem>>, %arg4: memref<2x8x128xf32, #tpu.memory_space<vmem>>, %arg5: memref<48x32x8xbf16, #tpu.memory_space<vmem>>, %arg6: memref<16x8x32xbf16, #tpu.memory_space<vmem>>, %arg7: memref<4x32x64xbf16, #tpu.memory_space<vmem>>, %arg8: memref<4x64x32xbf16, #tpu.memory_space<vmem>>, %arg9: memref<2x16x32xbf16, #tpu.memory_space<vmem>>, %arg10: memref<32x128xbf16, #tpu.memory_space<vmem>>, %arg11: memref<48x8xf32, #tpu.memory_space<vmem>>, %arg12: memref<58x128xf32, #tpu.memory_space<vmem>>, %arg13: memref<2x24x128xf32, #tpu.memory_space<vmem>>, %arg14: memref<48x32xf32, #tpu.memory_space<vmem>>) attributes {dimension_semantics = [#tpu.dimension_semantics<parallel>], iteration_bounds = array<i64: 1>, scalar_prefetch = 0 : i64, scratch_operands = 1 : i64, tpu.core_type = #tpu.core_type<tc>, window_params = [{transform_indices = @transform_0, window_bounds = array<i64: 2, 8, 16>}, {transform_indices = @transform_1, window_bounds = array<i64: 2, 8, 32>}, {transform_indices = @transform_2, window_bounds = array<i64: 2, 8, 16>}, {transform_indices = @transform_3, window_bounds = array<i64: 2, 8, 128>}, {pipeline_mode = #tpu.pipeline_mode<synchronous>, transform_indices = @transform_4, window_bounds = array<i64: 48, 32, 8>}, {pipeline_mode = #tpu.pipeline_mode<synchronous>, transform_indices = @transform_5, window_bounds = array<i64: 16, 8, 32>}, {pipeline_mode = #tpu.pipeline_mode<synchronous>, transform_indices = @transform_6, window_bounds = array<i64: 4, 32, 64>}, {pipeline_mode = #tpu.pipeline_mode<synchronous>, transform_indices = @transform_7, window_bounds = array<i64: 4, 64, 32>}, {pipeline_mode = #tpu.pipeline_mode<synchronous>, transform_indices = @transform_8, window_bounds = array<i64: 2, 16, 32>}, {pipeline_mode = #tpu.pipeline_mode<synchronous>, transform_indices = @transform_9, window_bounds = array<i64: 32, 128>}, {pipeline_mode = #tpu.pipeline_mode<synchronous>, transform_indices = @transform_10, window_bounds = array<i64: 48, 8>}, {pipeline_mode = #tpu.pipeline_mode<synchronous>, transform_indices = @transform_11, window_bounds = array<i64: 58, 128>}, {transform_indices = @transform_12, window_bounds = array<i64: 2, 24, 128>}]} {
    %c0 = arith.constant 0 : index
    %c0_0 = arith.constant 0 : index
    %c0_1 = arith.constant 0 : index
    %0 = vector.load %arg4[%c0, %c0_0, %c0_1] : memref<2x8x128xf32, #tpu.memory_space<vmem>>, vector<2x8x128xf32>
    %c0_2 = arith.constant 0 : index
    %c0_3 = arith.constant 0 : index
    %c0_4 = arith.constant 0 : index
    %1 = vector.load %arg1[%c0_2, %c0_3, %c0_4] : memref<2x8x16xf32, #tpu.memory_space<vmem>>, vector<2x8x16xf32>
    %2 = vector.shape_cast %1 : vector<2x8x16xf32> to vector<16x16xf32>
    %3 = arith.truncf %2 : vector<16x16xf32> to vector<16x16xbf16>
    %c0_5 = arith.constant 0 : index
    %c0_6 = arith.constant 0 : index
    %c0_7 = arith.constant 0 : index
    %4 = vector.load %arg9[%c0_5, %c0_6, %c0_7] : memref<2x16x32xbf16, #tpu.memory_space<vmem>>, vector<1x16x32xbf16>
    %5 = vector.shape_cast %4 : vector<1x16x32xbf16> to vector<16x32xbf16>
    %cst = arith.constant dense<0.000000e+00> : vector<16x32xf32>
    %6 = tpu.matmul %3, %5, %cst {dimension_numbers = #tpu.dot_dimension_numbers<[1], [0], [0], [1], [0, 0, 1, 1], [], []>} : vector<16x16xbf16>, vector<16x32xbf16>, vector<16x32xf32> -> vector<16x32xf32>
    %c35 = arith.constant 35 : index
    %c0_8 = arith.constant 0 : index
    %7 = vector.load %arg12[%c35, %c0_8] : memref<58x128xf32, #tpu.memory_space<vmem>>, vector<1x32xf32>
    %8 = vector.broadcast %7 : vector<1x32xf32> to vector<16x32xf32>
    %9 = arith.addf %6, %8 : vector<16x32xf32>
    %c42 = arith.constant 42 : index
    %c0_9 = arith.constant 0 : index
    %10 = vector.load %arg12[%c42, %c0_9] : memref<58x128xf32, #tpu.memory_space<vmem>>, vector<8x32xf32>
    %c32 = arith.constant 32 : index
    %c0_10 = arith.constant 0 : index
    %11 = vector.load %arg12[%c32, %c0_10] : memref<58x128xf32, #tpu.memory_space<vmem>>, vector<1x32xf32>
    %12 = vector.broadcast %11 : vector<1x32xf32> to vector<8x32xf32>
    %13 = arith.addf %10, %12 : vector<8x32xf32>
    %cst_11 = arith.constant 5.65685415 : f32
    %14 = vector.broadcast %cst_11 : f32 to vector<16x32xf32>
    %15 = arith.mulf %9, %14 : vector<16x32xf32>
    %16 = tpu.concatenate %13, %13 in 0 : vector<8x32xf32>, vector<8x32xf32> -> vector<16x32xf32>
    %17 = arith.addf %15, %16 : vector<16x32xf32>
    %cst_12 = arith.constant dense<0.000000e+00> : vector<16xf32>
    %18 = vector.multi_reduction <add>, %17, %cst_12 [1] : vector<16x32xf32> to vector<16xf32>
    %19 = vector.shape_cast %18 : vector<16xf32> to vector<16x1xf32>
    %cst_13 = arith.constant 3.200000e+01 : f32
    %20 = vector.broadcast %cst_13 : f32 to vector<16x1xf32>
    %21 = arith.divf %19, %20 : vector<16x1xf32>
    %22 = vector.broadcast %21 : vector<16x1xf32> to vector<16x32xf32>
    %23 = arith.subf %17, %22 : vector<16x32xf32>
    %24 = arith.mulf %23, %23 : vector<16x32xf32>
    %cst_14 = arith.constant dense<0.000000e+00> : vector<16xf32>
    %25 = vector.multi_reduction <add>, %24, %cst_14 [1] : vector<16x32xf32> to vector<16xf32>
    %26 = vector.shape_cast %25 : vector<16xf32> to vector<16x1xf32>
    %cst_15 = arith.constant 0.0322580636 : f32
    %27 = vector.broadcast %cst_15 : f32 to vector<16x1xf32>
    %28 = arith.mulf %26, %27 : vector<16x1xf32>
    %29 = math.sqrt %28 : vector<16x1xf32>
    %cst_16 = arith.constant 9.99999997E-7 : f32
    %30 = vector.broadcast %cst_16 : f32 to vector<16x1xf32>
    %31 = arith.addf %29, %30 : vector<16x1xf32>
    %cst_17 = arith.constant 1.000000e+00 : f32
    %32 = vector.broadcast %cst_17 : f32 to vector<16x1xf32>
    %33 = arith.divf %32, %31 : vector<16x1xf32>
    %c0_18 = arith.constant 0 : index
    %c0_19 = arith.constant 0 : index
    %34 = vector.load %arg12[%c0_18, %c0_19] : memref<58x128xf32, #tpu.memory_space<vmem>>, vector<1x32xf32>
    %35 = vector.broadcast %33 : vector<16x1xf32> to vector<16x32xf32>
    %36 = arith.mulf %23, %35 : vector<16x32xf32>
    %37 = vector.broadcast %34 : vector<1x32xf32> to vector<16x32xf32>
    %38 = arith.mulf %37, %36 : vector<16x32xf32>
    %c1 = arith.constant 1 : index
    %c0_20 = arith.constant 0 : index
    %39 = vector.load %arg12[%c1, %c0_20] : memref<58x128xf32, #tpu.memory_space<vmem>>, vector<1x32xf32>
    %40 = vector.broadcast %39 : vector<1x32xf32> to vector<16x32xf32>
    %41 = arith.addf %38, %40 : vector<16x32xf32>
    %42 = arith.truncf %41 : vector<16x32xf32> to vector<16x32xbf16>
    %cst_21 = arith.constant 0.000000e+00 : f32
    %43 = vector.broadcast %cst_21 : f32 to vector<8x32xf32>
    %cst_22 = arith.constant 0.000000e+00 : f32
    %44 = vector.broadcast %cst_22 : f32 to vector<8x32xf32>
    %c0_23 = arith.constant 0 : index
    %c0_24 = arith.constant 0 : index
    %c0_25 = arith.constant 0 : index
    %45 = vector.load %arg5[%c0_23, %c0_24, %c0_25] : memref<48x32x8xbf16, #tpu.memory_space<vmem>>, vector<1x32x8xbf16>
    %46 = vector.shape_cast %45 : vector<1x32x8xbf16> to vector<32x8xbf16>
    %c0_26 = arith.constant 0 : index
    %c0_27 = arith.constant 0 : index
    %47 = vector.load %arg11[%c0_26, %c0_27] : memref<48x8xf32, #tpu.memory_space<vmem>>, vector<1x8xf32>
    %cst_28 = arith.constant dense<0.000000e+00> : vector<16x8xf32>
    %48 = tpu.matmul %42, %46, %cst_28 {dimension_numbers = #tpu.dot_dimension_numbers<[1], [0], [0], [1], [0, 0, 1, 1], [], []>} : vector<16x32xbf16>, vector<32x8xbf16>, vector<16x8xf32> -> vector<16x8xf32>
    %49 = vector.broadcast %47 : vector<1x8xf32> to vector<16x8xf32>
    %50 = arith.addf %48, %49 : vector<16x8xf32>
    %51 = arith.truncf %50 : vector<16x8xf32> to vector<16x8xbf16>
    %c4 = arith.constant 4 : index
    %c0_29 = arith.constant 0 : index
    %c0_30 = arith.constant 0 : index
    %52 = vector.load %arg5[%c4, %c0_29, %c0_30] : memref<48x32x8xbf16, #tpu.memory_space<vmem>>, vector<1x32x8xbf16>
    %53 = vector.shape_cast %52 : vector<1x32x8xbf16> to vector<32x8xbf16>
    %c4_31 = arith.constant 4 : index
    %c0_32 = arith.constant 0 : index
    %54 = vector.load %arg11[%c4_31, %c0_32] : memref<48x8xf32, #tpu.memory_space<vmem>>, vector<1x8xf32>
    %cst_33 = arith.constant dense<0.000000e+00> : vector<16x8xf32>
    %55 = tpu.matmul %42, %53, %cst_33 {dimension_numbers = #tpu.dot_dimension_numbers<[1], [0], [0], [1], [0, 0, 1, 1], [], []>} : vector<16x32xbf16>, vector<32x8xbf16>, vector<16x8xf32> -> vector<16x8xf32>
    %56 = vector.broadcast %54 : vector<1x8xf32> to vector<16x8xf32>
    %57 = arith.addf %55, %56 : vector<16x8xf32>
    %58 = arith.truncf %57 : vector<16x8xf32> to vector<16x8xbf16>
    %c8 = arith.constant 8 : index
    %c0_34 = arith.constant 0 : index
    %c0_35 = arith.constant 0 : index
    %59 = vector.load %arg5[%c8, %c0_34, %c0_35] : memref<48x32x8xbf16, #tpu.memory_space<vmem>>, vector<1x32x8xbf16>
    %60 = vector.shape_cast %59 : vector<1x32x8xbf16> to vector<32x8xbf16>
    %c8_36 = arith.constant 8 : index
    %c0_37 = arith.constant 0 : index
    %61 = vector.load %arg11[%c8_36, %c0_37] : memref<48x8xf32, #tpu.memory_space<vmem>>, vector<1x8xf32>
    %cst_38 = arith.constant dense<0.000000e+00> : vector<16x8xf32>
    %62 = tpu.matmul %42, %60, %cst_38 {dimension_numbers = #tpu.dot_dimension_numbers<[1], [0], [0], [1], [0, 0, 1, 1], [], []>} : vector<16x32xbf16>, vector<32x8xbf16>, vector<16x8xf32> -> vector<16x8xf32>
    %63 = vector.broadcast %61 : vector<1x8xf32> to vector<16x8xf32>
    %64 = arith.addf %62, %63 : vector<16x8xf32>
    %65 = arith.truncf %64 : vector<16x8xf32> to vector<16x8xbf16>
    %c0_39 = arith.constant 0 : index
    %c0_40 = arith.constant 0 : index
    %c0_41 = arith.constant 0 : index
    %66 = vector.load %arg6[%c0_39, %c0_40, %c0_41] : memref<16x8x32xbf16, #tpu.memory_space<vmem>>, vector<1x8x32xbf16>
    %67 = vector.shape_cast %66 : vector<1x8x32xbf16> to vector<8x32xbf16>
    %68 = vector.extract_strided_slice %51 {offsets = [0, 0], sizes = [8, 8], strides = [1, 1]} : vector<16x8xbf16> to vector<8x8xbf16>
    %69 = vector.extract_strided_slice %58 {offsets = [0, 0], sizes = [8, 8], strides = [1, 1]} : vector<16x8xbf16> to vector<8x8xbf16>
    %cst_42 = arith.constant dense<0.000000e+00> : vector<8x8xf32>
    %70 = tpu.matmul %68, %69, %cst_42 {dimension_numbers = #tpu.dot_dimension_numbers<[1], [1], [0], [0], [0, 0, 1, 0], [], []>} : vector<8x8xbf16>, vector<8x8xbf16>, vector<8x8xf32> -> vector<8x8xf32>
    %cst_43 = arith.constant 0.353553385 : f32
    %71 = vector.broadcast %cst_43 : f32 to vector<8x8xf32>
    %72 = arith.mulf %70, %71 : vector<8x8xf32>
    %73 = vector.extract_strided_slice %0 {offsets = [0, 0, 0], sizes = [1, 1, 8], strides = [1, 1, 1]} : vector<2x8x128xf32> to vector<1x1x8xf32>
    %74 = vector.shape_cast %73 : vector<1x1x8xf32> to vector<1x8xf32>
    %75 = vector.broadcast %74 : vector<1x8xf32> to vector<8x8xf32>
    %76 = arith.addf %72, %75 : vector<8x8xf32>
    %cst_44 = arith.constant dense<0xFF800000> : vector<8xf32>
    %77 = vector.multi_reduction <maximumf>, %76, %cst_44 [1] : vector<8x8xf32> to vector<8xf32>
    %78 = vector.shape_cast %77 : vector<8xf32> to vector<8x1xf32>
    %79 = vector.broadcast %78 : vector<8x1xf32> to vector<8x8xf32>
    %80 = arith.subf %76, %79 : vector<8x8xf32>
    %81 = math.exp %80 : vector<8x8xf32>
    %cst_45 = arith.constant dense<0.000000e+00> : vector<8xf32>
    %82 = vector.multi_reduction <add>, %81, %cst_45 [1] : vector<8x8xf32> to vector<8xf32>
    %83 = vector.shape_cast %82 : vector<8xf32> to vector<8x1xf32>
    %84 = tpu.reciprocal %83 {approx = true} : vector<8x1xf32> -> vector<8x1xf32>
    %85 = vector.broadcast %84 : vector<8x1xf32> to vector<8x8xf32>
    %86 = arith.mulf %81, %85 : vector<8x8xf32>
    %87 = arith.truncf %86 : vector<8x8xf32> to vector<8x8xbf16>
    %88 = vector.extract_strided_slice %65 {offsets = [0, 0], sizes = [8, 8], strides = [1, 1]} : vector<16x8xbf16> to vector<8x8xbf16>
    %cst_46 = arith.constant dense<0.000000e+00> : vector<8x8xf32>
    %89 = tpu.matmul %87, %88, %cst_46 {dimension_numbers = #tpu.dot_dimension_numbers<[1], [0], [0], [1], [0, 0, 1, 1], [], []>} : vector<8x8xbf16>, vector<8x8xbf16>, vector<8x8xf32> -> vector<8x8xf32>
    %90 = arith.truncf %89 : vector<8x8xf32> to vector<8x8xbf16>
    %cst_47 = arith.constant dense<0.000000e+00> : vector<8x32xf32>
    %91 = tpu.matmul %90, %67, %cst_47 {dimension_numbers = #tpu.dot_dimension_numbers<[1], [0], [0], [1], [0, 0, 1, 1], [], []>} : vector<8x8xbf16>, vector<8x32xbf16>, vector<8x32xf32> -> vector<8x32xf32>
    %92 = arith.addf %43, %91 : vector<8x32xf32>
    %93 = vector.extract_strided_slice %51 {offsets = [8, 0], sizes = [8, 8], strides = [1, 1]} : vector<16x8xbf16> to vector<8x8xbf16>
    %94 = vector.extract_strided_slice %58 {offsets = [8, 0], sizes = [8, 8], strides = [1, 1]} : vector<16x8xbf16> to vector<8x8xbf16>
    %cst_48 = arith.constant dense<0.000000e+00> : vector<8x8xf32>
    %95 = tpu.matmul %93, %94, %cst_48 {dimension_numbers = #tpu.dot_dimension_numbers<[1], [1], [0], [0], [0, 0, 1, 0], [], []>} : vector<8x8xbf16>, vector<8x8xbf16>, vector<8x8xf32> -> vector<8x8xf32>
    %cst_49 = arith.constant 0.353553385 : f32
    %96 = vector.broadcast %cst_49 : f32 to vector<8x8xf32>
    %97 = arith.mulf %95, %96 : vector<8x8xf32>
    %98 = vector.extract_strided_slice %0 {offsets = [1, 0, 0], sizes = [1, 1, 8], strides = [1, 1, 1]} : vector<2x8x128xf32> to vector<1x1x8xf32>
    %99 = vector.shape_cast %98 : vector<1x1x8xf32> to vector<1x8xf32>
    %100 = vector.broadcast %99 : vector<1x8xf32> to vector<8x8xf32>
    %101 = arith.addf %97, %100 : vector<8x8xf32>
    %cst_50 = arith.constant dense<0xFF800000> : vector<8xf32>
    %102 = vector.multi_reduction <maximumf>, %101, %cst_50 [1] : vector<8x8xf32> to vector<8xf32>
    %103 = vector.shape_cast %102 : vector<8xf32> to vector<8x1xf32>
    %104 = vector.broadcast %103 : vector<8x1xf32> to vector<8x8xf32>
    %105 = arith.subf %101, %104 : vector<8x8xf32>
    %106 = math.exp %105 : vector<8x8xf32>
    %cst_51 = arith.constant dense<0.000000e+00> : vector<8xf32>
    %107 = vector.multi_reduction <add>, %106, %cst_51 [1] : vector<8x8xf32> to vector<8xf32>
    %108 = vector.shape_cast %107 : vector<8xf32> to vector<8x1xf32>
    %109 = tpu.reciprocal %108 {approx = true} : vector<8x1xf32> -> vector<8x1xf32>
    %110 = vector.broadcast %109 : vector<8x1xf32> to vector<8x8xf32>
    %111 = arith.mulf %106, %110 : vector<8x8xf32>
    %112 = arith.truncf %111 : vector<8x8xf32> to vector<8x8xbf16>
    %113 = vector.extract_strided_slice %65 {offsets = [8, 0], sizes = [8, 8], strides = [1, 1]} : vector<16x8xbf16> to vector<8x8xbf16>
    %cst_52 = arith.constant dense<0.000000e+00> : vector<8x8xf32>
    %114 = tpu.matmul %112, %113, %cst_52 {dimension_numbers = #tpu.dot_dimension_numbers<[1], [0], [0], [1], [0, 0, 1, 1], [], []>} : vector<8x8xbf16>, vector<8x8xbf16>, vector<8x8xf32> -> vector<8x8xf32>
    %115 = arith.truncf %114 : vector<8x8xf32> to vector<8x8xbf16>
    %cst_53 = arith.constant dense<0.000000e+00> : vector<8x32xf32>
    %116 = tpu.matmul %115, %67, %cst_53 {dimension_numbers = #tpu.dot_dimension_numbers<[1], [0], [0], [1], [0, 0, 1, 1], [], []>} : vector<8x8xbf16>, vector<8x32xbf16>, vector<8x32xf32> -> vector<8x32xf32>
    %117 = arith.addf %44, %116 : vector<8x32xf32>
    %c1_54 = arith.constant 1 : index
    %c0_55 = arith.constant 0 : index
    %c0_56 = arith.constant 0 : index
    %118 = vector.load %arg5[%c1_54, %c0_55, %c0_56] : memref<48x32x8xbf16, #tpu.memory_space<vmem>>, vector<1x32x8xbf16>
    %119 = vector.shape_cast %118 : vector<1x32x8xbf16> to vector<32x8xbf16>
    %c1_57 = arith.constant 1 : index
    %c0_58 = arith.constant 0 : index
    %120 = vector.load %arg11[%c1_57, %c0_58] : memref<48x8xf32, #tpu.memory_space<vmem>>, vector<1x8xf32>
    %cst_59 = arith.constant dense<0.000000e+00> : vector<16x8xf32>
    %121 = tpu.matmul %42, %119, %cst_59 {dimension_numbers = #tpu.dot_dimension_numbers<[1], [0], [0], [1], [0, 0, 1, 1], [], []>} : vector<16x32xbf16>, vector<32x8xbf16>, vector<16x8xf32> -> vector<16x8xf32>
    %122 = vector.broadcast %120 : vector<1x8xf32> to vector<16x8xf32>
    %123 = arith.addf %121, %122 : vector<16x8xf32>
    %124 = arith.truncf %123 : vector<16x8xf32> to vector<16x8xbf16>
    %c5 = arith.constant 5 : index
    %c0_60 = arith.constant 0 : index
    %c0_61 = arith.constant 0 : index
    %125 = vector.load %arg5[%c5, %c0_60, %c0_61] : memref<48x32x8xbf16, #tpu.memory_space<vmem>>, vector<1x32x8xbf16>
    %126 = vector.shape_cast %125 : vector<1x32x8xbf16> to vector<32x8xbf16>
    %c5_62 = arith.constant 5 : index
    %c0_63 = arith.constant 0 : index
    %127 = vector.load %arg11[%c5_62, %c0_63] : memref<48x8xf32, #tpu.memory_space<vmem>>, vector<1x8xf32>
    %cst_64 = arith.constant dense<0.000000e+00> : vector<16x8xf32>
    %128 = tpu.matmul %42, %126, %cst_64 {dimension_numbers = #tpu.dot_dimension_numbers<[1], [0], [0], [1], [0, 0, 1, 1], [], []>} : vector<16x32xbf16>, vector<32x8xbf16>, vector<16x8xf32> -> vector<16x8xf32>
    %129 = vector.broadcast %127 : vector<1x8xf32> to vector<16x8xf32>
    %130 = arith.addf %128, %129 : vector<16x8xf32>
    %131 = arith.truncf %130 : vector<16x8xf32> to vector<16x8xbf16>
    %c9 = arith.constant 9 : index
    %c0_65 = arith.constant 0 : index
    %c0_66 = arith.constant 0 : index
    %132 = vector.load %arg5[%c9, %c0_65, %c0_66] : memref<48x32x8xbf16, #tpu.memory_space<vmem>>, vector<1x32x8xbf16>
    %133 = vector.shape_cast %132 : vector<1x32x8xbf16> to vector<32x8xbf16>
    %c9_67 = arith.constant 9 : index
    %c0_68 = arith.constant 0 : index
    %134 = vector.load %arg11[%c9_67, %c0_68] : memref<48x8xf32, #tpu.memory_space<vmem>>, vector<1x8xf32>
    %cst_69 = arith.constant dense<0.000000e+00> : vector<16x8xf32>
    %135 = tpu.matmul %42, %133, %cst_69 {dimension_numbers = #tpu.dot_dimension_numbers<[1], [0], [0], [1], [0, 0, 1, 1], [], []>} : vector<16x32xbf16>, vector<32x8xbf16>, vector<16x8xf32> -> vector<16x8xf32>
    %136 = vector.broadcast %134 : vector<1x8xf32> to vector<16x8xf32>
    %137 = arith.addf %135, %136 : vector<16x8xf32>
    %138 = arith.truncf %137 : vector<16x8xf32> to vector<16x8xbf16>
    %c1_70 = arith.constant 1 : index
    %c0_71 = arith.constant 0 : index
    %c0_72 = arith.constant 0 : index
    %139 = vector.load %arg6[%c1_70, %c0_71, %c0_72] : memref<16x8x32xbf16, #tpu.memory_space<vmem>>, vector<1x8x32xbf16>
    %140 = vector.shape_cast %139 : vector<1x8x32xbf16> to vector<8x32xbf16>
    %141 = vector.extract_strided_slice %124 {offsets = [0, 0], sizes = [8, 8], strides = [1, 1]} : vector<16x8xbf16> to vector<8x8xbf16>
    %142 = vector.extract_strided_slice %131 {offsets = [0, 0], sizes = [8, 8], strides = [1, 1]} : vector<16x8xbf16> to vector<8x8xbf16>
    %cst_73 = arith.constant dense<0.000000e+00> : vector<8x8xf32>
    %143 = tpu.matmul %141, %142, %cst_73 {dimension_numbers = #tpu.dot_dimension_numbers<[1], [1], [0], [0], [0, 0, 1, 0], [], []>} : vector<8x8xbf16>, vector<8x8xbf16>, vector<8x8xf32> -> vector<8x8xf32>
    %cst_74 = arith.constant 0.353553385 : f32
    %144 = vector.broadcast %cst_74 : f32 to vector<8x8xf32>
    %145 = arith.mulf %143, %144 : vector<8x8xf32>
    %146 = vector.extract_strided_slice %0 {offsets = [0, 0, 0], sizes = [1, 1, 8], strides = [1, 1, 1]} : vector<2x8x128xf32> to vector<1x1x8xf32>
    %147 = vector.shape_cast %146 : vector<1x1x8xf32> to vector<1x8xf32>
    %148 = vector.broadcast %147 : vector<1x8xf32> to vector<8x8xf32>
    %149 = arith.addf %145, %148 : vector<8x8xf32>
    %cst_75 = arith.constant dense<0xFF800000> : vector<8xf32>
    %150 = vector.multi_reduction <maximumf>, %149, %cst_75 [1] : vector<8x8xf32> to vector<8xf32>
    %151 = vector.shape_cast %150 : vector<8xf32> to vector<8x1xf32>
    %152 = vector.broadcast %151 : vector<8x1xf32> to vector<8x8xf32>
    %153 = arith.subf %149, %152 : vector<8x8xf32>
    %154 = math.exp %153 : vector<8x8xf32>
    %cst_76 = arith.constant dense<0.000000e+00> : vector<8xf32>
    %155 = vector.multi_reduction <add>, %154, %cst_76 [1] : vector<8x8xf32> to vector<8xf32>
    %156 = vector.shape_cast %155 : vector<8xf32> to vector<8x1xf32>
    %157 = tpu.reciprocal %156 {approx = true} : vector<8x1xf32> -> vector<8x1xf32>
    %158 = vector.broadcast %157 : vector<8x1xf32> to vector<8x8xf32>
    %159 = arith.mulf %154, %158 : vector<8x8xf32>
    %160 = arith.truncf %159 : vector<8x8xf32> to vector<8x8xbf16>
    %161 = vector.extract_strided_slice %138 {offsets = [0, 0], sizes = [8, 8], strides = [1, 1]} : vector<16x8xbf16> to vector<8x8xbf16>
    %cst_77 = arith.constant dense<0.000000e+00> : vector<8x8xf32>
    %162 = tpu.matmul %160, %161, %cst_77 {dimension_numbers = #tpu.dot_dimension_numbers<[1], [0], [0], [1], [0, 0, 1, 1], [], []>} : vector<8x8xbf16>, vector<8x8xbf16>, vector<8x8xf32> -> vector<8x8xf32>
    %163 = arith.truncf %162 : vector<8x8xf32> to vector<8x8xbf16>
    %cst_78 = arith.constant dense<0.000000e+00> : vector<8x32xf32>
    %164 = tpu.matmul %163, %140, %cst_78 {dimension_numbers = #tpu.dot_dimension_numbers<[1], [0], [0], [1], [0, 0, 1, 1], [], []>} : vector<8x8xbf16>, vector<8x32xbf16>, vector<8x32xf32> -> vector<8x32xf32>
    %165 = arith.addf %92, %164 : vector<8x32xf32>
    %166 = vector.extract_strided_slice %124 {offsets = [8, 0], sizes = [8, 8], strides = [1, 1]} : vector<16x8xbf16> to vector<8x8xbf16>
    %167 = vector.extract_strided_slice %131 {offsets = [8, 0], sizes = [8, 8], strides = [1, 1]} : vector<16x8xbf16> to vector<8x8xbf16>
    %cst_79 = arith.constant dense<0.000000e+00> : vector<8x8xf32>
    %168 = tpu.matmul %166, %167, %cst_79 {dimension_numbers = #tpu.dot_dimension_numbers<[1], [1], [0], [0], [0, 0, 1, 0], [], []>} : vector<8x8xbf16>, vector<8x8xbf16>, vector<8x8xf32> -> vector<8x8xf32>
    %cst_80 = arith.constant 0.353553385 : f32
    %169 = vector.broadcast %cst_80 : f32 to vector<8x8xf32>
    %170 = arith.mulf %168, %169 : vector<8x8xf32>
    %171 = vector.extract_strided_slice %0 {offsets = [1, 0, 0], sizes = [1, 1, 8], strides = [1, 1, 1]} : vector<2x8x128xf32> to vector<1x1x8xf32>
    %172 = vector.shape_cast %171 : vector<1x1x8xf32> to vector<1x8xf32>
    %173 = vector.broadcast %172 : vector<1x8xf32> to vector<8x8xf32>
    %174 = arith.addf %170, %173 : vector<8x8xf32>
    %cst_81 = arith.constant dense<0xFF800000> : vector<8xf32>
    %175 = vector.multi_reduction <maximumf>, %174, %cst_81 [1] : vector<8x8xf32> to vector<8xf32>
    %176 = vector.shape_cast %175 : vector<8xf32> to vector<8x1xf32>
    %177 = vector.broadcast %176 : vector<8x1xf32> to vector<8x8xf32>
    %178 = arith.subf %174, %177 : vector<8x8xf32>
    %179 = math.exp %178 : vector<8x8xf32>
    %cst_82 = arith.constant dense<0.000000e+00> : vector<8xf32>
    %180 = vector.multi_reduction <add>, %179, %cst_82 [1] : vector<8x8xf32> to vector<8xf32>
    %181 = vector.shape_cast %180 : vector<8xf32> to vector<8x1xf32>
    %182 = tpu.reciprocal %181 {approx = true} : vector<8x1xf32> -> vector<8x1xf32>
    %183 = vector.broadcast %182 : vector<8x1xf32> to vector<8x8xf32>
    %184 = arith.mulf %179, %183 : vector<8x8xf32>
    %185 = arith.truncf %184 : vector<8x8xf32> to vector<8x8xbf16>
    %186 = vector.extract_strided_slice %138 {offsets = [8, 0], sizes = [8, 8], strides = [1, 1]} : vector<16x8xbf16> to vector<8x8xbf16>
    %cst_83 = arith.constant dense<0.000000e+00> : vector<8x8xf32>
    %187 = tpu.matmul %185, %186, %cst_83 {dimension_numbers = #tpu.dot_dimension_numbers<[1], [0], [0], [1], [0, 0, 1, 1], [], []>} : vector<8x8xbf16>, vector<8x8xbf16>, vector<8x8xf32> -> vector<8x8xf32>
    %188 = arith.truncf %187 : vector<8x8xf32> to vector<8x8xbf16>
    %cst_84 = arith.constant dense<0.000000e+00> : vector<8x32xf32>
    %189 = tpu.matmul %188, %140, %cst_84 {dimension_numbers = #tpu.dot_dimension_numbers<[1], [0], [0], [1], [0, 0, 1, 1], [], []>} : vector<8x8xbf16>, vector<8x32xbf16>, vector<8x32xf32> -> vector<8x32xf32>
    %190 = arith.addf %117, %189 : vector<8x32xf32>
    %c2 = arith.constant 2 : index
    %c0_85 = arith.constant 0 : index
    %c0_86 = arith.constant 0 : index
    %191 = vector.load %arg5[%c2, %c0_85, %c0_86] : memref<48x32x8xbf16, #tpu.memory_space<vmem>>, vector<1x32x8xbf16>
    %192 = vector.shape_cast %191 : vector<1x32x8xbf16> to vector<32x8xbf16>
    %c2_87 = arith.constant 2 : index
    %c0_88 = arith.constant 0 : index
    %193 = vector.load %arg11[%c2_87, %c0_88] : memref<48x8xf32, #tpu.memory_space<vmem>>, vector<1x8xf32>
    %cst_89 = arith.constant dense<0.000000e+00> : vector<16x8xf32>
    %194 = tpu.matmul %42, %192, %cst_89 {dimension_numbers = #tpu.dot_dimension_numbers<[1], [0], [0], [1], [0, 0, 1, 1], [], []>} : vector<16x32xbf16>, vector<32x8xbf16>, vector<16x8xf32> -> vector<16x8xf32>
    %195 = vector.broadcast %193 : vector<1x8xf32> to vector<16x8xf32>
    %196 = arith.addf %194, %195 : vector<16x8xf32>
    %197 = arith.truncf %196 : vector<16x8xf32> to vector<16x8xbf16>
    %c6 = arith.constant 6 : index
    %c0_90 = arith.constant 0 : index
    %c0_91 = arith.constant 0 : index
    %198 = vector.load %arg5[%c6, %c0_90, %c0_91] : memref<48x32x8xbf16, #tpu.memory_space<vmem>>, vector<1x32x8xbf16>
    %199 = vector.shape_cast %198 : vector<1x32x8xbf16> to vector<32x8xbf16>
    %c6_92 = arith.constant 6 : index
    %c0_93 = arith.constant 0 : index
    %200 = vector.load %arg11[%c6_92, %c0_93] : memref<48x8xf32, #tpu.memory_space<vmem>>, vector<1x8xf32>
    %cst_94 = arith.constant dense<0.000000e+00> : vector<16x8xf32>
    %201 = tpu.matmul %42, %199, %cst_94 {dimension_numbers = #tpu.dot_dimension_numbers<[1], [0], [0], [1], [0, 0, 1, 1], [], []>} : vector<16x32xbf16>, vector<32x8xbf16>, vector<16x8xf32> -> vector<16x8xf32>
    %202 = vector.broadcast %200 : vector<1x8xf32> to vector<16x8xf32>
    %203 = arith.addf %201, %202 : vector<16x8xf32>
    %204 = arith.truncf %203 : vector<16x8xf32> to vector<16x8xbf16>
    %c10 = arith.constant 10 : index
    %c0_95 = arith.constant 0 : index
    %c0_96 = arith.constant 0 : index
    %205 = vector.load %arg5[%c10, %c0_95, %c0_96] : memref<48x32x8xbf16, #tpu.memory_space<vmem>>, vector<1x32x8xbf16>
    %206 = vector.shape_cast %205 : vector<1x32x8xbf16> to vector<32x8xbf16>
    %c10_97 = arith.constant 10 : index
    %c0_98 = arith.constant 0 : index
    %207 = vector.load %arg11[%c10_97, %c0_98] : memref<48x8xf32, #tpu.memory_space<vmem>>, vector<1x8xf32>
    %cst_99 = arith.constant dense<0.000000e+00> : vector<16x8xf32>
    %208 = tpu.matmul %42, %206, %cst_99 {dimension_numbers = #tpu.dot_dimension_numbers<[1], [0], [0], [1], [0, 0, 1, 1], [], []>} : vector<16x32xbf16>, vector<32x8xbf16>, vector<16x8xf32> -> vector<16x8xf32>
    %209 = vector.broadcast %207 : vector<1x8xf32> to vector<16x8xf32>
    %210 = arith.addf %208, %209 : vector<16x8xf32>
    %211 = arith.truncf %210 : vector<16x8xf32> to vector<16x8xbf16>
    %c2_100 = arith.constant 2 : index
    %c0_101 = arith.constant 0 : index
    %c0_102 = arith.constant 0 : index
    %212 = vector.load %arg6[%c2_100, %c0_101, %c0_102] : memref<16x8x32xbf16, #tpu.memory_space<vmem>>, vector<1x8x32xbf16>
    %213 = vector.shape_cast %212 : vector<1x8x32xbf16> to vector<8x32xbf16>
    %214 = vector.extract_strided_slice %197 {offsets = [0, 0], sizes = [8, 8], strides = [1, 1]} : vector<16x8xbf16> to vector<8x8xbf16>
    %215 = vector.extract_strided_slice %204 {offsets = [0, 0], sizes = [8, 8], strides = [1, 1]} : vector<16x8xbf16> to vector<8x8xbf16>
    %cst_103 = arith.constant dense<0.000000e+00> : vector<8x8xf32>
    %216 = tpu.matmul %214, %215, %cst_103 {dimension_numbers = #tpu.dot_dimension_numbers<[1], [1], [0], [0], [0, 0, 1, 0], [], []>} : vector<8x8xbf16>, vector<8x8xbf16>, vector<8x8xf32> -> vector<8x8xf32>
    %cst_104 = arith.constant 0.353553385 : f32
    %217 = vector.broadcast %cst_104 : f32 to vector<8x8xf32>
    %218 = arith.mulf %216, %217 : vector<8x8xf32>
    %219 = vector.extract_strided_slice %0 {offsets = [0, 0, 0], sizes = [1, 1, 8], strides = [1, 1, 1]} : vector<2x8x128xf32> to vector<1x1x8xf32>
    %220 = vector.shape_cast %219 : vector<1x1x8xf32> to vector<1x8xf32>
    %221 = vector.broadcast %220 : vector<1x8xf32> to vector<8x8xf32>
    %222 = arith.addf %218, %221 : vector<8x8xf32>
    %cst_105 = arith.constant dense<0xFF800000> : vector<8xf32>
    %223 = vector.multi_reduction <maximumf>, %222, %cst_105 [1] : vector<8x8xf32> to vector<8xf32>
    %224 = vector.shape_cast %223 : vector<8xf32> to vector<8x1xf32>
    %225 = vector.broadcast %224 : vector<8x1xf32> to vector<8x8xf32>
    %226 = arith.subf %222, %225 : vector<8x8xf32>
    %227 = math.exp %226 : vector<8x8xf32>
    %cst_106 = arith.constant dense<0.000000e+00> : vector<8xf32>
    %228 = vector.multi_reduction <add>, %227, %cst_106 [1] : vector<8x8xf32> to vector<8xf32>
    %229 = vector.shape_cast %228 : vector<8xf32> to vector<8x1xf32>
    %230 = tpu.reciprocal %229 {approx = true} : vector<8x1xf32> -> vector<8x1xf32>
    %231 = vector.broadcast %230 : vector<8x1xf32> to vector<8x8xf32>
    %232 = arith.mulf %227, %231 : vector<8x8xf32>
    %233 = arith.truncf %232 : vector<8x8xf32> to vector<8x8xbf16>
    %234 = vector.extract_strided_slice %211 {offsets = [0, 0], sizes = [8, 8], strides = [1, 1]} : vector<16x8xbf16> to vector<8x8xbf16>
    %cst_107 = arith.constant dense<0.000000e+00> : vector<8x8xf32>
    %235 = tpu.matmul %233, %234, %cst_107 {dimension_numbers = #tpu.dot_dimension_numbers<[1], [0], [0], [1], [0, 0, 1, 1], [], []>} : vector<8x8xbf16>, vector<8x8xbf16>, vector<8x8xf32> -> vector<8x8xf32>
    %236 = arith.truncf %235 : vector<8x8xf32> to vector<8x8xbf16>
    %cst_108 = arith.constant dense<0.000000e+00> : vector<8x32xf32>
    %237 = tpu.matmul %236, %213, %cst_108 {dimension_numbers = #tpu.dot_dimension_numbers<[1], [0], [0], [1], [0, 0, 1, 1], [], []>} : vector<8x8xbf16>, vector<8x32xbf16>, vector<8x32xf32> -> vector<8x32xf32>
    %238 = arith.addf %165, %237 : vector<8x32xf32>
    %239 = vector.extract_strided_slice %197 {offsets = [8, 0], sizes = [8, 8], strides = [1, 1]} : vector<16x8xbf16> to vector<8x8xbf16>
    %240 = vector.extract_strided_slice %204 {offsets = [8, 0], sizes = [8, 8], strides = [1, 1]} : vector<16x8xbf16> to vector<8x8xbf16>
    %cst_109 = arith.constant dense<0.000000e+00> : vector<8x8xf32>
    %241 = tpu.matmul %239, %240, %cst_109 {dimension_numbers = #tpu.dot_dimension_numbers<[1], [1], [0], [0], [0, 0, 1, 0], [], []>} : vector<8x8xbf16>, vector<8x8xbf16>, vector<8x8xf32> -> vector<8x8xf32>
    %cst_110 = arith.constant 0.353553385 : f32
    %242 = vector.broadcast %cst_110 : f32 to vector<8x8xf32>
    %243 = arith.mulf %241, %242 : vector<8x8xf32>
    %244 = vector.extract_strided_slice %0 {offsets = [1, 0, 0], sizes = [1, 1, 8], strides = [1, 1, 1]} : vector<2x8x128xf32> to vector<1x1x8xf32>
    %245 = vector.shape_cast %244 : vector<1x1x8xf32> to vector<1x8xf32>
    %246 = vector.broadcast %245 : vector<1x8xf32> to vector<8x8xf32>
    %247 = arith.addf %243, %246 : vector<8x8xf32>
    %cst_111 = arith.constant dense<0xFF800000> : vector<8xf32>
    %248 = vector.multi_reduction <maximumf>, %247, %cst_111 [1] : vector<8x8xf32> to vector<8xf32>
    %249 = vector.shape_cast %248 : vector<8xf32> to vector<8x1xf32>
    %250 = vector.broadcast %249 : vector<8x1xf32> to vector<8x8xf32>
    %251 = arith.subf %247, %250 : vector<8x8xf32>
    %252 = math.exp %251 : vector<8x8xf32>
    %cst_112 = arith.constant dense<0.000000e+00> : vector<8xf32>
    %253 = vector.multi_reduction <add>, %252, %cst_112 [1] : vector<8x8xf32> to vector<8xf32>
    %254 = vector.shape_cast %253 : vector<8xf32> to vector<8x1xf32>
    %255 = tpu.reciprocal %254 {approx = true} : vector<8x1xf32> -> vector<8x1xf32>
    %256 = vector.broadcast %255 : vector<8x1xf32> to vector<8x8xf32>
    %257 = arith.mulf %252, %256 : vector<8x8xf32>
    %258 = arith.truncf %257 : vector<8x8xf32> to vector<8x8xbf16>
    %259 = vector.extract_strided_slice %211 {offsets = [8, 0], sizes = [8, 8], strides = [1, 1]} : vector<16x8xbf16> to vector<8x8xbf16>
    %cst_113 = arith.constant dense<0.000000e+00> : vector<8x8xf32>
    %260 = tpu.matmul %258, %259, %cst_113 {dimension_numbers = #tpu.dot_dimension_numbers<[1], [0], [0], [1], [0, 0, 1, 1], [], []>} : vector<8x8xbf16>, vector<8x8xbf16>, vector<8x8xf32> -> vector<8x8xf32>
    %261 = arith.truncf %260 : vector<8x8xf32> to vector<8x8xbf16>
    %cst_114 = arith.constant dense<0.000000e+00> : vector<8x32xf32>
    %262 = tpu.matmul %261, %213, %cst_114 {dimension_numbers = #tpu.dot_dimension_numbers<[1], [0], [0], [1], [0, 0, 1, 1], [], []>} : vector<8x8xbf16>, vector<8x32xbf16>, vector<8x32xf32> -> vector<8x32xf32>
    %263 = arith.addf %190, %262 : vector<8x32xf32>
    %c3 = arith.constant 3 : index
    %c0_115 = arith.constant 0 : index
    %c0_116 = arith.constant 0 : index
    %264 = vector.load %arg5[%c3, %c0_115, %c0_116] : memref<48x32x8xbf16, #tpu.memory_space<vmem>>, vector<1x32x8xbf16>
    %265 = vector.shape_cast %264 : vector<1x32x8xbf16> to vector<32x8xbf16>
    %c3_117 = arith.constant 3 : index
    %c0_118 = arith.constant 0 : index
    %266 = vector.load %arg11[%c3_117, %c0_118] : memref<48x8xf32, #tpu.memory_space<vmem>>, vector<1x8xf32>
    %cst_119 = arith.constant dense<0.000000e+00> : vector<16x8xf32>
    %267 = tpu.matmul %42, %265, %cst_119 {dimension_numbers = #tpu.dot_dimension_numbers<[1], [0], [0], [1], [0, 0, 1, 1], [], []>} : vector<16x32xbf16>, vector<32x8xbf16>, vector<16x8xf32> -> vector<16x8xf32>
    %268 = vector.broadcast %266 : vector<1x8xf32> to vector<16x8xf32>
    %269 = arith.addf %267, %268 : vector<16x8xf32>
    %270 = arith.truncf %269 : vector<16x8xf32> to vector<16x8xbf16>
    %c7 = arith.constant 7 : index
    %c0_120 = arith.constant 0 : index
    %c0_121 = arith.constant 0 : index
    %271 = vector.load %arg5[%c7, %c0_120, %c0_121] : memref<48x32x8xbf16, #tpu.memory_space<vmem>>, vector<1x32x8xbf16>
    %272 = vector.shape_cast %271 : vector<1x32x8xbf16> to vector<32x8xbf16>
    %c7_122 = arith.constant 7 : index
    %c0_123 = arith.constant 0 : index
    %273 = vector.load %arg11[%c7_122, %c0_123] : memref<48x8xf32, #tpu.memory_space<vmem>>, vector<1x8xf32>
    %cst_124 = arith.constant dense<0.000000e+00> : vector<16x8xf32>
    %274 = tpu.matmul %42, %272, %cst_124 {dimension_numbers = #tpu.dot_dimension_numbers<[1], [0], [0], [1], [0, 0, 1, 1], [], []>} : vector<16x32xbf16>, vector<32x8xbf16>, vector<16x8xf32> -> vector<16x8xf32>
    %275 = vector.broadcast %273 : vector<1x8xf32> to vector<16x8xf32>
    %276 = arith.addf %274, %275 : vector<16x8xf32>
    %277 = arith.truncf %276 : vector<16x8xf32> to vector<16x8xbf16>
    %c11 = arith.constant 11 : index
    %c0_125 = arith.constant 0 : index
    %c0_126 = arith.constant 0 : index
    %278 = vector.load %arg5[%c11, %c0_125, %c0_126] : memref<48x32x8xbf16, #tpu.memory_space<vmem>>, vector<1x32x8xbf16>
    %279 = vector.shape_cast %278 : vector<1x32x8xbf16> to vector<32x8xbf16>
    %c11_127 = arith.constant 11 : index
    %c0_128 = arith.constant 0 : index
    %280 = vector.load %arg11[%c11_127, %c0_128] : memref<48x8xf32, #tpu.memory_space<vmem>>, vector<1x8xf32>
    %cst_129 = arith.constant dense<0.000000e+00> : vector<16x8xf32>
    %281 = tpu.matmul %42, %279, %cst_129 {dimension_numbers = #tpu.dot_dimension_numbers<[1], [0], [0], [1], [0, 0, 1, 1], [], []>} : vector<16x32xbf16>, vector<32x8xbf16>, vector<16x8xf32> -> vector<16x8xf32>
    %282 = vector.broadcast %280 : vector<1x8xf32> to vector<16x8xf32>
    %283 = arith.addf %281, %282 : vector<16x8xf32>
    %284 = arith.truncf %283 : vector<16x8xf32> to vector<16x8xbf16>
    %c3_130 = arith.constant 3 : index
    %c0_131 = arith.constant 0 : index
    %c0_132 = arith.constant 0 : index
    %285 = vector.load %arg6[%c3_130, %c0_131, %c0_132] : memref<16x8x32xbf16, #tpu.memory_space<vmem>>, vector<1x8x32xbf16>
    %286 = vector.shape_cast %285 : vector<1x8x32xbf16> to vector<8x32xbf16>
    %287 = vector.extract_strided_slice %270 {offsets = [0, 0], sizes = [8, 8], strides = [1, 1]} : vector<16x8xbf16> to vector<8x8xbf16>
    %288 = vector.extract_strided_slice %277 {offsets = [0, 0], sizes = [8, 8], strides = [1, 1]} : vector<16x8xbf16> to vector<8x8xbf16>
    %cst_133 = arith.constant dense<0.000000e+00> : vector<8x8xf32>
    %289 = tpu.matmul %287, %288, %cst_133 {dimension_numbers = #tpu.dot_dimension_numbers<[1], [1], [0], [0], [0, 0, 1, 0], [], []>} : vector<8x8xbf16>, vector<8x8xbf16>, vector<8x8xf32> -> vector<8x8xf32>
    %cst_134 = arith.constant 0.353553385 : f32
    %290 = vector.broadcast %cst_134 : f32 to vector<8x8xf32>
    %291 = arith.mulf %289, %290 : vector<8x8xf32>
    %292 = vector.extract_strided_slice %0 {offsets = [0, 0, 0], sizes = [1, 1, 8], strides = [1, 1, 1]} : vector<2x8x128xf32> to vector<1x1x8xf32>
    %293 = vector.shape_cast %292 : vector<1x1x8xf32> to vector<1x8xf32>
    %294 = vector.broadcast %293 : vector<1x8xf32> to vector<8x8xf32>
    %295 = arith.addf %291, %294 : vector<8x8xf32>
    %cst_135 = arith.constant dense<0xFF800000> : vector<8xf32>
    %296 = vector.multi_reduction <maximumf>, %295, %cst_135 [1] : vector<8x8xf32> to vector<8xf32>
    %297 = vector.shape_cast %296 : vector<8xf32> to vector<8x1xf32>
    %298 = vector.broadcast %297 : vector<8x1xf32> to vector<8x8xf32>
    %299 = arith.subf %295, %298 : vector<8x8xf32>
    %300 = math.exp %299 : vector<8x8xf32>
    %cst_136 = arith.constant dense<0.000000e+00> : vector<8xf32>
    %301 = vector.multi_reduction <add>, %300, %cst_136 [1] : vector<8x8xf32> to vector<8xf32>
    %302 = vector.shape_cast %301 : vector<8xf32> to vector<8x1xf32>
    %303 = tpu.reciprocal %302 {approx = true} : vector<8x1xf32> -> vector<8x1xf32>
    %304 = vector.broadcast %303 : vector<8x1xf32> to vector<8x8xf32>
    %305 = arith.mulf %300, %304 : vector<8x8xf32>
    %306 = arith.truncf %305 : vector<8x8xf32> to vector<8x8xbf16>
    %307 = vector.extract_strided_slice %284 {offsets = [0, 0], sizes = [8, 8], strides = [1, 1]} : vector<16x8xbf16> to vector<8x8xbf16>
    %cst_137 = arith.constant dense<0.000000e+00> : vector<8x8xf32>
    %308 = tpu.matmul %306, %307, %cst_137 {dimension_numbers = #tpu.dot_dimension_numbers<[1], [0], [0], [1], [0, 0, 1, 1], [], []>} : vector<8x8xbf16>, vector<8x8xbf16>, vector<8x8xf32> -> vector<8x8xf32>
    %309 = arith.truncf %308 : vector<8x8xf32> to vector<8x8xbf16>
    %cst_138 = arith.constant dense<0.000000e+00> : vector<8x32xf32>
    %310 = tpu.matmul %309, %286, %cst_138 {dimension_numbers = #tpu.dot_dimension_numbers<[1], [0], [0], [1], [0, 0, 1, 1], [], []>} : vector<8x8xbf16>, vector<8x32xbf16>, vector<8x32xf32> -> vector<8x32xf32>
    %311 = arith.addf %238, %310 : vector<8x32xf32>
    %312 = vector.extract_strided_slice %270 {offsets = [8, 0], sizes = [8, 8], strides = [1, 1]} : vector<16x8xbf16> to vector<8x8xbf16>
    %313 = vector.extract_strided_slice %277 {offsets = [8, 0], sizes = [8, 8], strides = [1, 1]} : vector<16x8xbf16> to vector<8x8xbf16>
    %cst_139 = arith.constant dense<0.000000e+00> : vector<8x8xf32>
    %314 = tpu.matmul %312, %313, %cst_139 {dimension_numbers = #tpu.dot_dimension_numbers<[1], [1], [0], [0], [0, 0, 1, 0], [], []>} : vector<8x8xbf16>, vector<8x8xbf16>, vector<8x8xf32> -> vector<8x8xf32>
    %cst_140 = arith.constant 0.353553385 : f32
    %315 = vector.broadcast %cst_140 : f32 to vector<8x8xf32>
    %316 = arith.mulf %314, %315 : vector<8x8xf32>
    %317 = vector.extract_strided_slice %0 {offsets = [1, 0, 0], sizes = [1, 1, 8], strides = [1, 1, 1]} : vector<2x8x128xf32> to vector<1x1x8xf32>
    %318 = vector.shape_cast %317 : vector<1x1x8xf32> to vector<1x8xf32>
    %319 = vector.broadcast %318 : vector<1x8xf32> to vector<8x8xf32>
    %320 = arith.addf %316, %319 : vector<8x8xf32>
    %cst_141 = arith.constant dense<0xFF800000> : vector<8xf32>
    %321 = vector.multi_reduction <maximumf>, %320, %cst_141 [1] : vector<8x8xf32> to vector<8xf32>
    %322 = vector.shape_cast %321 : vector<8xf32> to vector<8x1xf32>
    %323 = vector.broadcast %322 : vector<8x1xf32> to vector<8x8xf32>
    %324 = arith.subf %320, %323 : vector<8x8xf32>
    %325 = math.exp %324 : vector<8x8xf32>
    %cst_142 = arith.constant dense<0.000000e+00> : vector<8xf32>
    %326 = vector.multi_reduction <add>, %325, %cst_142 [1] : vector<8x8xf32> to vector<8xf32>
    %327 = vector.shape_cast %326 : vector<8xf32> to vector<8x1xf32>
    %328 = tpu.reciprocal %327 {approx = true} : vector<8x1xf32> -> vector<8x1xf32>
    %329 = vector.broadcast %328 : vector<8x1xf32> to vector<8x8xf32>
    %330 = arith.mulf %325, %329 : vector<8x8xf32>
    %331 = arith.truncf %330 : vector<8x8xf32> to vector<8x8xbf16>
    %332 = vector.extract_strided_slice %284 {offsets = [8, 0], sizes = [8, 8], strides = [1, 1]} : vector<16x8xbf16> to vector<8x8xbf16>
    %cst_143 = arith.constant dense<0.000000e+00> : vector<8x8xf32>
    %333 = tpu.matmul %331, %332, %cst_143 {dimension_numbers = #tpu.dot_dimension_numbers<[1], [0], [0], [1], [0, 0, 1, 1], [], []>} : vector<8x8xbf16>, vector<8x8xbf16>, vector<8x8xf32> -> vector<8x8xf32>
    %334 = arith.truncf %333 : vector<8x8xf32> to vector<8x8xbf16>
    %cst_144 = arith.constant dense<0.000000e+00> : vector<8x32xf32>
    %335 = tpu.matmul %334, %286, %cst_144 {dimension_numbers = #tpu.dot_dimension_numbers<[1], [0], [0], [1], [0, 0, 1, 1], [], []>} : vector<8x8xbf16>, vector<8x32xbf16>, vector<8x32xf32> -> vector<8x32xf32>
    %336 = arith.addf %263, %335 : vector<8x32xf32>
    %337 = tpu.concatenate %311, %336 in 0 : vector<8x32xf32>, vector<8x32xf32> -> vector<16x32xf32>
    %338 = arith.addf %17, %337 : vector<16x32xf32>
    %c4_145 = arith.constant 4 : index
    %c0_146 = arith.constant 0 : index
    %339 = vector.load %arg12[%c4_145, %c0_146] : memref<58x128xf32, #tpu.memory_space<vmem>>, vector<1x32xf32>
    %340 = vector.broadcast %339 : vector<1x32xf32> to vector<16x32xf32>
    %341 = arith.addf %338, %340 : vector<16x32xf32>
    %cst_147 = arith.constant dense<0.000000e+00> : vector<16xf32>
    %342 = vector.multi_reduction <add>, %341, %cst_147 [1] : vector<16x32xf32> to vector<16xf32>
    %343 = vector.shape_cast %342 : vector<16xf32> to vector<16x1xf32>
    %cst_148 = arith.constant 3.200000e+01 : f32
    %344 = vector.broadcast %cst_148 : f32 to vector<16x1xf32>
    %345 = arith.divf %343, %344 : vector<16x1xf32>
    %346 = vector.broadcast %345 : vector<16x1xf32> to vector<16x32xf32>
    %347 = arith.subf %341, %346 : vector<16x32xf32>
    %348 = arith.mulf %347, %347 : vector<16x32xf32>
    %cst_149 = arith.constant dense<0.000000e+00> : vector<16xf32>
    %349 = vector.multi_reduction <add>, %348, %cst_149 [1] : vector<16x32xf32> to vector<16xf32>
    %350 = vector.shape_cast %349 : vector<16xf32> to vector<16x1xf32>
    %cst_150 = arith.constant 0.0322580636 : f32
    %351 = vector.broadcast %cst_150 : f32 to vector<16x1xf32>
    %352 = arith.mulf %350, %351 : vector<16x1xf32>
    %353 = math.sqrt %352 : vector<16x1xf32>
    %cst_151 = arith.constant 9.99999997E-7 : f32
    %354 = vector.broadcast %cst_151 : f32 to vector<16x1xf32>
    %355 = arith.addf %353, %354 : vector<16x1xf32>
    %cst_152 = arith.constant 1.000000e+00 : f32
    %356 = vector.broadcast %cst_152 : f32 to vector<16x1xf32>
    %357 = arith.divf %356, %355 : vector<16x1xf32>
    %c2_153 = arith.constant 2 : index
    %c0_154 = arith.constant 0 : index
    %358 = vector.load %arg12[%c2_153, %c0_154] : memref<58x128xf32, #tpu.memory_space<vmem>>, vector<1x32xf32>
    %359 = vector.broadcast %357 : vector<16x1xf32> to vector<16x32xf32>
    %360 = arith.mulf %347, %359 : vector<16x32xf32>
    %361 = vector.broadcast %358 : vector<1x32xf32> to vector<16x32xf32>
    %362 = arith.mulf %361, %360 : vector<16x32xf32>
    %c3_155 = arith.constant 3 : index
    %c0_156 = arith.constant 0 : index
    %363 = vector.load %arg12[%c3_155, %c0_156] : memref<58x128xf32, #tpu.memory_space<vmem>>, vector<1x32xf32>
    %364 = vector.broadcast %363 : vector<1x32xf32> to vector<16x32xf32>
    %365 = arith.addf %362, %364 : vector<16x32xf32>
    %366 = arith.truncf %365 : vector<16x32xf32> to vector<16x32xbf16>
    %c0_157 = arith.constant 0 : index
    %c0_158 = arith.constant 0 : index
    %c0_159 = arith.constant 0 : index
    %367 = vector.load %arg7[%c0_157, %c0_158, %c0_159] : memref<4x32x64xbf16, #tpu.memory_space<vmem>>, vector<1x32x64xbf16>
    %368 = vector.shape_cast %367 : vector<1x32x64xbf16> to vector<32x64xbf16>
    %cst_160 = arith.constant dense<0.000000e+00> : vector<16x64xf32>
    %369 = tpu.matmul %366, %368, %cst_160 {dimension_numbers = #tpu.dot_dimension_numbers<[1], [0], [0], [1], [0, 0, 1, 1], [], []>} : vector<16x32xbf16>, vector<32x64xbf16>, vector<16x64xf32> -> vector<16x64xf32>
    %c37 = arith.constant 37 : index
    %c0_161 = arith.constant 0 : index
    %370 = vector.load %arg12[%c37, %c0_161] : memref<58x128xf32, #tpu.memory_space<vmem>>, vector<1x64xf32>
    %371 = vector.broadcast %370 : vector<1x64xf32> to vector<16x64xf32>
    %372 = arith.addf %369, %371 : vector<16x64xf32>
    %cst_162 = arith.constant 0.000000e+00 : f32
    %373 = vector.broadcast %cst_162 : f32 to vector<16x64xf32>
    %374 = arith.maximumf %372, %373 : vector<16x64xf32>
    %375 = arith.truncf %374 : vector<16x64xf32> to vector<16x64xbf16>
    %c0_163 = arith.constant 0 : index
    %c0_164 = arith.constant 0 : index
    %c0_165 = arith.constant 0 : index
    %376 = vector.load %arg8[%c0_163, %c0_164, %c0_165] : memref<4x64x32xbf16, #tpu.memory_space<vmem>>, vector<1x64x32xbf16>
    %377 = vector.shape_cast %376 : vector<1x64x32xbf16> to vector<64x32xbf16>
    %cst_166 = arith.constant dense<0.000000e+00> : vector<16x32xf32>
    %378 = tpu.matmul %375, %377, %cst_166 {dimension_numbers = #tpu.dot_dimension_numbers<[1], [0], [0], [1], [0, 0, 1, 1], [], []>} : vector<16x64xbf16>, vector<64x32xbf16>, vector<16x32xf32> -> vector<16x32xf32>
    %c5_167 = arith.constant 5 : index
    %c0_168 = arith.constant 0 : index
    %379 = vector.load %arg12[%c5_167, %c0_168] : memref<58x128xf32, #tpu.memory_space<vmem>>, vector<1x32xf32>
    %380 = vector.broadcast %379 : vector<1x32xf32> to vector<16x32xf32>
    %381 = arith.addf %378, %380 : vector<16x32xf32>
    %382 = arith.addf %341, %381 : vector<16x32xf32>
    %cst_169 = arith.constant dense<0.000000e+00> : vector<16xf32>
    %383 = vector.multi_reduction <add>, %382, %cst_169 [1] : vector<16x32xf32> to vector<16xf32>
    %384 = vector.shape_cast %383 : vector<16xf32> to vector<16x1xf32>
    %cst_170 = arith.constant 3.200000e+01 : f32
    %385 = vector.broadcast %cst_170 : f32 to vector<16x1xf32>
    %386 = arith.divf %384, %385 : vector<16x1xf32>
    %387 = vector.broadcast %386 : vector<16x1xf32> to vector<16x32xf32>
    %388 = arith.subf %382, %387 : vector<16x32xf32>
    %389 = arith.mulf %388, %388 : vector<16x32xf32>
    %cst_171 = arith.constant dense<0.000000e+00> : vector<16xf32>
    %390 = vector.multi_reduction <add>, %389, %cst_171 [1] : vector<16x32xf32> to vector<16xf32>
    %391 = vector.shape_cast %390 : vector<16xf32> to vector<16x1xf32>
    %cst_172 = arith.constant 0.0322580636 : f32
    %392 = vector.broadcast %cst_172 : f32 to vector<16x1xf32>
    %393 = arith.mulf %391, %392 : vector<16x1xf32>
    %394 = math.sqrt %393 : vector<16x1xf32>
    %cst_173 = arith.constant 9.99999997E-7 : f32
    %395 = vector.broadcast %cst_173 : f32 to vector<16x1xf32>
    %396 = arith.addf %394, %395 : vector<16x1xf32>
    %cst_174 = arith.constant 1.000000e+00 : f32
    %397 = vector.broadcast %cst_174 : f32 to vector<16x1xf32>
    %398 = arith.divf %397, %396 : vector<16x1xf32>
    %c24 = arith.constant 24 : index
    %c0_175 = arith.constant 0 : index
    %399 = vector.load %arg12[%c24, %c0_175] : memref<58x128xf32, #tpu.memory_space<vmem>>, vector<1x32xf32>
    %400 = vector.broadcast %398 : vector<16x1xf32> to vector<16x32xf32>
    %401 = arith.mulf %388, %400 : vector<16x32xf32>
    %402 = vector.broadcast %399 : vector<1x32xf32> to vector<16x32xf32>
    %403 = arith.mulf %402, %401 : vector<16x32xf32>
    %c25 = arith.constant 25 : index
    %c0_176 = arith.constant 0 : index
    %404 = vector.load %arg12[%c25, %c0_176] : memref<58x128xf32, #tpu.memory_space<vmem>>, vector<1x32xf32>
    %405 = vector.broadcast %404 : vector<1x32xf32> to vector<16x32xf32>
    %406 = arith.addf %403, %405 : vector<16x32xf32>
    %c0_177 = arith.constant 0 : index
    %c0_178 = arith.constant 0 : index
    %c0_179 = arith.constant 0 : index
    %407 = vector.load %arg2[%c0_177, %c0_178, %c0_179] : memref<2x8x32xf32, #tpu.memory_space<vmem>>, vector<2x8x32xf32>
    %408 = vector.shape_cast %407 : vector<2x8x32xf32> to vector<16x32xf32>
    %c42_180 = arith.constant 42 : index
    %c0_181 = arith.constant 0 : index
    %409 = vector.load %arg12[%c42_180, %c0_181] : memref<58x128xf32, #tpu.memory_space<vmem>>, vector<8x32xf32>
    %c33 = arith.constant 33 : index
    %c0_182 = arith.constant 0 : index
    %410 = vector.load %arg12[%c33, %c0_182] : memref<58x128xf32, #tpu.memory_space<vmem>>, vector<1x32xf32>
    %411 = vector.broadcast %410 : vector<1x32xf32> to vector<8x32xf32>
    %412 = arith.addf %409, %411 : vector<8x32xf32>
    %cst_183 = arith.constant 5.65685415 : f32
    %413 = vector.broadcast %cst_183 : f32 to vector<16x32xf32>
    %414 = arith.mulf %408, %413 : vector<16x32xf32>
    %415 = tpu.concatenate %412, %412 in 0 : vector<8x32xf32>, vector<8x32xf32> -> vector<16x32xf32>
    %416 = arith.addf %414, %415 : vector<16x32xf32>
    %cst_184 = arith.constant dense<0.000000e+00> : vector<16xf32>
    %417 = vector.multi_reduction <add>, %416, %cst_184 [1] : vector<16x32xf32> to vector<16xf32>
    %418 = vector.shape_cast %417 : vector<16xf32> to vector<16x1xf32>
    %cst_185 = arith.constant 3.200000e+01 : f32
    %419 = vector.broadcast %cst_185 : f32 to vector<16x1xf32>
    %420 = arith.divf %418, %419 : vector<16x1xf32>
    %421 = vector.broadcast %420 : vector<16x1xf32> to vector<16x32xf32>
    %422 = arith.subf %416, %421 : vector<16x32xf32>
    %423 = arith.mulf %422, %422 : vector<16x32xf32>
    %cst_186 = arith.constant dense<0.000000e+00> : vector<16xf32>
    %424 = vector.multi_reduction <add>, %423, %cst_186 [1] : vector<16x32xf32> to vector<16xf32>
    %425 = vector.shape_cast %424 : vector<16xf32> to vector<16x1xf32>
    %cst_187 = arith.constant 0.0322580636 : f32
    %426 = vector.broadcast %cst_187 : f32 to vector<16x1xf32>
    %427 = arith.mulf %425, %426 : vector<16x1xf32>
    %428 = math.sqrt %427 : vector<16x1xf32>
    %cst_188 = arith.constant 9.99999997E-7 : f32
    %429 = vector.broadcast %cst_188 : f32 to vector<16x1xf32>
    %430 = arith.addf %428, %429 : vector<16x1xf32>
    %cst_189 = arith.constant 1.000000e+00 : f32
    %431 = vector.broadcast %cst_189 : f32 to vector<16x1xf32>
    %432 = arith.divf %431, %430 : vector<16x1xf32>
    %c6_190 = arith.constant 6 : index
    %c0_191 = arith.constant 0 : index
    %433 = vector.load %arg12[%c6_190, %c0_191] : memref<58x128xf32, #tpu.memory_space<vmem>>, vector<1x32xf32>
    %434 = vector.broadcast %432 : vector<16x1xf32> to vector<16x32xf32>
    %435 = arith.mulf %422, %434 : vector<16x32xf32>
    %436 = vector.broadcast %433 : vector<1x32xf32> to vector<16x32xf32>
    %437 = arith.mulf %436, %435 : vector<16x32xf32>
    %c7_192 = arith.constant 7 : index
    %c0_193 = arith.constant 0 : index
    %438 = vector.load %arg12[%c7_192, %c0_193] : memref<58x128xf32, #tpu.memory_space<vmem>>, vector<1x32xf32>
    %439 = vector.broadcast %438 : vector<1x32xf32> to vector<16x32xf32>
    %440 = arith.addf %437, %439 : vector<16x32xf32>
    %441 = arith.truncf %440 : vector<16x32xf32> to vector<16x32xbf16>
    %cst_194 = arith.constant 0.000000e+00 : f32
    %442 = vector.broadcast %cst_194 : f32 to vector<8x32xf32>
    %cst_195 = arith.constant 0.000000e+00 : f32
    %443 = vector.broadcast %cst_195 : f32 to vector<8x32xf32>
    %c12 = arith.constant 12 : index
    %c0_196 = arith.constant 0 : index
    %c0_197 = arith.constant 0 : index
    %444 = vector.load %arg5[%c12, %c0_196, %c0_197] : memref<48x32x8xbf16, #tpu.memory_space<vmem>>, vector<1x32x8xbf16>
    %445 = vector.shape_cast %444 : vector<1x32x8xbf16> to vector<32x8xbf16>
    %c12_198 = arith.constant 12 : index
    %c0_199 = arith.constant 0 : index
    %446 = vector.load %arg11[%c12_198, %c0_199] : memref<48x8xf32, #tpu.memory_space<vmem>>, vector<1x8xf32>
    %cst_200 = arith.constant dense<0.000000e+00> : vector<16x8xf32>
    %447 = tpu.matmul %441, %445, %cst_200 {dimension_numbers = #tpu.dot_dimension_numbers<[1], [0], [0], [1], [0, 0, 1, 1], [], []>} : vector<16x32xbf16>, vector<32x8xbf16>, vector<16x8xf32> -> vector<16x8xf32>
    %448 = vector.broadcast %446 : vector<1x8xf32> to vector<16x8xf32>
    %449 = arith.addf %447, %448 : vector<16x8xf32>
    %450 = arith.truncf %449 : vector<16x8xf32> to vector<16x8xbf16>
    %c16 = arith.constant 16 : index
    %c0_201 = arith.constant 0 : index
    %c0_202 = arith.constant 0 : index
    %451 = vector.load %arg5[%c16, %c0_201, %c0_202] : memref<48x32x8xbf16, #tpu.memory_space<vmem>>, vector<1x32x8xbf16>
    %452 = vector.shape_cast %451 : vector<1x32x8xbf16> to vector<32x8xbf16>
    %c16_203 = arith.constant 16 : index
    %c0_204 = arith.constant 0 : index
    %453 = vector.load %arg11[%c16_203, %c0_204] : memref<48x8xf32, #tpu.memory_space<vmem>>, vector<1x8xf32>
    %cst_205 = arith.constant dense<0.000000e+00> : vector<16x8xf32>
    %454 = tpu.matmul %441, %452, %cst_205 {dimension_numbers = #tpu.dot_dimension_numbers<[1], [0], [0], [1], [0, 0, 1, 1], [], []>} : vector<16x32xbf16>, vector<32x8xbf16>, vector<16x8xf32> -> vector<16x8xf32>
    %455 = vector.broadcast %453 : vector<1x8xf32> to vector<16x8xf32>
    %456 = arith.addf %454, %455 : vector<16x8xf32>
    %457 = arith.truncf %456 : vector<16x8xf32> to vector<16x8xbf16>
    %c20 = arith.constant 20 : index
    %c0_206 = arith.constant 0 : index
    %c0_207 = arith.constant 0 : index
    %458 = vector.load %arg5[%c20, %c0_206, %c0_207] : memref<48x32x8xbf16, #tpu.memory_space<vmem>>, vector<1x32x8xbf16>
    %459 = vector.shape_cast %458 : vector<1x32x8xbf16> to vector<32x8xbf16>
    %c20_208 = arith.constant 20 : index
    %c0_209 = arith.constant 0 : index
    %460 = vector.load %arg11[%c20_208, %c0_209] : memref<48x8xf32, #tpu.memory_space<vmem>>, vector<1x8xf32>
    %cst_210 = arith.constant dense<0.000000e+00> : vector<16x8xf32>
    %461 = tpu.matmul %441, %459, %cst_210 {dimension_numbers = #tpu.dot_dimension_numbers<[1], [0], [0], [1], [0, 0, 1, 1], [], []>} : vector<16x32xbf16>, vector<32x8xbf16>, vector<16x8xf32> -> vector<16x8xf32>
    %462 = vector.broadcast %460 : vector<1x8xf32> to vector<16x8xf32>
    %463 = arith.addf %461, %462 : vector<16x8xf32>
    %464 = arith.truncf %463 : vector<16x8xf32> to vector<16x8xbf16>
    %c4_211 = arith.constant 4 : index
    %c0_212 = arith.constant 0 : index
    %c0_213 = arith.constant 0 : index
    %465 = vector.load %arg6[%c4_211, %c0_212, %c0_213] : memref<16x8x32xbf16, #tpu.memory_space<vmem>>, vector<1x8x32xbf16>
    %466 = vector.shape_cast %465 : vector<1x8x32xbf16> to vector<8x32xbf16>
    %467 = vector.extract_strided_slice %450 {offsets = [0, 0], sizes = [8, 8], strides = [1, 1]} : vector<16x8xbf16> to vector<8x8xbf16>
    %468 = vector.extract_strided_slice %457 {offsets = [0, 0], sizes = [8, 8], strides = [1, 1]} : vector<16x8xbf16> to vector<8x8xbf16>
    %cst_214 = arith.constant dense<0.000000e+00> : vector<8x8xf32>
    %469 = tpu.matmul %467, %468, %cst_214 {dimension_numbers = #tpu.dot_dimension_numbers<[1], [1], [0], [0], [0, 0, 1, 0], [], []>} : vector<8x8xbf16>, vector<8x8xbf16>, vector<8x8xf32> -> vector<8x8xf32>
    %cst_215 = arith.constant 0.353553385 : f32
    %470 = vector.broadcast %cst_215 : f32 to vector<8x8xf32>
    %471 = arith.mulf %469, %470 : vector<8x8xf32>
    %472 = vector.extract_strided_slice %0 {offsets = [0, 1, 0], sizes = [1, 1, 8], strides = [1, 1, 1]} : vector<2x8x128xf32> to vector<1x1x8xf32>
    %473 = vector.shape_cast %472 : vector<1x1x8xf32> to vector<1x8xf32>
    %474 = vector.broadcast %473 : vector<1x8xf32> to vector<8x8xf32>
    %475 = arith.addf %471, %474 : vector<8x8xf32>
    %cst_216 = arith.constant dense<0xFF800000> : vector<8xf32>
    %476 = vector.multi_reduction <maximumf>, %475, %cst_216 [1] : vector<8x8xf32> to vector<8xf32>
    %477 = vector.shape_cast %476 : vector<8xf32> to vector<8x1xf32>
    %478 = vector.broadcast %477 : vector<8x1xf32> to vector<8x8xf32>
    %479 = arith.subf %475, %478 : vector<8x8xf32>
    %480 = math.exp %479 : vector<8x8xf32>
    %cst_217 = arith.constant dense<0.000000e+00> : vector<8xf32>
    %481 = vector.multi_reduction <add>, %480, %cst_217 [1] : vector<8x8xf32> to vector<8xf32>
    %482 = vector.shape_cast %481 : vector<8xf32> to vector<8x1xf32>
    %483 = tpu.reciprocal %482 {approx = true} : vector<8x1xf32> -> vector<8x1xf32>
    %484 = vector.broadcast %483 : vector<8x1xf32> to vector<8x8xf32>
    %485 = arith.mulf %480, %484 : vector<8x8xf32>
    %486 = arith.truncf %485 : vector<8x8xf32> to vector<8x8xbf16>
    %487 = vector.extract_strided_slice %464 {offsets = [0, 0], sizes = [8, 8], strides = [1, 1]} : vector<16x8xbf16> to vector<8x8xbf16>
    %cst_218 = arith.constant dense<0.000000e+00> : vector<8x8xf32>
    %488 = tpu.matmul %486, %487, %cst_218 {dimension_numbers = #tpu.dot_dimension_numbers<[1], [0], [0], [1], [0, 0, 1, 1], [], []>} : vector<8x8xbf16>, vector<8x8xbf16>, vector<8x8xf32> -> vector<8x8xf32>
    %489 = arith.truncf %488 : vector<8x8xf32> to vector<8x8xbf16>
    %cst_219 = arith.constant dense<0.000000e+00> : vector<8x32xf32>
    %490 = tpu.matmul %489, %466, %cst_219 {dimension_numbers = #tpu.dot_dimension_numbers<[1], [0], [0], [1], [0, 0, 1, 1], [], []>} : vector<8x8xbf16>, vector<8x32xbf16>, vector<8x32xf32> -> vector<8x32xf32>
    %491 = arith.addf %442, %490 : vector<8x32xf32>
    %492 = vector.extract_strided_slice %450 {offsets = [8, 0], sizes = [8, 8], strides = [1, 1]} : vector<16x8xbf16> to vector<8x8xbf16>
    %493 = vector.extract_strided_slice %457 {offsets = [8, 0], sizes = [8, 8], strides = [1, 1]} : vector<16x8xbf16> to vector<8x8xbf16>
    %cst_220 = arith.constant dense<0.000000e+00> : vector<8x8xf32>
    %494 = tpu.matmul %492, %493, %cst_220 {dimension_numbers = #tpu.dot_dimension_numbers<[1], [1], [0], [0], [0, 0, 1, 0], [], []>} : vector<8x8xbf16>, vector<8x8xbf16>, vector<8x8xf32> -> vector<8x8xf32>
    %cst_221 = arith.constant 0.353553385 : f32
    %495 = vector.broadcast %cst_221 : f32 to vector<8x8xf32>
    %496 = arith.mulf %494, %495 : vector<8x8xf32>
    %497 = vector.extract_strided_slice %0 {offsets = [1, 1, 0], sizes = [1, 1, 8], strides = [1, 1, 1]} : vector<2x8x128xf32> to vector<1x1x8xf32>
    %498 = vector.shape_cast %497 : vector<1x1x8xf32> to vector<1x8xf32>
    %499 = vector.broadcast %498 : vector<1x8xf32> to vector<8x8xf32>
    %500 = arith.addf %496, %499 : vector<8x8xf32>
    %cst_222 = arith.constant dense<0xFF800000> : vector<8xf32>
    %501 = vector.multi_reduction <maximumf>, %500, %cst_222 [1] : vector<8x8xf32> to vector<8xf32>
    %502 = vector.shape_cast %501 : vector<8xf32> to vector<8x1xf32>
    %503 = vector.broadcast %502 : vector<8x1xf32> to vector<8x8xf32>
    %504 = arith.subf %500, %503 : vector<8x8xf32>
    %505 = math.exp %504 : vector<8x8xf32>
    %cst_223 = arith.constant dense<0.000000e+00> : vector<8xf32>
    %506 = vector.multi_reduction <add>, %505, %cst_223 [1] : vector<8x8xf32> to vector<8xf32>
    %507 = vector.shape_cast %506 : vector<8xf32> to vector<8x1xf32>
    %508 = tpu.reciprocal %507 {approx = true} : vector<8x1xf32> -> vector<8x1xf32>
    %509 = vector.broadcast %508 : vector<8x1xf32> to vector<8x8xf32>
    %510 = arith.mulf %505, %509 : vector<8x8xf32>
    %511 = arith.truncf %510 : vector<8x8xf32> to vector<8x8xbf16>
    %512 = vector.extract_strided_slice %464 {offsets = [8, 0], sizes = [8, 8], strides = [1, 1]} : vector<16x8xbf16> to vector<8x8xbf16>
    %cst_224 = arith.constant dense<0.000000e+00> : vector<8x8xf32>
    %513 = tpu.matmul %511, %512, %cst_224 {dimension_numbers = #tpu.dot_dimension_numbers<[1], [0], [0], [1], [0, 0, 1, 1], [], []>} : vector<8x8xbf16>, vector<8x8xbf16>, vector<8x8xf32> -> vector<8x8xf32>
    %514 = arith.truncf %513 : vector<8x8xf32> to vector<8x8xbf16>
    %cst_225 = arith.constant dense<0.000000e+00> : vector<8x32xf32>
    %515 = tpu.matmul %514, %466, %cst_225 {dimension_numbers = #tpu.dot_dimension_numbers<[1], [0], [0], [1], [0, 0, 1, 1], [], []>} : vector<8x8xbf16>, vector<8x32xbf16>, vector<8x32xf32> -> vector<8x32xf32>
    %516 = arith.addf %443, %515 : vector<8x32xf32>
    %c13 = arith.constant 13 : index
    %c0_226 = arith.constant 0 : index
    %c0_227 = arith.constant 0 : index
    %517 = vector.load %arg5[%c13, %c0_226, %c0_227] : memref<48x32x8xbf16, #tpu.memory_space<vmem>>, vector<1x32x8xbf16>
    %518 = vector.shape_cast %517 : vector<1x32x8xbf16> to vector<32x8xbf16>
    %c13_228 = arith.constant 13 : index
    %c0_229 = arith.constant 0 : index
    %519 = vector.load %arg11[%c13_228, %c0_229] : memref<48x8xf32, #tpu.memory_space<vmem>>, vector<1x8xf32>
    %cst_230 = arith.constant dense<0.000000e+00> : vector<16x8xf32>
    %520 = tpu.matmul %441, %518, %cst_230 {dimension_numbers = #tpu.dot_dimension_numbers<[1], [0], [0], [1], [0, 0, 1, 1], [], []>} : vector<16x32xbf16>, vector<32x8xbf16>, vector<16x8xf32> -> vector<16x8xf32>
    %521 = vector.broadcast %519 : vector<1x8xf32> to vector<16x8xf32>
    %522 = arith.addf %520, %521 : vector<16x8xf32>
    %523 = arith.truncf %522 : vector<16x8xf32> to vector<16x8xbf16>
    %c17 = arith.constant 17 : index
    %c0_231 = arith.constant 0 : index
    %c0_232 = arith.constant 0 : index
    %524 = vector.load %arg5[%c17, %c0_231, %c0_232] : memref<48x32x8xbf16, #tpu.memory_space<vmem>>, vector<1x32x8xbf16>
    %525 = vector.shape_cast %524 : vector<1x32x8xbf16> to vector<32x8xbf16>
    %c17_233 = arith.constant 17 : index
    %c0_234 = arith.constant 0 : index
    %526 = vector.load %arg11[%c17_233, %c0_234] : memref<48x8xf32, #tpu.memory_space<vmem>>, vector<1x8xf32>
    %cst_235 = arith.constant dense<0.000000e+00> : vector<16x8xf32>
    %527 = tpu.matmul %441, %525, %cst_235 {dimension_numbers = #tpu.dot_dimension_numbers<[1], [0], [0], [1], [0, 0, 1, 1], [], []>} : vector<16x32xbf16>, vector<32x8xbf16>, vector<16x8xf32> -> vector<16x8xf32>
    %528 = vector.broadcast %526 : vector<1x8xf32> to vector<16x8xf32>
    %529 = arith.addf %527, %528 : vector<16x8xf32>
    %530 = arith.truncf %529 : vector<16x8xf32> to vector<16x8xbf16>
    %c21 = arith.constant 21 : index
    %c0_236 = arith.constant 0 : index
    %c0_237 = arith.constant 0 : index
    %531 = vector.load %arg5[%c21, %c0_236, %c0_237] : memref<48x32x8xbf16, #tpu.memory_space<vmem>>, vector<1x32x8xbf16>
    %532 = vector.shape_cast %531 : vector<1x32x8xbf16> to vector<32x8xbf16>
    %c21_238 = arith.constant 21 : index
    %c0_239 = arith.constant 0 : index
    %533 = vector.load %arg11[%c21_238, %c0_239] : memref<48x8xf32, #tpu.memory_space<vmem>>, vector<1x8xf32>
    %cst_240 = arith.constant dense<0.000000e+00> : vector<16x8xf32>
    %534 = tpu.matmul %441, %532, %cst_240 {dimension_numbers = #tpu.dot_dimension_numbers<[1], [0], [0], [1], [0, 0, 1, 1], [], []>} : vector<16x32xbf16>, vector<32x8xbf16>, vector<16x8xf32> -> vector<16x8xf32>
    %535 = vector.broadcast %533 : vector<1x8xf32> to vector<16x8xf32>
    %536 = arith.addf %534, %535 : vector<16x8xf32>
    %537 = arith.truncf %536 : vector<16x8xf32> to vector<16x8xbf16>
    %c5_241 = arith.constant 5 : index
    %c0_242 = arith.constant 0 : index
    %c0_243 = arith.constant 0 : index
    %538 = vector.load %arg6[%c5_241, %c0_242, %c0_243] : memref<16x8x32xbf16, #tpu.memory_space<vmem>>, vector<1x8x32xbf16>
    %539 = vector.shape_cast %538 : vector<1x8x32xbf16> to vector<8x32xbf16>
    %540 = vector.extract_strided_slice %523 {offsets = [0, 0], sizes = [8, 8], strides = [1, 1]} : vector<16x8xbf16> to vector<8x8xbf16>
    %541 = vector.extract_strided_slice %530 {offsets = [0, 0], sizes = [8, 8], strides = [1, 1]} : vector<16x8xbf16> to vector<8x8xbf16>
    %cst_244 = arith.constant dense<0.000000e+00> : vector<8x8xf32>
    %542 = tpu.matmul %540, %541, %cst_244 {dimension_numbers = #tpu.dot_dimension_numbers<[1], [1], [0], [0], [0, 0, 1, 0], [], []>} : vector<8x8xbf16>, vector<8x8xbf16>, vector<8x8xf32> -> vector<8x8xf32>
    %cst_245 = arith.constant 0.353553385 : f32
    %543 = vector.broadcast %cst_245 : f32 to vector<8x8xf32>
    %544 = arith.mulf %542, %543 : vector<8x8xf32>
    %545 = vector.extract_strided_slice %0 {offsets = [0, 1, 0], sizes = [1, 1, 8], strides = [1, 1, 1]} : vector<2x8x128xf32> to vector<1x1x8xf32>
    %546 = vector.shape_cast %545 : vector<1x1x8xf32> to vector<1x8xf32>
    %547 = vector.broadcast %546 : vector<1x8xf32> to vector<8x8xf32>
    %548 = arith.addf %544, %547 : vector<8x8xf32>
    %cst_246 = arith.constant dense<0xFF800000> : vector<8xf32>
    %549 = vector.multi_reduction <maximumf>, %548, %cst_246 [1] : vector<8x8xf32> to vector<8xf32>
    %550 = vector.shape_cast %549 : vector<8xf32> to vector<8x1xf32>
    %551 = vector.broadcast %550 : vector<8x1xf32> to vector<8x8xf32>
    %552 = arith.subf %548, %551 : vector<8x8xf32>
    %553 = math.exp %552 : vector<8x8xf32>
    %cst_247 = arith.constant dense<0.000000e+00> : vector<8xf32>
    %554 = vector.multi_reduction <add>, %553, %cst_247 [1] : vector<8x8xf32> to vector<8xf32>
    %555 = vector.shape_cast %554 : vector<8xf32> to vector<8x1xf32>
    %556 = tpu.reciprocal %555 {approx = true} : vector<8x1xf32> -> vector<8x1xf32>
    %557 = vector.broadcast %556 : vector<8x1xf32> to vector<8x8xf32>
    %558 = arith.mulf %553, %557 : vector<8x8xf32>
    %559 = arith.truncf %558 : vector<8x8xf32> to vector<8x8xbf16>
    %560 = vector.extract_strided_slice %537 {offsets = [0, 0], sizes = [8, 8], strides = [1, 1]} : vector<16x8xbf16> to vector<8x8xbf16>
    %cst_248 = arith.constant dense<0.000000e+00> : vector<8x8xf32>
    %561 = tpu.matmul %559, %560, %cst_248 {dimension_numbers = #tpu.dot_dimension_numbers<[1], [0], [0], [1], [0, 0, 1, 1], [], []>} : vector<8x8xbf16>, vector<8x8xbf16>, vector<8x8xf32> -> vector<8x8xf32>
    %562 = arith.truncf %561 : vector<8x8xf32> to vector<8x8xbf16>
    %cst_249 = arith.constant dense<0.000000e+00> : vector<8x32xf32>
    %563 = tpu.matmul %562, %539, %cst_249 {dimension_numbers = #tpu.dot_dimension_numbers<[1], [0], [0], [1], [0, 0, 1, 1], [], []>} : vector<8x8xbf16>, vector<8x32xbf16>, vector<8x32xf32> -> vector<8x32xf32>
    %564 = arith.addf %491, %563 : vector<8x32xf32>
    %565 = vector.extract_strided_slice %523 {offsets = [8, 0], sizes = [8, 8], strides = [1, 1]} : vector<16x8xbf16> to vector<8x8xbf16>
    %566 = vector.extract_strided_slice %530 {offsets = [8, 0], sizes = [8, 8], strides = [1, 1]} : vector<16x8xbf16> to vector<8x8xbf16>
    %cst_250 = arith.constant dense<0.000000e+00> : vector<8x8xf32>
    %567 = tpu.matmul %565, %566, %cst_250 {dimension_numbers = #tpu.dot_dimension_numbers<[1], [1], [0], [0], [0, 0, 1, 0], [], []>} : vector<8x8xbf16>, vector<8x8xbf16>, vector<8x8xf32> -> vector<8x8xf32>
    %cst_251 = arith.constant 0.353553385 : f32
    %568 = vector.broadcast %cst_251 : f32 to vector<8x8xf32>
    %569 = arith.mulf %567, %568 : vector<8x8xf32>
    %570 = vector.extract_strided_slice %0 {offsets = [1, 1, 0], sizes = [1, 1, 8], strides = [1, 1, 1]} : vector<2x8x128xf32> to vector<1x1x8xf32>
    %571 = vector.shape_cast %570 : vector<1x1x8xf32> to vector<1x8xf32>
    %572 = vector.broadcast %571 : vector<1x8xf32> to vector<8x8xf32>
    %573 = arith.addf %569, %572 : vector<8x8xf32>
    %cst_252 = arith.constant dense<0xFF800000> : vector<8xf32>
    %574 = vector.multi_reduction <maximumf>, %573, %cst_252 [1] : vector<8x8xf32> to vector<8xf32>
    %575 = vector.shape_cast %574 : vector<8xf32> to vector<8x1xf32>
    %576 = vector.broadcast %575 : vector<8x1xf32> to vector<8x8xf32>
    %577 = arith.subf %573, %576 : vector<8x8xf32>
    %578 = math.exp %577 : vector<8x8xf32>
    %cst_253 = arith.constant dense<0.000000e+00> : vector<8xf32>
    %579 = vector.multi_reduction <add>, %578, %cst_253 [1] : vector<8x8xf32> to vector<8xf32>
    %580 = vector.shape_cast %579 : vector<8xf32> to vector<8x1xf32>
    %581 = tpu.reciprocal %580 {approx = true} : vector<8x1xf32> -> vector<8x1xf32>
    %582 = vector.broadcast %581 : vector<8x1xf32> to vector<8x8xf32>
    %583 = arith.mulf %578, %582 : vector<8x8xf32>
    %584 = arith.truncf %583 : vector<8x8xf32> to vector<8x8xbf16>
    %585 = vector.extract_strided_slice %537 {offsets = [8, 0], sizes = [8, 8], strides = [1, 1]} : vector<16x8xbf16> to vector<8x8xbf16>
    %cst_254 = arith.constant dense<0.000000e+00> : vector<8x8xf32>
    %586 = tpu.matmul %584, %585, %cst_254 {dimension_numbers = #tpu.dot_dimension_numbers<[1], [0], [0], [1], [0, 0, 1, 1], [], []>} : vector<8x8xbf16>, vector<8x8xbf16>, vector<8x8xf32> -> vector<8x8xf32>
    %587 = arith.truncf %586 : vector<8x8xf32> to vector<8x8xbf16>
    %cst_255 = arith.constant dense<0.000000e+00> : vector<8x32xf32>
    %588 = tpu.matmul %587, %539, %cst_255 {dimension_numbers = #tpu.dot_dimension_numbers<[1], [0], [0], [1], [0, 0, 1, 1], [], []>} : vector<8x8xbf16>, vector<8x32xbf16>, vector<8x32xf32> -> vector<8x32xf32>
    %589 = arith.addf %516, %588 : vector<8x32xf32>
    %c14 = arith.constant 14 : index
    %c0_256 = arith.constant 0 : index
    %c0_257 = arith.constant 0 : index
    %590 = vector.load %arg5[%c14, %c0_256, %c0_257] : memref<48x32x8xbf16, #tpu.memory_space<vmem>>, vector<1x32x8xbf16>
    %591 = vector.shape_cast %590 : vector<1x32x8xbf16> to vector<32x8xbf16>
    %c14_258 = arith.constant 14 : index
    %c0_259 = arith.constant 0 : index
    %592 = vector.load %arg11[%c14_258, %c0_259] : memref<48x8xf32, #tpu.memory_space<vmem>>, vector<1x8xf32>
    %cst_260 = arith.constant dense<0.000000e+00> : vector<16x8xf32>
    %593 = tpu.matmul %441, %591, %cst_260 {dimension_numbers = #tpu.dot_dimension_numbers<[1], [0], [0], [1], [0, 0, 1, 1], [], []>} : vector<16x32xbf16>, vector<32x8xbf16>, vector<16x8xf32> -> vector<16x8xf32>
    %594 = vector.broadcast %592 : vector<1x8xf32> to vector<16x8xf32>
    %595 = arith.addf %593, %594 : vector<16x8xf32>
    %596 = arith.truncf %595 : vector<16x8xf32> to vector<16x8xbf16>
    %c18 = arith.constant 18 : index
    %c0_261 = arith.constant 0 : index
    %c0_262 = arith.constant 0 : index
    %597 = vector.load %arg5[%c18, %c0_261, %c0_262] : memref<48x32x8xbf16, #tpu.memory_space<vmem>>, vector<1x32x8xbf16>
    %598 = vector.shape_cast %597 : vector<1x32x8xbf16> to vector<32x8xbf16>
    %c18_263 = arith.constant 18 : index
    %c0_264 = arith.constant 0 : index
    %599 = vector.load %arg11[%c18_263, %c0_264] : memref<48x8xf32, #tpu.memory_space<vmem>>, vector<1x8xf32>
    %cst_265 = arith.constant dense<0.000000e+00> : vector<16x8xf32>
    %600 = tpu.matmul %441, %598, %cst_265 {dimension_numbers = #tpu.dot_dimension_numbers<[1], [0], [0], [1], [0, 0, 1, 1], [], []>} : vector<16x32xbf16>, vector<32x8xbf16>, vector<16x8xf32> -> vector<16x8xf32>
    %601 = vector.broadcast %599 : vector<1x8xf32> to vector<16x8xf32>
    %602 = arith.addf %600, %601 : vector<16x8xf32>
    %603 = arith.truncf %602 : vector<16x8xf32> to vector<16x8xbf16>
    %c22 = arith.constant 22 : index
    %c0_266 = arith.constant 0 : index
    %c0_267 = arith.constant 0 : index
    %604 = vector.load %arg5[%c22, %c0_266, %c0_267] : memref<48x32x8xbf16, #tpu.memory_space<vmem>>, vector<1x32x8xbf16>
    %605 = vector.shape_cast %604 : vector<1x32x8xbf16> to vector<32x8xbf16>
    %c22_268 = arith.constant 22 : index
    %c0_269 = arith.constant 0 : index
    %606 = vector.load %arg11[%c22_268, %c0_269] : memref<48x8xf32, #tpu.memory_space<vmem>>, vector<1x8xf32>
    %cst_270 = arith.constant dense<0.000000e+00> : vector<16x8xf32>
    %607 = tpu.matmul %441, %605, %cst_270 {dimension_numbers = #tpu.dot_dimension_numbers<[1], [0], [0], [1], [0, 0, 1, 1], [], []>} : vector<16x32xbf16>, vector<32x8xbf16>, vector<16x8xf32> -> vector<16x8xf32>
    %608 = vector.broadcast %606 : vector<1x8xf32> to vector<16x8xf32>
    %609 = arith.addf %607, %608 : vector<16x8xf32>
    %610 = arith.truncf %609 : vector<16x8xf32> to vector<16x8xbf16>
    %c6_271 = arith.constant 6 : index
    %c0_272 = arith.constant 0 : index
    %c0_273 = arith.constant 0 : index
    %611 = vector.load %arg6[%c6_271, %c0_272, %c0_273] : memref<16x8x32xbf16, #tpu.memory_space<vmem>>, vector<1x8x32xbf16>
    %612 = vector.shape_cast %611 : vector<1x8x32xbf16> to vector<8x32xbf16>
    %613 = vector.extract_strided_slice %596 {offsets = [0, 0], sizes = [8, 8], strides = [1, 1]} : vector<16x8xbf16> to vector<8x8xbf16>
    %614 = vector.extract_strided_slice %603 {offsets = [0, 0], sizes = [8, 8], strides = [1, 1]} : vector<16x8xbf16> to vector<8x8xbf16>
    %cst_274 = arith.constant dense<0.000000e+00> : vector<8x8xf32>
    %615 = tpu.matmul %613, %614, %cst_274 {dimension_numbers = #tpu.dot_dimension_numbers<[1], [1], [0], [0], [0, 0, 1, 0], [], []>} : vector<8x8xbf16>, vector<8x8xbf16>, vector<8x8xf32> -> vector<8x8xf32>
    %cst_275 = arith.constant 0.353553385 : f32
    %616 = vector.broadcast %cst_275 : f32 to vector<8x8xf32>
    %617 = arith.mulf %615, %616 : vector<8x8xf32>
    %618 = vector.extract_strided_slice %0 {offsets = [0, 1, 0], sizes = [1, 1, 8], strides = [1, 1, 1]} : vector<2x8x128xf32> to vector<1x1x8xf32>
    %619 = vector.shape_cast %618 : vector<1x1x8xf32> to vector<1x8xf32>
    %620 = vector.broadcast %619 : vector<1x8xf32> to vector<8x8xf32>
    %621 = arith.addf %617, %620 : vector<8x8xf32>
    %cst_276 = arith.constant dense<0xFF800000> : vector<8xf32>
    %622 = vector.multi_reduction <maximumf>, %621, %cst_276 [1] : vector<8x8xf32> to vector<8xf32>
    %623 = vector.shape_cast %622 : vector<8xf32> to vector<8x1xf32>
    %624 = vector.broadcast %623 : vector<8x1xf32> to vector<8x8xf32>
    %625 = arith.subf %621, %624 : vector<8x8xf32>
    %626 = math.exp %625 : vector<8x8xf32>
    %cst_277 = arith.constant dense<0.000000e+00> : vector<8xf32>
    %627 = vector.multi_reduction <add>, %626, %cst_277 [1] : vector<8x8xf32> to vector<8xf32>
    %628 = vector.shape_cast %627 : vector<8xf32> to vector<8x1xf32>
    %629 = tpu.reciprocal %628 {approx = true} : vector<8x1xf32> -> vector<8x1xf32>
    %630 = vector.broadcast %629 : vector<8x1xf32> to vector<8x8xf32>
    %631 = arith.mulf %626, %630 : vector<8x8xf32>
    %632 = arith.truncf %631 : vector<8x8xf32> to vector<8x8xbf16>
    %633 = vector.extract_strided_slice %610 {offsets = [0, 0], sizes = [8, 8], strides = [1, 1]} : vector<16x8xbf16> to vector<8x8xbf16>
    %cst_278 = arith.constant dense<0.000000e+00> : vector<8x8xf32>
    %634 = tpu.matmul %632, %633, %cst_278 {dimension_numbers = #tpu.dot_dimension_numbers<[1], [0], [0], [1], [0, 0, 1, 1], [], []>} : vector<8x8xbf16>, vector<8x8xbf16>, vector<8x8xf32> -> vector<8x8xf32>
    %635 = arith.truncf %634 : vector<8x8xf32> to vector<8x8xbf16>
    %cst_279 = arith.constant dense<0.000000e+00> : vector<8x32xf32>
    %636 = tpu.matmul %635, %612, %cst_279 {dimension_numbers = #tpu.dot_dimension_numbers<[1], [0], [0], [1], [0, 0, 1, 1], [], []>} : vector<8x8xbf16>, vector<8x32xbf16>, vector<8x32xf32> -> vector<8x32xf32>
    %637 = arith.addf %564, %636 : vector<8x32xf32>
    %638 = vector.extract_strided_slice %596 {offsets = [8, 0], sizes = [8, 8], strides = [1, 1]} : vector<16x8xbf16> to vector<8x8xbf16>
    %639 = vector.extract_strided_slice %603 {offsets = [8, 0], sizes = [8, 8], strides = [1, 1]} : vector<16x8xbf16> to vector<8x8xbf16>
    %cst_280 = arith.constant dense<0.000000e+00> : vector<8x8xf32>
    %640 = tpu.matmul %638, %639, %cst_280 {dimension_numbers = #tpu.dot_dimension_numbers<[1], [1], [0], [0], [0, 0, 1, 0], [], []>} : vector<8x8xbf16>, vector<8x8xbf16>, vector<8x8xf32> -> vector<8x8xf32>
    %cst_281 = arith.constant 0.353553385 : f32
    %641 = vector.broadcast %cst_281 : f32 to vector<8x8xf32>
    %642 = arith.mulf %640, %641 : vector<8x8xf32>
    %643 = vector.extract_strided_slice %0 {offsets = [1, 1, 0], sizes = [1, 1, 8], strides = [1, 1, 1]} : vector<2x8x128xf32> to vector<1x1x8xf32>
    %644 = vector.shape_cast %643 : vector<1x1x8xf32> to vector<1x8xf32>
    %645 = vector.broadcast %644 : vector<1x8xf32> to vector<8x8xf32>
    %646 = arith.addf %642, %645 : vector<8x8xf32>
    %cst_282 = arith.constant dense<0xFF800000> : vector<8xf32>
    %647 = vector.multi_reduction <maximumf>, %646, %cst_282 [1] : vector<8x8xf32> to vector<8xf32>
    %648 = vector.shape_cast %647 : vector<8xf32> to vector<8x1xf32>
    %649 = vector.broadcast %648 : vector<8x1xf32> to vector<8x8xf32>
    %650 = arith.subf %646, %649 : vector<8x8xf32>
    %651 = math.exp %650 : vector<8x8xf32>
    %cst_283 = arith.constant dense<0.000000e+00> : vector<8xf32>
    %652 = vector.multi_reduction <add>, %651, %cst_283 [1] : vector<8x8xf32> to vector<8xf32>
    %653 = vector.shape_cast %652 : vector<8xf32> to vector<8x1xf32>
    %654 = tpu.reciprocal %653 {approx = true} : vector<8x1xf32> -> vector<8x1xf32>
    %655 = vector.broadcast %654 : vector<8x1xf32> to vector<8x8xf32>
    %656 = arith.mulf %651, %655 : vector<8x8xf32>
    %657 = arith.truncf %656 : vector<8x8xf32> to vector<8x8xbf16>
    %658 = vector.extract_strided_slice %610 {offsets = [8, 0], sizes = [8, 8], strides = [1, 1]} : vector<16x8xbf16> to vector<8x8xbf16>
    %cst_284 = arith.constant dense<0.000000e+00> : vector<8x8xf32>
    %659 = tpu.matmul %657, %658, %cst_284 {dimension_numbers = #tpu.dot_dimension_numbers<[1], [0], [0], [1], [0, 0, 1, 1], [], []>} : vector<8x8xbf16>, vector<8x8xbf16>, vector<8x8xf32> -> vector<8x8xf32>
    %660 = arith.truncf %659 : vector<8x8xf32> to vector<8x8xbf16>
    %cst_285 = arith.constant dense<0.000000e+00> : vector<8x32xf32>
    %661 = tpu.matmul %660, %612, %cst_285 {dimension_numbers = #tpu.dot_dimension_numbers<[1], [0], [0], [1], [0, 0, 1, 1], [], []>} : vector<8x8xbf16>, vector<8x32xbf16>, vector<8x32xf32> -> vector<8x32xf32>
    %662 = arith.addf %589, %661 : vector<8x32xf32>
    %c15 = arith.constant 15 : index
    %c0_286 = arith.constant 0 : index
    %c0_287 = arith.constant 0 : index
    %663 = vector.load %arg5[%c15, %c0_286, %c0_287] : memref<48x32x8xbf16, #tpu.memory_space<vmem>>, vector<1x32x8xbf16>
    %664 = vector.shape_cast %663 : vector<1x32x8xbf16> to vector<32x8xbf16>
    %c15_288 = arith.constant 15 : index
    %c0_289 = arith.constant 0 : index
    %665 = vector.load %arg11[%c15_288, %c0_289] : memref<48x8xf32, #tpu.memory_space<vmem>>, vector<1x8xf32>
    %cst_290 = arith.constant dense<0.000000e+00> : vector<16x8xf32>
    %666 = tpu.matmul %441, %664, %cst_290 {dimension_numbers = #tpu.dot_dimension_numbers<[1], [0], [0], [1], [0, 0, 1, 1], [], []>} : vector<16x32xbf16>, vector<32x8xbf16>, vector<16x8xf32> -> vector<16x8xf32>
    %667 = vector.broadcast %665 : vector<1x8xf32> to vector<16x8xf32>
    %668 = arith.addf %666, %667 : vector<16x8xf32>
    %669 = arith.truncf %668 : vector<16x8xf32> to vector<16x8xbf16>
    %c19 = arith.constant 19 : index
    %c0_291 = arith.constant 0 : index
    %c0_292 = arith.constant 0 : index
    %670 = vector.load %arg5[%c19, %c0_291, %c0_292] : memref<48x32x8xbf16, #tpu.memory_space<vmem>>, vector<1x32x8xbf16>
    %671 = vector.shape_cast %670 : vector<1x32x8xbf16> to vector<32x8xbf16>
    %c19_293 = arith.constant 19 : index
    %c0_294 = arith.constant 0 : index
    %672 = vector.load %arg11[%c19_293, %c0_294] : memref<48x8xf32, #tpu.memory_space<vmem>>, vector<1x8xf32>
    %cst_295 = arith.constant dense<0.000000e+00> : vector<16x8xf32>
    %673 = tpu.matmul %441, %671, %cst_295 {dimension_numbers = #tpu.dot_dimension_numbers<[1], [0], [0], [1], [0, 0, 1, 1], [], []>} : vector<16x32xbf16>, vector<32x8xbf16>, vector<16x8xf32> -> vector<16x8xf32>
    %674 = vector.broadcast %672 : vector<1x8xf32> to vector<16x8xf32>
    %675 = arith.addf %673, %674 : vector<16x8xf32>
    %676 = arith.truncf %675 : vector<16x8xf32> to vector<16x8xbf16>
    %c23 = arith.constant 23 : index
    %c0_296 = arith.constant 0 : index
    %c0_297 = arith.constant 0 : index
    %677 = vector.load %arg5[%c23, %c0_296, %c0_297] : memref<48x32x8xbf16, #tpu.memory_space<vmem>>, vector<1x32x8xbf16>
    %678 = vector.shape_cast %677 : vector<1x32x8xbf16> to vector<32x8xbf16>
    %c23_298 = arith.constant 23 : index
    %c0_299 = arith.constant 0 : index
    %679 = vector.load %arg11[%c23_298, %c0_299] : memref<48x8xf32, #tpu.memory_space<vmem>>, vector<1x8xf32>
    %cst_300 = arith.constant dense<0.000000e+00> : vector<16x8xf32>
    %680 = tpu.matmul %441, %678, %cst_300 {dimension_numbers = #tpu.dot_dimension_numbers<[1], [0], [0], [1], [0, 0, 1, 1], [], []>} : vector<16x32xbf16>, vector<32x8xbf16>, vector<16x8xf32> -> vector<16x8xf32>
    %681 = vector.broadcast %679 : vector<1x8xf32> to vector<16x8xf32>
    %682 = arith.addf %680, %681 : vector<16x8xf32>
    %683 = arith.truncf %682 : vector<16x8xf32> to vector<16x8xbf16>
    %c7_301 = arith.constant 7 : index
    %c0_302 = arith.constant 0 : index
    %c0_303 = arith.constant 0 : index
    %684 = vector.load %arg6[%c7_301, %c0_302, %c0_303] : memref<16x8x32xbf16, #tpu.memory_space<vmem>>, vector<1x8x32xbf16>
    %685 = vector.shape_cast %684 : vector<1x8x32xbf16> to vector<8x32xbf16>
    %686 = vector.extract_strided_slice %669 {offsets = [0, 0], sizes = [8, 8], strides = [1, 1]} : vector<16x8xbf16> to vector<8x8xbf16>
    %687 = vector.extract_strided_slice %676 {offsets = [0, 0], sizes = [8, 8], strides = [1, 1]} : vector<16x8xbf16> to vector<8x8xbf16>
    %cst_304 = arith.constant dense<0.000000e+00> : vector<8x8xf32>
    %688 = tpu.matmul %686, %687, %cst_304 {dimension_numbers = #tpu.dot_dimension_numbers<[1], [1], [0], [0], [0, 0, 1, 0], [], []>} : vector<8x8xbf16>, vector<8x8xbf16>, vector<8x8xf32> -> vector<8x8xf32>
    %cst_305 = arith.constant 0.353553385 : f32
    %689 = vector.broadcast %cst_305 : f32 to vector<8x8xf32>
    %690 = arith.mulf %688, %689 : vector<8x8xf32>
    %691 = vector.extract_strided_slice %0 {offsets = [0, 1, 0], sizes = [1, 1, 8], strides = [1, 1, 1]} : vector<2x8x128xf32> to vector<1x1x8xf32>
    %692 = vector.shape_cast %691 : vector<1x1x8xf32> to vector<1x8xf32>
    %693 = vector.broadcast %692 : vector<1x8xf32> to vector<8x8xf32>
    %694 = arith.addf %690, %693 : vector<8x8xf32>
    %cst_306 = arith.constant dense<0xFF800000> : vector<8xf32>
    %695 = vector.multi_reduction <maximumf>, %694, %cst_306 [1] : vector<8x8xf32> to vector<8xf32>
    %696 = vector.shape_cast %695 : vector<8xf32> to vector<8x1xf32>
    %697 = vector.broadcast %696 : vector<8x1xf32> to vector<8x8xf32>
    %698 = arith.subf %694, %697 : vector<8x8xf32>
    %699 = math.exp %698 : vector<8x8xf32>
    %cst_307 = arith.constant dense<0.000000e+00> : vector<8xf32>
    %700 = vector.multi_reduction <add>, %699, %cst_307 [1] : vector<8x8xf32> to vector<8xf32>
    %701 = vector.shape_cast %700 : vector<8xf32> to vector<8x1xf32>
    %702 = tpu.reciprocal %701 {approx = true} : vector<8x1xf32> -> vector<8x1xf32>
    %703 = vector.broadcast %702 : vector<8x1xf32> to vector<8x8xf32>
    %704 = arith.mulf %699, %703 : vector<8x8xf32>
    %705 = arith.truncf %704 : vector<8x8xf32> to vector<8x8xbf16>
    %706 = vector.extract_strided_slice %683 {offsets = [0, 0], sizes = [8, 8], strides = [1, 1]} : vector<16x8xbf16> to vector<8x8xbf16>
    %cst_308 = arith.constant dense<0.000000e+00> : vector<8x8xf32>
    %707 = tpu.matmul %705, %706, %cst_308 {dimension_numbers = #tpu.dot_dimension_numbers<[1], [0], [0], [1], [0, 0, 1, 1], [], []>} : vector<8x8xbf16>, vector<8x8xbf16>, vector<8x8xf32> -> vector<8x8xf32>
    %708 = arith.truncf %707 : vector<8x8xf32> to vector<8x8xbf16>
    %cst_309 = arith.constant dense<0.000000e+00> : vector<8x32xf32>
    %709 = tpu.matmul %708, %685, %cst_309 {dimension_numbers = #tpu.dot_dimension_numbers<[1], [0], [0], [1], [0, 0, 1, 1], [], []>} : vector<8x8xbf16>, vector<8x32xbf16>, vector<8x32xf32> -> vector<8x32xf32>
    %710 = arith.addf %637, %709 : vector<8x32xf32>
    %711 = vector.extract_strided_slice %669 {offsets = [8, 0], sizes = [8, 8], strides = [1, 1]} : vector<16x8xbf16> to vector<8x8xbf16>
    %712 = vector.extract_strided_slice %676 {offsets = [8, 0], sizes = [8, 8], strides = [1, 1]} : vector<16x8xbf16> to vector<8x8xbf16>
    %cst_310 = arith.constant dense<0.000000e+00> : vector<8x8xf32>
    %713 = tpu.matmul %711, %712, %cst_310 {dimension_numbers = #tpu.dot_dimension_numbers<[1], [1], [0], [0], [0, 0, 1, 0], [], []>} : vector<8x8xbf16>, vector<8x8xbf16>, vector<8x8xf32> -> vector<8x8xf32>
    %cst_311 = arith.constant 0.353553385 : f32
    %714 = vector.broadcast %cst_311 : f32 to vector<8x8xf32>
    %715 = arith.mulf %713, %714 : vector<8x8xf32>
    %716 = vector.extract_strided_slice %0 {offsets = [1, 1, 0], sizes = [1, 1, 8], strides = [1, 1, 1]} : vector<2x8x128xf32> to vector<1x1x8xf32>
    %717 = vector.shape_cast %716 : vector<1x1x8xf32> to vector<1x8xf32>
    %718 = vector.broadcast %717 : vector<1x8xf32> to vector<8x8xf32>
    %719 = arith.addf %715, %718 : vector<8x8xf32>
    %cst_312 = arith.constant dense<0xFF800000> : vector<8xf32>
    %720 = vector.multi_reduction <maximumf>, %719, %cst_312 [1] : vector<8x8xf32> to vector<8xf32>
    %721 = vector.shape_cast %720 : vector<8xf32> to vector<8x1xf32>
    %722 = vector.broadcast %721 : vector<8x1xf32> to vector<8x8xf32>
    %723 = arith.subf %719, %722 : vector<8x8xf32>
    %724 = math.exp %723 : vector<8x8xf32>
    %cst_313 = arith.constant dense<0.000000e+00> : vector<8xf32>
    %725 = vector.multi_reduction <add>, %724, %cst_313 [1] : vector<8x8xf32> to vector<8xf32>
    %726 = vector.shape_cast %725 : vector<8xf32> to vector<8x1xf32>
    %727 = tpu.reciprocal %726 {approx = true} : vector<8x1xf32> -> vector<8x1xf32>
    %728 = vector.broadcast %727 : vector<8x1xf32> to vector<8x8xf32>
    %729 = arith.mulf %724, %728 : vector<8x8xf32>
    %730 = arith.truncf %729 : vector<8x8xf32> to vector<8x8xbf16>
    %731 = vector.extract_strided_slice %683 {offsets = [8, 0], sizes = [8, 8], strides = [1, 1]} : vector<16x8xbf16> to vector<8x8xbf16>
    %cst_314 = arith.constant dense<0.000000e+00> : vector<8x8xf32>
    %732 = tpu.matmul %730, %731, %cst_314 {dimension_numbers = #tpu.dot_dimension_numbers<[1], [0], [0], [1], [0, 0, 1, 1], [], []>} : vector<8x8xbf16>, vector<8x8xbf16>, vector<8x8xf32> -> vector<8x8xf32>
    %733 = arith.truncf %732 : vector<8x8xf32> to vector<8x8xbf16>
    %cst_315 = arith.constant dense<0.000000e+00> : vector<8x32xf32>
    %734 = tpu.matmul %733, %685, %cst_315 {dimension_numbers = #tpu.dot_dimension_numbers<[1], [0], [0], [1], [0, 0, 1, 1], [], []>} : vector<8x8xbf16>, vector<8x32xbf16>, vector<8x32xf32> -> vector<8x32xf32>
    %735 = arith.addf %662, %734 : vector<8x32xf32>
    %736 = tpu.concatenate %710, %735 in 0 : vector<8x32xf32>, vector<8x32xf32> -> vector<16x32xf32>
    %737 = arith.addf %416, %736 : vector<16x32xf32>
    %c10_316 = arith.constant 10 : index
    %c0_317 = arith.constant 0 : index
    %738 = vector.load %arg12[%c10_316, %c0_317] : memref<58x128xf32, #tpu.memory_space<vmem>>, vector<1x32xf32>
    %739 = vector.broadcast %738 : vector<1x32xf32> to vector<16x32xf32>
    %740 = arith.addf %737, %739 : vector<16x32xf32>
    %cst_318 = arith.constant dense<0.000000e+00> : vector<16xf32>
    %741 = vector.multi_reduction <add>, %740, %cst_318 [1] : vector<16x32xf32> to vector<16xf32>
    %742 = vector.shape_cast %741 : vector<16xf32> to vector<16x1xf32>
    %cst_319 = arith.constant 3.200000e+01 : f32
    %743 = vector.broadcast %cst_319 : f32 to vector<16x1xf32>
    %744 = arith.divf %742, %743 : vector<16x1xf32>
    %745 = vector.broadcast %744 : vector<16x1xf32> to vector<16x32xf32>
    %746 = arith.subf %740, %745 : vector<16x32xf32>
    %747 = arith.mulf %746, %746 : vector<16x32xf32>
    %cst_320 = arith.constant dense<0.000000e+00> : vector<16xf32>
    %748 = vector.multi_reduction <add>, %747, %cst_320 [1] : vector<16x32xf32> to vector<16xf32>
    %749 = vector.shape_cast %748 : vector<16xf32> to vector<16x1xf32>
    %cst_321 = arith.constant 0.0322580636 : f32
    %750 = vector.broadcast %cst_321 : f32 to vector<16x1xf32>
    %751 = arith.mulf %749, %750 : vector<16x1xf32>
    %752 = math.sqrt %751 : vector<16x1xf32>
    %cst_322 = arith.constant 9.99999997E-7 : f32
    %753 = vector.broadcast %cst_322 : f32 to vector<16x1xf32>
    %754 = arith.addf %752, %753 : vector<16x1xf32>
    %cst_323 = arith.constant 1.000000e+00 : f32
    %755 = vector.broadcast %cst_323 : f32 to vector<16x1xf32>
    %756 = arith.divf %755, %754 : vector<16x1xf32>
    %c8_324 = arith.constant 8 : index
    %c0_325 = arith.constant 0 : index
    %757 = vector.load %arg12[%c8_324, %c0_325] : memref<58x128xf32, #tpu.memory_space<vmem>>, vector<1x32xf32>
    %758 = vector.broadcast %756 : vector<16x1xf32> to vector<16x32xf32>
    %759 = arith.mulf %746, %758 : vector<16x32xf32>
    %760 = vector.broadcast %757 : vector<1x32xf32> to vector<16x32xf32>
    %761 = arith.mulf %760, %759 : vector<16x32xf32>
    %c9_326 = arith.constant 9 : index
    %c0_327 = arith.constant 0 : index
    %762 = vector.load %arg12[%c9_326, %c0_327] : memref<58x128xf32, #tpu.memory_space<vmem>>, vector<1x32xf32>
    %763 = vector.broadcast %762 : vector<1x32xf32> to vector<16x32xf32>
    %764 = arith.addf %761, %763 : vector<16x32xf32>
    %765 = arith.truncf %764 : vector<16x32xf32> to vector<16x32xbf16>
    %c1_328 = arith.constant 1 : index
    %c0_329 = arith.constant 0 : index
    %c0_330 = arith.constant 0 : index
    %766 = vector.load %arg7[%c1_328, %c0_329, %c0_330] : memref<4x32x64xbf16, #tpu.memory_space<vmem>>, vector<1x32x64xbf16>
    %767 = vector.shape_cast %766 : vector<1x32x64xbf16> to vector<32x64xbf16>
    %cst_331 = arith.constant dense<0.000000e+00> : vector<16x64xf32>
    %768 = tpu.matmul %765, %767, %cst_331 {dimension_numbers = #tpu.dot_dimension_numbers<[1], [0], [0], [1], [0, 0, 1, 1], [], []>} : vector<16x32xbf16>, vector<32x64xbf16>, vector<16x64xf32> -> vector<16x64xf32>
    %c38 = arith.constant 38 : index
    %c0_332 = arith.constant 0 : index
    %769 = vector.load %arg12[%c38, %c0_332] : memref<58x128xf32, #tpu.memory_space<vmem>>, vector<1x64xf32>
    %770 = vector.broadcast %769 : vector<1x64xf32> to vector<16x64xf32>
    %771 = arith.addf %768, %770 : vector<16x64xf32>
    %cst_333 = arith.constant 0.000000e+00 : f32
    %772 = vector.broadcast %cst_333 : f32 to vector<16x64xf32>
    %773 = arith.maximumf %771, %772 : vector<16x64xf32>
    %774 = arith.truncf %773 : vector<16x64xf32> to vector<16x64xbf16>
    %c1_334 = arith.constant 1 : index
    %c0_335 = arith.constant 0 : index
    %c0_336 = arith.constant 0 : index
    %775 = vector.load %arg8[%c1_334, %c0_335, %c0_336] : memref<4x64x32xbf16, #tpu.memory_space<vmem>>, vector<1x64x32xbf16>
    %776 = vector.shape_cast %775 : vector<1x64x32xbf16> to vector<64x32xbf16>
    %cst_337 = arith.constant dense<0.000000e+00> : vector<16x32xf32>
    %777 = tpu.matmul %774, %776, %cst_337 {dimension_numbers = #tpu.dot_dimension_numbers<[1], [0], [0], [1], [0, 0, 1, 1], [], []>} : vector<16x64xbf16>, vector<64x32xbf16>, vector<16x32xf32> -> vector<16x32xf32>
    %c11_338 = arith.constant 11 : index
    %c0_339 = arith.constant 0 : index
    %778 = vector.load %arg12[%c11_338, %c0_339] : memref<58x128xf32, #tpu.memory_space<vmem>>, vector<1x32xf32>
    %779 = vector.broadcast %778 : vector<1x32xf32> to vector<16x32xf32>
    %780 = arith.addf %777, %779 : vector<16x32xf32>
    %781 = arith.addf %740, %780 : vector<16x32xf32>
    %cst_340 = arith.constant dense<0.000000e+00> : vector<16xf32>
    %782 = vector.multi_reduction <add>, %781, %cst_340 [1] : vector<16x32xf32> to vector<16xf32>
    %783 = vector.shape_cast %782 : vector<16xf32> to vector<16x1xf32>
    %cst_341 = arith.constant 3.200000e+01 : f32
    %784 = vector.broadcast %cst_341 : f32 to vector<16x1xf32>
    %785 = arith.divf %783, %784 : vector<16x1xf32>
    %786 = vector.broadcast %785 : vector<16x1xf32> to vector<16x32xf32>
    %787 = arith.subf %781, %786 : vector<16x32xf32>
    %788 = arith.mulf %787, %787 : vector<16x32xf32>
    %cst_342 = arith.constant dense<0.000000e+00> : vector<16xf32>
    %789 = vector.multi_reduction <add>, %788, %cst_342 [1] : vector<16x32xf32> to vector<16xf32>
    %790 = vector.shape_cast %789 : vector<16xf32> to vector<16x1xf32>
    %cst_343 = arith.constant 0.0322580636 : f32
    %791 = vector.broadcast %cst_343 : f32 to vector<16x1xf32>
    %792 = arith.mulf %790, %791 : vector<16x1xf32>
    %793 = math.sqrt %792 : vector<16x1xf32>
    %cst_344 = arith.constant 9.99999997E-7 : f32
    %794 = vector.broadcast %cst_344 : f32 to vector<16x1xf32>
    %795 = arith.addf %793, %794 : vector<16x1xf32>
    %cst_345 = arith.constant 1.000000e+00 : f32
    %796 = vector.broadcast %cst_345 : f32 to vector<16x1xf32>
    %797 = arith.divf %796, %795 : vector<16x1xf32>
    %c26 = arith.constant 26 : index
    %c0_346 = arith.constant 0 : index
    %798 = vector.load %arg12[%c26, %c0_346] : memref<58x128xf32, #tpu.memory_space<vmem>>, vector<1x32xf32>
    %799 = vector.broadcast %797 : vector<16x1xf32> to vector<16x32xf32>
    %800 = arith.mulf %787, %799 : vector<16x32xf32>
    %801 = vector.broadcast %798 : vector<1x32xf32> to vector<16x32xf32>
    %802 = arith.mulf %801, %800 : vector<16x32xf32>
    %c27 = arith.constant 27 : index
    %c0_347 = arith.constant 0 : index
    %803 = vector.load %arg12[%c27, %c0_347] : memref<58x128xf32, #tpu.memory_space<vmem>>, vector<1x32xf32>
    %804 = vector.broadcast %803 : vector<1x32xf32> to vector<16x32xf32>
    %805 = arith.addf %802, %804 : vector<16x32xf32>
    %c0_348 = arith.constant 0 : index
    %c0_349 = arith.constant 0 : index
    %c0_350 = arith.constant 0 : index
    %806 = vector.load %arg3[%c0_348, %c0_349, %c0_350] : memref<2x8x16xf32, #tpu.memory_space<vmem>>, vector<2x8x16xf32>
    %807 = vector.shape_cast %806 : vector<2x8x16xf32> to vector<16x16xf32>
    %808 = arith.truncf %807 : vector<16x16xf32> to vector<16x16xbf16>
    %c1_351 = arith.constant 1 : index
    %c0_352 = arith.constant 0 : index
    %c0_353 = arith.constant 0 : index
    %809 = vector.load %arg9[%c1_351, %c0_352, %c0_353] : memref<2x16x32xbf16, #tpu.memory_space<vmem>>, vector<1x16x32xbf16>
    %810 = vector.shape_cast %809 : vector<1x16x32xbf16> to vector<16x32xbf16>
    %cst_354 = arith.constant dense<0.000000e+00> : vector<16x32xf32>
    %811 = tpu.matmul %808, %810, %cst_354 {dimension_numbers = #tpu.dot_dimension_numbers<[1], [0], [0], [1], [0, 0, 1, 1], [], []>} : vector<16x16xbf16>, vector<16x32xbf16>, vector<16x32xf32> -> vector<16x32xf32>
    %c36 = arith.constant 36 : index
    %c0_355 = arith.constant 0 : index
    %812 = vector.load %arg12[%c36, %c0_355] : memref<58x128xf32, #tpu.memory_space<vmem>>, vector<1x32xf32>
    %813 = vector.broadcast %812 : vector<1x32xf32> to vector<16x32xf32>
    %814 = arith.addf %811, %813 : vector<16x32xf32>
    %c42_356 = arith.constant 42 : index
    %c0_357 = arith.constant 0 : index
    %815 = vector.load %arg12[%c42_356, %c0_357] : memref<58x128xf32, #tpu.memory_space<vmem>>, vector<8x32xf32>
    %c34 = arith.constant 34 : index
    %c0_358 = arith.constant 0 : index
    %816 = vector.load %arg12[%c34, %c0_358] : memref<58x128xf32, #tpu.memory_space<vmem>>, vector<1x32xf32>
    %817 = vector.broadcast %816 : vector<1x32xf32> to vector<8x32xf32>
    %818 = arith.addf %815, %817 : vector<8x32xf32>
    %cst_359 = arith.constant 5.65685415 : f32
    %819 = vector.broadcast %cst_359 : f32 to vector<16x32xf32>
    %820 = arith.mulf %814, %819 : vector<16x32xf32>
    %821 = tpu.concatenate %818, %818 in 0 : vector<8x32xf32>, vector<8x32xf32> -> vector<16x32xf32>
    %822 = arith.addf %820, %821 : vector<16x32xf32>
    %cst_360 = arith.constant dense<0.000000e+00> : vector<16xf32>
    %823 = vector.multi_reduction <add>, %822, %cst_360 [1] : vector<16x32xf32> to vector<16xf32>
    %824 = vector.shape_cast %823 : vector<16xf32> to vector<16x1xf32>
    %cst_361 = arith.constant 3.200000e+01 : f32
    %825 = vector.broadcast %cst_361 : f32 to vector<16x1xf32>
    %826 = arith.divf %824, %825 : vector<16x1xf32>
    %827 = vector.broadcast %826 : vector<16x1xf32> to vector<16x32xf32>
    %828 = arith.subf %822, %827 : vector<16x32xf32>
    %829 = arith.mulf %828, %828 : vector<16x32xf32>
    %cst_362 = arith.constant dense<0.000000e+00> : vector<16xf32>
    %830 = vector.multi_reduction <add>, %829, %cst_362 [1] : vector<16x32xf32> to vector<16xf32>
    %831 = vector.shape_cast %830 : vector<16xf32> to vector<16x1xf32>
    %cst_363 = arith.constant 0.0322580636 : f32
    %832 = vector.broadcast %cst_363 : f32 to vector<16x1xf32>
    %833 = arith.mulf %831, %832 : vector<16x1xf32>
    %834 = math.sqrt %833 : vector<16x1xf32>
    %cst_364 = arith.constant 9.99999997E-7 : f32
    %835 = vector.broadcast %cst_364 : f32 to vector<16x1xf32>
    %836 = arith.addf %834, %835 : vector<16x1xf32>
    %cst_365 = arith.constant 1.000000e+00 : f32
    %837 = vector.broadcast %cst_365 : f32 to vector<16x1xf32>
    %838 = arith.divf %837, %836 : vector<16x1xf32>
    %c12_366 = arith.constant 12 : index
    %c0_367 = arith.constant 0 : index
    %839 = vector.load %arg12[%c12_366, %c0_367] : memref<58x128xf32, #tpu.memory_space<vmem>>, vector<1x32xf32>
    %840 = vector.broadcast %838 : vector<16x1xf32> to vector<16x32xf32>
    %841 = arith.mulf %828, %840 : vector<16x32xf32>
    %842 = vector.broadcast %839 : vector<1x32xf32> to vector<16x32xf32>
    %843 = arith.mulf %842, %841 : vector<16x32xf32>
    %c13_368 = arith.constant 13 : index
    %c0_369 = arith.constant 0 : index
    %844 = vector.load %arg12[%c13_368, %c0_369] : memref<58x128xf32, #tpu.memory_space<vmem>>, vector<1x32xf32>
    %845 = vector.broadcast %844 : vector<1x32xf32> to vector<16x32xf32>
    %846 = arith.addf %843, %845 : vector<16x32xf32>
    %847 = arith.truncf %846 : vector<16x32xf32> to vector<16x32xbf16>
    %cst_370 = arith.constant 0.000000e+00 : f32
    %848 = vector.broadcast %cst_370 : f32 to vector<8x32xf32>
    %cst_371 = arith.constant 0.000000e+00 : f32
    %849 = vector.broadcast %cst_371 : f32 to vector<8x32xf32>
    %c24_372 = arith.constant 24 : index
    %c0_373 = arith.constant 0 : index
    %c0_374 = arith.constant 0 : index
    %850 = vector.load %arg5[%c24_372, %c0_373, %c0_374] : memref<48x32x8xbf16, #tpu.memory_space<vmem>>, vector<1x32x8xbf16>
    %851 = vector.shape_cast %850 : vector<1x32x8xbf16> to vector<32x8xbf16>
    %c24_375 = arith.constant 24 : index
    %c0_376 = arith.constant 0 : index
    %852 = vector.load %arg11[%c24_375, %c0_376] : memref<48x8xf32, #tpu.memory_space<vmem>>, vector<1x8xf32>
    %cst_377 = arith.constant dense<0.000000e+00> : vector<16x8xf32>
    %853 = tpu.matmul %847, %851, %cst_377 {dimension_numbers = #tpu.dot_dimension_numbers<[1], [0], [0], [1], [0, 0, 1, 1], [], []>} : vector<16x32xbf16>, vector<32x8xbf16>, vector<16x8xf32> -> vector<16x8xf32>
    %854 = vector.broadcast %852 : vector<1x8xf32> to vector<16x8xf32>
    %855 = arith.addf %853, %854 : vector<16x8xf32>
    %856 = arith.truncf %855 : vector<16x8xf32> to vector<16x8xbf16>
    %c28 = arith.constant 28 : index
    %c0_378 = arith.constant 0 : index
    %c0_379 = arith.constant 0 : index
    %857 = vector.load %arg5[%c28, %c0_378, %c0_379] : memref<48x32x8xbf16, #tpu.memory_space<vmem>>, vector<1x32x8xbf16>
    %858 = vector.shape_cast %857 : vector<1x32x8xbf16> to vector<32x8xbf16>
    %c28_380 = arith.constant 28 : index
    %c0_381 = arith.constant 0 : index
    %859 = vector.load %arg11[%c28_380, %c0_381] : memref<48x8xf32, #tpu.memory_space<vmem>>, vector<1x8xf32>
    %cst_382 = arith.constant dense<0.000000e+00> : vector<16x8xf32>
    %860 = tpu.matmul %847, %858, %cst_382 {dimension_numbers = #tpu.dot_dimension_numbers<[1], [0], [0], [1], [0, 0, 1, 1], [], []>} : vector<16x32xbf16>, vector<32x8xbf16>, vector<16x8xf32> -> vector<16x8xf32>
    %861 = vector.broadcast %859 : vector<1x8xf32> to vector<16x8xf32>
    %862 = arith.addf %860, %861 : vector<16x8xf32>
    %863 = arith.truncf %862 : vector<16x8xf32> to vector<16x8xbf16>
    %c32_383 = arith.constant 32 : index
    %c0_384 = arith.constant 0 : index
    %c0_385 = arith.constant 0 : index
    %864 = vector.load %arg5[%c32_383, %c0_384, %c0_385] : memref<48x32x8xbf16, #tpu.memory_space<vmem>>, vector<1x32x8xbf16>
    %865 = vector.shape_cast %864 : vector<1x32x8xbf16> to vector<32x8xbf16>
    %c32_386 = arith.constant 32 : index
    %c0_387 = arith.constant 0 : index
    %866 = vector.load %arg11[%c32_386, %c0_387] : memref<48x8xf32, #tpu.memory_space<vmem>>, vector<1x8xf32>
    %cst_388 = arith.constant dense<0.000000e+00> : vector<16x8xf32>
    %867 = tpu.matmul %847, %865, %cst_388 {dimension_numbers = #tpu.dot_dimension_numbers<[1], [0], [0], [1], [0, 0, 1, 1], [], []>} : vector<16x32xbf16>, vector<32x8xbf16>, vector<16x8xf32> -> vector<16x8xf32>
    %868 = vector.broadcast %866 : vector<1x8xf32> to vector<16x8xf32>
    %869 = arith.addf %867, %868 : vector<16x8xf32>
    %870 = arith.truncf %869 : vector<16x8xf32> to vector<16x8xbf16>
    %c8_389 = arith.constant 8 : index
    %c0_390 = arith.constant 0 : index
    %c0_391 = arith.constant 0 : index
    %871 = vector.load %arg6[%c8_389, %c0_390, %c0_391] : memref<16x8x32xbf16, #tpu.memory_space<vmem>>, vector<1x8x32xbf16>
    %872 = vector.shape_cast %871 : vector<1x8x32xbf16> to vector<8x32xbf16>
    %873 = vector.extract_strided_slice %856 {offsets = [0, 0], sizes = [8, 8], strides = [1, 1]} : vector<16x8xbf16> to vector<8x8xbf16>
    %874 = vector.extract_strided_slice %863 {offsets = [0, 0], sizes = [8, 8], strides = [1, 1]} : vector<16x8xbf16> to vector<8x8xbf16>
    %cst_392 = arith.constant dense<0.000000e+00> : vector<8x8xf32>
    %875 = tpu.matmul %873, %874, %cst_392 {dimension_numbers = #tpu.dot_dimension_numbers<[1], [1], [0], [0], [0, 0, 1, 0], [], []>} : vector<8x8xbf16>, vector<8x8xbf16>, vector<8x8xf32> -> vector<8x8xf32>
    %cst_393 = arith.constant 0.353553385 : f32
    %876 = vector.broadcast %cst_393 : f32 to vector<8x8xf32>
    %877 = arith.mulf %875, %876 : vector<8x8xf32>
    %878 = vector.extract_strided_slice %0 {offsets = [0, 2, 0], sizes = [1, 1, 8], strides = [1, 1, 1]} : vector<2x8x128xf32> to vector<1x1x8xf32>
    %879 = vector.shape_cast %878 : vector<1x1x8xf32> to vector<1x8xf32>
    %880 = vector.broadcast %879 : vector<1x8xf32> to vector<8x8xf32>
    %881 = arith.addf %877, %880 : vector<8x8xf32>
    %cst_394 = arith.constant dense<0xFF800000> : vector<8xf32>
    %882 = vector.multi_reduction <maximumf>, %881, %cst_394 [1] : vector<8x8xf32> to vector<8xf32>
    %883 = vector.shape_cast %882 : vector<8xf32> to vector<8x1xf32>
    %884 = vector.broadcast %883 : vector<8x1xf32> to vector<8x8xf32>
    %885 = arith.subf %881, %884 : vector<8x8xf32>
    %886 = math.exp %885 : vector<8x8xf32>
    %cst_395 = arith.constant dense<0.000000e+00> : vector<8xf32>
    %887 = vector.multi_reduction <add>, %886, %cst_395 [1] : vector<8x8xf32> to vector<8xf32>
    %888 = vector.shape_cast %887 : vector<8xf32> to vector<8x1xf32>
    %889 = tpu.reciprocal %888 {approx = true} : vector<8x1xf32> -> vector<8x1xf32>
    %890 = vector.broadcast %889 : vector<8x1xf32> to vector<8x8xf32>
    %891 = arith.mulf %886, %890 : vector<8x8xf32>
    %892 = arith.truncf %891 : vector<8x8xf32> to vector<8x8xbf16>
    %893 = vector.extract_strided_slice %870 {offsets = [0, 0], sizes = [8, 8], strides = [1, 1]} : vector<16x8xbf16> to vector<8x8xbf16>
    %cst_396 = arith.constant dense<0.000000e+00> : vector<8x8xf32>
    %894 = tpu.matmul %892, %893, %cst_396 {dimension_numbers = #tpu.dot_dimension_numbers<[1], [0], [0], [1], [0, 0, 1, 1], [], []>} : vector<8x8xbf16>, vector<8x8xbf16>, vector<8x8xf32> -> vector<8x8xf32>
    %895 = arith.truncf %894 : vector<8x8xf32> to vector<8x8xbf16>
    %cst_397 = arith.constant dense<0.000000e+00> : vector<8x32xf32>
    %896 = tpu.matmul %895, %872, %cst_397 {dimension_numbers = #tpu.dot_dimension_numbers<[1], [0], [0], [1], [0, 0, 1, 1], [], []>} : vector<8x8xbf16>, vector<8x32xbf16>, vector<8x32xf32> -> vector<8x32xf32>
    %897 = arith.addf %848, %896 : vector<8x32xf32>
    %898 = vector.extract_strided_slice %856 {offsets = [8, 0], sizes = [8, 8], strides = [1, 1]} : vector<16x8xbf16> to vector<8x8xbf16>
    %899 = vector.extract_strided_slice %863 {offsets = [8, 0], sizes = [8, 8], strides = [1, 1]} : vector<16x8xbf16> to vector<8x8xbf16>
    %cst_398 = arith.constant dense<0.000000e+00> : vector<8x8xf32>
    %900 = tpu.matmul %898, %899, %cst_398 {dimension_numbers = #tpu.dot_dimension_numbers<[1], [1], [0], [0], [0, 0, 1, 0], [], []>} : vector<8x8xbf16>, vector<8x8xbf16>, vector<8x8xf32> -> vector<8x8xf32>
    %cst_399 = arith.constant 0.353553385 : f32
    %901 = vector.broadcast %cst_399 : f32 to vector<8x8xf32>
    %902 = arith.mulf %900, %901 : vector<8x8xf32>
    %903 = vector.extract_strided_slice %0 {offsets = [1, 2, 0], sizes = [1, 1, 8], strides = [1, 1, 1]} : vector<2x8x128xf32> to vector<1x1x8xf32>
    %904 = vector.shape_cast %903 : vector<1x1x8xf32> to vector<1x8xf32>
    %905 = vector.broadcast %904 : vector<1x8xf32> to vector<8x8xf32>
    %906 = arith.addf %902, %905 : vector<8x8xf32>
    %cst_400 = arith.constant dense<0xFF800000> : vector<8xf32>
    %907 = vector.multi_reduction <maximumf>, %906, %cst_400 [1] : vector<8x8xf32> to vector<8xf32>
    %908 = vector.shape_cast %907 : vector<8xf32> to vector<8x1xf32>
    %909 = vector.broadcast %908 : vector<8x1xf32> to vector<8x8xf32>
    %910 = arith.subf %906, %909 : vector<8x8xf32>
    %911 = math.exp %910 : vector<8x8xf32>
    %cst_401 = arith.constant dense<0.000000e+00> : vector<8xf32>
    %912 = vector.multi_reduction <add>, %911, %cst_401 [1] : vector<8x8xf32> to vector<8xf32>
    %913 = vector.shape_cast %912 : vector<8xf32> to vector<8x1xf32>
    %914 = tpu.reciprocal %913 {approx = true} : vector<8x1xf32> -> vector<8x1xf32>
    %915 = vector.broadcast %914 : vector<8x1xf32> to vector<8x8xf32>
    %916 = arith.mulf %911, %915 : vector<8x8xf32>
    %917 = arith.truncf %916 : vector<8x8xf32> to vector<8x8xbf16>
    %918 = vector.extract_strided_slice %870 {offsets = [8, 0], sizes = [8, 8], strides = [1, 1]} : vector<16x8xbf16> to vector<8x8xbf16>
    %cst_402 = arith.constant dense<0.000000e+00> : vector<8x8xf32>
    %919 = tpu.matmul %917, %918, %cst_402 {dimension_numbers = #tpu.dot_dimension_numbers<[1], [0], [0], [1], [0, 0, 1, 1], [], []>} : vector<8x8xbf16>, vector<8x8xbf16>, vector<8x8xf32> -> vector<8x8xf32>
    %920 = arith.truncf %919 : vector<8x8xf32> to vector<8x8xbf16>
    %cst_403 = arith.constant dense<0.000000e+00> : vector<8x32xf32>
    %921 = tpu.matmul %920, %872, %cst_403 {dimension_numbers = #tpu.dot_dimension_numbers<[1], [0], [0], [1], [0, 0, 1, 1], [], []>} : vector<8x8xbf16>, vector<8x32xbf16>, vector<8x32xf32> -> vector<8x32xf32>
    %922 = arith.addf %849, %921 : vector<8x32xf32>
    %c25_404 = arith.constant 25 : index
    %c0_405 = arith.constant 0 : index
    %c0_406 = arith.constant 0 : index
    %923 = vector.load %arg5[%c25_404, %c0_405, %c0_406] : memref<48x32x8xbf16, #tpu.memory_space<vmem>>, vector<1x32x8xbf16>
    %924 = vector.shape_cast %923 : vector<1x32x8xbf16> to vector<32x8xbf16>
    %c25_407 = arith.constant 25 : index
    %c0_408 = arith.constant 0 : index
    %925 = vector.load %arg11[%c25_407, %c0_408] : memref<48x8xf32, #tpu.memory_space<vmem>>, vector<1x8xf32>
    %cst_409 = arith.constant dense<0.000000e+00> : vector<16x8xf32>
    %926 = tpu.matmul %847, %924, %cst_409 {dimension_numbers = #tpu.dot_dimension_numbers<[1], [0], [0], [1], [0, 0, 1, 1], [], []>} : vector<16x32xbf16>, vector<32x8xbf16>, vector<16x8xf32> -> vector<16x8xf32>
    %927 = vector.broadcast %925 : vector<1x8xf32> to vector<16x8xf32>
    %928 = arith.addf %926, %927 : vector<16x8xf32>
    %929 = arith.truncf %928 : vector<16x8xf32> to vector<16x8xbf16>
    %c29 = arith.constant 29 : index
    %c0_410 = arith.constant 0 : index
    %c0_411 = arith.constant 0 : index
    %930 = vector.load %arg5[%c29, %c0_410, %c0_411] : memref<48x32x8xbf16, #tpu.memory_space<vmem>>, vector<1x32x8xbf16>
    %931 = vector.shape_cast %930 : vector<1x32x8xbf16> to vector<32x8xbf16>
    %c29_412 = arith.constant 29 : index
    %c0_413 = arith.constant 0 : index
    %932 = vector.load %arg11[%c29_412, %c0_413] : memref<48x8xf32, #tpu.memory_space<vmem>>, vector<1x8xf32>
    %cst_414 = arith.constant dense<0.000000e+00> : vector<16x8xf32>
    %933 = tpu.matmul %847, %931, %cst_414 {dimension_numbers = #tpu.dot_dimension_numbers<[1], [0], [0], [1], [0, 0, 1, 1], [], []>} : vector<16x32xbf16>, vector<32x8xbf16>, vector<16x8xf32> -> vector<16x8xf32>
    %934 = vector.broadcast %932 : vector<1x8xf32> to vector<16x8xf32>
    %935 = arith.addf %933, %934 : vector<16x8xf32>
    %936 = arith.truncf %935 : vector<16x8xf32> to vector<16x8xbf16>
    %c33_415 = arith.constant 33 : index
    %c0_416 = arith.constant 0 : index
    %c0_417 = arith.constant 0 : index
    %937 = vector.load %arg5[%c33_415, %c0_416, %c0_417] : memref<48x32x8xbf16, #tpu.memory_space<vmem>>, vector<1x32x8xbf16>
    %938 = vector.shape_cast %937 : vector<1x32x8xbf16> to vector<32x8xbf16>
    %c33_418 = arith.constant 33 : index
    %c0_419 = arith.constant 0 : index
    %939 = vector.load %arg11[%c33_418, %c0_419] : memref<48x8xf32, #tpu.memory_space<vmem>>, vector<1x8xf32>
    %cst_420 = arith.constant dense<0.000000e+00> : vector<16x8xf32>
    %940 = tpu.matmul %847, %938, %cst_420 {dimension_numbers = #tpu.dot_dimension_numbers<[1], [0], [0], [1], [0, 0, 1, 1], [], []>} : vector<16x32xbf16>, vector<32x8xbf16>, vector<16x8xf32> -> vector<16x8xf32>
    %941 = vector.broadcast %939 : vector<1x8xf32> to vector<16x8xf32>
    %942 = arith.addf %940, %941 : vector<16x8xf32>
    %943 = arith.truncf %942 : vector<16x8xf32> to vector<16x8xbf16>
    %c9_421 = arith.constant 9 : index
    %c0_422 = arith.constant 0 : index
    %c0_423 = arith.constant 0 : index
    %944 = vector.load %arg6[%c9_421, %c0_422, %c0_423] : memref<16x8x32xbf16, #tpu.memory_space<vmem>>, vector<1x8x32xbf16>
    %945 = vector.shape_cast %944 : vector<1x8x32xbf16> to vector<8x32xbf16>
    %946 = vector.extract_strided_slice %929 {offsets = [0, 0], sizes = [8, 8], strides = [1, 1]} : vector<16x8xbf16> to vector<8x8xbf16>
    %947 = vector.extract_strided_slice %936 {offsets = [0, 0], sizes = [8, 8], strides = [1, 1]} : vector<16x8xbf16> to vector<8x8xbf16>
    %cst_424 = arith.constant dense<0.000000e+00> : vector<8x8xf32>
    %948 = tpu.matmul %946, %947, %cst_424 {dimension_numbers = #tpu.dot_dimension_numbers<[1], [1], [0], [0], [0, 0, 1, 0], [], []>} : vector<8x8xbf16>, vector<8x8xbf16>, vector<8x8xf32> -> vector<8x8xf32>
    %cst_425 = arith.constant 0.353553385 : f32
    %949 = vector.broadcast %cst_425 : f32 to vector<8x8xf32>
    %950 = arith.mulf %948, %949 : vector<8x8xf32>
    %951 = vector.extract_strided_slice %0 {offsets = [0, 2, 0], sizes = [1, 1, 8], strides = [1, 1, 1]} : vector<2x8x128xf32> to vector<1x1x8xf32>
    %952 = vector.shape_cast %951 : vector<1x1x8xf32> to vector<1x8xf32>
    %953 = vector.broadcast %952 : vector<1x8xf32> to vector<8x8xf32>
    %954 = arith.addf %950, %953 : vector<8x8xf32>
    %cst_426 = arith.constant dense<0xFF800000> : vector<8xf32>
    %955 = vector.multi_reduction <maximumf>, %954, %cst_426 [1] : vector<8x8xf32> to vector<8xf32>
    %956 = vector.shape_cast %955 : vector<8xf32> to vector<8x1xf32>
    %957 = vector.broadcast %956 : vector<8x1xf32> to vector<8x8xf32>
    %958 = arith.subf %954, %957 : vector<8x8xf32>
    %959 = math.exp %958 : vector<8x8xf32>
    %cst_427 = arith.constant dense<0.000000e+00> : vector<8xf32>
    %960 = vector.multi_reduction <add>, %959, %cst_427 [1] : vector<8x8xf32> to vector<8xf32>
    %961 = vector.shape_cast %960 : vector<8xf32> to vector<8x1xf32>
    %962 = tpu.reciprocal %961 {approx = true} : vector<8x1xf32> -> vector<8x1xf32>
    %963 = vector.broadcast %962 : vector<8x1xf32> to vector<8x8xf32>
    %964 = arith.mulf %959, %963 : vector<8x8xf32>
    %965 = arith.truncf %964 : vector<8x8xf32> to vector<8x8xbf16>
    %966 = vector.extract_strided_slice %943 {offsets = [0, 0], sizes = [8, 8], strides = [1, 1]} : vector<16x8xbf16> to vector<8x8xbf16>
    %cst_428 = arith.constant dense<0.000000e+00> : vector<8x8xf32>
    %967 = tpu.matmul %965, %966, %cst_428 {dimension_numbers = #tpu.dot_dimension_numbers<[1], [0], [0], [1], [0, 0, 1, 1], [], []>} : vector<8x8xbf16>, vector<8x8xbf16>, vector<8x8xf32> -> vector<8x8xf32>
    %968 = arith.truncf %967 : vector<8x8xf32> to vector<8x8xbf16>
    %cst_429 = arith.constant dense<0.000000e+00> : vector<8x32xf32>
    %969 = tpu.matmul %968, %945, %cst_429 {dimension_numbers = #tpu.dot_dimension_numbers<[1], [0], [0], [1], [0, 0, 1, 1], [], []>} : vector<8x8xbf16>, vector<8x32xbf16>, vector<8x32xf32> -> vector<8x32xf32>
    %970 = arith.addf %897, %969 : vector<8x32xf32>
    %971 = vector.extract_strided_slice %929 {offsets = [8, 0], sizes = [8, 8], strides = [1, 1]} : vector<16x8xbf16> to vector<8x8xbf16>
    %972 = vector.extract_strided_slice %936 {offsets = [8, 0], sizes = [8, 8], strides = [1, 1]} : vector<16x8xbf16> to vector<8x8xbf16>
    %cst_430 = arith.constant dense<0.000000e+00> : vector<8x8xf32>
    %973 = tpu.matmul %971, %972, %cst_430 {dimension_numbers = #tpu.dot_dimension_numbers<[1], [1], [0], [0], [0, 0, 1, 0], [], []>} : vector<8x8xbf16>, vector<8x8xbf16>, vector<8x8xf32> -> vector<8x8xf32>
    %cst_431 = arith.constant 0.353553385 : f32
    %974 = vector.broadcast %cst_431 : f32 to vector<8x8xf32>
    %975 = arith.mulf %973, %974 : vector<8x8xf32>
    %976 = vector.extract_strided_slice %0 {offsets = [1, 2, 0], sizes = [1, 1, 8], strides = [1, 1, 1]} : vector<2x8x128xf32> to vector<1x1x8xf32>
    %977 = vector.shape_cast %976 : vector<1x1x8xf32> to vector<1x8xf32>
    %978 = vector.broadcast %977 : vector<1x8xf32> to vector<8x8xf32>
    %979 = arith.addf %975, %978 : vector<8x8xf32>
    %cst_432 = arith.constant dense<0xFF800000> : vector<8xf32>
    %980 = vector.multi_reduction <maximumf>, %979, %cst_432 [1] : vector<8x8xf32> to vector<8xf32>
    %981 = vector.shape_cast %980 : vector<8xf32> to vector<8x1xf32>
    %982 = vector.broadcast %981 : vector<8x1xf32> to vector<8x8xf32>
    %983 = arith.subf %979, %982 : vector<8x8xf32>
    %984 = math.exp %983 : vector<8x8xf32>
    %cst_433 = arith.constant dense<0.000000e+00> : vector<8xf32>
    %985 = vector.multi_reduction <add>, %984, %cst_433 [1] : vector<8x8xf32> to vector<8xf32>
    %986 = vector.shape_cast %985 : vector<8xf32> to vector<8x1xf32>
    %987 = tpu.reciprocal %986 {approx = true} : vector<8x1xf32> -> vector<8x1xf32>
    %988 = vector.broadcast %987 : vector<8x1xf32> to vector<8x8xf32>
    %989 = arith.mulf %984, %988 : vector<8x8xf32>
    %990 = arith.truncf %989 : vector<8x8xf32> to vector<8x8xbf16>
    %991 = vector.extract_strided_slice %943 {offsets = [8, 0], sizes = [8, 8], strides = [1, 1]} : vector<16x8xbf16> to vector<8x8xbf16>
    %cst_434 = arith.constant dense<0.000000e+00> : vector<8x8xf32>
    %992 = tpu.matmul %990, %991, %cst_434 {dimension_numbers = #tpu.dot_dimension_numbers<[1], [0], [0], [1], [0, 0, 1, 1], [], []>} : vector<8x8xbf16>, vector<8x8xbf16>, vector<8x8xf32> -> vector<8x8xf32>
    %993 = arith.truncf %992 : vector<8x8xf32> to vector<8x8xbf16>
    %cst_435 = arith.constant dense<0.000000e+00> : vector<8x32xf32>
    %994 = tpu.matmul %993, %945, %cst_435 {dimension_numbers = #tpu.dot_dimension_numbers<[1], [0], [0], [1], [0, 0, 1, 1], [], []>} : vector<8x8xbf16>, vector<8x32xbf16>, vector<8x32xf32> -> vector<8x32xf32>
    %995 = arith.addf %922, %994 : vector<8x32xf32>
    %c26_436 = arith.constant 26 : index
    %c0_437 = arith.constant 0 : index
    %c0_438 = arith.constant 0 : index
    %996 = vector.load %arg5[%c26_436, %c0_437, %c0_438] : memref<48x32x8xbf16, #tpu.memory_space<vmem>>, vector<1x32x8xbf16>
    %997 = vector.shape_cast %996 : vector<1x32x8xbf16> to vector<32x8xbf16>
    %c26_439 = arith.constant 26 : index
    %c0_440 = arith.constant 0 : index
    %998 = vector.load %arg11[%c26_439, %c0_440] : memref<48x8xf32, #tpu.memory_space<vmem>>, vector<1x8xf32>
    %cst_441 = arith.constant dense<0.000000e+00> : vector<16x8xf32>
    %999 = tpu.matmul %847, %997, %cst_441 {dimension_numbers = #tpu.dot_dimension_numbers<[1], [0], [0], [1], [0, 0, 1, 1], [], []>} : vector<16x32xbf16>, vector<32x8xbf16>, vector<16x8xf32> -> vector<16x8xf32>
    %1000 = vector.broadcast %998 : vector<1x8xf32> to vector<16x8xf32>
    %1001 = arith.addf %999, %1000 : vector<16x8xf32>
    %1002 = arith.truncf %1001 : vector<16x8xf32> to vector<16x8xbf16>
    %c30 = arith.constant 30 : index
    %c0_442 = arith.constant 0 : index
    %c0_443 = arith.constant 0 : index
    %1003 = vector.load %arg5[%c30, %c0_442, %c0_443] : memref<48x32x8xbf16, #tpu.memory_space<vmem>>, vector<1x32x8xbf16>
    %1004 = vector.shape_cast %1003 : vector<1x32x8xbf16> to vector<32x8xbf16>
    %c30_444 = arith.constant 30 : index
    %c0_445 = arith.constant 0 : index
    %1005 = vector.load %arg11[%c30_444, %c0_445] : memref<48x8xf32, #tpu.memory_space<vmem>>, vector<1x8xf32>
    %cst_446 = arith.constant dense<0.000000e+00> : vector<16x8xf32>
    %1006 = tpu.matmul %847, %1004, %cst_446 {dimension_numbers = #tpu.dot_dimension_numbers<[1], [0], [0], [1], [0, 0, 1, 1], [], []>} : vector<16x32xbf16>, vector<32x8xbf16>, vector<16x8xf32> -> vector<16x8xf32>
    %1007 = vector.broadcast %1005 : vector<1x8xf32> to vector<16x8xf32>
    %1008 = arith.addf %1006, %1007 : vector<16x8xf32>
    %1009 = arith.truncf %1008 : vector<16x8xf32> to vector<16x8xbf16>
    %c34_447 = arith.constant 34 : index
    %c0_448 = arith.constant 0 : index
    %c0_449 = arith.constant 0 : index
    %1010 = vector.load %arg5[%c34_447, %c0_448, %c0_449] : memref<48x32x8xbf16, #tpu.memory_space<vmem>>, vector<1x32x8xbf16>
    %1011 = vector.shape_cast %1010 : vector<1x32x8xbf16> to vector<32x8xbf16>
    %c34_450 = arith.constant 34 : index
    %c0_451 = arith.constant 0 : index
    %1012 = vector.load %arg11[%c34_450, %c0_451] : memref<48x8xf32, #tpu.memory_space<vmem>>, vector<1x8xf32>
    %cst_452 = arith.constant dense<0.000000e+00> : vector<16x8xf32>
    %1013 = tpu.matmul %847, %1011, %cst_452 {dimension_numbers = #tpu.dot_dimension_numbers<[1], [0], [0], [1], [0, 0, 1, 1], [], []>} : vector<16x32xbf16>, vector<32x8xbf16>, vector<16x8xf32> -> vector<16x8xf32>
    %1014 = vector.broadcast %1012 : vector<1x8xf32> to vector<16x8xf32>
    %1015 = arith.addf %1013, %1014 : vector<16x8xf32>
    %1016 = arith.truncf %1015 : vector<16x8xf32> to vector<16x8xbf16>
    %c10_453 = arith.constant 10 : index
    %c0_454 = arith.constant 0 : index
    %c0_455 = arith.constant 0 : index
    %1017 = vector.load %arg6[%c10_453, %c0_454, %c0_455] : memref<16x8x32xbf16, #tpu.memory_space<vmem>>, vector<1x8x32xbf16>
    %1018 = vector.shape_cast %1017 : vector<1x8x32xbf16> to vector<8x32xbf16>
    %1019 = vector.extract_strided_slice %1002 {offsets = [0, 0], sizes = [8, 8], strides = [1, 1]} : vector<16x8xbf16> to vector<8x8xbf16>
    %1020 = vector.extract_strided_slice %1009 {offsets = [0, 0], sizes = [8, 8], strides = [1, 1]} : vector<16x8xbf16> to vector<8x8xbf16>
    %cst_456 = arith.constant dense<0.000000e+00> : vector<8x8xf32>
    %1021 = tpu.matmul %1019, %1020, %cst_456 {dimension_numbers = #tpu.dot_dimension_numbers<[1], [1], [0], [0], [0, 0, 1, 0], [], []>} : vector<8x8xbf16>, vector<8x8xbf16>, vector<8x8xf32> -> vector<8x8xf32>
    %cst_457 = arith.constant 0.353553385 : f32
    %1022 = vector.broadcast %cst_457 : f32 to vector<8x8xf32>
    %1023 = arith.mulf %1021, %1022 : vector<8x8xf32>
    %1024 = vector.extract_strided_slice %0 {offsets = [0, 2, 0], sizes = [1, 1, 8], strides = [1, 1, 1]} : vector<2x8x128xf32> to vector<1x1x8xf32>
    %1025 = vector.shape_cast %1024 : vector<1x1x8xf32> to vector<1x8xf32>
    %1026 = vector.broadcast %1025 : vector<1x8xf32> to vector<8x8xf32>
    %1027 = arith.addf %1023, %1026 : vector<8x8xf32>
    %cst_458 = arith.constant dense<0xFF800000> : vector<8xf32>
    %1028 = vector.multi_reduction <maximumf>, %1027, %cst_458 [1] : vector<8x8xf32> to vector<8xf32>
    %1029 = vector.shape_cast %1028 : vector<8xf32> to vector<8x1xf32>
    %1030 = vector.broadcast %1029 : vector<8x1xf32> to vector<8x8xf32>
    %1031 = arith.subf %1027, %1030 : vector<8x8xf32>
    %1032 = math.exp %1031 : vector<8x8xf32>
    %cst_459 = arith.constant dense<0.000000e+00> : vector<8xf32>
    %1033 = vector.multi_reduction <add>, %1032, %cst_459 [1] : vector<8x8xf32> to vector<8xf32>
    %1034 = vector.shape_cast %1033 : vector<8xf32> to vector<8x1xf32>
    %1035 = tpu.reciprocal %1034 {approx = true} : vector<8x1xf32> -> vector<8x1xf32>
    %1036 = vector.broadcast %1035 : vector<8x1xf32> to vector<8x8xf32>
    %1037 = arith.mulf %1032, %1036 : vector<8x8xf32>
    %1038 = arith.truncf %1037 : vector<8x8xf32> to vector<8x8xbf16>
    %1039 = vector.extract_strided_slice %1016 {offsets = [0, 0], sizes = [8, 8], strides = [1, 1]} : vector<16x8xbf16> to vector<8x8xbf16>
    %cst_460 = arith.constant dense<0.000000e+00> : vector<8x8xf32>
    %1040 = tpu.matmul %1038, %1039, %cst_460 {dimension_numbers = #tpu.dot_dimension_numbers<[1], [0], [0], [1], [0, 0, 1, 1], [], []>} : vector<8x8xbf16>, vector<8x8xbf16>, vector<8x8xf32> -> vector<8x8xf32>
    %1041 = arith.truncf %1040 : vector<8x8xf32> to vector<8x8xbf16>
    %cst_461 = arith.constant dense<0.000000e+00> : vector<8x32xf32>
    %1042 = tpu.matmul %1041, %1018, %cst_461 {dimension_numbers = #tpu.dot_dimension_numbers<[1], [0], [0], [1], [0, 0, 1, 1], [], []>} : vector<8x8xbf16>, vector<8x32xbf16>, vector<8x32xf32> -> vector<8x32xf32>
    %1043 = arith.addf %970, %1042 : vector<8x32xf32>
    %1044 = vector.extract_strided_slice %1002 {offsets = [8, 0], sizes = [8, 8], strides = [1, 1]} : vector<16x8xbf16> to vector<8x8xbf16>
    %1045 = vector.extract_strided_slice %1009 {offsets = [8, 0], sizes = [8, 8], strides = [1, 1]} : vector<16x8xbf16> to vector<8x8xbf16>
    %cst_462 = arith.constant dense<0.000000e+00> : vector<8x8xf32>
    %1046 = tpu.matmul %1044, %1045, %cst_462 {dimension_numbers = #tpu.dot_dimension_numbers<[1], [1], [0], [0], [0, 0, 1, 0], [], []>} : vector<8x8xbf16>, vector<8x8xbf16>, vector<8x8xf32> -> vector<8x8xf32>
    %cst_463 = arith.constant 0.353553385 : f32
    %1047 = vector.broadcast %cst_463 : f32 to vector<8x8xf32>
    %1048 = arith.mulf %1046, %1047 : vector<8x8xf32>
    %1049 = vector.extract_strided_slice %0 {offsets = [1, 2, 0], sizes = [1, 1, 8], strides = [1, 1, 1]} : vector<2x8x128xf32> to vector<1x1x8xf32>
    %1050 = vector.shape_cast %1049 : vector<1x1x8xf32> to vector<1x8xf32>
    %1051 = vector.broadcast %1050 : vector<1x8xf32> to vector<8x8xf32>
    %1052 = arith.addf %1048, %1051 : vector<8x8xf32>
    %cst_464 = arith.constant dense<0xFF800000> : vector<8xf32>
    %1053 = vector.multi_reduction <maximumf>, %1052, %cst_464 [1] : vector<8x8xf32> to vector<8xf32>
    %1054 = vector.shape_cast %1053 : vector<8xf32> to vector<8x1xf32>
    %1055 = vector.broadcast %1054 : vector<8x1xf32> to vector<8x8xf32>
    %1056 = arith.subf %1052, %1055 : vector<8x8xf32>
    %1057 = math.exp %1056 : vector<8x8xf32>
    %cst_465 = arith.constant dense<0.000000e+00> : vector<8xf32>
    %1058 = vector.multi_reduction <add>, %1057, %cst_465 [1] : vector<8x8xf32> to vector<8xf32>
    %1059 = vector.shape_cast %1058 : vector<8xf32> to vector<8x1xf32>
    %1060 = tpu.reciprocal %1059 {approx = true} : vector<8x1xf32> -> vector<8x1xf32>
    %1061 = vector.broadcast %1060 : vector<8x1xf32> to vector<8x8xf32>
    %1062 = arith.mulf %1057, %1061 : vector<8x8xf32>
    %1063 = arith.truncf %1062 : vector<8x8xf32> to vector<8x8xbf16>
    %1064 = vector.extract_strided_slice %1016 {offsets = [8, 0], sizes = [8, 8], strides = [1, 1]} : vector<16x8xbf16> to vector<8x8xbf16>
    %cst_466 = arith.constant dense<0.000000e+00> : vector<8x8xf32>
    %1065 = tpu.matmul %1063, %1064, %cst_466 {dimension_numbers = #tpu.dot_dimension_numbers<[1], [0], [0], [1], [0, 0, 1, 1], [], []>} : vector<8x8xbf16>, vector<8x8xbf16>, vector<8x8xf32> -> vector<8x8xf32>
    %1066 = arith.truncf %1065 : vector<8x8xf32> to vector<8x8xbf16>
    %cst_467 = arith.constant dense<0.000000e+00> : vector<8x32xf32>
    %1067 = tpu.matmul %1066, %1018, %cst_467 {dimension_numbers = #tpu.dot_dimension_numbers<[1], [0], [0], [1], [0, 0, 1, 1], [], []>} : vector<8x8xbf16>, vector<8x32xbf16>, vector<8x32xf32> -> vector<8x32xf32>
    %1068 = arith.addf %995, %1067 : vector<8x32xf32>
    %c27_468 = arith.constant 27 : index
    %c0_469 = arith.constant 0 : index
    %c0_470 = arith.constant 0 : index
    %1069 = vector.load %arg5[%c27_468, %c0_469, %c0_470] : memref<48x32x8xbf16, #tpu.memory_space<vmem>>, vector<1x32x8xbf16>
    %1070 = vector.shape_cast %1069 : vector<1x32x8xbf16> to vector<32x8xbf16>
    %c27_471 = arith.constant 27 : index
    %c0_472 = arith.constant 0 : index
    %1071 = vector.load %arg11[%c27_471, %c0_472] : memref<48x8xf32, #tpu.memory_space<vmem>>, vector<1x8xf32>
    %cst_473 = arith.constant dense<0.000000e+00> : vector<16x8xf32>
    %1072 = tpu.matmul %847, %1070, %cst_473 {dimension_numbers = #tpu.dot_dimension_numbers<[1], [0], [0], [1], [0, 0, 1, 1], [], []>} : vector<16x32xbf16>, vector<32x8xbf16>, vector<16x8xf32> -> vector<16x8xf32>
    %1073 = vector.broadcast %1071 : vector<1x8xf32> to vector<16x8xf32>
    %1074 = arith.addf %1072, %1073 : vector<16x8xf32>
    %1075 = arith.truncf %1074 : vector<16x8xf32> to vector<16x8xbf16>
    %c31 = arith.constant 31 : index
    %c0_474 = arith.constant 0 : index
    %c0_475 = arith.constant 0 : index
    %1076 = vector.load %arg5[%c31, %c0_474, %c0_475] : memref<48x32x8xbf16, #tpu.memory_space<vmem>>, vector<1x32x8xbf16>
    %1077 = vector.shape_cast %1076 : vector<1x32x8xbf16> to vector<32x8xbf16>
    %c31_476 = arith.constant 31 : index
    %c0_477 = arith.constant 0 : index
    %1078 = vector.load %arg11[%c31_476, %c0_477] : memref<48x8xf32, #tpu.memory_space<vmem>>, vector<1x8xf32>
    %cst_478 = arith.constant dense<0.000000e+00> : vector<16x8xf32>
    %1079 = tpu.matmul %847, %1077, %cst_478 {dimension_numbers = #tpu.dot_dimension_numbers<[1], [0], [0], [1], [0, 0, 1, 1], [], []>} : vector<16x32xbf16>, vector<32x8xbf16>, vector<16x8xf32> -> vector<16x8xf32>
    %1080 = vector.broadcast %1078 : vector<1x8xf32> to vector<16x8xf32>
    %1081 = arith.addf %1079, %1080 : vector<16x8xf32>
    %1082 = arith.truncf %1081 : vector<16x8xf32> to vector<16x8xbf16>
    %c35_479 = arith.constant 35 : index
    %c0_480 = arith.constant 0 : index
    %c0_481 = arith.constant 0 : index
    %1083 = vector.load %arg5[%c35_479, %c0_480, %c0_481] : memref<48x32x8xbf16, #tpu.memory_space<vmem>>, vector<1x32x8xbf16>
    %1084 = vector.shape_cast %1083 : vector<1x32x8xbf16> to vector<32x8xbf16>
    %c35_482 = arith.constant 35 : index
    %c0_483 = arith.constant 0 : index
    %1085 = vector.load %arg11[%c35_482, %c0_483] : memref<48x8xf32, #tpu.memory_space<vmem>>, vector<1x8xf32>
    %cst_484 = arith.constant dense<0.000000e+00> : vector<16x8xf32>
    %1086 = tpu.matmul %847, %1084, %cst_484 {dimension_numbers = #tpu.dot_dimension_numbers<[1], [0], [0], [1], [0, 0, 1, 1], [], []>} : vector<16x32xbf16>, vector<32x8xbf16>, vector<16x8xf32> -> vector<16x8xf32>
    %1087 = vector.broadcast %1085 : vector<1x8xf32> to vector<16x8xf32>
    %1088 = arith.addf %1086, %1087 : vector<16x8xf32>
    %1089 = arith.truncf %1088 : vector<16x8xf32> to vector<16x8xbf16>
    %c11_485 = arith.constant 11 : index
    %c0_486 = arith.constant 0 : index
    %c0_487 = arith.constant 0 : index
    %1090 = vector.load %arg6[%c11_485, %c0_486, %c0_487] : memref<16x8x32xbf16, #tpu.memory_space<vmem>>, vector<1x8x32xbf16>
    %1091 = vector.shape_cast %1090 : vector<1x8x32xbf16> to vector<8x32xbf16>
    %1092 = vector.extract_strided_slice %1075 {offsets = [0, 0], sizes = [8, 8], strides = [1, 1]} : vector<16x8xbf16> to vector<8x8xbf16>
    %1093 = vector.extract_strided_slice %1082 {offsets = [0, 0], sizes = [8, 8], strides = [1, 1]} : vector<16x8xbf16> to vector<8x8xbf16>
    %cst_488 = arith.constant dense<0.000000e+00> : vector<8x8xf32>
    %1094 = tpu.matmul %1092, %1093, %cst_488 {dimension_numbers = #tpu.dot_dimension_numbers<[1], [1], [0], [0], [0, 0, 1, 0], [], []>} : vector<8x8xbf16>, vector<8x8xbf16>, vector<8x8xf32> -> vector<8x8xf32>
    %cst_489 = arith.constant 0.353553385 : f32
    %1095 = vector.broadcast %cst_489 : f32 to vector<8x8xf32>
    %1096 = arith.mulf %1094, %1095 : vector<8x8xf32>
    %1097 = vector.extract_strided_slice %0 {offsets = [0, 2, 0], sizes = [1, 1, 8], strides = [1, 1, 1]} : vector<2x8x128xf32> to vector<1x1x8xf32>
    %1098 = vector.shape_cast %1097 : vector<1x1x8xf32> to vector<1x8xf32>
    %1099 = vector.broadcast %1098 : vector<1x8xf32> to vector<8x8xf32>
    %1100 = arith.addf %1096, %1099 : vector<8x8xf32>
    %cst_490 = arith.constant dense<0xFF800000> : vector<8xf32>
    %1101 = vector.multi_reduction <maximumf>, %1100, %cst_490 [1] : vector<8x8xf32> to vector<8xf32>
    %1102 = vector.shape_cast %1101 : vector<8xf32> to vector<8x1xf32>
    %1103 = vector.broadcast %1102 : vector<8x1xf32> to vector<8x8xf32>
    %1104 = arith.subf %1100, %1103 : vector<8x8xf32>
    %1105 = math.exp %1104 : vector<8x8xf32>
    %cst_491 = arith.constant dense<0.000000e+00> : vector<8xf32>
    %1106 = vector.multi_reduction <add>, %1105, %cst_491 [1] : vector<8x8xf32> to vector<8xf32>
    %1107 = vector.shape_cast %1106 : vector<8xf32> to vector<8x1xf32>
    %1108 = tpu.reciprocal %1107 {approx = true} : vector<8x1xf32> -> vector<8x1xf32>
    %1109 = vector.broadcast %1108 : vector<8x1xf32> to vector<8x8xf32>
    %1110 = arith.mulf %1105, %1109 : vector<8x8xf32>
    %1111 = arith.truncf %1110 : vector<8x8xf32> to vector<8x8xbf16>
    %1112 = vector.extract_strided_slice %1089 {offsets = [0, 0], sizes = [8, 8], strides = [1, 1]} : vector<16x8xbf16> to vector<8x8xbf16>
    %cst_492 = arith.constant dense<0.000000e+00> : vector<8x8xf32>
    %1113 = tpu.matmul %1111, %1112, %cst_492 {dimension_numbers = #tpu.dot_dimension_numbers<[1], [0], [0], [1], [0, 0, 1, 1], [], []>} : vector<8x8xbf16>, vector<8x8xbf16>, vector<8x8xf32> -> vector<8x8xf32>
    %1114 = arith.truncf %1113 : vector<8x8xf32> to vector<8x8xbf16>
    %cst_493 = arith.constant dense<0.000000e+00> : vector<8x32xf32>
    %1115 = tpu.matmul %1114, %1091, %cst_493 {dimension_numbers = #tpu.dot_dimension_numbers<[1], [0], [0], [1], [0, 0, 1, 1], [], []>} : vector<8x8xbf16>, vector<8x32xbf16>, vector<8x32xf32> -> vector<8x32xf32>
    %1116 = arith.addf %1043, %1115 : vector<8x32xf32>
    %1117 = vector.extract_strided_slice %1075 {offsets = [8, 0], sizes = [8, 8], strides = [1, 1]} : vector<16x8xbf16> to vector<8x8xbf16>
    %1118 = vector.extract_strided_slice %1082 {offsets = [8, 0], sizes = [8, 8], strides = [1, 1]} : vector<16x8xbf16> to vector<8x8xbf16>
    %cst_494 = arith.constant dense<0.000000e+00> : vector<8x8xf32>
    %1119 = tpu.matmul %1117, %1118, %cst_494 {dimension_numbers = #tpu.dot_dimension_numbers<[1], [1], [0], [0], [0, 0, 1, 0], [], []>} : vector<8x8xbf16>, vector<8x8xbf16>, vector<8x8xf32> -> vector<8x8xf32>
    %cst_495 = arith.constant 0.353553385 : f32
    %1120 = vector.broadcast %cst_495 : f32 to vector<8x8xf32>
    %1121 = arith.mulf %1119, %1120 : vector<8x8xf32>
    %1122 = vector.extract_strided_slice %0 {offsets = [1, 2, 0], sizes = [1, 1, 8], strides = [1, 1, 1]} : vector<2x8x128xf32> to vector<1x1x8xf32>
    %1123 = vector.shape_cast %1122 : vector<1x1x8xf32> to vector<1x8xf32>
    %1124 = vector.broadcast %1123 : vector<1x8xf32> to vector<8x8xf32>
    %1125 = arith.addf %1121, %1124 : vector<8x8xf32>
    %cst_496 = arith.constant dense<0xFF800000> : vector<8xf32>
    %1126 = vector.multi_reduction <maximumf>, %1125, %cst_496 [1] : vector<8x8xf32> to vector<8xf32>
    %1127 = vector.shape_cast %1126 : vector<8xf32> to vector<8x1xf32>
    %1128 = vector.broadcast %1127 : vector<8x1xf32> to vector<8x8xf32>
    %1129 = arith.subf %1125, %1128 : vector<8x8xf32>
    %1130 = math.exp %1129 : vector<8x8xf32>
    %cst_497 = arith.constant dense<0.000000e+00> : vector<8xf32>
    %1131 = vector.multi_reduction <add>, %1130, %cst_497 [1] : vector<8x8xf32> to vector<8xf32>
    %1132 = vector.shape_cast %1131 : vector<8xf32> to vector<8x1xf32>
    %1133 = tpu.reciprocal %1132 {approx = true} : vector<8x1xf32> -> vector<8x1xf32>
    %1134 = vector.broadcast %1133 : vector<8x1xf32> to vector<8x8xf32>
    %1135 = arith.mulf %1130, %1134 : vector<8x8xf32>
    %1136 = arith.truncf %1135 : vector<8x8xf32> to vector<8x8xbf16>
    %1137 = vector.extract_strided_slice %1089 {offsets = [8, 0], sizes = [8, 8], strides = [1, 1]} : vector<16x8xbf16> to vector<8x8xbf16>
    %cst_498 = arith.constant dense<0.000000e+00> : vector<8x8xf32>
    %1138 = tpu.matmul %1136, %1137, %cst_498 {dimension_numbers = #tpu.dot_dimension_numbers<[1], [0], [0], [1], [0, 0, 1, 1], [], []>} : vector<8x8xbf16>, vector<8x8xbf16>, vector<8x8xf32> -> vector<8x8xf32>
    %1139 = arith.truncf %1138 : vector<8x8xf32> to vector<8x8xbf16>
    %cst_499 = arith.constant dense<0.000000e+00> : vector<8x32xf32>
    %1140 = tpu.matmul %1139, %1091, %cst_499 {dimension_numbers = #tpu.dot_dimension_numbers<[1], [0], [0], [1], [0, 0, 1, 1], [], []>} : vector<8x8xbf16>, vector<8x32xbf16>, vector<8x32xf32> -> vector<8x32xf32>
    %1141 = arith.addf %1068, %1140 : vector<8x32xf32>
    %1142 = tpu.concatenate %1116, %1141 in 0 : vector<8x32xf32>, vector<8x32xf32> -> vector<16x32xf32>
    %1143 = arith.addf %822, %1142 : vector<16x32xf32>
    %c16_500 = arith.constant 16 : index
    %c0_501 = arith.constant 0 : index
    %1144 = vector.load %arg12[%c16_500, %c0_501] : memref<58x128xf32, #tpu.memory_space<vmem>>, vector<1x32xf32>
    %1145 = vector.broadcast %1144 : vector<1x32xf32> to vector<16x32xf32>
    %1146 = arith.addf %1143, %1145 : vector<16x32xf32>
    %cst_502 = arith.constant dense<0.000000e+00> : vector<16xf32>
    %1147 = vector.multi_reduction <add>, %1146, %cst_502 [1] : vector<16x32xf32> to vector<16xf32>
    %1148 = vector.shape_cast %1147 : vector<16xf32> to vector<16x1xf32>
    %cst_503 = arith.constant 3.200000e+01 : f32
    %1149 = vector.broadcast %cst_503 : f32 to vector<16x1xf32>
    %1150 = arith.divf %1148, %1149 : vector<16x1xf32>
    %1151 = vector.broadcast %1150 : vector<16x1xf32> to vector<16x32xf32>
    %1152 = arith.subf %1146, %1151 : vector<16x32xf32>
    %1153 = arith.mulf %1152, %1152 : vector<16x32xf32>
    %cst_504 = arith.constant dense<0.000000e+00> : vector<16xf32>
    %1154 = vector.multi_reduction <add>, %1153, %cst_504 [1] : vector<16x32xf32> to vector<16xf32>
    %1155 = vector.shape_cast %1154 : vector<16xf32> to vector<16x1xf32>
    %cst_505 = arith.constant 0.0322580636 : f32
    %1156 = vector.broadcast %cst_505 : f32 to vector<16x1xf32>
    %1157 = arith.mulf %1155, %1156 : vector<16x1xf32>
    %1158 = math.sqrt %1157 : vector<16x1xf32>
    %cst_506 = arith.constant 9.99999997E-7 : f32
    %1159 = vector.broadcast %cst_506 : f32 to vector<16x1xf32>
    %1160 = arith.addf %1158, %1159 : vector<16x1xf32>
    %cst_507 = arith.constant 1.000000e+00 : f32
    %1161 = vector.broadcast %cst_507 : f32 to vector<16x1xf32>
    %1162 = arith.divf %1161, %1160 : vector<16x1xf32>
    %c14_508 = arith.constant 14 : index
    %c0_509 = arith.constant 0 : index
    %1163 = vector.load %arg12[%c14_508, %c0_509] : memref<58x128xf32, #tpu.memory_space<vmem>>, vector<1x32xf32>
    %1164 = vector.broadcast %1162 : vector<16x1xf32> to vector<16x32xf32>
    %1165 = arith.mulf %1152, %1164 : vector<16x32xf32>
    %1166 = vector.broadcast %1163 : vector<1x32xf32> to vector<16x32xf32>
    %1167 = arith.mulf %1166, %1165 : vector<16x32xf32>
    %c15_510 = arith.constant 15 : index
    %c0_511 = arith.constant 0 : index
    %1168 = vector.load %arg12[%c15_510, %c0_511] : memref<58x128xf32, #tpu.memory_space<vmem>>, vector<1x32xf32>
    %1169 = vector.broadcast %1168 : vector<1x32xf32> to vector<16x32xf32>
    %1170 = arith.addf %1167, %1169 : vector<16x32xf32>
    %1171 = arith.truncf %1170 : vector<16x32xf32> to vector<16x32xbf16>
    %c2_512 = arith.constant 2 : index
    %c0_513 = arith.constant 0 : index
    %c0_514 = arith.constant 0 : index
    %1172 = vector.load %arg7[%c2_512, %c0_513, %c0_514] : memref<4x32x64xbf16, #tpu.memory_space<vmem>>, vector<1x32x64xbf16>
    %1173 = vector.shape_cast %1172 : vector<1x32x64xbf16> to vector<32x64xbf16>
    %cst_515 = arith.constant dense<0.000000e+00> : vector<16x64xf32>
    %1174 = tpu.matmul %1171, %1173, %cst_515 {dimension_numbers = #tpu.dot_dimension_numbers<[1], [0], [0], [1], [0, 0, 1, 1], [], []>} : vector<16x32xbf16>, vector<32x64xbf16>, vector<16x64xf32> -> vector<16x64xf32>
    %c39 = arith.constant 39 : index
    %c0_516 = arith.constant 0 : index
    %1175 = vector.load %arg12[%c39, %c0_516] : memref<58x128xf32, #tpu.memory_space<vmem>>, vector<1x64xf32>
    %1176 = vector.broadcast %1175 : vector<1x64xf32> to vector<16x64xf32>
    %1177 = arith.addf %1174, %1176 : vector<16x64xf32>
    %cst_517 = arith.constant 0.000000e+00 : f32
    %1178 = vector.broadcast %cst_517 : f32 to vector<16x64xf32>
    %1179 = arith.maximumf %1177, %1178 : vector<16x64xf32>
    %1180 = arith.truncf %1179 : vector<16x64xf32> to vector<16x64xbf16>
    %c2_518 = arith.constant 2 : index
    %c0_519 = arith.constant 0 : index
    %c0_520 = arith.constant 0 : index
    %1181 = vector.load %arg8[%c2_518, %c0_519, %c0_520] : memref<4x64x32xbf16, #tpu.memory_space<vmem>>, vector<1x64x32xbf16>
    %1182 = vector.shape_cast %1181 : vector<1x64x32xbf16> to vector<64x32xbf16>
    %cst_521 = arith.constant dense<0.000000e+00> : vector<16x32xf32>
    %1183 = tpu.matmul %1180, %1182, %cst_521 {dimension_numbers = #tpu.dot_dimension_numbers<[1], [0], [0], [1], [0, 0, 1, 1], [], []>} : vector<16x64xbf16>, vector<64x32xbf16>, vector<16x32xf32> -> vector<16x32xf32>
    %c17_522 = arith.constant 17 : index
    %c0_523 = arith.constant 0 : index
    %1184 = vector.load %arg12[%c17_522, %c0_523] : memref<58x128xf32, #tpu.memory_space<vmem>>, vector<1x32xf32>
    %1185 = vector.broadcast %1184 : vector<1x32xf32> to vector<16x32xf32>
    %1186 = arith.addf %1183, %1185 : vector<16x32xf32>
    %1187 = arith.addf %1146, %1186 : vector<16x32xf32>
    %cst_524 = arith.constant dense<0.000000e+00> : vector<16xf32>
    %1188 = vector.multi_reduction <add>, %1187, %cst_524 [1] : vector<16x32xf32> to vector<16xf32>
    %1189 = vector.shape_cast %1188 : vector<16xf32> to vector<16x1xf32>
    %cst_525 = arith.constant 3.200000e+01 : f32
    %1190 = vector.broadcast %cst_525 : f32 to vector<16x1xf32>
    %1191 = arith.divf %1189, %1190 : vector<16x1xf32>
    %1192 = vector.broadcast %1191 : vector<16x1xf32> to vector<16x32xf32>
    %1193 = arith.subf %1187, %1192 : vector<16x32xf32>
    %1194 = arith.mulf %1193, %1193 : vector<16x32xf32>
    %cst_526 = arith.constant dense<0.000000e+00> : vector<16xf32>
    %1195 = vector.multi_reduction <add>, %1194, %cst_526 [1] : vector<16x32xf32> to vector<16xf32>
    %1196 = vector.shape_cast %1195 : vector<16xf32> to vector<16x1xf32>
    %cst_527 = arith.constant 0.0322580636 : f32
    %1197 = vector.broadcast %cst_527 : f32 to vector<16x1xf32>
    %1198 = arith.mulf %1196, %1197 : vector<16x1xf32>
    %1199 = math.sqrt %1198 : vector<16x1xf32>
    %cst_528 = arith.constant 9.99999997E-7 : f32
    %1200 = vector.broadcast %cst_528 : f32 to vector<16x1xf32>
    %1201 = arith.addf %1199, %1200 : vector<16x1xf32>
    %cst_529 = arith.constant 1.000000e+00 : f32
    %1202 = vector.broadcast %cst_529 : f32 to vector<16x1xf32>
    %1203 = arith.divf %1202, %1201 : vector<16x1xf32>
    %c28_530 = arith.constant 28 : index
    %c0_531 = arith.constant 0 : index
    %1204 = vector.load %arg12[%c28_530, %c0_531] : memref<58x128xf32, #tpu.memory_space<vmem>>, vector<1x32xf32>
    %1205 = vector.broadcast %1203 : vector<16x1xf32> to vector<16x32xf32>
    %1206 = arith.mulf %1193, %1205 : vector<16x32xf32>
    %1207 = vector.broadcast %1204 : vector<1x32xf32> to vector<16x32xf32>
    %1208 = arith.mulf %1207, %1206 : vector<16x32xf32>
    %c29_532 = arith.constant 29 : index
    %c0_533 = arith.constant 0 : index
    %1209 = vector.load %arg12[%c29_532, %c0_533] : memref<58x128xf32, #tpu.memory_space<vmem>>, vector<1x32xf32>
    %1210 = vector.broadcast %1209 : vector<1x32xf32> to vector<16x32xf32>
    %1211 = arith.addf %1208, %1210 : vector<16x32xf32>
    %1212 = vector.extract_strided_slice %406 {offsets = [0, 0], sizes = [8, 32], strides = [1, 1]} : vector<16x32xf32> to vector<8x32xf32>
    %c0_534 = arith.constant 0 : index
    %c0_535 = arith.constant 0 : index
    %1213 = vector.load %arg14[%c0_534, %c0_535] : memref<48x32xf32, #tpu.memory_space<vmem>>, vector<8x32xf32>
    tpu.vector_store %arg14[%c0_534, %c0_535], %1212 {strides = array<i32>} : memref<48x32xf32, #tpu.memory_space<vmem>>, vector<8x32xf32>,
    %1214 = vector.extract_strided_slice %1211 {offsets = [0, 0], sizes = [8, 32], strides = [1, 1]} : vector<16x32xf32> to vector<8x32xf32>
    %c8_536 = arith.constant 8 : index
    %c0_537 = arith.constant 0 : index
    %1215 = vector.load %arg14[%c8_536, %c0_537] : memref<48x32xf32, #tpu.memory_space<vmem>>, vector<8x32xf32>
    tpu.vector_store %arg14[%c8_536, %c0_537], %1214 {strides = array<i32>} : memref<48x32xf32, #tpu.memory_space<vmem>>, vector<8x32xf32>,
    %1216 = vector.extract_strided_slice %805 {offsets = [0, 0], sizes = [8, 32], strides = [1, 1]} : vector<16x32xf32> to vector<8x32xf32>
    %c16_538 = arith.constant 16 : index
    %c0_539 = arith.constant 0 : index
    %1217 = vector.load %arg14[%c16_538, %c0_539] : memref<48x32xf32, #tpu.memory_space<vmem>>, vector<8x32xf32>
    tpu.vector_store %arg14[%c16_538, %c0_539], %1216 {strides = array<i32>} : memref<48x32xf32, #tpu.memory_space<vmem>>, vector<8x32xf32>,
    %1218 = vector.extract_strided_slice %406 {offsets = [8, 0], sizes = [8, 32], strides = [1, 1]} : vector<16x32xf32> to vector<8x32xf32>
    %c24_540 = arith.constant 24 : index
    %c0_541 = arith.constant 0 : index
    %1219 = vector.load %arg14[%c24_540, %c0_541] : memref<48x32xf32, #tpu.memory_space<vmem>>, vector<8x32xf32>
    tpu.vector_store %arg14[%c24_540, %c0_541], %1218 {strides = array<i32>} : memref<48x32xf32, #tpu.memory_space<vmem>>, vector<8x32xf32>,
    %1220 = vector.extract_strided_slice %1211 {offsets = [8, 0], sizes = [8, 32], strides = [1, 1]} : vector<16x32xf32> to vector<8x32xf32>
    %c32_542 = arith.constant 32 : index
    %c0_543 = arith.constant 0 : index
    %1221 = vector.load %arg14[%c32_542, %c0_543] : memref<48x32xf32, #tpu.memory_space<vmem>>, vector<8x32xf32>
    tpu.vector_store %arg14[%c32_542, %c0_543], %1220 {strides = array<i32>} : memref<48x32xf32, #tpu.memory_space<vmem>>, vector<8x32xf32>,
    %1222 = vector.extract_strided_slice %805 {offsets = [8, 0], sizes = [8, 32], strides = [1, 1]} : vector<16x32xf32> to vector<8x32xf32>
    %c40 = arith.constant 40 : index
    %c0_544 = arith.constant 0 : index
    %1223 = vector.load %arg14[%c40, %c0_544] : memref<48x32xf32, #tpu.memory_space<vmem>>, vector<8x32xf32>
    tpu.vector_store %arg14[%c40, %c0_544], %1222 {strides = array<i32>} : memref<48x32xf32, #tpu.memory_space<vmem>>, vector<8x32xf32>,
    %c0_545 = arith.constant 0 : index
    %c0_546 = arith.constant 0 : index
    %1224 = vector.load %arg14[%c0_545, %c0_546] : memref<48x32xf32, #tpu.memory_space<vmem>>, vector<48x32xf32>
    %cst_547 = arith.constant dense<0.000000e+00> : vector<48xf32>
    %1225 = vector.multi_reduction <add>, %1224, %cst_547 [1] : vector<48x32xf32> to vector<48xf32>
    %1226 = vector.shape_cast %1225 : vector<48xf32> to vector<48x1xf32>
    %cst_548 = arith.constant 3.200000e+01 : f32
    %1227 = vector.broadcast %cst_548 : f32 to vector<48x1xf32>
    %1228 = arith.divf %1226, %1227 : vector<48x1xf32>
    %1229 = vector.broadcast %1228 : vector<48x1xf32> to vector<48x32xf32>
    %1230 = arith.subf %1224, %1229 : vector<48x32xf32>
    %1231 = arith.mulf %1230, %1230 : vector<48x32xf32>
    %cst_549 = arith.constant dense<0.000000e+00> : vector<48xf32>
    %1232 = vector.multi_reduction <add>, %1231, %cst_549 [1] : vector<48x32xf32> to vector<48xf32>
    %1233 = vector.shape_cast %1232 : vector<48xf32> to vector<48x1xf32>
    %cst_550 = arith.constant 0.0322580636 : f32
    %1234 = vector.broadcast %cst_550 : f32 to vector<48x1xf32>
    %1235 = arith.mulf %1233, %1234 : vector<48x1xf32>
    %1236 = math.sqrt %1235 : vector<48x1xf32>
    %cst_551 = arith.constant 9.99999997E-7 : f32
    %1237 = vector.broadcast %cst_551 : f32 to vector<48x1xf32>
    %1238 = arith.addf %1236, %1237 : vector<48x1xf32>
    %cst_552 = arith.constant 1.000000e+00 : f32
    %1239 = vector.broadcast %cst_552 : f32 to vector<48x1xf32>
    %1240 = arith.divf %1239, %1238 : vector<48x1xf32>
    %c18_553 = arith.constant 18 : index
    %c0_554 = arith.constant 0 : index
    %1241 = vector.load %arg12[%c18_553, %c0_554] : memref<58x128xf32, #tpu.memory_space<vmem>>, vector<1x32xf32>
    %1242 = vector.broadcast %1240 : vector<48x1xf32> to vector<48x32xf32>
    %1243 = arith.mulf %1230, %1242 : vector<48x32xf32>
    %1244 = vector.broadcast %1241 : vector<1x32xf32> to vector<48x32xf32>
    %1245 = arith.mulf %1244, %1243 : vector<48x32xf32>
    %c19_555 = arith.constant 19 : index
    %c0_556 = arith.constant 0 : index
    %1246 = vector.load %arg12[%c19_555, %c0_556] : memref<58x128xf32, #tpu.memory_space<vmem>>, vector<1x32xf32>
    %1247 = vector.broadcast %1246 : vector<1x32xf32> to vector<48x32xf32>
    %1248 = arith.addf %1245, %1247 : vector<48x32xf32>
    %1249 = arith.truncf %1248 : vector<48x32xf32> to vector<48x32xbf16>
    %cst_557 = arith.constant 0.000000e+00 : f32
    %1250 = vector.broadcast %cst_557 : f32 to vector<24x32xf32>
    %cst_558 = arith.constant 0.000000e+00 : f32
    %1251 = vector.broadcast %cst_558 : f32 to vector<24x32xf32>
    %c36_559 = arith.constant 36 : index
    %c0_560 = arith.constant 0 : index
    %c0_561 = arith.constant 0 : index
    %1252 = vector.load %arg5[%c36_559, %c0_560, %c0_561] : memref<48x32x8xbf16, #tpu.memory_space<vmem>>, vector<1x32x8xbf16>
    %1253 = vector.shape_cast %1252 : vector<1x32x8xbf16> to vector<32x8xbf16>
    %c36_562 = arith.constant 36 : index
    %c0_563 = arith.constant 0 : index
    %1254 = vector.load %arg11[%c36_562, %c0_563] : memref<48x8xf32, #tpu.memory_space<vmem>>, vector<1x8xf32>
    %cst_564 = arith.constant dense<0.000000e+00> : vector<48x8xf32>
    %1255 = tpu.matmul %1249, %1253, %cst_564 {dimension_numbers = #tpu.dot_dimension_numbers<[1], [0], [0], [1], [0, 0, 1, 1], [], []>} : vector<48x32xbf16>, vector<32x8xbf16>, vector<48x8xf32> -> vector<48x8xf32>
    %1256 = vector.broadcast %1254 : vector<1x8xf32> to vector<48x8xf32>
    %1257 = arith.addf %1255, %1256 : vector<48x8xf32>
    %1258 = arith.truncf %1257 : vector<48x8xf32> to vector<48x8xbf16>
    %c40_565 = arith.constant 40 : index
    %c0_566 = arith.constant 0 : index
    %c0_567 = arith.constant 0 : index
    %1259 = vector.load %arg5[%c40_565, %c0_566, %c0_567] : memref<48x32x8xbf16, #tpu.memory_space<vmem>>, vector<1x32x8xbf16>
    %1260 = vector.shape_cast %1259 : vector<1x32x8xbf16> to vector<32x8xbf16>
    %c40_568 = arith.constant 40 : index
    %c0_569 = arith.constant 0 : index
    %1261 = vector.load %arg11[%c40_568, %c0_569] : memref<48x8xf32, #tpu.memory_space<vmem>>, vector<1x8xf32>
    %cst_570 = arith.constant dense<0.000000e+00> : vector<48x8xf32>
    %1262 = tpu.matmul %1249, %1260, %cst_570 {dimension_numbers = #tpu.dot_dimension_numbers<[1], [0], [0], [1], [0, 0, 1, 1], [], []>} : vector<48x32xbf16>, vector<32x8xbf16>, vector<48x8xf32> -> vector<48x8xf32>
    %1263 = vector.broadcast %1261 : vector<1x8xf32> to vector<48x8xf32>
    %1264 = arith.addf %1262, %1263 : vector<48x8xf32>
    %1265 = arith.truncf %1264 : vector<48x8xf32> to vector<48x8xbf16>
    %c44 = arith.constant 44 : index
    %c0_571 = arith.constant 0 : index
    %c0_572 = arith.constant 0 : index
    %1266 = vector.load %arg5[%c44, %c0_571, %c0_572] : memref<48x32x8xbf16, #tpu.memory_space<vmem>>, vector<1x32x8xbf16>
    %1267 = vector.shape_cast %1266 : vector<1x32x8xbf16> to vector<32x8xbf16>
    %c44_573 = arith.constant 44 : index
    %c0_574 = arith.constant 0 : index
    %1268 = vector.load %arg11[%c44_573, %c0_574] : memref<48x8xf32, #tpu.memory_space<vmem>>, vector<1x8xf32>
    %cst_575 = arith.constant dense<0.000000e+00> : vector<48x8xf32>
    %1269 = tpu.matmul %1249, %1267, %cst_575 {dimension_numbers = #tpu.dot_dimension_numbers<[1], [0], [0], [1], [0, 0, 1, 1], [], []>} : vector<48x32xbf16>, vector<32x8xbf16>, vector<48x8xf32> -> vector<48x8xf32>
    %1270 = vector.broadcast %1268 : vector<1x8xf32> to vector<48x8xf32>
    %1271 = arith.addf %1269, %1270 : vector<48x8xf32>
    %1272 = arith.truncf %1271 : vector<48x8xf32> to vector<48x8xbf16>
    %c12_576 = arith.constant 12 : index
    %c0_577 = arith.constant 0 : index
    %c0_578 = arith.constant 0 : index
    %1273 = vector.load %arg6[%c12_576, %c0_577, %c0_578] : memref<16x8x32xbf16, #tpu.memory_space<vmem>>, vector<1x8x32xbf16>
    %1274 = vector.shape_cast %1273 : vector<1x8x32xbf16> to vector<8x32xbf16>
    %1275 = vector.extract_strided_slice %1258 {offsets = [0, 0], sizes = [24, 8], strides = [1, 1]} : vector<48x8xbf16> to vector<24x8xbf16>
    %1276 = vector.extract_strided_slice %1265 {offsets = [0, 0], sizes = [24, 8], strides = [1, 1]} : vector<48x8xbf16> to vector<24x8xbf16>
    %cst_579 = arith.constant dense<0.000000e+00> : vector<24x24xf32>
    %1277 = tpu.matmul %1275, %1276, %cst_579 {dimension_numbers = #tpu.dot_dimension_numbers<[1], [1], [0], [0], [0, 0, 1, 0], [], []>} : vector<24x8xbf16>, vector<24x8xbf16>, vector<24x24xf32> -> vector<24x24xf32>
    %cst_580 = arith.constant 0.353553385 : f32
    %1278 = vector.broadcast %cst_580 : f32 to vector<24x24xf32>
    %1279 = arith.mulf %1277, %1278 : vector<24x24xf32>
    %1280 = vector.extract_strided_slice %0 {offsets = [0, 3, 0], sizes = [1, 1, 24], strides = [1, 1, 1]} : vector<2x8x128xf32> to vector<1x1x24xf32>
    %1281 = vector.shape_cast %1280 : vector<1x1x24xf32> to vector<1x24xf32>
    %1282 = vector.broadcast %1281 : vector<1x24xf32> to vector<24x24xf32>
    %1283 = arith.addf %1279, %1282 : vector<24x24xf32>
    %cst_581 = arith.constant dense<0xFF800000> : vector<24xf32>
    %1284 = vector.multi_reduction <maximumf>, %1283, %cst_581 [1] : vector<24x24xf32> to vector<24xf32>
    %1285 = vector.shape_cast %1284 : vector<24xf32> to vector<24x1xf32>
    %1286 = vector.broadcast %1285 : vector<24x1xf32> to vector<24x24xf32>
    %1287 = arith.subf %1283, %1286 : vector<24x24xf32>
    %1288 = math.exp %1287 : vector<24x24xf32>
    %cst_582 = arith.constant dense<0.000000e+00> : vector<24xf32>
    %1289 = vector.multi_reduction <add>, %1288, %cst_582 [1] : vector<24x24xf32> to vector<24xf32>
    %1290 = vector.shape_cast %1289 : vector<24xf32> to vector<24x1xf32>
    %1291 = tpu.reciprocal %1290 {approx = true} : vector<24x1xf32> -> vector<24x1xf32>
    %1292 = vector.broadcast %1291 : vector<24x1xf32> to vector<24x24xf32>
    %1293 = arith.mulf %1288, %1292 : vector<24x24xf32>
    %1294 = arith.truncf %1293 : vector<24x24xf32> to vector<24x24xbf16>
    %1295 = vector.extract_strided_slice %1272 {offsets = [0, 0], sizes = [24, 8], strides = [1, 1]} : vector<48x8xbf16> to vector<24x8xbf16>
    %cst_583 = arith.constant dense<0.000000e+00> : vector<24x8xf32>
    %1296 = tpu.matmul %1294, %1295, %cst_583 {dimension_numbers = #tpu.dot_dimension_numbers<[1], [0], [0], [1], [0, 0, 1, 1], [], []>} : vector<24x24xbf16>, vector<24x8xbf16>, vector<24x8xf32> -> vector<24x8xf32>
    %1297 = arith.truncf %1296 : vector<24x8xf32> to vector<24x8xbf16>
    %cst_584 = arith.constant dense<0.000000e+00> : vector<24x32xf32>
    %1298 = tpu.matmul %1297, %1274, %cst_584 {dimension_numbers = #tpu.dot_dimension_numbers<[1], [0], [0], [1], [0, 0, 1, 1], [], []>} : vector<24x8xbf16>, vector<8x32xbf16>, vector<24x32xf32> -> vector<24x32xf32>
    %1299 = arith.addf %1250, %1298 : vector<24x32xf32>
    %1300 = vector.extract_strided_slice %1258 {offsets = [24, 0], sizes = [24, 8], strides = [1, 1]} : vector<48x8xbf16> to vector<24x8xbf16>
    %1301 = vector.extract_strided_slice %1265 {offsets = [24, 0], sizes = [24, 8], strides = [1, 1]} : vector<48x8xbf16> to vector<24x8xbf16>
    %cst_585 = arith.constant dense<0.000000e+00> : vector<24x24xf32>
    %1302 = tpu.matmul %1300, %1301, %cst_585 {dimension_numbers = #tpu.dot_dimension_numbers<[1], [1], [0], [0], [0, 0, 1, 0], [], []>} : vector<24x8xbf16>, vector<24x8xbf16>, vector<24x24xf32> -> vector<24x24xf32>
    %cst_586 = arith.constant 0.353553385 : f32
    %1303 = vector.broadcast %cst_586 : f32 to vector<24x24xf32>
    %1304 = arith.mulf %1302, %1303 : vector<24x24xf32>
    %1305 = vector.extract_strided_slice %0 {offsets = [1, 3, 0], sizes = [1, 1, 24], strides = [1, 1, 1]} : vector<2x8x128xf32> to vector<1x1x24xf32>
    %1306 = vector.shape_cast %1305 : vector<1x1x24xf32> to vector<1x24xf32>
    %1307 = vector.broadcast %1306 : vector<1x24xf32> to vector<24x24xf32>
    %1308 = arith.addf %1304, %1307 : vector<24x24xf32>
    %cst_587 = arith.constant dense<0xFF800000> : vector<24xf32>
    %1309 = vector.multi_reduction <maximumf>, %1308, %cst_587 [1] : vector<24x24xf32> to vector<24xf32>
    %1310 = vector.shape_cast %1309 : vector<24xf32> to vector<24x1xf32>
    %1311 = vector.broadcast %1310 : vector<24x1xf32> to vector<24x24xf32>
    %1312 = arith.subf %1308, %1311 : vector<24x24xf32>
    %1313 = math.exp %1312 : vector<24x24xf32>
    %cst_588 = arith.constant dense<0.000000e+00> : vector<24xf32>
    %1314 = vector.multi_reduction <add>, %1313, %cst_588 [1] : vector<24x24xf32> to vector<24xf32>
    %1315 = vector.shape_cast %1314 : vector<24xf32> to vector<24x1xf32>
    %1316 = tpu.reciprocal %1315 {approx = true} : vector<24x1xf32> -> vector<24x1xf32>
    %1317 = vector.broadcast %1316 : vector<24x1xf32> to vector<24x24xf32>
    %1318 = arith.mulf %1313, %1317 : vector<24x24xf32>
    %1319 = arith.truncf %1318 : vector<24x24xf32> to vector<24x24xbf16>
    %1320 = vector.extract_strided_slice %1272 {offsets = [24, 0], sizes = [24, 8], strides = [1, 1]} : vector<48x8xbf16> to vector<24x8xbf16>
    %cst_589 = arith.constant dense<0.000000e+00> : vector<24x8xf32>
    %1321 = tpu.matmul %1319, %1320, %cst_589 {dimension_numbers = #tpu.dot_dimension_numbers<[1], [0], [0], [1], [0, 0, 1, 1], [], []>} : vector<24x24xbf16>, vector<24x8xbf16>, vector<24x8xf32> -> vector<24x8xf32>
    %1322 = arith.truncf %1321 : vector<24x8xf32> to vector<24x8xbf16>
    %cst_590 = arith.constant dense<0.000000e+00> : vector<24x32xf32>
    %1323 = tpu.matmul %1322, %1274, %cst_590 {dimension_numbers = #tpu.dot_dimension_numbers<[1], [0], [0], [1], [0, 0, 1, 1], [], []>} : vector<24x8xbf16>, vector<8x32xbf16>, vector<24x32xf32> -> vector<24x32xf32>
    %1324 = arith.addf %1251, %1323 : vector<24x32xf32>
    %c37_591 = arith.constant 37 : index
    %c0_592 = arith.constant 0 : index
    %c0_593 = arith.constant 0 : index
    %1325 = vector.load %arg5[%c37_591, %c0_592, %c0_593] : memref<48x32x8xbf16, #tpu.memory_space<vmem>>, vector<1x32x8xbf16>
    %1326 = vector.shape_cast %1325 : vector<1x32x8xbf16> to vector<32x8xbf16>
    %c37_594 = arith.constant 37 : index
    %c0_595 = arith.constant 0 : index
    %1327 = vector.load %arg11[%c37_594, %c0_595] : memref<48x8xf32, #tpu.memory_space<vmem>>, vector<1x8xf32>
    %cst_596 = arith.constant dense<0.000000e+00> : vector<48x8xf32>
    %1328 = tpu.matmul %1249, %1326, %cst_596 {dimension_numbers = #tpu.dot_dimension_numbers<[1], [0], [0], [1], [0, 0, 1, 1], [], []>} : vector<48x32xbf16>, vector<32x8xbf16>, vector<48x8xf32> -> vector<48x8xf32>
    %1329 = vector.broadcast %1327 : vector<1x8xf32> to vector<48x8xf32>
    %1330 = arith.addf %1328, %1329 : vector<48x8xf32>
    %1331 = arith.truncf %1330 : vector<48x8xf32> to vector<48x8xbf16>
    %c41 = arith.constant 41 : index
    %c0_597 = arith.constant 0 : index
    %c0_598 = arith.constant 0 : index
    %1332 = vector.load %arg5[%c41, %c0_597, %c0_598] : memref<48x32x8xbf16, #tpu.memory_space<vmem>>, vector<1x32x8xbf16>
    %1333 = vector.shape_cast %1332 : vector<1x32x8xbf16> to vector<32x8xbf16>
    %c41_599 = arith.constant 41 : index
    %c0_600 = arith.constant 0 : index
    %1334 = vector.load %arg11[%c41_599, %c0_600] : memref<48x8xf32, #tpu.memory_space<vmem>>, vector<1x8xf32>
    %cst_601 = arith.constant dense<0.000000e+00> : vector<48x8xf32>
    %1335 = tpu.matmul %1249, %1333, %cst_601 {dimension_numbers = #tpu.dot_dimension_numbers<[1], [0], [0], [1], [0, 0, 1, 1], [], []>} : vector<48x32xbf16>, vector<32x8xbf16>, vector<48x8xf32> -> vector<48x8xf32>
    %1336 = vector.broadcast %1334 : vector<1x8xf32> to vector<48x8xf32>
    %1337 = arith.addf %1335, %1336 : vector<48x8xf32>
    %1338 = arith.truncf %1337 : vector<48x8xf32> to vector<48x8xbf16>
    %c45 = arith.constant 45 : index
    %c0_602 = arith.constant 0 : index
    %c0_603 = arith.constant 0 : index
    %1339 = vector.load %arg5[%c45, %c0_602, %c0_603] : memref<48x32x8xbf16, #tpu.memory_space<vmem>>, vector<1x32x8xbf16>
    %1340 = vector.shape_cast %1339 : vector<1x32x8xbf16> to vector<32x8xbf16>
    %c45_604 = arith.constant 45 : index
    %c0_605 = arith.constant 0 : index
    %1341 = vector.load %arg11[%c45_604, %c0_605] : memref<48x8xf32, #tpu.memory_space<vmem>>, vector<1x8xf32>
    %cst_606 = arith.constant dense<0.000000e+00> : vector<48x8xf32>
    %1342 = tpu.matmul %1249, %1340, %cst_606 {dimension_numbers = #tpu.dot_dimension_numbers<[1], [0], [0], [1], [0, 0, 1, 1], [], []>} : vector<48x32xbf16>, vector<32x8xbf16>, vector<48x8xf32> -> vector<48x8xf32>
    %1343 = vector.broadcast %1341 : vector<1x8xf32> to vector<48x8xf32>
    %1344 = arith.addf %1342, %1343 : vector<48x8xf32>
    %1345 = arith.truncf %1344 : vector<48x8xf32> to vector<48x8xbf16>
    %c13_607 = arith.constant 13 : index
    %c0_608 = arith.constant 0 : index
    %c0_609 = arith.constant 0 : index
    %1346 = vector.load %arg6[%c13_607, %c0_608, %c0_609] : memref<16x8x32xbf16, #tpu.memory_space<vmem>>, vector<1x8x32xbf16>
    %1347 = vector.shape_cast %1346 : vector<1x8x32xbf16> to vector<8x32xbf16>
    %1348 = vector.extract_strided_slice %1331 {offsets = [0, 0], sizes = [24, 8], strides = [1, 1]} : vector<48x8xbf16> to vector<24x8xbf16>
    %1349 = vector.extract_strided_slice %1338 {offsets = [0, 0], sizes = [24, 8], strides = [1, 1]} : vector<48x8xbf16> to vector<24x8xbf16>
    %cst_610 = arith.constant dense<0.000000e+00> : vector<24x24xf32>
    %1350 = tpu.matmul %1348, %1349, %cst_610 {dimension_numbers = #tpu.dot_dimension_numbers<[1], [1], [0], [0], [0, 0, 1, 0], [], []>} : vector<24x8xbf16>, vector<24x8xbf16>, vector<24x24xf32> -> vector<24x24xf32>
    %cst_611 = arith.constant 0.353553385 : f32
    %1351 = vector.broadcast %cst_611 : f32 to vector<24x24xf32>
    %1352 = arith.mulf %1350, %1351 : vector<24x24xf32>
    %1353 = vector.extract_strided_slice %0 {offsets = [0, 3, 0], sizes = [1, 1, 24], strides = [1, 1, 1]} : vector<2x8x128xf32> to vector<1x1x24xf32>
    %1354 = vector.shape_cast %1353 : vector<1x1x24xf32> to vector<1x24xf32>
    %1355 = vector.broadcast %1354 : vector<1x24xf32> to vector<24x24xf32>
    %1356 = arith.addf %1352, %1355 : vector<24x24xf32>
    %cst_612 = arith.constant dense<0xFF800000> : vector<24xf32>
    %1357 = vector.multi_reduction <maximumf>, %1356, %cst_612 [1] : vector<24x24xf32> to vector<24xf32>
    %1358 = vector.shape_cast %1357 : vector<24xf32> to vector<24x1xf32>
    %1359 = vector.broadcast %1358 : vector<24x1xf32> to vector<24x24xf32>
    %1360 = arith.subf %1356, %1359 : vector<24x24xf32>
    %1361 = math.exp %1360 : vector<24x24xf32>
    %cst_613 = arith.constant dense<0.000000e+00> : vector<24xf32>
    %1362 = vector.multi_reduction <add>, %1361, %cst_613 [1] : vector<24x24xf32> to vector<24xf32>
    %1363 = vector.shape_cast %1362 : vector<24xf32> to vector<24x1xf32>
    %1364 = tpu.reciprocal %1363 {approx = true} : vector<24x1xf32> -> vector<24x1xf32>
    %1365 = vector.broadcast %1364 : vector<24x1xf32> to vector<24x24xf32>
    %1366 = arith.mulf %1361, %1365 : vector<24x24xf32>
    %1367 = arith.truncf %1366 : vector<24x24xf32> to vector<24x24xbf16>
    %1368 = vector.extract_strided_slice %1345 {offsets = [0, 0], sizes = [24, 8], strides = [1, 1]} : vector<48x8xbf16> to vector<24x8xbf16>
    %cst_614 = arith.constant dense<0.000000e+00> : vector<24x8xf32>
    %1369 = tpu.matmul %1367, %1368, %cst_614 {dimension_numbers = #tpu.dot_dimension_numbers<[1], [0], [0], [1], [0, 0, 1, 1], [], []>} : vector<24x24xbf16>, vector<24x8xbf16>, vector<24x8xf32> -> vector<24x8xf32>
    %1370 = arith.truncf %1369 : vector<24x8xf32> to vector<24x8xbf16>
    %cst_615 = arith.constant dense<0.000000e+00> : vector<24x32xf32>
    %1371 = tpu.matmul %1370, %1347, %cst_615 {dimension_numbers = #tpu.dot_dimension_numbers<[1], [0], [0], [1], [0, 0, 1, 1], [], []>} : vector<24x8xbf16>, vector<8x32xbf16>, vector<24x32xf32> -> vector<24x32xf32>
    %1372 = arith.addf %1299, %1371 : vector<24x32xf32>
    %1373 = vector.extract_strided_slice %1331 {offsets = [24, 0], sizes = [24, 8], strides = [1, 1]} : vector<48x8xbf16> to vector<24x8xbf16>
    %1374 = vector.extract_strided_slice %1338 {offsets = [24, 0], sizes = [24, 8], strides = [1, 1]} : vector<48x8xbf16> to vector<24x8xbf16>
    %cst_616 = arith.constant dense<0.000000e+00> : vector<24x24xf32>
    %1375 = tpu.matmul %1373, %1374, %cst_616 {dimension_numbers = #tpu.dot_dimension_numbers<[1], [1], [0], [0], [0, 0, 1, 0], [], []>} : vector<24x8xbf16>, vector<24x8xbf16>, vector<24x24xf32> -> vector<24x24xf32>
    %cst_617 = arith.constant 0.353553385 : f32
    %1376 = vector.broadcast %cst_617 : f32 to vector<24x24xf32>
    %1377 = arith.mulf %1375, %1376 : vector<24x24xf32>
    %1378 = vector.extract_strided_slice %0 {offsets = [1, 3, 0], sizes = [1, 1, 24], strides = [1, 1, 1]} : vector<2x8x128xf32> to vector<1x1x24xf32>
    %1379 = vector.shape_cast %1378 : vector<1x1x24xf32> to vector<1x24xf32>
    %1380 = vector.broadcast %1379 : vector<1x24xf32> to vector<24x24xf32>
    %1381 = arith.addf %1377, %1380 : vector<24x24xf32>
    %cst_618 = arith.constant dense<0xFF800000> : vector<24xf32>
    %1382 = vector.multi_reduction <maximumf>, %1381, %cst_618 [1] : vector<24x24xf32> to vector<24xf32>
    %1383 = vector.shape_cast %1382 : vector<24xf32> to vector<24x1xf32>
    %1384 = vector.broadcast %1383 : vector<24x1xf32> to vector<24x24xf32>
    %1385 = arith.subf %1381, %1384 : vector<24x24xf32>
    %1386 = math.exp %1385 : vector<24x24xf32>
    %cst_619 = arith.constant dense<0.000000e+00> : vector<24xf32>
    %1387 = vector.multi_reduction <add>, %1386, %cst_619 [1] : vector<24x24xf32> to vector<24xf32>
    %1388 = vector.shape_cast %1387 : vector<24xf32> to vector<24x1xf32>
    %1389 = tpu.reciprocal %1388 {approx = true} : vector<24x1xf32> -> vector<24x1xf32>
    %1390 = vector.broadcast %1389 : vector<24x1xf32> to vector<24x24xf32>
    %1391 = arith.mulf %1386, %1390 : vector<24x24xf32>
    %1392 = arith.truncf %1391 : vector<24x24xf32> to vector<24x24xbf16>
    %1393 = vector.extract_strided_slice %1345 {offsets = [24, 0], sizes = [24, 8], strides = [1, 1]} : vector<48x8xbf16> to vector<24x8xbf16>
    %cst_620 = arith.constant dense<0.000000e+00> : vector<24x8xf32>
    %1394 = tpu.matmul %1392, %1393, %cst_620 {dimension_numbers = #tpu.dot_dimension_numbers<[1], [0], [0], [1], [0, 0, 1, 1], [], []>} : vector<24x24xbf16>, vector<24x8xbf16>, vector<24x8xf32> -> vector<24x8xf32>
    %1395 = arith.truncf %1394 : vector<24x8xf32> to vector<24x8xbf16>
    %cst_621 = arith.constant dense<0.000000e+00> : vector<24x32xf32>
    %1396 = tpu.matmul %1395, %1347, %cst_621 {dimension_numbers = #tpu.dot_dimension_numbers<[1], [0], [0], [1], [0, 0, 1, 1], [], []>} : vector<24x8xbf16>, vector<8x32xbf16>, vector<24x32xf32> -> vector<24x32xf32>
    %1397 = arith.addf %1324, %1396 : vector<24x32xf32>
    %c38_622 = arith.constant 38 : index
    %c0_623 = arith.constant 0 : index
    %c0_624 = arith.constant 0 : index
    %1398 = vector.load %arg5[%c38_622, %c0_623, %c0_624] : memref<48x32x8xbf16, #tpu.memory_space<vmem>>, vector<1x32x8xbf16>
    %1399 = vector.shape_cast %1398 : vector<1x32x8xbf16> to vector<32x8xbf16>
    %c38_625 = arith.constant 38 : index
    %c0_626 = arith.constant 0 : index
    %1400 = vector.load %arg11[%c38_625, %c0_626] : memref<48x8xf32, #tpu.memory_space<vmem>>, vector<1x8xf32>
    %cst_627 = arith.constant dense<0.000000e+00> : vector<48x8xf32>
    %1401 = tpu.matmul %1249, %1399, %cst_627 {dimension_numbers = #tpu.dot_dimension_numbers<[1], [0], [0], [1], [0, 0, 1, 1], [], []>} : vector<48x32xbf16>, vector<32x8xbf16>, vector<48x8xf32> -> vector<48x8xf32>
    %1402 = vector.broadcast %1400 : vector<1x8xf32> to vector<48x8xf32>
    %1403 = arith.addf %1401, %1402 : vector<48x8xf32>
    %1404 = arith.truncf %1403 : vector<48x8xf32> to vector<48x8xbf16>
    %c42_628 = arith.constant 42 : index
    %c0_629 = arith.constant 0 : index
    %c0_630 = arith.constant 0 : index
    %1405 = vector.load %arg5[%c42_628, %c0_629, %c0_630] : memref<48x32x8xbf16, #tpu.memory_space<vmem>>, vector<1x32x8xbf16>
    %1406 = vector.shape_cast %1405 : vector<1x32x8xbf16> to vector<32x8xbf16>
    %c42_631 = arith.constant 42 : index
    %c0_632 = arith.constant 0 : index
    %1407 = vector.load %arg11[%c42_631, %c0_632] : memref<48x8xf32, #tpu.memory_space<vmem>>, vector<1x8xf32>
    %cst_633 = arith.constant dense<0.000000e+00> : vector<48x8xf32>
    %1408 = tpu.matmul %1249, %1406, %cst_633 {dimension_numbers = #tpu.dot_dimension_numbers<[1], [0], [0], [1], [0, 0, 1, 1], [], []>} : vector<48x32xbf16>, vector<32x8xbf16>, vector<48x8xf32> -> vector<48x8xf32>
    %1409 = vector.broadcast %1407 : vector<1x8xf32> to vector<48x8xf32>
    %1410 = arith.addf %1408, %1409 : vector<48x8xf32>
    %1411 = arith.truncf %1410 : vector<48x8xf32> to vector<48x8xbf16>
    %c46 = arith.constant 46 : index
    %c0_634 = arith.constant 0 : index
    %c0_635 = arith.constant 0 : index
    %1412 = vector.load %arg5[%c46, %c0_634, %c0_635] : memref<48x32x8xbf16, #tpu.memory_space<vmem>>, vector<1x32x8xbf16>
    %1413 = vector.shape_cast %1412 : vector<1x32x8xbf16> to vector<32x8xbf16>
    %c46_636 = arith.constant 46 : index
    %c0_637 = arith.constant 0 : index
    %1414 = vector.load %arg11[%c46_636, %c0_637] : memref<48x8xf32, #tpu.memory_space<vmem>>, vector<1x8xf32>
    %cst_638 = arith.constant dense<0.000000e+00> : vector<48x8xf32>
    %1415 = tpu.matmul %1249, %1413, %cst_638 {dimension_numbers = #tpu.dot_dimension_numbers<[1], [0], [0], [1], [0, 0, 1, 1], [], []>} : vector<48x32xbf16>, vector<32x8xbf16>, vector<48x8xf32> -> vector<48x8xf32>
    %1416 = vector.broadcast %1414 : vector<1x8xf32> to vector<48x8xf32>
    %1417 = arith.addf %1415, %1416 : vector<48x8xf32>
    %1418 = arith.truncf %1417 : vector<48x8xf32> to vector<48x8xbf16>
    %c14_639 = arith.constant 14 : index
    %c0_640 = arith.constant 0 : index
    %c0_641 = arith.constant 0 : index
    %1419 = vector.load %arg6[%c14_639, %c0_640, %c0_641] : memref<16x8x32xbf16, #tpu.memory_space<vmem>>, vector<1x8x32xbf16>
    %1420 = vector.shape_cast %1419 : vector<1x8x32xbf16> to vector<8x32xbf16>
    %1421 = vector.extract_strided_slice %1404 {offsets = [0, 0], sizes = [24, 8], strides = [1, 1]} : vector<48x8xbf16> to vector<24x8xbf16>
    %1422 = vector.extract_strided_slice %1411 {offsets = [0, 0], sizes = [24, 8], strides = [1, 1]} : vector<48x8xbf16> to vector<24x8xbf16>
    %cst_642 = arith.constant dense<0.000000e+00> : vector<24x24xf32>
    %1423 = tpu.matmul %1421, %1422, %cst_642 {dimension_numbers = #tpu.dot_dimension_numbers<[1], [1], [0], [0], [0, 0, 1, 0], [], []>} : vector<24x8xbf16>, vector<24x8xbf16>, vector<24x24xf32> -> vector<24x24xf32>
    %cst_643 = arith.constant 0.353553385 : f32
    %1424 = vector.broadcast %cst_643 : f32 to vector<24x24xf32>
    %1425 = arith.mulf %1423, %1424 : vector<24x24xf32>
    %1426 = vector.extract_strided_slice %0 {offsets = [0, 3, 0], sizes = [1, 1, 24], strides = [1, 1, 1]} : vector<2x8x128xf32> to vector<1x1x24xf32>
    %1427 = vector.shape_cast %1426 : vector<1x1x24xf32> to vector<1x24xf32>
    %1428 = vector.broadcast %1427 : vector<1x24xf32> to vector<24x24xf32>
    %1429 = arith.addf %1425, %1428 : vector<24x24xf32>
    %cst_644 = arith.constant dense<0xFF800000> : vector<24xf32>
    %1430 = vector.multi_reduction <maximumf>, %1429, %cst_644 [1] : vector<24x24xf32> to vector<24xf32>
    %1431 = vector.shape_cast %1430 : vector<24xf32> to vector<24x1xf32>
    %1432 = vector.broadcast %1431 : vector<24x1xf32> to vector<24x24xf32>
    %1433 = arith.subf %1429, %1432 : vector<24x24xf32>
    %1434 = math.exp %1433 : vector<24x24xf32>
    %cst_645 = arith.constant dense<0.000000e+00> : vector<24xf32>
    %1435 = vector.multi_reduction <add>, %1434, %cst_645 [1] : vector<24x24xf32> to vector<24xf32>
    %1436 = vector.shape_cast %1435 : vector<24xf32> to vector<24x1xf32>
    %1437 = tpu.reciprocal %1436 {approx = true} : vector<24x1xf32> -> vector<24x1xf32>
    %1438 = vector.broadcast %1437 : vector<24x1xf32> to vector<24x24xf32>
    %1439 = arith.mulf %1434, %1438 : vector<24x24xf32>
    %1440 = arith.truncf %1439 : vector<24x24xf32> to vector<24x24xbf16>
    %1441 = vector.extract_strided_slice %1418 {offsets = [0, 0], sizes = [24, 8], strides = [1, 1]} : vector<48x8xbf16> to vector<24x8xbf16>
    %cst_646 = arith.constant dense<0.000000e+00> : vector<24x8xf32>
    %1442 = tpu.matmul %1440, %1441, %cst_646 {dimension_numbers = #tpu.dot_dimension_numbers<[1], [0], [0], [1], [0, 0, 1, 1], [], []>} : vector<24x24xbf16>, vector<24x8xbf16>, vector<24x8xf32> -> vector<24x8xf32>
    %1443 = arith.truncf %1442 : vector<24x8xf32> to vector<24x8xbf16>
    %cst_647 = arith.constant dense<0.000000e+00> : vector<24x32xf32>
    %1444 = tpu.matmul %1443, %1420, %cst_647 {dimension_numbers = #tpu.dot_dimension_numbers<[1], [0], [0], [1], [0, 0, 1, 1], [], []>} : vector<24x8xbf16>, vector<8x32xbf16>, vector<24x32xf32> -> vector<24x32xf32>
    %1445 = arith.addf %1372, %1444 : vector<24x32xf32>
    %1446 = vector.extract_strided_slice %1404 {offsets = [24, 0], sizes = [24, 8], strides = [1, 1]} : vector<48x8xbf16> to vector<24x8xbf16>
    %1447 = vector.extract_strided_slice %1411 {offsets = [24, 0], sizes = [24, 8], strides = [1, 1]} : vector<48x8xbf16> to vector<24x8xbf16>
    %cst_648 = arith.constant dense<0.000000e+00> : vector<24x24xf32>
    %1448 = tpu.matmul %1446, %1447, %cst_648 {dimension_numbers = #tpu.dot_dimension_numbers<[1], [1], [0], [0], [0, 0, 1, 0], [], []>} : vector<24x8xbf16>, vector<24x8xbf16>, vector<24x24xf32> -> vector<24x24xf32>
    %cst_649 = arith.constant 0.353553385 : f32
    %1449 = vector.broadcast %cst_649 : f32 to vector<24x24xf32>
    %1450 = arith.mulf %1448, %1449 : vector<24x24xf32>
    %1451 = vector.extract_strided_slice %0 {offsets = [1, 3, 0], sizes = [1, 1, 24], strides = [1, 1, 1]} : vector<2x8x128xf32> to vector<1x1x24xf32>
    %1452 = vector.shape_cast %1451 : vector<1x1x24xf32> to vector<1x24xf32>
    %1453 = vector.broadcast %1452 : vector<1x24xf32> to vector<24x24xf32>
    %1454 = arith.addf %1450, %1453 : vector<24x24xf32>
    %cst_650 = arith.constant dense<0xFF800000> : vector<24xf32>
    %1455 = vector.multi_reduction <maximumf>, %1454, %cst_650 [1] : vector<24x24xf32> to vector<24xf32>
    %1456 = vector.shape_cast %1455 : vector<24xf32> to vector<24x1xf32>
    %1457 = vector.broadcast %1456 : vector<24x1xf32> to vector<24x24xf32>
    %1458 = arith.subf %1454, %1457 : vector<24x24xf32>
    %1459 = math.exp %1458 : vector<24x24xf32>
    %cst_651 = arith.constant dense<0.000000e+00> : vector<24xf32>
    %1460 = vector.multi_reduction <add>, %1459, %cst_651 [1] : vector<24x24xf32> to vector<24xf32>
    %1461 = vector.shape_cast %1460 : vector<24xf32> to vector<24x1xf32>
    %1462 = tpu.reciprocal %1461 {approx = true} : vector<24x1xf32> -> vector<24x1xf32>
    %1463 = vector.broadcast %1462 : vector<24x1xf32> to vector<24x24xf32>
    %1464 = arith.mulf %1459, %1463 : vector<24x24xf32>
    %1465 = arith.truncf %1464 : vector<24x24xf32> to vector<24x24xbf16>
    %1466 = vector.extract_strided_slice %1418 {offsets = [24, 0], sizes = [24, 8], strides = [1, 1]} : vector<48x8xbf16> to vector<24x8xbf16>
    %cst_652 = arith.constant dense<0.000000e+00> : vector<24x8xf32>
    %1467 = tpu.matmul %1465, %1466, %cst_652 {dimension_numbers = #tpu.dot_dimension_numbers<[1], [0], [0], [1], [0, 0, 1, 1], [], []>} : vector<24x24xbf16>, vector<24x8xbf16>, vector<24x8xf32> -> vector<24x8xf32>
    %1468 = arith.truncf %1467 : vector<24x8xf32> to vector<24x8xbf16>
    %cst_653 = arith.constant dense<0.000000e+00> : vector<24x32xf32>
    %1469 = tpu.matmul %1468, %1420, %cst_653 {dimension_numbers = #tpu.dot_dimension_numbers<[1], [0], [0], [1], [0, 0, 1, 1], [], []>} : vector<24x8xbf16>, vector<8x32xbf16>, vector<24x32xf32> -> vector<24x32xf32>
    %1470 = arith.addf %1397, %1469 : vector<24x32xf32>
    %c39_654 = arith.constant 39 : index
    %c0_655 = arith.constant 0 : index
    %c0_656 = arith.constant 0 : index
    %1471 = vector.load %arg5[%c39_654, %c0_655, %c0_656] : memref<48x32x8xbf16, #tpu.memory_space<vmem>>, vector<1x32x8xbf16>
    %1472 = vector.shape_cast %1471 : vector<1x32x8xbf16> to vector<32x8xbf16>
    %c39_657 = arith.constant 39 : index
    %c0_658 = arith.constant 0 : index
    %1473 = vector.load %arg11[%c39_657, %c0_658] : memref<48x8xf32, #tpu.memory_space<vmem>>, vector<1x8xf32>
    %cst_659 = arith.constant dense<0.000000e+00> : vector<48x8xf32>
    %1474 = tpu.matmul %1249, %1472, %cst_659 {dimension_numbers = #tpu.dot_dimension_numbers<[1], [0], [0], [1], [0, 0, 1, 1], [], []>} : vector<48x32xbf16>, vector<32x8xbf16>, vector<48x8xf32> -> vector<48x8xf32>
    %1475 = vector.broadcast %1473 : vector<1x8xf32> to vector<48x8xf32>
    %1476 = arith.addf %1474, %1475 : vector<48x8xf32>
    %1477 = arith.truncf %1476 : vector<48x8xf32> to vector<48x8xbf16>
    %c43 = arith.constant 43 : index
    %c0_660 = arith.constant 0 : index
    %c0_661 = arith.constant 0 : index
    %1478 = vector.load %arg5[%c43, %c0_660, %c0_661] : memref<48x32x8xbf16, #tpu.memory_space<vmem>>, vector<1x32x8xbf16>
    %1479 = vector.shape_cast %1478 : vector<1x32x8xbf16> to vector<32x8xbf16>
    %c43_662 = arith.constant 43 : index
    %c0_663 = arith.constant 0 : index
    %1480 = vector.load %arg11[%c43_662, %c0_663] : memref<48x8xf32, #tpu.memory_space<vmem>>, vector<1x8xf32>
    %cst_664 = arith.constant dense<0.000000e+00> : vector<48x8xf32>
    %1481 = tpu.matmul %1249, %1479, %cst_664 {dimension_numbers = #tpu.dot_dimension_numbers<[1], [0], [0], [1], [0, 0, 1, 1], [], []>} : vector<48x32xbf16>, vector<32x8xbf16>, vector<48x8xf32> -> vector<48x8xf32>
    %1482 = vector.broadcast %1480 : vector<1x8xf32> to vector<48x8xf32>
    %1483 = arith.addf %1481, %1482 : vector<48x8xf32>
    %1484 = arith.truncf %1483 : vector<48x8xf32> to vector<48x8xbf16>
    %c47 = arith.constant 47 : index
    %c0_665 = arith.constant 0 : index
    %c0_666 = arith.constant 0 : index
    %1485 = vector.load %arg5[%c47, %c0_665, %c0_666] : memref<48x32x8xbf16, #tpu.memory_space<vmem>>, vector<1x32x8xbf16>
    %1486 = vector.shape_cast %1485 : vector<1x32x8xbf16> to vector<32x8xbf16>
    %c47_667 = arith.constant 47 : index
    %c0_668 = arith.constant 0 : index
    %1487 = vector.load %arg11[%c47_667, %c0_668] : memref<48x8xf32, #tpu.memory_space<vmem>>, vector<1x8xf32>
    %cst_669 = arith.constant dense<0.000000e+00> : vector<48x8xf32>
    %1488 = tpu.matmul %1249, %1486, %cst_669 {dimension_numbers = #tpu.dot_dimension_numbers<[1], [0], [0], [1], [0, 0, 1, 1], [], []>} : vector<48x32xbf16>, vector<32x8xbf16>, vector<48x8xf32> -> vector<48x8xf32>
    %1489 = vector.broadcast %1487 : vector<1x8xf32> to vector<48x8xf32>
    %1490 = arith.addf %1488, %1489 : vector<48x8xf32>
    %1491 = arith.truncf %1490 : vector<48x8xf32> to vector<48x8xbf16>
    %c15_670 = arith.constant 15 : index
    %c0_671 = arith.constant 0 : index
    %c0_672 = arith.constant 0 : index
    %1492 = vector.load %arg6[%c15_670, %c0_671, %c0_672] : memref<16x8x32xbf16, #tpu.memory_space<vmem>>, vector<1x8x32xbf16>
    %1493 = vector.shape_cast %1492 : vector<1x8x32xbf16> to vector<8x32xbf16>
    %1494 = vector.extract_strided_slice %1477 {offsets = [0, 0], sizes = [24, 8], strides = [1, 1]} : vector<48x8xbf16> to vector<24x8xbf16>
    %1495 = vector.extract_strided_slice %1484 {offsets = [0, 0], sizes = [24, 8], strides = [1, 1]} : vector<48x8xbf16> to vector<24x8xbf16>
    %cst_673 = arith.constant dense<0.000000e+00> : vector<24x24xf32>
    %1496 = tpu.matmul %1494, %1495, %cst_673 {dimension_numbers = #tpu.dot_dimension_numbers<[1], [1], [0], [0], [0, 0, 1, 0], [], []>} : vector<24x8xbf16>, vector<24x8xbf16>, vector<24x24xf32> -> vector<24x24xf32>
    %cst_674 = arith.constant 0.353553385 : f32
    %1497 = vector.broadcast %cst_674 : f32 to vector<24x24xf32>
    %1498 = arith.mulf %1496, %1497 : vector<24x24xf32>
    %1499 = vector.extract_strided_slice %0 {offsets = [0, 3, 0], sizes = [1, 1, 24], strides = [1, 1, 1]} : vector<2x8x128xf32> to vector<1x1x24xf32>
    %1500 = vector.shape_cast %1499 : vector<1x1x24xf32> to vector<1x24xf32>
    %1501 = vector.broadcast %1500 : vector<1x24xf32> to vector<24x24xf32>
    %1502 = arith.addf %1498, %1501 : vector<24x24xf32>
    %cst_675 = arith.constant dense<0xFF800000> : vector<24xf32>
    %1503 = vector.multi_reduction <maximumf>, %1502, %cst_675 [1] : vector<24x24xf32> to vector<24xf32>
    %1504 = vector.shape_cast %1503 : vector<24xf32> to vector<24x1xf32>
    %1505 = vector.broadcast %1504 : vector<24x1xf32> to vector<24x24xf32>
    %1506 = arith.subf %1502, %1505 : vector<24x24xf32>
    %1507 = math.exp %1506 : vector<24x24xf32>
    %cst_676 = arith.constant dense<0.000000e+00> : vector<24xf32>
    %1508 = vector.multi_reduction <add>, %1507, %cst_676 [1] : vector<24x24xf32> to vector<24xf32>
    %1509 = vector.shape_cast %1508 : vector<24xf32> to vector<24x1xf32>
    %1510 = tpu.reciprocal %1509 {approx = true} : vector<24x1xf32> -> vector<24x1xf32>
    %1511 = vector.broadcast %1510 : vector<24x1xf32> to vector<24x24xf32>
    %1512 = arith.mulf %1507, %1511 : vector<24x24xf32>
    %1513 = arith.truncf %1512 : vector<24x24xf32> to vector<24x24xbf16>
    %1514 = vector.extract_strided_slice %1491 {offsets = [0, 0], sizes = [24, 8], strides = [1, 1]} : vector<48x8xbf16> to vector<24x8xbf16>
    %cst_677 = arith.constant dense<0.000000e+00> : vector<24x8xf32>
    %1515 = tpu.matmul %1513, %1514, %cst_677 {dimension_numbers = #tpu.dot_dimension_numbers<[1], [0], [0], [1], [0, 0, 1, 1], [], []>} : vector<24x24xbf16>, vector<24x8xbf16>, vector<24x8xf32> -> vector<24x8xf32>
    %1516 = arith.truncf %1515 : vector<24x8xf32> to vector<24x8xbf16>
    %cst_678 = arith.constant dense<0.000000e+00> : vector<24x32xf32>
    %1517 = tpu.matmul %1516, %1493, %cst_678 {dimension_numbers = #tpu.dot_dimension_numbers<[1], [0], [0], [1], [0, 0, 1, 1], [], []>} : vector<24x8xbf16>, vector<8x32xbf16>, vector<24x32xf32> -> vector<24x32xf32>
    %1518 = arith.addf %1445, %1517 : vector<24x32xf32>
    %1519 = vector.extract_strided_slice %1477 {offsets = [24, 0], sizes = [24, 8], strides = [1, 1]} : vector<48x8xbf16> to vector<24x8xbf16>
    %1520 = vector.extract_strided_slice %1484 {offsets = [24, 0], sizes = [24, 8], strides = [1, 1]} : vector<48x8xbf16> to vector<24x8xbf16>
    %cst_679 = arith.constant dense<0.000000e+00> : vector<24x24xf32>
    %1521 = tpu.matmul %1519, %1520, %cst_679 {dimension_numbers = #tpu.dot_dimension_numbers<[1], [1], [0], [0], [0, 0, 1, 0], [], []>} : vector<24x8xbf16>, vector<24x8xbf16>, vector<24x24xf32> -> vector<24x24xf32>
    %cst_680 = arith.constant 0.353553385 : f32
    %1522 = vector.broadcast %cst_680 : f32 to vector<24x24xf32>
    %1523 = arith.mulf %1521, %1522 : vector<24x24xf32>
    %1524 = vector.extract_strided_slice %0 {offsets = [1, 3, 0], sizes = [1, 1, 24], strides = [1, 1, 1]} : vector<2x8x128xf32> to vector<1x1x24xf32>
    %1525 = vector.shape_cast %1524 : vector<1x1x24xf32> to vector<1x24xf32>
    %1526 = vector.broadcast %1525 : vector<1x24xf32> to vector<24x24xf32>
    %1527 = arith.addf %1523, %1526 : vector<24x24xf32>
    %cst_681 = arith.constant dense<0xFF800000> : vector<24xf32>
    %1528 = vector.multi_reduction <maximumf>, %1527, %cst_681 [1] : vector<24x24xf32> to vector<24xf32>
    %1529 = vector.shape_cast %1528 : vector<24xf32> to vector<24x1xf32>
    %1530 = vector.broadcast %1529 : vector<24x1xf32> to vector<24x24xf32>
    %1531 = arith.subf %1527, %1530 : vector<24x24xf32>
    %1532 = math.exp %1531 : vector<24x24xf32>
    %cst_682 = arith.constant dense<0.000000e+00> : vector<24xf32>
    %1533 = vector.multi_reduction <add>, %1532, %cst_682 [1] : vector<24x24xf32> to vector<24xf32>
    %1534 = vector.shape_cast %1533 : vector<24xf32> to vector<24x1xf32>
    %1535 = tpu.reciprocal %1534 {approx = true} : vector<24x1xf32> -> vector<24x1xf32>
    %1536 = vector.broadcast %1535 : vector<24x1xf32> to vector<24x24xf32>
    %1537 = arith.mulf %1532, %1536 : vector<24x24xf32>
    %1538 = arith.truncf %1537 : vector<24x24xf32> to vector<24x24xbf16>
    %1539 = vector.extract_strided_slice %1491 {offsets = [24, 0], sizes = [24, 8], strides = [1, 1]} : vector<48x8xbf16> to vector<24x8xbf16>
    %cst_683 = arith.constant dense<0.000000e+00> : vector<24x8xf32>
    %1540 = tpu.matmul %1538, %1539, %cst_683 {dimension_numbers = #tpu.dot_dimension_numbers<[1], [0], [0], [1], [0, 0, 1, 1], [], []>} : vector<24x24xbf16>, vector<24x8xbf16>, vector<24x8xf32> -> vector<24x8xf32>
    %1541 = arith.truncf %1540 : vector<24x8xf32> to vector<24x8xbf16>
    %cst_684 = arith.constant dense<0.000000e+00> : vector<24x32xf32>
    %1542 = tpu.matmul %1541, %1493, %cst_684 {dimension_numbers = #tpu.dot_dimension_numbers<[1], [0], [0], [1], [0, 0, 1, 1], [], []>} : vector<24x8xbf16>, vector<8x32xbf16>, vector<24x32xf32> -> vector<24x32xf32>
    %1543 = arith.addf %1470, %1542 : vector<24x32xf32>
    %1544 = tpu.concatenate %1518, %1543 in 0 : vector<24x32xf32>, vector<24x32xf32> -> vector<48x32xf32>
    %1545 = arith.addf %1224, %1544 : vector<48x32xf32>
    %c22_685 = arith.constant 22 : index
    %c0_686 = arith.constant 0 : index
    %1546 = vector.load %arg12[%c22_685, %c0_686] : memref<58x128xf32, #tpu.memory_space<vmem>>, vector<1x32xf32>
    %1547 = vector.broadcast %1546 : vector<1x32xf32> to vector<48x32xf32>
    %1548 = arith.addf %1545, %1547 : vector<48x32xf32>
    %cst_687 = arith.constant dense<0.000000e+00> : vector<48xf32>
    %1549 = vector.multi_reduction <add>, %1548, %cst_687 [1] : vector<48x32xf32> to vector<48xf32>
    %1550 = vector.shape_cast %1549 : vector<48xf32> to vector<48x1xf32>
    %cst_688 = arith.constant 3.200000e+01 : f32
    %1551 = vector.broadcast %cst_688 : f32 to vector<48x1xf32>
    %1552 = arith.divf %1550, %1551 : vector<48x1xf32>
    %1553 = vector.broadcast %1552 : vector<48x1xf32> to vector<48x32xf32>
    %1554 = arith.subf %1548, %1553 : vector<48x32xf32>
    %1555 = arith.mulf %1554, %1554 : vector<48x32xf32>
    %cst_689 = arith.constant dense<0.000000e+00> : vector<48xf32>
    %1556 = vector.multi_reduction <add>, %1555, %cst_689 [1] : vector<48x32xf32> to vector<48xf32>
    %1557 = vector.shape_cast %1556 : vector<48xf32> to vector<48x1xf32>
    %cst_690 = arith.constant 0.0322580636 : f32
    %1558 = vector.broadcast %cst_690 : f32 to vector<48x1xf32>
    %1559 = arith.mulf %1557, %1558 : vector<48x1xf32>
    %1560 = math.sqrt %1559 : vector<48x1xf32>
    %cst_691 = arith.constant 9.99999997E-7 : f32
    %1561 = vector.broadcast %cst_691 : f32 to vector<48x1xf32>
    %1562 = arith.addf %1560, %1561 : vector<48x1xf32>
    %cst_692 = arith.constant 1.000000e+00 : f32
    %1563 = vector.broadcast %cst_692 : f32 to vector<48x1xf32>
    %1564 = arith.divf %1563, %1562 : vector<48x1xf32>
    %c20_693 = arith.constant 20 : index
    %c0_694 = arith.constant 0 : index
    %1565 = vector.load %arg12[%c20_693, %c0_694] : memref<58x128xf32, #tpu.memory_space<vmem>>, vector<1x32xf32>
    %1566 = vector.broadcast %1564 : vector<48x1xf32> to vector<48x32xf32>
    %1567 = arith.mulf %1554, %1566 : vector<48x32xf32>
    %1568 = vector.broadcast %1565 : vector<1x32xf32> to vector<48x32xf32>
    %1569 = arith.mulf %1568, %1567 : vector<48x32xf32>
    %c21_695 = arith.constant 21 : index
    %c0_696 = arith.constant 0 : index
    %1570 = vector.load %arg12[%c21_695, %c0_696] : memref<58x128xf32, #tpu.memory_space<vmem>>, vector<1x32xf32>
    %1571 = vector.broadcast %1570 : vector<1x32xf32> to vector<48x32xf32>
    %1572 = arith.addf %1569, %1571 : vector<48x32xf32>
    %1573 = arith.truncf %1572 : vector<48x32xf32> to vector<48x32xbf16>
    %c3_697 = arith.constant 3 : index
    %c0_698 = arith.constant 0 : index
    %c0_699 = arith.constant 0 : index
    %1574 = vector.load %arg7[%c3_697, %c0_698, %c0_699] : memref<4x32x64xbf16, #tpu.memory_space<vmem>>, vector<1x32x64xbf16>
    %1575 = vector.shape_cast %1574 : vector<1x32x64xbf16> to vector<32x64xbf16>
    %cst_700 = arith.constant dense<0.000000e+00> : vector<48x64xf32>
    %1576 = tpu.matmul %1573, %1575, %cst_700 {dimension_numbers = #tpu.dot_dimension_numbers<[1], [0], [0], [1], [0, 0, 1, 1], [], []>} : vector<48x32xbf16>, vector<32x64xbf16>, vector<48x64xf32> -> vector<48x64xf32>
    %c40_701 = arith.constant 40 : index
    %c0_702 = arith.constant 0 : index
    %1577 = vector.load %arg12[%c40_701, %c0_702] : memref<58x128xf32, #tpu.memory_space<vmem>>, vector<1x64xf32>
    %1578 = vector.broadcast %1577 : vector<1x64xf32> to vector<48x64xf32>
    %1579 = arith.addf %1576, %1578 : vector<48x64xf32>
    %cst_703 = arith.constant 0.000000e+00 : f32
    %1580 = vector.broadcast %cst_703 : f32 to vector<48x64xf32>
    %1581 = arith.maximumf %1579, %1580 : vector<48x64xf32>
    %1582 = arith.truncf %1581 : vector<48x64xf32> to vector<48x64xbf16>
    %c3_704 = arith.constant 3 : index
    %c0_705 = arith.constant 0 : index
    %c0_706 = arith.constant 0 : index
    %1583 = vector.load %arg8[%c3_704, %c0_705, %c0_706] : memref<4x64x32xbf16, #tpu.memory_space<vmem>>, vector<1x64x32xbf16>
    %1584 = vector.shape_cast %1583 : vector<1x64x32xbf16> to vector<64x32xbf16>
    %cst_707 = arith.constant dense<0.000000e+00> : vector<48x32xf32>
    %1585 = tpu.matmul %1582, %1584, %cst_707 {dimension_numbers = #tpu.dot_dimension_numbers<[1], [0], [0], [1], [0, 0, 1, 1], [], []>} : vector<48x64xbf16>, vector<64x32xbf16>, vector<48x32xf32> -> vector<48x32xf32>
    %c23_708 = arith.constant 23 : index
    %c0_709 = arith.constant 0 : index
    %1586 = vector.load %arg12[%c23_708, %c0_709] : memref<58x128xf32, #tpu.memory_space<vmem>>, vector<1x32xf32>
    %1587 = vector.broadcast %1586 : vector<1x32xf32> to vector<48x32xf32>
    %1588 = arith.addf %1585, %1587 : vector<48x32xf32>
    %1589 = arith.addf %1548, %1588 : vector<48x32xf32>
    %cst_710 = arith.constant dense<0.000000e+00> : vector<48xf32>
    %1590 = vector.multi_reduction <add>, %1589, %cst_710 [1] : vector<48x32xf32> to vector<48xf32>
    %1591 = vector.shape_cast %1590 : vector<48xf32> to vector<48x1xf32>
    %cst_711 = arith.constant 3.200000e+01 : f32
    %1592 = vector.broadcast %cst_711 : f32 to vector<48x1xf32>
    %1593 = arith.divf %1591, %1592 : vector<48x1xf32>
    %1594 = vector.broadcast %1593 : vector<48x1xf32> to vector<48x32xf32>
    %1595 = arith.subf %1589, %1594 : vector<48x32xf32>
    %1596 = arith.mulf %1595, %1595 : vector<48x32xf32>
    %cst_712 = arith.constant dense<0.000000e+00> : vector<48xf32>
    %1597 = vector.multi_reduction <add>, %1596, %cst_712 [1] : vector<48x32xf32> to vector<48xf32>
    %1598 = vector.shape_cast %1597 : vector<48xf32> to vector<48x1xf32>
    %cst_713 = arith.constant 0.0322580636 : f32
    %1599 = vector.broadcast %cst_713 : f32 to vector<48x1xf32>
    %1600 = arith.mulf %1598, %1599 : vector<48x1xf32>
    %1601 = math.sqrt %1600 : vector<48x1xf32>
    %cst_714 = arith.constant 9.99999997E-7 : f32
    %1602 = vector.broadcast %cst_714 : f32 to vector<48x1xf32>
    %1603 = arith.addf %1601, %1602 : vector<48x1xf32>
    %cst_715 = arith.constant 1.000000e+00 : f32
    %1604 = vector.broadcast %cst_715 : f32 to vector<48x1xf32>
    %1605 = arith.divf %1604, %1603 : vector<48x1xf32>
    %c30_716 = arith.constant 30 : index
    %c0_717 = arith.constant 0 : index
    %1606 = vector.load %arg12[%c30_716, %c0_717] : memref<58x128xf32, #tpu.memory_space<vmem>>, vector<1x32xf32>
    %1607 = vector.broadcast %1605 : vector<48x1xf32> to vector<48x32xf32>
    %1608 = arith.mulf %1595, %1607 : vector<48x32xf32>
    %1609 = vector.broadcast %1606 : vector<1x32xf32> to vector<48x32xf32>
    %1610 = arith.mulf %1609, %1608 : vector<48x32xf32>
    %c31_718 = arith.constant 31 : index
    %c0_719 = arith.constant 0 : index
    %1611 = vector.load %arg12[%c31_718, %c0_719] : memref<58x128xf32, #tpu.memory_space<vmem>>, vector<1x32xf32>
    %1612 = vector.broadcast %1611 : vector<1x32xf32> to vector<48x32xf32>
    %1613 = arith.addf %1610, %1612 : vector<48x32xf32>
    %1614 = arith.truncf %1613 : vector<48x32xf32> to vector<48x32xbf16>
    %c0_720 = arith.constant 0 : index
    %c0_721 = arith.constant 0 : index
    %1615 = vector.load %arg10[%c0_720, %c0_721] : memref<32x128xbf16, #tpu.memory_space<vmem>>, vector<32x128xbf16>
    %cst_722 = arith.constant dense<0.000000e+00> : vector<48x128xf32>
    %1616 = tpu.matmul %1614, %1615, %cst_722 {dimension_numbers = #tpu.dot_dimension_numbers<[1], [0], [0], [1], [0, 0, 1, 1], [], []>} : vector<48x32xbf16>, vector<32x128xbf16>, vector<48x128xf32> -> vector<48x128xf32>
    %c41_723 = arith.constant 41 : index
    %c0_724 = arith.constant 0 : index
    %1617 = vector.load %arg12[%c41_723, %c0_724] : memref<58x128xf32, #tpu.memory_space<vmem>>, vector<1x128xf32>
    %1618 = vector.broadcast %1617 : vector<1x128xf32> to vector<48x128xf32>
    %1619 = arith.addf %1616, %1618 : vector<48x128xf32>
    %1620 = vector.shape_cast %1619 : vector<48x128xf32> to vector<2x24x128xf32>
    %c0_725 = arith.constant 0 : index
    %c0_726 = arith.constant 0 : index
    %c0_727 = arith.constant 0 : index
    %1621 = vector.load %arg13[%c0_725, %c0_726, %c0_727] : memref<2x24x128xf32, #tpu.memory_space<vmem>>, vector<2x24x128xf32>
    tpu.vector_store %arg13[%c0_725, %c0_726, %c0_727], %1620 {strides = array<i32>} : memref<2x24x128xf32, #tpu.memory_space<vmem>>, vector<2x24x128xf32>,
    return
  }
  func.func @transform_0(%arg0: i32) -> (i32, i32, i32) {
    %c0_i32 = arith.constant 0 : i32
    %c0_i32_0 = arith.constant 0 : i32
    %c0_i32_1 = arith.constant 0 : i32
    return %arg0, %c0_i32, %c0_i32_0 : i32, i32, i32
  }
  func.func @transform_1(%arg0: i32) -> (i32, i32, i32) {
    %c0_i32 = arith.constant 0 : i32
    %c0_i32_0 = arith.constant 0 : i32
    %c0_i32_1 = arith.constant 0 : i32
    return %arg0, %c0_i32, %c0_i32_0 : i32, i32, i32
  }
  func.func @transform_2(%arg0: i32) -> (i32, i32, i32) {
    %c0_i32 = arith.constant 0 : i32
    %c0_i32_0 = arith.constant 0 : i32
    %c0_i32_1 = arith.constant 0 : i32
    return %arg0, %c0_i32, %c0_i32_0 : i32, i32, i32
  }
  func.func @transform_3(%arg0: i32) -> (i32, i32, i32) {
    %c0_i32 = arith.constant 0 : i32
    %c0_i32_0 = arith.constant 0 : i32
    %c0_i32_1 = arith.constant 0 : i32
    return %arg0, %c0_i32, %c0_i32_0 : i32, i32, i32
  }
  func.func @transform_4(%arg0: i32) -> (i32, i32, i32) {
    %c0_i32 = arith.constant 0 : i32
    %c0_i32_0 = arith.constant 0 : i32
    %c0_i32_1 = arith.constant 0 : i32
    %c0_i32_2 = arith.constant 0 : i32
    return %c0_i32, %c0_i32_0, %c0_i32_1 : i32, i32, i32
  }
  func.func @transform_5(%arg0: i32) -> (i32, i32, i32) {
    %c0_i32 = arith.constant 0 : i32
    %c0_i32_0 = arith.constant 0 : i32
    %c0_i32_1 = arith.constant 0 : i32
    %c0_i32_2 = arith.constant 0 : i32
    return %c0_i32, %c0_i32_0, %c0_i32_1 : i32, i32, i32
  }
  func.func @transform_6(%arg0: i32) -> (i32, i32, i32) {
    %c0_i32 = arith.constant 0 : i32
    %c0_i32_0 = arith.constant 0 : i32
    %c0_i32_1 = arith.constant 0 : i32
    %c0_i32_2 = arith.constant 0 : i32
    return %c0_i32, %c0_i32_0, %c0_i32_1 : i32, i32, i32
  }
  func.func @transform_7(%arg0: i32) -> (i32, i32, i32) {
    %c0_i32 = arith.constant 0 : i32
    %c0_i32_0 = arith.constant 0 : i32
    %c0_i32_1 = arith.constant 0 : i32
    %c0_i32_2 = arith.constant 0 : i32
    return %c0_i32, %c0_i32_0, %c0_i32_1 : i32, i32, i32
  }
  func.func @transform_8(%arg0: i32) -> (i32, i32, i32) {
    %c0_i32 = arith.constant 0 : i32
    %c0_i32_0 = arith.constant 0 : i32
    %c0_i32_1 = arith.constant 0 : i32
    %c0_i32_2 = arith.constant 0 : i32
    return %c0_i32, %c0_i32_0, %c0_i32_1 : i32, i32, i32
  }
  func.func @transform_9(%arg0: i32) -> (i32, i32) {
    %c0_i32 = arith.constant 0 : i32
    %c0_i32_0 = arith.constant 0 : i32
    %c0_i32_1 = arith.constant 0 : i32
    return %c0_i32, %c0_i32_0 : i32, i32
  }
  func.func @transform_10(%arg0: i32) -> (i32, i32) {
    %c0_i32 = arith.constant 0 : i32
    %c0_i32_0 = arith.constant 0 : i32
    %c0_i32_1 = arith.constant 0 : i32
    return %c0_i32, %c0_i32_0 : i32, i32
  }
  func.func @transform_11(%arg0: i32) -> (i32, i32) {
    %c0_i32 = arith.constant 0 : i32
    %c0_i32_0 = arith.constant 0 : i32
    %c0_i32_1 = arith.constant 0 : i32
    return %c0_i32, %c0_i32_0 : i32, i32
  }
  func.func @transform_12(%arg0: i32) -> (i32, i32, i32) {
    %c0_i32 = arith.constant 0 : i32
    %c0_i32_0 = arith.constant 0 : i32
    %c0_i32_1 = arith.constant 0 : i32
    return %arg0, %c0_i32, %c0_i32_0 : i32, i32, i32
  }
}

</mosaic_0001>

<bundles_post_ra>
// kernel: transformer_forward_vc.1
= control target key start
LH: loop header
LB: loop body
LE: loop exit
PB: predicated region body
PF: predicated region fallthrough
CT: control target
= control target key end

     0   :  { %v13704_v0 = vmov 0.0   ;;  %vm13705_vm0 = vmmov 0   ;;  %vm60_vm1 = vcmask 130048   ;;  %vm116_vm2 = vcmask 261120   ;;  %s16301_s8 = inlined_call_operand.vmem [shape: bf16[2,16,32], index: 8, kind: input, shape index: {}]   ;;  %s16302_s0 = inlined_call_operand.vmem [shape: f32[2,8,16], index: 0, kind: input, shape index: {}]   ;;  %s16303_s11 = inlined_call_operand.vmem [shape: f32[58,128], index: 11, kind: input, shape index: {}]   ;;  %s16304_s4 = inlined_call_operand.vmem [shape: bf16[48,32,8], index: 4, kind: input, shape index: {}]   ;;  %s16305_s10 = inlined_call_operand.vmem [shape: f32[48,8], index: 10, kind: input, shape index: {}]   ;;  %s16306_s3 = inlined_call_operand.vmem [shape: f32[2,8,128], index: 3, kind: input, shape index: {}]   ;;  %s16307_s5 = inlined_call_operand.vmem [shape: bf16[16,8,32], index: 5, kind: input, shape index: {}]   ;;  %s16308_s1 = inlined_call_operand.vmem [shape: f32[2,8,32], index: 1, kind: input, shape index: {}]   ;;  %s16309_s6 = inlined_call_operand.vmem [shape: bf16[4,32,64], index: 6, kind: input, shape index: {}]   ;;  %s16310_s7 = inlined_call_operand.vmem [shape: bf16[4,64,32], index: 7, kind: input, shape index: {}]   ;;  %s16311_s2 = inlined_call_operand.vmem [shape: f32[2,8,16], index: 2, kind: input, shape index: {}]   ;;  %s16312_s9 = inlined_call_operand.vmem [shape: bf16[32,128], index: 9, kind: input, shape index: {}]   ;;  %s16313_s12 = inlined_call_operand.vmem [shape: f32[2,24,128], index: 12, kind: output, shape index: {}]  }
   0x1   :  { %11983 = vmatprep.subr.bf16.mxu1 %v13704_v0  ;;  %v13229_v1 = vld [vmem:[%s16301_s8] sm:$0xff]   ;;  %11985 = vmatprep.mubr.msk.bf16.mxu1 %vm13705_vm0, %v13704_v0  ;;  %v45_v3 = vld [vmem:[%s16302_s0 + $0x8] sm:$0xff]  ;;  %vm370_vm7 = vcmask 64512   ;;  %vm438_vm8 = vcmask 1043456  }
   0x2   :  { %v44_v2 = vld [vmem:[%s16302_s0] sm:$0xff]  ;;  %11997 = vmatprep.subr.bf16.mxu0 %v13704_v0  ;;  %12001 = vmatprep.mubr.msk.bf16.mxu0 %vm13705_vm0, %v13704_v0  ;;  %v105_v6 = vld [vmem:[%s16303_s11 + $0x2a] sm:$0xff] }
   0x3   :  { %11984 = vmatpush3.bf16.msra.mxu1 %v13229_v1  ;;  %v46_v4 = vpack.c.bf16 %v45_v3, %v44_v2  ;;  %v10874_v5 = vld [vmem:[%s16303_s11 + $0x23] ss:$0 sm:$0xff]  ;;  %v10877_v7 = vld [vmem:[%s16303_s11 + $0x20] ss:$0 sm:$0xff]  ;;  %v13232_v33 = vld [vmem:[%s16304_s4 + $0x8] sm:$0xff]  }
   0x4   :  { %11989 = vmatprep.subr.bf16.mxu1 %v13704_v0  ;;  %v111_v11 = vadd.f32 %v10877_v7, %v105_v6  ;;  %v13230_v31 = vld [vmem:[%s16304_s4] sm:$0xff]   ;;  %v13233_v34 = vld [vmem:[%s16304_s4 + $0x48] sm:$0xff]  }
   0x5   :  { %v13231_v32 = vld [vmem:[%s16304_s4 + $0x40] sm:$0xff]   ;;  %v13235_v63 = vld [vmem:[%s16304_s4 + $0x88] sm:$0xff]  }
   0x6   :  { %11986 = vmatmul.mubr.msk.bf16.vlgmr.msra.gmra.mrb[0].mxu1 %vm60_vm1, %v46_v4  ;;  %11998 = vmatpush3.bf16.msra.mxu0 %v13231_v32  ;;  %v10878_v53 = vld [vmem:[%s16303_s11] ss:$0 sm:$0xff]  ;;  %v10879_v57 = vld [vmem:[%s16303_s11 + $0x1] ss:$0 sm:$0xff]  ;;  %v10888_v3 = vld [vmem:[%s16305_s10 + $0x4] ss:$0 sm:$0xff] }
   0x7   :  { %11993 = vmatprep.mubr.msk.bf16.mxu1 %vm13705_vm0, %v13704_v0  ;;  %11990 = vmatpush3.bf16.msra.mxu1 %v13230_v31  ;;  %v13234_v61 = vld [vmem:[%s16304_s4 + $0x80] sm:$0xff]   ;;  %v13236_v31 = vld [vmem:[%s16304_s4 + $0x10] sm:$0xff]  }
   0x8   :  { %11991 = vmatprep.subr.bf16.mxu1 %v13704_v0  ;;  %11999 = vmatprep.subr.bf16.mxu0 %v13704_v0  ;;  %v10880_v1 = vld [vmem:[%s16305_s10] ss:$0 sm:$0xff] }
   0xa   :  { %12000 = vmatpush3.bf16.msra.mxu0 %v13233_v34  ;;  %v13238_v34 = vld [vmem:[%s16304_s4 + $0x90] sm:$0xff]  }
   0xb   :  { %11992 = vmatpush3.bf16.msra.mxu1 %v13232_v33  ;;  %12013 = vmatprep.subr.bf16.mxu0 %v13704_v0  ;;  %v13237_v33 = vld [vmem:[%s16304_s4 + $0x18] sm:$0xff]  }
   0xc   :  { %12005 = vmatprep.subr.bf16.mxu1 %v13704_v0 }
  0xd9   :  { %v98_v8 = vpop.f32.mrb[0].mxu1 }
  0xda   :  { %v99_v9 = vadd.f32 %v10874_v5, %v98_v8  ;;  %v11987_v10 = vpop.f32.mrb[1].mxu1 }
  0xdb   :  { %v101_v12 = vpop.f32.mrb[2].mxu1 }
  0xdc   :  { %v112_v13 = vmul.f32 5.656854, %v99_v9  ;;  %v102_v14 = vadd.f32 %v10874_v5, %v101_v12  ;;  %v11988_v15 = vpop.f32.mrb[3].mxu1 }
  0xde   :  { %v113_v16 = vmul.f32 5.656854, %v102_v14  ;;  %v13799_v17 = vadd.f32 %v112_v13, %v111_v11 }
  0xe0   :  { %v117_v18 = vsel %vm116_vm2, %v13799_v17, 0.0  ;;  %v13803_v19 = vadd.f32 %v113_v16, %v111_v11 }
  0xe1   :  { %118 = vadd.xlane.f32.xlu0 %v117_v18 }
  0xe2   :  { %v120_v20 = vsel %vm116_vm2, %v13803_v19, 0.0 }
  0xe5   :  { %121 = vadd.xlane.f32.xlu0 %v120_v20  ;;  %v10896_v20 = vld [vmem:[%s16305_s10 + $0x8] ss:$0 sm:$0xff] }
 0x16e   :  { %v119_v21 = vpop.xlane.xlu0 %118 }
 0x16f   :  { %v124_v22 = vmul.f32 0.03125, %v119_v21 }
 0x171   :  { %v126_v23 = vsub.f32 %v13799_v17, %v124_v22 }
 0x172   :  { %v122_v24 = vpop.xlane.xlu0 %121 }
 0x173   :  { %v125_v25 = vmul.f32 0.03125, %v122_v24  ;;  %v128_v26 = vmul.f32 %v126_v23, %v126_v23 }
 0x175   :  { %v127_v27 = vsub.f32 %v13803_v19, %v125_v25  ;;  %v130_v28 = vsel %vm116_vm2, %v128_v26, 0.0 }
 0x176   :  { %131 = vadd.xlane.f32.xlu1 %v130_v28 }
 0x177   :  { %v129_v29 = vmul.f32 %v127_v27, %v127_v27 }
 0x179   :  { %v133_v30 = vsel %vm116_vm2, %v129_v29, 0.0 }
 0x17a   :  { %134 = vadd.xlane.f32.xlu1 %v133_v30 }
 0x203   :  { %v132_v35 = vpop.xlane.xlu1 %131 }
 0x204   :  { %v136_v36 = vmul.f32 0.032258064, %v132_v35  ;;  %v13239_v35 = vld [vmem:[%s16304_s4 + $0x98] sm:$0xff]  }
 0x206   :  { %13353 = vrsqrt.f32 %v136_v36  ;;  %vm140_vm3 = vcmp.eq.f32.partialorder %v136_v36, inf  ;;  %v143_v41 = vand.u32 2147483648, %v136_v36  ;;  %vm142_vm4 = vcmp.eq.f32.partialorder %v136_v36, 0.0 }
 0x207   :  { %v135_v37 = vpop.xlane.xlu1 %134 }
 0x208   :  { %v137_v38 = vmul.f32 0.032258064, %v135_v37 }
 0x20a   :  { %13355 = vrsqrt.f32 %v137_v38  ;;  %vm147_vm5 = vcmp.eq.f32.partialorder %v137_v38, inf  ;;  %v150_v47 = vand.u32 2147483648, %v137_v38  ;;  %vm149_vm6 = vcmp.eq.f32.partialorder %v137_v38, 0.0 }
 0x210   :  { %v13354_v39 = vpop.eup %13353 }
 0x211   :  { %v139_v40 = vmul.f32 %v13354_v39, %v136_v36  ;;  %v42_v39 = vld [vmem:[%s16306_s3] sm:$0xff] }
 0x213   :  { %v141_v42 = vsel %vm140_vm3, %v136_v36, %v139_v40  ;;  %v418_v36 = vlaneseq }
 0x214   :  { %v13356_v43 = vpop.eup %13355  ;;  %v144_v44 = vsel %vm142_vm4, %v143_v41, %v141_v42  ;;  %vm2373_vm4 = vcmask 523264  }
 0x215   :  { %v152_v45 = vadd.f32 1e-06, %v144_v44  ;;  %v146_v46 = vmul.f32 %v13356_v43, %v137_v38  ;;  %v13903_v37 = vshrl.u32 %v418_v36, 7 }
 0x217   :  { %13357 = vrcp.f32 %v152_v45  ;;  %v148_v48 = vsel %vm147_vm5, %v137_v38, %v146_v46  ;;  %v420_v38 = vsub.s32 0, %v13903_v37 }
 0x218   :  { %v151_v49 = vsel %vm149_vm6, %v150_v47, %v148_v48  ;;  %v43_v47 = vld [vmem:[%s16306_s3 + $0x8] sm:$0xff] }
 0x219   :  { %v153_v50 = vadd.f32 1e-06, %v151_v49  ;;  %v13909_v40 = vrot.slane %v42_v39, %v420_v38  ;;  %v13916_v49 = vrot.slane %v43_v47, %v420_v38 }
 0x21b   :  { %13359 = vrcp.f32 %v153_v50 }
 0x221   :  { %v13358_v51 = vpop.eup %13357 }
 0x222   :  { %v159_v52 = vmul.f32 %v13358_v51, %v126_v23 }
 0x224   :  { %v165_v55 = vmul.f32 %v10878_v53, %v159_v52 }
 0x225   :  { %v13360_v54 = vpop.eup %13359 }
 0x226   :  { %v160_v56 = vmul.f32 %v13360_v54, %v127_v27  ;;  %v172_v59 = vadd.f32 %v10879_v57, %v165_v55 }
 0x228   :  { %v166_v58 = vmul.f32 %v10878_v53, %v160_v56 }
 0x22a   :  { %v173_v60 = vadd.f32 %v10879_v57, %v166_v58  ;;  %v10908_v57 = vld [vmem:[%s16305_s10 + $0x1] ss:$0 sm:$0xff] }
 0x22c   :  { %v13836_v62 = vpack.c.bf16 %v173_v60, %v172_v59 }
 0x22e   :  { %11994 = vmatmul.mubr.msk.bf16.vlgmr.msra.gmra.mrb[4].mxu1 %vm116_vm2, %v13836_v62  ;;  %12002 = vmatmul.mubr.msk.bf16.vlgmr.msra.gmra.mrb[0].mxu0 %vm116_vm2, %v13836_v62 }
 0x22f   :  { %12006 = vmatpush3.bf16.msra.mxu1 %v13234_v61  ;;  %12009 = vmatprep.mubr.msk.bf16.mxu1 %vm13705_vm0, %v13704_v0 }
 0x230   :  { %12007 = vmatprep.subr.bf16.mxu1 %v13704_v0  ;;  %12015 = vmatprep.mubr.msk.bf16.mxu0 %vm13705_vm0, %v13704_v0 }
 0x233   :  { %12008 = vmatpush3.bf16.msra.mxu1 %v13235_v63 }
 0x234   :  { %12019 = vmatprep.subr.bf16.mxu1 %v13704_v0 }
 0x236   :  { %12010 = vmatmul.mubr.msk.bf16.vlgmr.msra.gmra.mrb[8].mxu1 %vm116_vm2, %v13836_v62 }
 0x237   :  { %12021 = vmatprep.mubr.msk.bf16.mxu1 %vm13705_vm0, %v13704_v0 }
 0x301   :  { %v233_v2 = vpop.f32.mrb[4].mxu1  ;;  %v297_v4 = vpop.f32.mrb[0].mxu0 }
 0x302   :  { %v11995_v5 = vpop.f32.mrb[5].mxu1  ;;  %v12003_v6 = vpop.f32.mrb[1].mxu0  ;;  %v234_v9 = vadd.f32 %v10880_v1, %v233_v2  ;;  %v298_v10 = vadd.f32 %v10888_v3, %v297_v4 }
 0x303   :  { %v236_v7 = vpop.f32.mrb[6].mxu1  ;;  %v300_v8 = vpop.f32.mrb[2].mxu0 }
 0x304   :  { %v237_v11 = vadd.f32 %v10880_v1, %v236_v7  ;;  %v301_v12 = vadd.f32 %v10888_v3, %v300_v8  ;;  %v11996_v13 = vpop.f32.mrb[7].mxu1  ;;  %v12004_v14 = vpop.f32.mrb[3].mxu0  ;;  %v10924_v3 = vld [vmem:[%s16305_s10 + $0x9] ss:$0 sm:$0xff] }
 0x306   :  { %v240_v15 = vpack.c.bf16 %v237_v11, %v234_v9  ;;  %v304_v16 = vpack.c.bf16 %v301_v12, %v298_v10 }
 0x308   :  { %v375_v18 = vsel %vm370_vm7, %v304_v16, 0  ;;  %v486_v27 = vrot.slane %v304_v16, 4  ;;  %v484_v32 = vrot.slane %v240_v15, 4 }
 0x309   :  { %v361_v21 = vpop.f32.mrb[8].mxu1  ;;  %12014 = vmatpush3.bf16.xpose.msra.mxu0 %v375_v18 }
 0x30a   :  { %v12011_v22 = vpop.f32.mrb[9].mxu1  ;;  %12025 = vmatprep.subr.bf16.mxu0 %v13704_v0  ;;  %v362_v24 = vadd.f32 %v10896_v20, %v361_v21  ;;  %v491_v30 = vsel %vm370_vm7, %v486_v27, 0 }
 0x30b   :  { %v364_v23 = vpop.f32.mrb[10].mxu1 }
 0x30c   :  { %v365_v25 = vadd.f32 %v10896_v20, %v364_v23  ;;  %v12012_v26 = vpop.f32.mrb[11].mxu1 }
 0x30e   :  { %v13866_v28 = vpack.c.bf16 %v365_v25, %v362_v24 }
 0x310   :  { %12016 = vmatmul.mubr.msk.bf16.vlgmr.msra.gmra.mrb[4].mxu0 %vm370_vm7, %v240_v15  ;;  %v440_v29 = vsel %vm438_vm8, %v13866_v28, 0 }
 0x311   :  { %12020 = vmatpush3.bf16.msra.mxu1 %v440_v29  ;;  %12026 = vmatpush3.bf16.xpose.msra.mxu0 %v491_v30  ;;  %v552_v29 = vrot.slane %v13866_v28, 4  ;;  %v13241_v28 = vld [vmem:[%s16304_s4 + $0x58] sm:$0xff]  }
 0x312   :  { %12027 = vmatprep.mubr.msk.bf16.mxu0 %vm13705_vm0, %v13704_v0  ;;  %12037 = vmatprep.subr.bf16.mxu0 %v13704_v0 }
 0x313   :  { %12031 = vmatprep.subr.bf16.mxu1 %v13704_v0 }
 0x318   :  { %12028 = vmatmul.mubr.msk.bf16.vlgmr.msra.gmra.mrb[8].mxu0 %vm370_vm7, %v484_v32 }
 0x319   :  { %12038 = vmatpush3.bf16.msra.mxu0 %v13236_v31  ;;  %12041 = vmatprep.mubr.msk.bf16.mxu0 %vm13705_vm0, %v13704_v0  ;;  %v557_v31 = vsel %vm438_vm8, %v552_v29, 0 }
 0x31a   :  { %12039 = vmatprep.subr.bf16.mxu0 %v13704_v0 }
 0x31d   :  { %12040 = vmatpush3.bf16.msra.mxu0 %v13237_v33 }
 0x31e   :  { %12053 = vmatprep.subr.bf16.mxu0 %v13704_v0 }
 0x320   :  { %12042 = vmatmul.mubr.msk.bf16.vlgmr.msra.gmra.mrb[12].mxu0 %vm116_vm2, %v13836_v62 }
 0x321   :  { %12054 = vmatpush3.bf16.msra.mxu0 %v13238_v34  ;;  %12057 = vmatprep.mubr.msk.bf16.mxu0 %vm13705_vm0, %v13704_v0  ;;  %v13240_v34 = vld [vmem:[%s16304_s4 + $0x50] sm:$0xff]  }
 0x322   :  { %12055 = vmatprep.subr.bf16.mxu0 %v13704_v0 }
 0x325   :  { %12056 = vmatpush3.bf16.msra.mxu0 %v13239_v35 }
 0x326   :  { %12067 = vmatprep.subr.bf16.mxu0 %v13704_v0 }
 0x328   :  { %12058 = vmatmul.mubr.msk.bf16.vlgmr.msra.gmra.mrb[16].mxu0 %vm116_vm2, %v13836_v62 }
 0x329   :  { %12069 = vmatprep.mubr.msk.bf16.mxu0 %vm13705_vm0, %v13704_v0 }
 0x3e3   :  { %v411_v41 = vpop.f32.mrb[4].mxu0 }
 0x3e4   :  { %v417_v42 = vmul.f32 0.35355338, %v411_v41  ;;  %v12017_v43 = vpop.f32.mrb[5].mxu0 }
 0x3e5   :  { %v414_v44 = vpop.f32.mrb[6].mxu0 }
 0x3e6   :  { %v12018_v45 = vpop.f32.mrb[7].mxu0  ;;  %v422_v46 = vadd.f32 %v13909_v40, %v417_v42 }
 0x3e8   :  { %v423_v48 = vsel %vm370_vm7, %v422_v46, -inf }
 0x3e9   :  { %424 = vmax.xlane.f32.xlu0 %v423_v48 }
 0x3eb   :  { %v527_v50 = vpop.f32.mrb[8].mxu0 }
 0x3ec   :  { %v533_v51 = vmul.f32 0.35355338, %v527_v50  ;;  %v12029_v52 = vpop.f32.mrb[9].mxu0 }
 0x3ed   :  { %v530_v53 = vpop.f32.mrb[10].mxu0 }
 0x3ee   :  { %v12030_v54 = vpop.f32.mrb[11].mxu0  ;;  %v538_v55 = vadd.f32 %v13916_v49, %v533_v51 }
 0x3f0   :  { %v539_v56 = vsel %vm370_vm7, %v538_v55, -inf }
 0x3f1   :  { %540 = vmax.xlane.f32.xlu1 %v539_v56 }
 0x3f3   :  { %v656_v58 = vpop.f32.mrb[12].mxu0 }
 0x3f4   :  { %v12043_v59 = vpop.f32.mrb[13].mxu0  ;;  %v657_v61 = vadd.f32 %v10908_v57, %v656_v58 }
 0x3f5   :  { %v659_v60 = vpop.f32.mrb[14].mxu0 }
 0x3f6   :  { %v660_v63 = vadd.f32 %v10908_v57, %v659_v60  ;;  %v12044_v1 = vpop.f32.mrb[15].mxu0 }
 0x3f8   :  { %v13923_v2 = vpack.c.bf16 %v660_v63, %v657_v61 }
 0x3fa   :  { %v994_v29 = vrot.slane %v13923_v2, 4 }
 0x3fb   :  { %v784_v4 = vpop.f32.mrb[16].mxu0 }
 0x3fc   :  { %v12059_v5 = vpop.f32.mrb[17].mxu0  ;;  %v785_v7 = vadd.f32 %v10924_v3, %v784_v4 }
 0x3fd   :  { %v787_v6 = vpop.f32.mrb[18].mxu0 }
 0x3fe   :  { %v788_v8 = vadd.f32 %v10924_v3, %v787_v6  ;;  %v12060_v9 = vpop.f32.mrb[19].mxu0 }
 0x400   :  { %v13928_v10 = vpack.c.bf16 %v788_v8, %v785_v7  ;;  %v10928_v7 = vld [vmem:[%s16307_s5 + $0x4] sm:$0xf] }
 0x401   :  { %v905_v8 = vsel %vm438_vm8, %v10928_v7, 0 }
 0x402   :  { %v858_v11 = vsel %vm438_vm8, %v13928_v10, 0 }
 0x403   :  { %12068 = vmatpush3.bf16.msra.mxu0 %v858_v11 }
 0x404   :  { %12079 = vmatprep.subr.bf16.mxu0 %v13704_v0 }
 0x476   :  { %v425_v12 = vpop.xlane.xlu0 %424 }
 0x477   :  { %v426_v13 = vsub.f32 %v422_v46, %v425_v12  ;;  %v10916_v46 = vld [vmem:[%s16305_s10 + $0x5] ss:$0 sm:$0xff]  ;;  %v369_v12 = vld [vmem:[%s16307_s5] sm:$0xf] }
 0x479   :  { %v427_v14 = vmul.f32 1.442695, %v426_v13 }
 0x47b   :  { %13361 = vpow2.f32 %v427_v14 }
 0x47e   :  { %v541_v15 = vpop.xlane.xlu1 %540 }
 0x47f   :  { %v542_v16 = vsub.f32 %v538_v55, %v541_v15  ;;  %v951_v15 = vsel %vm438_vm8, %v369_v12, 0 }
 0x481   :  { %v543_v18 = vmul.f32 1.442695, %v542_v16  ;;  %v1058_v16 = vrot.slane %v13928_v10, 4 }
 0x483   :  { %13363 = vpow2.f32 %v543_v18 }
 0x485   :  { %v13362_v20 = vpop.eup %13361 }
 0x486   :  { %v429_v21 = vsel %vm370_vm7, %v13362_v20, 0.0 }
 0x487   :  { %430 = vadd.xlane.f32.xlu0 %v429_v21 }
 0x48d   :  { %v13364_v22 = vpop.eup %13363 }
 0x48e   :  { %v545_v23 = vsel %vm370_vm7, %v13364_v22, 0.0 }
 0x48f   :  { %546 = vadd.xlane.f32.xlu1 %v545_v23 }
 0x514   :  { %v431_v24 = vpop.xlane.xlu0 %430 }
 0x515   :  { %13365 = vrcp.f32 %v431_v24 }
 0x51c   :  { %v547_v25 = vpop.xlane.xlu1 %546 }
 0x51d   :  { %13367 = vrcp.f32 %v547_v25 }
 0x51f   :  { %v13366_v26 = vpop.eup %13365 }
 0x520   :  { %v433_v27 = vmul.f32 %v13366_v26, %v13362_v20  ;;  %v1063_v20 = vsel %vm438_vm8, %v1058_v16, 0 }
 0x522   :  { %v434_v30 = vpack.c.bf16 %v433_v27, %v433_v27 }
 0x524   :  { %12022 = vmatmul.mubr.msk.bf16.vlgmr.msra.gmra.mrb[12].mxu1 %vm370_vm7, %v434_v30 }
 0x525   :  { %12032 = vmatpush3.bf16.msra.mxu1 %v557_v31  ;;  %12033 = vmatprep.mubr.msk.bf16.mxu1 %vm13705_vm0, %v13704_v0 }
 0x526   :  { %12045 = vmatprep.subr.bf16.mxu1 %v13704_v0 }
 0x527   :  { %v13368_v32 = vpop.eup %13367 }
 0x528   :  { %v549_v33 = vmul.f32 %v13368_v32, %v13364_v22 }
 0x52a   :  { %v550_v35 = vpack.c.bf16 %v549_v33, %v549_v33 }
 0x52c   :  { %12034 = vmatmul.mubr.msk.bf16.vlgmr.msra.gmra.mrb[16].mxu1 %vm370_vm7, %v550_v35 }
 0x52d   :  { %12046 = vmatpush3.bf16.msra.mxu1 %v13240_v34  ;;  %12049 = vmatprep.mubr.msk.bf16.mxu1 %vm13705_vm0, %v13704_v0 }
 0x52e   :  { %12047 = vmatprep.subr.bf16.mxu1 %v13704_v0 }
 0x531   :  { %12048 = vmatpush3.bf16.msra.mxu1 %v13241_v28 }
 0x532   :  { %12061 = vmatprep.subr.bf16.mxu1 %v13704_v0 }
 0x534   :  { %12050 = vmatmul.mubr.msk.bf16.vlgmr.msra.gmra.mrb[20].mxu1 %vm116_vm2, %v13836_v62 }
 0x535   :  { %12063 = vmatprep.mubr.msk.bf16.mxu1 %vm13705_vm0, %v13704_v0 }
 0x5f7   :  { %v476_v36 = vpop.f32.mrb[12].mxu1 }
 0x5f8   :  { %v12023_v38 = vpop.f32.mrb[13].mxu1  ;;  %v482_v18 = vpack.c.bf16 %v476_v36, %v476_v36 }
 0x5f9   :  { %v479_v39 = vpop.f32.mrb[14].mxu1 }
 0x5fa   :  { %v12024_v41 = vpop.f32.mrb[15].mxu1 }
 0x5ff   :  { %v13956_v42 = vpop.f32.mrb[16].mxu1 }
 0x600   :  { %v12035_v43 = vpop.f32.mrb[17].mxu1 }
 0x601   :  { %v596_v44 = vpop.f32.mrb[18].mxu1 }
 0x602   :  { %v12036_v45 = vpop.f32.mrb[19].mxu1 }
 0x607   :  { %v720_v47 = vpop.f32.mrb[20].mxu1 }
 0x608   :  { %v12051_v48 = vpop.f32.mrb[21].mxu1  ;;  %v721_v51 = vadd.f32 %v10916_v46, %v720_v47 }
 0x609   :  { %v723_v50 = vpop.f32.mrb[22].mxu1 }
 0x60a   :  { %v724_v52 = vadd.f32 %v10916_v46, %v723_v50  ;;  %v12052_v53 = vpop.f32.mrb[23].mxu1 }
 0x60c   :  { %v727_v54 = vpack.c.bf16 %v724_v52, %v721_v51 }
 0x60e   :  { %v798_v55 = vsel %vm370_vm7, %v727_v54, 0  ;;  %v996_v21 = vrot.slane %v727_v54, 4 }
 0x60f   :  { %12062 = vmatpush3.bf16.xpose.msra.mxu1 %v798_v55 }
 0x610   :  { %12073 = vmatprep.subr.bf16.mxu1 %v13704_v0  ;;  %v1001_v10 = vsel %vm370_vm7, %v996_v21, 0 }
 0x616   :  { %12064 = vmatmul.mubr.msk.bf16.vlgmr.msra.gmra.mrb[24].mxu1 %vm370_vm7, %v13923_v2 }
 0x617   :  { %12075 = vmatprep.mubr.msk.bf16.mxu1 %vm13705_vm0, %v13704_v0  ;;  %12074 = vmatpush3.bf16.msra.mxu1 %v905_v8 }
 0x618   :  { %12085 = vmatprep.subr.bf16.mxu1 %v13704_v0 }
 0x6e9   :  { %v834_v56 = vpop.f32.mrb[24].mxu1 }
 0x6ea   :  { %v840_v57 = vmul.f32 0.35355338, %v834_v56  ;;  %v12065_v58 = vpop.f32.mrb[25].mxu1  ;;  %v13242_v56 = vld [vmem:[%s16304_s4 + $0x60] sm:$0xff]  }
 0x6eb   :  { %v837_v59 = vpop.f32.mrb[26].mxu1  ;;  %v13243_v58 = vld [vmem:[%s16304_s4 + $0x68] sm:$0xff]  }
 0x6ec   :  { %v12066_v60 = vpop.f32.mrb[27].mxu1  ;;  %v841_v61 = vadd.f32 %v840_v57, %v13909_v40  ;;  %v599_v57 = vpack.c.bf16 %v13956_v42, %v13956_v42  ;;  %v13244_v59 = vld [vmem:[%s16304_s4 + $0x20] sm:$0xff]  }
 0x6ee   :  { %v842_v63 = vsel %vm370_vm7, %v841_v61, -inf }
 0x6ef   :  { %843 = vmax.xlane.f32.xlu0 %v842_v63 }
 0x77c   :  { %v844_v1 = vpop.xlane.xlu0 %843 }
 0x77d   :  { %v845_v3 = vsub.f32 %v841_v61, %v844_v1 }
 0x77f   :  { %v846_v4 = vmul.f32 1.442695, %v845_v3  ;;  %v13245_v3 = vld [vmem:[%s16304_s4 + $0x28] sm:$0xff]  }
 0x781   :  { %13369 = vpow2.f32 %v846_v4 }
 0x78b   :  { %v13370_v5 = vpop.eup %13369 }
 0x78c   :  { %v848_v6 = vsel %vm370_vm7, %v13370_v5, 0.0 }
 0x78d   :  { %849 = vadd.xlane.f32.xlu1 %v848_v6 }
 0x81a   :  { %v850_v9 = vpop.xlane.xlu1 %849 }
 0x81b   :  { %13371 = vrcp.f32 %v850_v9  ;;  %v13247_v9 = vld [vmem:[%s16304_s4 + $0xa8] sm:$0xff]  }
 0x825   :  { %v13372_v11 = vpop.eup %13371 }
 0x826   :  { %v852_v13 = vmul.f32 %v13372_v11, %v13370_v5  ;;  %v13246_v5 = vld [vmem:[%s16304_s4 + $0xa0] sm:$0xff]  }
 0x827   :  { %v10949_v11 = vld [vmem:[%s16305_s10 + $0x6] ss:$0 sm:$0xff] }
 0x828   :  { %v853_v14 = vpack.c.bf16 %v852_v13, %v852_v13 }
 0x82a   :  { %12070 = vmatmul.mubr.msk.bf16.vlgmr.msra.gmra.mrb[20].mxu0 %vm370_vm7, %v853_v14 }
 0x82b   :  { %12080 = vmatpush3.bf16.msra.mxu0 %v951_v15  ;;  %12081 = vmatprep.mubr.msk.bf16.mxu0 %vm13705_vm0, %v13704_v0 }
 0x82c   :  { %12091 = vmatprep.subr.bf16.mxu0 %v13704_v0 }
 0x832   :  { %12082 = vmatmul.mubr.msk.bf16.vlgmr.msra.gmra.mrb[24].mxu0 %vm370_vm7, %v482_v18 }
 0x833   :  { %12092 = vmatpush3.bf16.msra.mxu0 %v1063_v20  ;;  %12093 = vmatprep.mubr.msk.bf16.mxu0 %vm13705_vm0, %v13704_v0 }
 0x834   :  { %12103 = vmatprep.subr.bf16.mxu0 %v13704_v0 }
 0x8fd   :  { %v894_v22 = vpop.f32.mrb[20].mxu0 }
 0x8fe   :  { %v900_v23 = vpack.c.bf16 %v894_v22, %v894_v22  ;;  %v12071_v24 = vpop.f32.mrb[21].mxu0 }
 0x8ff   :  { %v897_v25 = vpop.f32.mrb[22].mxu0 }
 0x900   :  { %v12072_v26 = vpop.f32.mrb[23].mxu0  ;;  %12076 = vmatmul.mubr.msk.bf16.vlgmr.msra.gmra.mrb[28].mxu1 %vm370_vm7, %v900_v23 }
 0x901   :  { %12086 = vmatpush3.bf16.xpose.msra.mxu1 %v1001_v10  ;;  %12087 = vmatprep.mubr.msk.bf16.mxu1 %vm13705_vm0, %v13704_v0  ;;  %v10941_v10 = vld [vmem:[%s16305_s10 + $0x2] ss:$0 sm:$0xff] }
 0x902   :  { %12097 = vmatprep.subr.bf16.mxu1 %v13704_v0 }
 0x905   :  { %v987_v27 = vpop.f32.mrb[24].mxu0 }
 0x906   :  { %v12083_v30 = vpop.f32.mrb[25].mxu0 }
 0x907   :  { %v990_v31 = vpop.f32.mrb[26].mxu0 }
 0x908   :  { %v12084_v32 = vpop.f32.mrb[27].mxu0  ;;  %12088 = vmatmul.mubr.msk.bf16.vlgmr.msra.gmra.mrb[32].mxu1 %vm370_vm7, %v994_v29 }
 0x909   :  { %12098 = vmatpush3.bf16.msra.mxu1 %v905_v8  ;;  %12099 = vmatprep.mubr.msk.bf16.mxu1 %vm13705_vm0, %v13704_v0 }
 0x90a   :  { %12109 = vmatprep.subr.bf16.mxu1 %v13704_v0 }
 0x9d3   :  { %v941_v33 = vpop.f32.mrb[28].mxu1 }
 0x9d4   :  { %v13999_v34 = vadd.f32 %v987_v27, %v941_v33  ;;  %v12077_v35 = vpop.f32.mrb[29].mxu1 }
 0x9d5   :  { %v944_v28 = vpop.f32.mrb[30].mxu1 }
 0x9d6   :  { %v12078_v36 = vpop.f32.mrb[31].mxu1  ;;  %v10957_v28 = vld [vmem:[%s16305_s10 + $0xa] ss:$0 sm:$0xff] }
 0x9db   :  { %v1037_v38 = vpop.f32.mrb[32].mxu1 }
 0x9dc   :  { %v1043_v39 = vmul.f32 0.35355338, %v1037_v38  ;;  %v12089_v2 = vpop.f32.mrb[33].mxu1 }
 0x9dd   :  { %v1040_v41 = vpop.f32.mrb[34].mxu1 }
 0x9de   :  { %v12090_v43 = vpop.f32.mrb[35].mxu1  ;;  %v1044_v44 = vadd.f32 %v1043_v39, %v13916_v49 }
 0x9e0   :  { %v1045_v45 = vsel %vm370_vm7, %v1044_v44, -inf }
 0x9e1   :  { %1046 = vmax.xlane.f32.xlu0 %v1045_v45 }
 0xa6e   :  { %v1047_v46 = vpop.xlane.xlu0 %1046 }
 0xa6f   :  { %v1048_v47 = vsub.f32 %v1044_v44, %v1047_v46 }
 0xa71   :  { %v1049_v48 = vmul.f32 1.442695, %v1048_v47 }
 0xa73   :  { %13373 = vpow2.f32 %v1049_v48 }
 0xa7d   :  { %v13374_v50 = vpop.eup %13373 }
 0xa7e   :  { %v1051_v51 = vsel %vm370_vm7, %v13374_v50, 0.0 }
 0xa7f   :  { %1052 = vadd.xlane.f32.xlu1 %v1051_v51 }
 0xb0c   :  { %v1053_v52 = vpop.xlane.xlu1 %1052 }
 0xb0d   :  { %13375 = vrcp.f32 %v1053_v52 }
 0xb17   :  { %v13376_v53 = vpop.eup %13375 }
 0xb18   :  { %v1055_v54 = vmul.f32 %v13376_v53, %v13374_v50 }
 0xb1a   :  { %v1056_v55 = vpack.c.bf16 %v1055_v54, %v1055_v54 }
 0xb1c   :  { %12094 = vmatmul.mubr.msk.bf16.vlgmr.msra.gmra.mrb[28].mxu0 %vm370_vm7, %v1056_v55 }
 0xb1d   :  { %12104 = vmatpush3.bf16.msra.mxu0 %v951_v15  ;;  %12105 = vmatprep.mubr.msk.bf16.mxu0 %vm13705_vm0, %v13704_v0 }
 0xb1e   :  { %12117 = vmatprep.subr.bf16.mxu0 %v13704_v0 }
 0xb24   :  { %12106 = vmatmul.mubr.msk.bf16.vlgmr.msra.gmra.mrb[32].mxu0 %vm370_vm7, %v599_v57 }
 0xb25   :  { %12118 = vmatpush3.bf16.msra.mxu0 %v13242_v56  ;;  %12121 = vmatprep.mubr.msk.bf16.mxu0 %vm13705_vm0, %v13704_v0 }
 0xb26   :  { %12119 = vmatprep.subr.bf16.mxu0 %v13704_v0 }
 0xb29   :  { %12120 = vmatpush3.bf16.msra.mxu0 %v13243_v58 }
 0xb2a   :  { %12133 = vmatprep.subr.bf16.mxu0 %v13704_v0 }
 0xb2c   :  { %12122 = vmatmul.mubr.msk.bf16.vlgmr.msra.gmra.mrb[36].mxu0 %vm116_vm2, %v13836_v62 }
 0xb2d   :  { %12135 = vmatprep.mubr.msk.bf16.mxu0 %vm13705_vm0, %v13704_v0 }
 0xbef   :  { %v1099_v42 = vpop.f32.mrb[28].mxu0 }
 0xbf0   :  { %v1105_v60 = vpack.c.bf16 %v1099_v42, %v1099_v42  ;;  %v12095_v61 = vpop.f32.mrb[29].mxu0  ;;  %v10961_v42 = vld [vmem:[%s16307_s5 + $0x8] sm:$0xf] }
 0xbf1   :  { %v1102_v63 = vpop.f32.mrb[30].mxu0 }
 0xbf2   :  { %v12096_v1 = vpop.f32.mrb[31].mxu0  ;;  %12100 = vmatmul.mubr.msk.bf16.vlgmr.msra.gmra.mrb[36].mxu1 %vm370_vm7, %v1105_v60 }
 0xbf3   :  { %12110 = vmatpush3.bf16.msra.mxu1 %v13244_v59  ;;  %12113 = vmatprep.mubr.msk.bf16.mxu1 %vm13705_vm0, %v13704_v0  ;;  %v1497_v59 = vsel %vm438_vm8, %v10961_v42, 0  ;;  %v10988_v42 = vld [vmem:[%s16305_s10 + $0xb] ss:$0 sm:$0xff] }
 0xbf4   :  { %12111 = vmatprep.subr.bf16.mxu1 %v13704_v0 }
 0xbf7   :  { %v1186_v4 = vpop.f32.mrb[32].mxu0  ;;  %12112 = vmatpush3.bf16.msra.mxu1 %v13245_v3 }
 0xbf8   :  { %v12107_v6 = vpop.f32.mrb[33].mxu0  ;;  %12125 = vmatprep.subr.bf16.mxu1 %v13704_v0 }
 0xbf9   :  { %v1189_v7 = vpop.f32.mrb[34].mxu0 }
 0xbfa   :  { %v12108_v8 = vpop.f32.mrb[35].mxu0  ;;  %12114 = vmatmul.mubr.msk.bf16.vlgmr.msra.gmra.mrb[40].mxu1 %vm116_vm2, %v13836_v62 }
 0xbfb   :  { %12126 = vmatpush3.bf16.msra.mxu1 %v13246_v5  ;;  %12129 = vmatprep.mubr.msk.bf16.mxu1 %vm13705_vm0, %v13704_v0 }
 0xbfc   :  { %12127 = vmatprep.subr.bf16.mxu1 %v13704_v0 }
 0xbff   :  { %v1312_v12 = vpop.f32.mrb[36].mxu0  ;;  %12128 = vmatpush3.bf16.msra.mxu1 %v13247_v9 }
 0xc00   :  { %v12123_v13 = vpop.f32.mrb[37].mxu0  ;;  %12139 = vmatprep.subr.bf16.mxu1 %v13704_v0  ;;  %v1313_v15 = vadd.f32 %v10949_v11, %v1312_v12 }
 0xc01   :  { %v1315_v14 = vpop.f32.mrb[38].mxu0 }
 0xc02   :  { %v1316_v16 = vadd.f32 %v10949_v11, %v1315_v14  ;;  %v12124_v18 = vpop.f32.mrb[39].mxu0  ;;  %12130 = vmatmul.mubr.msk.bf16.vlgmr.msra.gmra.mrb[44].mxu1 %vm116_vm2, %v13836_v62 }
 0xc03   :  { %12141 = vmatprep.mubr.msk.bf16.mxu1 %vm13705_vm0, %v13704_v0 }
 0xc04   :  { %v1319_v20 = vpack.c.bf16 %v1316_v16, %v1313_v15 }
 0xc06   :  { %v1390_v21 = vsel %vm370_vm7, %v1319_v20, 0  ;;  %v1543_v1 = vrot.slane %v1319_v20, 4 }
 0xc07   :  { %12134 = vmatpush3.bf16.xpose.msra.mxu0 %v1390_v21 }
 0xc08   :  { %12145 = vmatprep.subr.bf16.mxu0 %v13704_v0 }
 0xcc5   :  { %v1143_v22 = vpop.f32.mrb[36].mxu1 }
 0xcc6   :  { %v14057_v23 = vadd.f32 %v1186_v4, %v1143_v22  ;;  %v12101_v24 = vpop.f32.mrb[37].mxu1  ;;  %v1548_v4 = vsel %vm370_vm7, %v1543_v1, 0 }
 0xcc7   :  { %v1146_v25 = vpop.f32.mrb[38].mxu1 }
 0xcc8   :  { %v12102_v26 = vpop.f32.mrb[39].mxu1 }
 0xccd   :  { %v1248_v27 = vpop.f32.mrb[40].mxu1 }
 0xcce   :  { %v12115_v29 = vpop.f32.mrb[41].mxu1  ;;  %v1249_v31 = vadd.f32 %v10941_v10, %v1248_v27 }
 0xccf   :  { %v1251_v30 = vpop.f32.mrb[42].mxu1 }
 0xcd0   :  { %v1252_v32 = vadd.f32 %v10941_v10, %v1251_v30  ;;  %v12116_v33 = vpop.f32.mrb[43].mxu1 }
 0xcd2   :  { %v1255_v35 = vpack.c.bf16 %v1252_v32, %v1249_v31 }
 0xcd4   :  { %12136 = vmatmul.mubr.msk.bf16.vlgmr.msra.gmra.mrb[40].mxu0 %vm370_vm7, %v1255_v35  ;;  %v1541_v5 = vrot.slane %v1255_v35, 4 }
 0xcd5   :  { %v1376_v36 = vpop.f32.mrb[44].mxu1  ;;  %12147 = vmatprep.mubr.msk.bf16.mxu0 %vm13705_vm0, %v13704_v0  ;;  %12146 = vmatpush3.bf16.msra.mxu0 %v1497_v59 }
 0xcd6   :  { %v12131_v38 = vpop.f32.mrb[45].mxu1  ;;  %v1377_v2 = vadd.f32 %v10957_v28, %v1376_v36  ;;  %12157 = vmatprep.subr.bf16.mxu0 %v13704_v0 }
 0xcd7   :  { %v1379_v39 = vpop.f32.mrb[46].mxu1  ;;  %v13248_v38 = vld [vmem:[%s16304_s4 + $0x30] sm:$0xff]  }
 0xcd8   :  { %v1380_v41 = vadd.f32 %v10957_v28, %v1379_v39  ;;  %v12132_v43 = vpop.f32.mrb[47].mxu1 }
 0xcda   :  { %v1383_v44 = vpack.c.bf16 %v1380_v41, %v1377_v2  ;;  %v13250_v2 = vld [vmem:[%s16304_s4 + $0xb0] sm:$0xff]   ;;  %v13251_v41 = vld [vmem:[%s16304_s4 + $0xb8] sm:$0xff]  }
 0xcdc   :  { %v1450_v45 = vsel %vm438_vm8, %v1383_v44, 0  ;;  %v1605_v6 = vrot.slane %v1383_v44, 4  ;;  %v13252_v44 = vld [vmem:[%s16304_s4 + $0x70] sm:$0xff]  }
 0xcdd   :  { %12140 = vmatpush3.bf16.msra.mxu1 %v1450_v45 }
 0xcde   :  { %12151 = vmatprep.subr.bf16.mxu1 %v13704_v0  ;;  %v1610_v13 = vsel %vm438_vm8, %v1605_v6, 0 }
 0xda7   :  { %v1426_v46 = vpop.f32.mrb[40].mxu0 }
 0xda8   :  { %v1432_v47 = vmul.f32 0.35355338, %v1426_v46  ;;  %v12137_v48 = vpop.f32.mrb[41].mxu0 }
 0xda9   :  { %v1429_v50 = vpop.f32.mrb[42].mxu0 }
 0xdaa   :  { %v12138_v51 = vpop.f32.mrb[43].mxu0  ;;  %v1433_v52 = vadd.f32 %v1432_v47, %v13909_v40  ;;  %v13253_v50 = vld [vmem:[%s16304_s4 + $0x78] sm:$0xff]  }
 0xdab   :  { %v10972_v51 = vld [vmem:[%s16305_s10 + $0x3] ss:$0 sm:$0xff] }
 0xdac   :  { %v1434_v53 = vsel %vm370_vm7, %v1433_v52, -inf }
 0xdad   :  { %1435 = vmax.xlane.f32.xlu0 %v1434_v53 }
 0xe3a   :  { %v1436_v54 = vpop.xlane.xlu0 %1435 }
 0xe3b   :  { %v1437_v55 = vsub.f32 %v1433_v52, %v1436_v54 }
 0xe3d   :  { %v1438_v56 = vmul.f32 1.442695, %v1437_v55 }
 0xe3f   :  { %13377 = vpow2.f32 %v1438_v56 }
 0xe49   :  { %v13378_v57 = vpop.eup %13377 }
 0xe4a   :  { %v1440_v58 = vsel %vm370_vm7, %v13378_v57, 0.0 }
 0xe4b   :  { %1441 = vadd.xlane.f32.xlu1 %v1440_v58 }
 0xed8   :  { %v1442_v60 = vpop.xlane.xlu1 %1441 }
 0xed9   :  { %13379 = vrcp.f32 %v1442_v60 }
 0xee3   :  { %v13380_v61 = vpop.eup %13379 }
 0xee4   :  { %v1444_v63 = vmul.f32 %v13380_v61, %v13378_v57 }
 0xee6   :  { %v1445_v3 = vpack.c.bf16 %v1444_v63, %v1444_v63 }
 0xee8   :  { %12142 = vmatmul.mubr.msk.bf16.vlgmr.msra.gmra.mrb[48].mxu1 %vm370_vm7, %v1445_v3 }
 0xee9   :  { %12152 = vmatpush3.bf16.xpose.msra.mxu1 %v1548_v4  ;;  %12153 = vmatprep.mubr.msk.bf16.mxu1 %vm13705_vm0, %v13704_v0 }
 0xeea   :  { %12163 = vmatprep.subr.bf16.mxu1 %v13704_v0 }
 0xef0   :  { %12154 = vmatmul.mubr.msk.bf16.vlgmr.msra.gmra.mrb[52].mxu1 %vm370_vm7, %v1541_v5 }
 0xef1   :  { %12164 = vmatpush3.bf16.msra.mxu1 %v1497_v59  ;;  %12165 = vmatprep.mubr.msk.bf16.mxu1 %vm13705_vm0, %v13704_v0 }
 0xef2   :  { %12177 = vmatprep.subr.bf16.mxu1 %v13704_v0 }
 0xfbb   :  { %v1486_v7 = vpop.f32.mrb[48].mxu1 }
 0xfbc   :  { %v1492_v8 = vpack.c.bf16 %v1486_v7, %v1486_v7  ;;  %v12143_v9 = vpop.f32.mrb[49].mxu1 }
 0xfbd   :  { %v1489_v11 = vpop.f32.mrb[50].mxu1 }
 0xfbe   :  { %v12144_v12 = vpop.f32.mrb[51].mxu1  ;;  %12148 = vmatmul.mubr.msk.bf16.vlgmr.msra.gmra.mrb[44].mxu0 %vm370_vm7, %v1492_v8  ;;  %v10980_v11 = vld [vmem:[%s16305_s10 + $0x7] ss:$0 sm:$0xff] }
 0xfbf   :  { %12158 = vmatpush3.bf16.msra.mxu0 %v1610_v13  ;;  %12159 = vmatprep.mubr.msk.bf16.mxu0 %vm13705_vm0, %v13704_v0 }
 0xfc0   :  { %12169 = vmatprep.subr.bf16.mxu0 %v13704_v0 }
 0xfc3   :  { %v1584_v14 = vpop.f32.mrb[52].mxu1 }
 0xfc4   :  { %v1590_v15 = vmul.f32 0.35355338, %v1584_v14  ;;  %v12155_v16 = vpop.f32.mrb[53].mxu1 }
 0xfc5   :  { %v1587_v18 = vpop.f32.mrb[54].mxu1 }
 0xfc6   :  { %v12156_v20 = vpop.f32.mrb[55].mxu1  ;;  %v1591_v21 = vadd.f32 %v1590_v15, %v13916_v49 }
 0xfc8   :  { %v1592_v22 = vsel %vm370_vm7, %v1591_v21, -inf }
 0xfc9   :  { %1593 = vmax.xlane.f32.xlu0 %v1592_v22 }
0x1056   :  { %v1594_v24 = vpop.xlane.xlu0 %1593 }
0x1057   :  { %v1595_v25 = vsub.f32 %v1591_v21, %v1594_v24 }
0x1059   :  { %v1596_v26 = vmul.f32 1.442695, %v1595_v25 }
0x105b   :  { %13381 = vpow2.f32 %v1596_v26 }
0x1065   :  { %v13382_v10 = vpop.eup %13381 }
0x1066   :  { %v1598_v27 = vsel %vm370_vm7, %v13382_v10, 0.0 }
0x1067   :  { %1599 = vadd.xlane.f32.xlu1 %v1598_v27 }
0x1091   :  { %v1533_v29 = vpop.f32.mrb[44].mxu0 }
0x1092   :  { %v14096_v30 = vadd.f32 %v1533_v29, %v13999_v34  ;;  %v12149_v31 = vpop.f32.mrb[45].mxu0  ;;  %v13249_v34 = vld [vmem:[%s16304_s4 + $0x38] sm:$0xff]  }
0x1093   :  { %v1536_v32 = vpop.f32.mrb[46].mxu0 }
0x1094   :  { %v12150_v33 = vpop.f32.mrb[47].mxu0 }
0x10f4   :  { %v1600_v35 = vpop.xlane.xlu1 %1599 }
0x10f5   :  { %13383 = vrcp.f32 %v1600_v35 }
0x10ff   :  { %v13384_v28 = vpop.eup %13383 }
0x1100   :  { %v1602_v36 = vmul.f32 %v13384_v28, %v13382_v10  ;;  %v10992_v28 = vld [vmem:[%s16307_s5 + $0xc] sm:$0xf] }
0x1102   :  { %v1603_v39 = vpack.c.bf16 %v1602_v36, %v1602_v36  ;;  %v2002_v36 = vsel %vm438_vm8, %v10992_v28, 0 }
0x1104   :  { %12160 = vmatmul.mubr.msk.bf16.vlgmr.msra.gmra.mrb[48].mxu0 %vm370_vm7, %v1603_v39 }
0x1105   :  { %12170 = vmatpush3.bf16.msra.mxu0 %v13248_v38  ;;  %12173 = vmatprep.mubr.msk.bf16.mxu0 %vm13705_vm0, %v13704_v0 }
0x1106   :  { %12171 = vmatprep.subr.bf16.mxu0 %v13704_v0 }
0x1109   :  { %12172 = vmatpush3.bf16.msra.mxu0 %v13249_v34 }
0x110a   :  { %12185 = vmatprep.subr.bf16.mxu0 %v13704_v0 }
0x110c   :  { %12174 = vmatmul.mubr.msk.bf16.vlgmr.msra.gmra.mrb[52].mxu0 %vm116_vm2, %v13836_v62 }
0x110d   :  { %12186 = vmatpush3.bf16.msra.mxu0 %v13250_v2  ;;  %12189 = vmatprep.mubr.msk.bf16.mxu0 %vm13705_vm0, %v13704_v0 }
0x110e   :  { %12187 = vmatprep.subr.bf16.mxu0 %v13704_v0 }
0x1111   :  { %12188 = vmatpush3.bf16.msra.mxu0 %v13251_v41 }
0x1112   :  { %12199 = vmatprep.subr.bf16.mxu0 %v13704_v0 }
0x1114   :  { %12190 = vmatmul.mubr.msk.bf16.vlgmr.msra.gmra.mrb[56].mxu0 %vm116_vm2, %v13836_v62 }
0x1115   :  { %12201 = vmatprep.mubr.msk.bf16.mxu0 %vm13705_vm0, %v13704_v0 }
0x11d7   :  { %v1646_v43 = vpop.f32.mrb[48].mxu0 }
0x11d8   :  { %v1652_v45 = vpack.c.bf16 %v1646_v43, %v1646_v43  ;;  %v12161_v46 = vpop.f32.mrb[49].mxu0 }
0x11d9   :  { %v1649_v47 = vpop.f32.mrb[50].mxu0 }
0x11da   :  { %v12162_v48 = vpop.f32.mrb[51].mxu0  ;;  %12166 = vmatmul.mubr.msk.bf16.vlgmr.msra.gmra.mrb[56].mxu1 %vm370_vm7, %v1652_v45 }
0x11db   :  { %12178 = vmatpush3.bf16.msra.mxu1 %v13252_v44  ;;  %12181 = vmatprep.mubr.msk.bf16.mxu1 %vm13705_vm0, %v13704_v0 }
0x11dc   :  { %12179 = vmatprep.subr.bf16.mxu1 %v13704_v0 }
0x11df   :  { %v1753_v52 = vpop.f32.mrb[52].mxu0  ;;  %12180 = vmatpush3.bf16.msra.mxu1 %v13253_v50 }
0x11e0   :  { %v12175_v53 = vpop.f32.mrb[53].mxu0  ;;  %12193 = vmatprep.subr.bf16.mxu1 %v13704_v0  ;;  %v1754_v55 = vadd.f32 %v10972_v51, %v1753_v52 }
0x11e1   :  { %v1756_v54 = vpop.f32.mrb[54].mxu0 }
0x11e2   :  { %v1757_v56 = vadd.f32 %v10972_v51, %v1756_v54  ;;  %v12176_v57 = vpop.f32.mrb[55].mxu0  ;;  %12182 = vmatmul.mubr.msk.bf16.vlgmr.msra.gmra.mrb[60].mxu1 %vm116_vm2, %v13836_v62 }
0x11e3   :  { %12195 = vmatprep.mubr.msk.bf16.mxu1 %vm13705_vm0, %v13704_v0 }
0x11e4   :  { %v1760_v58 = vpack.c.bf16 %v1757_v56, %v1754_v55 }
0x11e6   :  { %v2046_v43 = vrot.slane %v1760_v58, 4 }
0x11e7   :  { %v1881_v59 = vpop.f32.mrb[56].mxu0 }
0x11e8   :  { %v12191_v60 = vpop.f32.mrb[57].mxu0  ;;  %v1882_v63 = vadd.f32 %v10988_v42, %v1881_v59 }
0x11e9   :  { %v1884_v61 = vpop.f32.mrb[58].mxu0 }
0x11ea   :  { %v1885_v1 = vadd.f32 %v10988_v42, %v1884_v61  ;;  %v12192_v3 = vpop.f32.mrb[59].mxu0 }
0x11ec   :  { %v14146_v4 = vpack.c.bf16 %v1885_v1, %v1882_v63 }
0x11ee   :  { %v1955_v5 = vsel %vm438_vm8, %v14146_v4, 0  ;;  %v2110_v44 = vrot.slane %v14146_v4, 4 }
0x11ef   :  { %12200 = vmatpush3.bf16.msra.mxu0 %v1955_v5 }
0x11f0   :  { %12211 = vmatprep.subr.bf16.mxu0 %v13704_v0  ;;  %v2115_v51 = vsel %vm438_vm8, %v2110_v44, 0 }
0x12ad   :  { %v1690_v62 = vpop.f32.mrb[56].mxu1 }
0x12ae   :  { %v14152_v6 = vadd.f32 %v1690_v62, %v14057_v23  ;;  %v12167_v7 = vpop.f32.mrb[57].mxu1 }
0x12af   :  { %v1693_v8 = vpop.f32.mrb[58].mxu1 }
0x12b0   :  { %v12168_v9 = vpop.f32.mrb[59].mxu1 }
0x12b5   :  { %v1817_v12 = vpop.f32.mrb[60].mxu1 }
0x12b6   :  { %v12183_v13 = vpop.f32.mrb[61].mxu1  ;;  %v1818_v15 = vadd.f32 %v10980_v11, %v1817_v12  ;;  %v13689_v12 = vld [vmem:[%s16303_s11 + $0x2a] sm:$0xff] }
0x12b7   :  { %v1820_v14 = vpop.f32.mrb[62].mxu1 }
0x12b8   :  { %v1821_v16 = vadd.f32 %v10980_v11, %v1820_v14  ;;  %v12184_v18 = vpop.f32.mrb[63].mxu1  ;;  %v2476_v11 = vld [vmem:[%s16308_s1] sm:$0xff] }
0x12b9   :  { %v2484_v13 = vmul.f32 5.656854, %v2476_v11 }
0x12ba   :  { %v1824_v20 = vpack.c.bf16 %v1821_v16, %v1818_v15 }
0x12bc   :  { %v1895_v21 = vsel %vm370_vm7, %v1824_v20, 0  ;;  %v2048_v34 = vrot.slane %v1824_v20, 4 }
0x12bd   :  { %12194 = vmatpush3.bf16.xpose.msra.mxu1 %v1895_v21 }
0x12be   :  { %12205 = vmatprep.subr.bf16.mxu1 %v13704_v0  ;;  %v2053_v41 = vsel %vm370_vm7, %v2048_v34, 0 }
0x12c4   :  { %12196 = vmatmul.mubr.msk.bf16.vlgmr.msra.gmra.mrb[64].mxu1 %vm370_vm7, %v1760_v58 }
0x12c5   :  { %12207 = vmatprep.mubr.msk.bf16.mxu1 %vm13705_vm0, %v13704_v0  ;;  %12206 = vmatpush3.bf16.msra.mxu1 %v2002_v36 }
0x12c6   :  { %12217 = vmatprep.subr.bf16.mxu1 %v13704_v0 }
0x1397   :  { %v1931_v23 = vpop.f32.mrb[64].mxu1 }
0x1398   :  { %v1937_v22 = vmul.f32 0.35355338, %v1931_v23  ;;  %v12197_v24 = vpop.f32.mrb[65].mxu1 }
0x1399   :  { %v1934_v25 = vpop.f32.mrb[66].mxu1 }
0x139a   :  { %v12198_v26 = vpop.f32.mrb[67].mxu1  ;;  %v1938_v10 = vadd.f32 %v1937_v22, %v13909_v40 }
0x139c   :  { %v1939_v27 = vsel %vm370_vm7, %v1938_v10, -inf }
0x139d   :  { %1940 = vmax.xlane.f32.xlu0 %v1939_v27 }
0x142a   :  { %v1941_v29 = vpop.xlane.xlu0 %1940 }
0x142b   :  { %v1942_v31 = vsub.f32 %v1938_v10, %v1941_v29 }
0x142d   :  { %v1943_v32 = vmul.f32 1.442695, %v1942_v31 }
0x142f   :  { %13385 = vpow2.f32 %v1943_v32 }
0x1439   :  { %v13386_v33 = vpop.eup %13385 }
0x143a   :  { %v1945_v35 = vsel %vm370_vm7, %v13386_v33, 0.0 }
0x143b   :  { %1946 = vadd.xlane.f32.xlu1 %v1945_v35 }
0x14c8   :  { %v1947_v40 = vpop.xlane.xlu1 %1946 }
0x14c9   :  { %13387 = vrcp.f32 %v1947_v40 }
0x14d3   :  { %v13388_v38 = vpop.eup %13387 }
0x14d4   :  { %v1949_v39 = vmul.f32 %v13388_v38, %v13386_v33  ;;  %v2477_v38 = vld [vmem:[%s16308_s1 + $0x8] sm:$0xff] }
0x14d6   :  { %v1950_v2 = vpack.c.bf16 %v1949_v39, %v1949_v39 }
0x14d8   :  { %12202 = vmatmul.mubr.msk.bf16.vlgmr.msra.gmra.mrb[60].mxu0 %vm370_vm7, %v1950_v2 }
0x14d9   :  { %12212 = vmatpush3.bf16.xpose.msra.mxu0 %v2053_v41  ;;  %12213 = vmatprep.mubr.msk.bf16.mxu0 %vm13705_vm0, %v13704_v0  ;;  %v2485_v41 = vmul.f32 5.656854, %v2477_v38 }
0x14da   :  { %12223 = vmatprep.subr.bf16.mxu0 %v13704_v0 }
0x14e0   :  { %12214 = vmatmul.mubr.msk.bf16.vlgmr.msra.gmra.mrb[64].mxu0 %vm370_vm7, %v2046_v43 }
0x14e1   :  { %12224 = vmatpush3.bf16.msra.mxu0 %v2002_v36  ;;  %12225 = vmatprep.mubr.msk.bf16.mxu0 %vm13705_vm0, %v13704_v0 }
0x14e2   :  { %12237 = vmatprep.subr.bf16.mxu0 %v13704_v0 }
0x15ab   :  { %v1991_v45 = vpop.f32.mrb[60].mxu0 }
0x15ac   :  { %v1997_v46 = vpack.c.bf16 %v1991_v45, %v1991_v45  ;;  %v12203_v47 = vpop.f32.mrb[61].mxu0 }
0x15ad   :  { %v1994_v48 = vpop.f32.mrb[62].mxu0 }
0x15ae   :  { %v12204_v50 = vpop.f32.mrb[63].mxu0  ;;  %12208 = vmatmul.mubr.msk.bf16.vlgmr.msra.gmra.mrb[68].mxu1 %vm370_vm7, %v1997_v46 }
0x15af   :  { %12218 = vmatpush3.bf16.msra.mxu1 %v2115_v51  ;;  %12219 = vmatprep.mubr.msk.bf16.mxu1 %vm13705_vm0, %v13704_v0 }
0x15b0   :  { %12229 = vmatprep.subr.bf16.mxu1 %v13704_v0 }
0x15b3   :  { %v2089_v52 = vpop.f32.mrb[64].mxu0 }
0x15b4   :  { %v2095_v53 = vmul.f32 0.35355338, %v2089_v52  ;;  %v12215_v54 = vpop.f32.mrb[65].mxu0 }
0x15b5   :  { %v2092_v55 = vpop.f32.mrb[66].mxu0 }
0x15b6   :  { %v12216_v56 = vpop.f32.mrb[67].mxu0  ;;  %v2096_v57 = vadd.f32 %v2095_v53, %v13916_v49  ;;  %v10999_v49 = vld [vmem:[%s16303_s11 + $0x4] ss:$0 sm:$0xff] }
0x15b8   :  { %v2097_v58 = vsel %vm370_vm7, %v2096_v57, -inf }
0x15b9   :  { %2098 = vmax.xlane.f32.xlu0 %v2097_v58 }
0x1646   :  { %v2099_v42 = vpop.xlane.xlu0 %2098 }
0x1647   :  { %v2100_v59 = vsub.f32 %v2096_v57, %v2099_v42  ;;  %v13254_v42 = vld [vmem:[%s16309_s6] sm:$0xff]  }
0x1649   :  { %v2101_v60 = vmul.f32 1.442695, %v2100_v59  ;;  %v13255_v59 = vld [vmem:[%s16309_s6 + $0x8] sm:$0xff]  }
0x164b   :  { %13389 = vpow2.f32 %v2101_v60  ;;  %v13260_v60 = vld [vmem:[%s16310_s7] sm:$0xff]  }
0x1655   :  { %v13390_v61 = vpop.eup %13389 }
0x1656   :  { %v2103_v63 = vsel %vm370_vm7, %v13390_v61, 0.0 }
0x1657   :  { %2104 = vadd.xlane.f32.xlu1 %v2103_v63 }
0x1681   :  { %v2038_v1 = vpop.f32.mrb[68].mxu1 }
0x1682   :  { %v2044_v3 = vadd.f32 %v2038_v1, %v14096_v30  ;;  %v12209_v4 = vpop.f32.mrb[69].mxu1  ;;  %v11014_v30 = vld [vmem:[%s16303_s11 + $0x21] ss:$0 sm:$0xff] }
0x1683   :  { %v2041_v5 = vpop.f32.mrb[70].mxu1 }
0x1684   :  { %v2202_v62 = vadd.f32 %v2044_v3, %v13799_v17  ;;  %v12210_v7 = vpop.f32.mrb[71].mxu1  ;;  %v2483_v17 = vadd.f32 %v13689_v12, %v11014_v30 }
0x1686   :  { %v14193_v8 = vadd.f32 %v10999_v49, %v2202_v62  ;;  %v14206_v14 = vadd.f32 %v2484_v13, %v2483_v17  ;;  %v14235_v47 = vadd.f32 %v2485_v41, %v2483_v17 }
0x1688   :  { %v2211_v9 = vsel %vm116_vm2, %v14193_v8, 0.0  ;;  %v2488_v15 = vsel %vm116_vm2, %v14206_v14, 0.0  ;;  %v2491_v50 = vsel %vm116_vm2, %v14235_v47, 0.0 }
0x1689   :  { %2212 = vadd.xlane.f32.xlu0 %v2211_v9 }
0x168d   :  { %2489 = vadd.xlane.f32.xlu0 %v2488_v15 }
0x16e4   :  { %v2105_v16 = vpop.xlane.xlu1 %2104 }
0x16e5   :  { %13391 = vrcp.f32 %v2105_v16 }
0x16ef   :  { %v13392_v18 = vpop.eup %13391 }
0x16f0   :  { %v2107_v20 = vmul.f32 %v13392_v18, %v13390_v61  ;;  %v13261_v61 = vld [vmem:[%s16310_s7 + $0x8] sm:$0xff]  }
0x16f2   :  { %v2108_v21 = vpack.c.bf16 %v2107_v20, %v2107_v20 }
0x16f4   :  { %12220 = vmatmul.mubr.msk.bf16.vlgmr.msra.gmra.mrb[72].mxu1 %vm370_vm7, %v2108_v21 }
0x16f5   :  { %12233 = vmatprep.mubr.msk.bf16.mxu1 %vm13705_vm0, %v13704_v0  ;;  %12230 = vmatpush3.bf16.msra.mxu1 %v13254_v42 }
0x16f6   :  { %12231 = vmatprep.subr.bf16.mxu1 %v13704_v0 }
0x16f9   :  { %12232 = vmatpush3.bf16.msra.mxu1 %v13255_v59  ;;  %v13258_v59 = vld [vmem:[%s16304_s4 + $0x100] sm:$0xff]  }
0x16fa   :  { %12249 = vmatprep.subr.bf16.mxu1 %v13704_v0 }
0x1716   :  { %v2213_v23 = vpop.xlane.xlu0 %2212 }
0x1717   :  { %v2217_v22 = vmul.f32 0.03125, %v2213_v23 }
0x1719   :  { %v14214_v24 = vsub.f32 %v14193_v8, %v2217_v22 }
0x171a   :  { %v2490_v10 = vpop.xlane.xlu0 %2489 }
0x171b   :  { %v2221_v25 = vmul.f32 %v14214_v24, %v14214_v24  ;;  %v2494_v27 = vmul.f32 0.03125, %v2490_v10 }
0x171d   :  { %v2223_v26 = vsel %vm116_vm2, %v2221_v25, 0.0  ;;  %v14220_v29 = vsub.f32 %v14206_v14, %v2494_v27 }
0x171e   :  { %2224 = vadd.xlane.f32.xlu0 %v2223_v26 }
0x171f   :  { %v2498_v31 = vmul.f32 %v14220_v29, %v14220_v29 }
0x1721   :  { %v2500_v32 = vsel %vm116_vm2, %v2498_v31, 0.0 }
0x1722   :  { %2501 = vadd.xlane.f32.xlu0 %v2500_v32 }
0x17ab   :  { %v2225_v63 = vpop.xlane.xlu0 %2224 }
0x17ac   :  { %v2229_v1 = vmul.f32 0.032258064, %v2225_v63  ;;  %v13262_v63 = vld [vmem:[%s16310_s7 + $0x10] sm:$0xff]  }
0x17ae   :  { %13393 = vrsqrt.f32 %v2229_v1  ;;  %vm2233_vm9 = vcmp.eq.f32.partialorder %v2229_v1, inf  ;;  %v2236_v12 = vand.u32 2147483648, %v2229_v1  ;;  %vm2235_vm10 = vcmp.eq.f32.partialorder %v2229_v1, 0.0 }
0x17af   :  { %v2502_v3 = vpop.xlane.xlu0 %2501 }
0x17b0   :  { %v2506_v4 = vmul.f32 0.032258064, %v2502_v3  ;;  %v11002_v3 = vld [vmem:[%s16303_s11 + $0x25] ss:$0 sm:$0xff] }
0x17b2   :  { %13395 = vrsqrt.f32 %v2506_v4  ;;  %vm2510_vm11 = vcmp.eq.f32.partialorder %v2506_v4, inf  ;;  %v2513_v18 = vand.u32 2147483648, %v2506_v4  ;;  %vm2512_vm12 = vcmp.eq.f32.partialorder %v2506_v4, 0.0 }
0x17b8   :  { %v13394_v5 = vpop.eup %13393 }
0x17bc   :  { %v13396_v30 = vpop.eup %13395 }
0x17bd   :  { %v2509_v15 = vmul.f32 %v13396_v30, %v2506_v4 }
0x17bf   :  { %v2511_v20 = vsel %vm2510_vm11, %v2506_v4, %v2509_v15 }
0x17c0   :  { %v2514_v22 = vsel %vm2512_vm12, %v2513_v18, %v2511_v20  ;;  %v13265_v20 = vld [vmem:[%s16304_s4 + $0x148] sm:$0xff]  }
0x17c1   :  { %v2522_v31 = vadd.f32 1e-06, %v2514_v22 }
0x17c7   :  { %v2151_v33 = vpop.f32.mrb[72].mxu1 }
0x17c8   :  { %v2157_v35 = vpack.c.bf16 %v2151_v33, %v2151_v33  ;;  %v12221_v28 = vpop.f32.mrb[73].mxu1 }
0x17c9   :  { %v2154_v36 = vpop.f32.mrb[74].mxu1 }
0x17ca   :  { %v12222_v40 = vpop.f32.mrb[75].mxu1  ;;  %12226 = vmatmul.mubr.msk.bf16.vlgmr.msra.gmra.mrb[68].mxu0 %vm370_vm7, %v2157_v35 }
0x17cb   :  { %12245 = vmatprep.mubr.msk.bf16.mxu0 %vm13705_vm0, %v13704_v0  ;;  %12238 = vmatpush3.bf16.msra.mxu0 %v13260_v60 }
0x17cc   :  { %12239 = vmatprep.subr.bf16.mxu0 %v13704_v0 }
0x17cf   :  { %12240 = vmatpush3.bf16.msra.mxu0 %v13261_v61  ;;  %v13259_v61 = vld [vmem:[%s16304_s4 + $0x108] sm:$0xff]  }
0x17d0   :  { %12241 = vmatprep.subr.bf16.mxu0 %v13704_v0 }
0x17d3   :  { %12242 = vmatpush3.bf16.msra.mxu0 %v13262_v63 }
0x17d4   :  { %12243 = vmatprep.subr.bf16.mxu0 %v13704_v0 }
0x189d   :  { %v2195_v39 = vpop.f32.mrb[68].mxu0 }
0x189e   :  { %v2201_v34 = vadd.f32 %v2195_v39, %v14152_v6  ;;  %v12227_v2 = vpop.f32.mrb[69].mxu0 }
0x189f   :  { %v2198_v43 = vpop.f32.mrb[70].mxu0 }
0x18a0   :  { %v2203_v44 = vadd.f32 %v2201_v34, %v13803_v19  ;;  %v12228_v45 = vpop.f32.mrb[71].mxu0  ;;  %v11000_v34 = vld [vmem:[%s16303_s11 + $0x2] ss:$0 sm:$0xff] }
0x18a1   :  { %v11001_v45 = vld [vmem:[%s16303_s11 + $0x3] ss:$0 sm:$0xff] }
0x18a2   :  { %v14233_v46 = vadd.f32 %v10999_v49, %v2203_v44  ;;  %v2232_v49 = vmul.f32 %v13394_v5, %v2229_v1 }
0x18a4   :  { %v2214_v48 = vsel %vm116_vm2, %v14233_v46, 0.0  ;;  %v2234_v9 = vsel %vm2233_vm9, %v2229_v1, %v2232_v49  ;;  %v13263_v1 = vld [vmem:[%s16310_s7 + $0x18] sm:$0xff]  }
0x18a5   :  { %2215 = vadd.xlane.f32.xlu1 %v2214_v48  ;;  %v2237_v13 = vsel %vm2235_vm10, %v2236_v12, %v2234_v9  ;;  %12244 = vmatpush3.bf16.msra.mxu0 %v13263_v1  ;;  %v13264_v12 = vld [vmem:[%s16304_s4 + $0x140] sm:$0xff]  }
0x18a6   :  { %v2245_v16 = vadd.f32 1e-06, %v2237_v13  ;;  %12265 = vmatprep.subr.bf16.mxu0 %v13704_v0  ;;  %v11021_v13 = vld [vmem:[%s16305_s10 + $0xc] ss:$0 sm:$0xff] }
0x18a9   :  { %2492 = vadd.xlane.f32.xlu1 %v2491_v50 }
0x1932   :  { %v2216_v51 = vpop.xlane.xlu1 %2215 }
0x1933   :  { %v2218_v6 = vmul.f32 0.03125, %v2216_v51 }
0x1935   :  { %v14242_v52 = vsub.f32 %v14233_v46, %v2218_v6 }
0x1936   :  { %v2493_v53 = vpop.xlane.xlu1 %2492 }
0x1937   :  { %v2495_v19 = vmul.f32 0.03125, %v2493_v53  ;;  %v2222_v54 = vmul.f32 %v14242_v52, %v14242_v52 }
0x1939   :  { %v14247_v55 = vsub.f32 %v14235_v47, %v2495_v19  ;;  %v2226_v56 = vsel %vm116_vm2, %v2222_v54, 0.0  ;;  %v11015_v19 = vld [vmem:[%s16303_s11 + $0x6] ss:$0 sm:$0xff] }
0x193a   :  { %2227 = vadd.xlane.f32.xlu1 %v2226_v56 }
0x193b   :  { %v2499_v57 = vmul.f32 %v14247_v55, %v14247_v55 }
0x193d   :  { %v2503_v58 = vsel %vm116_vm2, %v2499_v57, 0.0 }
0x193e   :  { %2504 = vadd.xlane.f32.xlu1 %v2503_v58 }
0x19c7   :  { %v2228_v62 = vpop.xlane.xlu1 %2227 }
0x19c8   :  { %v2230_v7 = vmul.f32 0.032258064, %v2228_v62 }
0x19ca   :  { %13397 = vrsqrt.f32 %v2230_v7  ;;  %vm2240_vm13 = vcmp.eq.f32.partialorder %v2230_v7, inf  ;;  %v2243_v25 = vand.u32 2147483648, %v2230_v7  ;;  %vm2242_vm14 = vcmp.eq.f32.partialorder %v2230_v7, 0.0 }
0x19cb   :  { %v2505_v11 = vpop.xlane.xlu1 %2504 }
0x19cc   :  { %v2507_v17 = vmul.f32 0.032258064, %v2505_v11 }
0x19ce   :  { %13399 = vrsqrt.f32 %v2507_v17  ;;  %vm2517_vm15 = vcmp.eq.f32.partialorder %v2507_v17, inf  ;;  %v2520_v35 = vand.u32 2147483648, %v2507_v17  ;;  %vm2519_vm3 = vcmp.eq.f32.partialorder %v2507_v17, 0.0 }
0x19cf   :  { %13401 = vrcp.f32 %v2245_v16 }
0x19d4   :  { %v13398_v21 = vpop.eup %13397 }
0x19d5   :  { %v2239_v23 = vmul.f32 %v13398_v21, %v2230_v7 }
0x19d7   :  { %v2241_v26 = vsel %vm2240_vm13, %v2230_v7, %v2239_v23 }
0x19d8   :  { %v13400_v10 = vpop.eup %13399  ;;  %v2244_v27 = vsel %vm2242_vm14, %v2243_v25, %v2241_v26  ;;  %v11029_v26 = vld [vmem:[%s16305_s10 + $0x10] ss:$0 sm:$0xff] }
0x19d9   :  { %v2246_v32 = vadd.f32 1e-06, %v2244_v27  ;;  %v2516_v33 = vmul.f32 %v13400_v10, %v2507_v17  ;;  %v13402_v38 = vpop.eup %13401 }
0x19da   :  { %v2252_v39 = vmul.f32 %v13402_v38, %v14214_v24 }
0x19db   :  { %13403 = vrcp.f32 %v2246_v32  ;;  %v2518_v28 = vsel %vm2517_vm15, %v2507_v17, %v2516_v33 }
0x19dc   :  { %v2521_v36 = vsel %vm2519_vm3, %v2520_v35, %v2518_v28  ;;  %13405 = vrcp.f32 %v2522_v31  ;;  %v2258_v43 = vmul.f32 %v11000_v34, %v2252_v39  ;;  %v13266_v39 = vld [vmem:[%s16304_s4 + $0xd0] sm:$0xff]  }
0x19dd   :  { %v2523_v40 = vadd.f32 1e-06, %v2521_v36 }
0x19de   :  { %v2265_v24 = vadd.f32 %v11001_v45, %v2258_v43  ;;  %v13269_v43 = vld [vmem:[%s16304_s4 + $0x158] sm:$0xff]  }
0x19df   :  { %13407 = vrcp.f32 %v2523_v40 }
0x19e5   :  { %v13404_v2 = vpop.eup %13403 }
0x19e6   :  { %v2253_v41 = vmul.f32 %v13404_v2, %v14242_v52  ;;  %v13406_v44 = vpop.eup %13405  ;;  %v13256_v52 = vld [vmem:[%s16304_s4 + $0xc0] sm:$0xff]   ;;  %v13267_v2 = vld [vmem:[%s16304_s4 + $0xd8] sm:$0xff]  }
0x19e7   :  { %v2529_v51 = vmul.f32 %v13406_v44, %v14220_v29  ;;  %v11016_v29 = vld [vmem:[%s16303_s11 + $0x7] ss:$0 sm:$0xff] }
0x19e8   :  { %v2259_v48 = vmul.f32 %v11000_v34, %v2253_v41  ;;  %v13268_v41 = vld [vmem:[%s16304_s4 + $0x150] sm:$0xff]  }
0x19e9   :  { %v13408_v50 = vpop.eup %13407  ;;  %v2535_v57 = vmul.f32 %v11015_v19, %v2529_v51  ;;  %v11037_v51 = vld [vmem:[%s16305_s10 + $0x14] ss:$0 sm:$0xff] }
0x19ea   :  { %v2530_v6 = vmul.f32 %v13408_v50, %v14247_v55  ;;  %v2266_v53 = vadd.f32 %v11001_v45, %v2259_v48  ;;  %v13257_v55 = vld [vmem:[%s16304_s4 + $0xc8] sm:$0xff]  }
0x19eb   :  { %v2542_v42 = vadd.f32 %v11016_v29, %v2535_v57 }
0x19ec   :  { %v2536_v54 = vmul.f32 %v11015_v19, %v2530_v6  ;;  %v2267_v56 = vpack.c.bf16 %v2266_v53, %v2265_v24 }
0x19ee   :  { %12234 = vmatmul.mubr.msk.bf16.vlgmr.msra.gmra.mrb[76].mxu1 %vm116_vm2, %v2267_v56  ;;  %v2543_v58 = vadd.f32 %v11016_v29, %v2536_v54  ;;  %v2791_v29 = vsub.s32 1, %v13903_v37 }
0x19ef   :  { %12250 = vmatpush3.bf16.msra.mxu1 %v13256_v52  ;;  %12253 = vmatprep.mubr.msk.bf16.mxu1 %vm13705_vm0, %v13704_v0 }
0x19f0   :  { %12251 = vmatprep.subr.bf16.mxu1 %v13704_v0  ;;  %v14298_v60 = vpack.c.bf16 %v2543_v58, %v2542_v42 }
0x19f3   :  { %12252 = vmatpush3.bf16.msra.mxu1 %v13257_v55  ;;  %v13690_v55 = vld [vmem:[%s16306_s3] sm:$0xff] }
0x19f4   :  { %12257 = vmatprep.subr.bf16.mxu1 %v13704_v0  ;;  %v14396_v58 = vrot.slane %v13690_v55, %v2791_v29  ;;  %v13270_v55 = vld [vmem:[%s16304_s4 + $0x110] sm:$0xff]  }
0x19f6   :  { %12254 = vmatmul.mubr.msk.bf16.vlgmr.msra.gmra.mrb[80].mxu1 %vm116_vm2, %v14298_v60 }
0x19f7   :  { %12258 = vmatpush3.bf16.msra.mxu1 %v13258_v59  ;;  %12261 = vmatprep.mubr.msk.bf16.mxu1 %vm13705_vm0, %v13704_v0 }
0x19f8   :  { %12259 = vmatprep.subr.bf16.mxu1 %v13704_v0 }
0x19fb   :  { %12260 = vmatpush3.bf16.msra.mxu1 %v13259_v61 }
0x19fc   :  { %12273 = vmatprep.subr.bf16.mxu1 %v13704_v0 }
0x19fe   :  { %12262 = vmatmul.mubr.msk.bf16.vlgmr.msra.gmra.mrb[84].mxu1 %vm116_vm2, %v14298_v60 }
0x19ff   :  { %12275 = vmatprep.mubr.msk.bf16.mxu1 %vm13705_vm0, %v13704_v0 }
0x1ac1   :  { %v2326_v4 = vpop.f32.mrb[76].mxu1 }
0x1ac2   :  { %v2327_v5 = vadd.f32 %v11002_v3, %v2326_v4  ;;  %v12235_v49 = vpop.f32.mrb[77].mxu1 }
0x1ac3   :  { %v2329_v62 = vpop.f32.mrb[78].mxu1 }
0x1ac4   :  { %v2330_v7 = vadd.f32 %v11002_v3, %v2329_v62  ;;  %v12236_v9 = vpop.f32.mrb[79].mxu1  ;;  %v2333_v11 = vmax.f32 %v2327_v5, 0.0  ;;  %v13691_v5 = vld [vmem:[%s16306_s3 + $0x8] sm:$0xff] }
0x1ac5   :  { %v14403_v49 = vrot.slane %v13691_v5, %v2791_v29 }
0x1ac6   :  { %v2334_v30 = vmax.f32 %v2330_v7, 0.0 }
0x1ac8   :  { %v2335_v17 = vpack.c.bf16 %v2334_v30, %v2333_v11 }
0x1ac9   :  { %v2604_v15 = vpop.f32.mrb[80].mxu1 }
0x1aca   :  { %12246 = vmatmul.mubr.msk.bf16.vlgmr.msra.gmra.mrb[72].mxu0 %vm2373_vm4, %v2335_v17  ;;  %v12255_v16 = vpop.f32.mrb[81].mxu1  ;;  %v2605_v21 = vadd.f32 %v11021_v13, %v2604_v15 }
0x1acb   :  { %v2607_v18 = vpop.f32.mrb[82].mxu1  ;;  %12266 = vmatpush3.bf16.msra.mxu0 %v13264_v12  ;;  %12269 = vmatprep.mubr.msk.bf16.mxu0 %vm13705_vm0, %v13704_v0 }
0x1acc   :  { %v2608_v23 = vadd.f32 %v11021_v13, %v2607_v18  ;;  %v12256_v22 = vpop.f32.mrb[83].mxu1  ;;  %12267 = vmatprep.subr.bf16.mxu0 %v13704_v0  ;;  %v11050_v13 = vld [vmem:[%s16305_s10 + $0xd] ss:$0 sm:$0xff] }
0x1ace   :  { %v2611_v25 = vpack.c.bf16 %v2608_v23, %v2605_v21 }
0x1acf   :  { %12268 = vmatpush3.bf16.msra.mxu0 %v13265_v20 }
0x1ad0   :  { %12279 = vmatprep.subr.bf16.mxu0 %v13704_v0  ;;  %v2854_v34 = vrot.slane %v2611_v25, 4 }
0x1ad1   :  { %v2668_v10 = vpop.f32.mrb[84].mxu1 }
0x1ad2   :  { %v12263_v27 = vpop.f32.mrb[85].mxu1  ;;  %12270 = vmatmul.mubr.msk.bf16.vlgmr.msra.gmra.mrb[76].mxu0 %vm116_vm2, %v14298_v60  ;;  %v2669_v32 = vadd.f32 %v11029_v26, %v2668_v10 }
0x1ad3   :  { %v2671_v31 = vpop.f32.mrb[86].mxu1  ;;  %12281 = vmatprep.mubr.msk.bf16.mxu0 %vm13705_vm0, %v13704_v0 }
0x1ad4   :  { %v2672_v33 = vadd.f32 %v11029_v26, %v2671_v31  ;;  %v12264_v35 = vpop.f32.mrb[87].mxu1 }
0x1ad6   :  { %v2675_v28 = vpack.c.bf16 %v2672_v33, %v2669_v32 }
0x1ad8   :  { %v2746_v36 = vsel %vm370_vm7, %v2675_v28, 0  ;;  %v2856_v40 = vrot.slane %v2675_v28, 4 }
0x1ad9   :  { %12274 = vmatpush3.bf16.xpose.msra.mxu1 %v2746_v36 }
0x1ada   :  { %12285 = vmatprep.subr.bf16.mxu1 %v13704_v0  ;;  %v2861_v38 = vsel %vm370_vm7, %v2856_v40, 0 }
0x1ae0   :  { %12276 = vmatmul.mubr.msk.bf16.vlgmr.msra.gmra.mrb[88].mxu1 %vm370_vm7, %v2611_v25  ;;  %v11066_v25 = vld [vmem:[%s16305_s10 + $0x15] ss:$0 sm:$0xff] }
0x1ae1   :  { %12286 = vmatpush3.bf16.xpose.msra.mxu1 %v2861_v38  ;;  %12287 = vmatprep.mubr.msk.bf16.mxu1 %vm13705_vm0, %v13704_v0 }
0x1ae2   :  { %12297 = vmatprep.subr.bf16.mxu1 %v13704_v0 }
0x1ae8   :  { %12288 = vmatmul.mubr.msk.bf16.vlgmr.msra.gmra.mrb[92].mxu1 %vm370_vm7, %v2854_v34 }
0x1ae9   :  { %12298 = vmatpush3.bf16.msra.mxu1 %v13266_v39  ;;  %12301 = vmatprep.mubr.msk.bf16.mxu1 %vm13705_vm0, %v13704_v0 }
0x1aea   :  { %12299 = vmatprep.subr.bf16.mxu1 %v13704_v0 }
0x1aed   :  { %12300 = vmatpush3.bf16.msra.mxu1 %v13267_v2 }
0x1aee   :  { %12313 = vmatprep.subr.bf16.mxu1 %v13704_v0 }
0x1af0   :  { %12302 = vmatmul.mubr.msk.bf16.vlgmr.msra.gmra.mrb[96].mxu1 %vm116_vm2, %v14298_v60 }
0x1af1   :  { %12314 = vmatpush3.bf16.msra.mxu1 %v13268_v41  ;;  %12317 = vmatprep.mubr.msk.bf16.mxu1 %vm13705_vm0, %v13704_v0 }
0x1af2   :  { %12315 = vmatprep.subr.bf16.mxu1 %v13704_v0 }
0x1af5   :  { %12316 = vmatpush3.bf16.msra.mxu1 %v13269_v43 }
0x1af6   :  { %12327 = vmatprep.subr.bf16.mxu1 %v13704_v0 }
0x1af8   :  { %12318 = vmatmul.mubr.msk.bf16.vlgmr.msra.gmra.mrb[100].mxu1 %vm116_vm2, %v14298_v60 }
0x1af9   :  { %12329 = vmatprep.mubr.msk.bf16.mxu1 %vm13705_vm0, %v13704_v0 }
0x1b9d   :  { %v14380_v44 = vpop.f32.mrb[72].mxu0 }
0x1b9e   :  { %v12247_v45 = vpop.f32.mrb[73].mxu0 }
0x1b9f   :  { %v14382_v48 = vpop.f32.mrb[74].mxu0 }
0x1ba0   :  { %v12248_v50 = vpop.f32.mrb[75].mxu0 }
0x1ba5   :  { %v2732_v6 = vpop.f32.mrb[76].mxu0 }
0x1ba6   :  { %v12271_v24 = vpop.f32.mrb[77].mxu0  ;;  %v2733_v19 = vadd.f32 %v11037_v51, %v2732_v6 }
0x1ba7   :  { %v2735_v53 = vpop.f32.mrb[78].mxu0 }
0x1ba8   :  { %v2736_v52 = vadd.f32 %v11037_v51, %v2735_v53  ;;  %v12272_v54 = vpop.f32.mrb[79].mxu0 }
0x1baa   :  { %v14387_v56 = vpack.c.bf16 %v2736_v52, %v2733_v19 }
0x1bac   :  { %v2810_v57 = vsel %vm438_vm8, %v14387_v56, 0  ;;  %v2922_v19 = vrot.slane %v14387_v56, 4  ;;  %v13271_v56 = vld [vmem:[%s16304_s4 + $0x118] sm:$0xff]  }
0x1bad   :  { %12280 = vmatpush3.bf16.msra.mxu0 %v2810_v57 }
0x1bae   :  { %12291 = vmatprep.subr.bf16.mxu0 %v13704_v0  ;;  %v2927_v54 = vsel %vm438_vm8, %v2922_v19, 0 }
0x1bb3   :  { %v2782_v42 = vpop.f32.mrb[88].mxu1 }
0x1bb4   :  { %v2788_v59 = vmul.f32 0.35355338, %v2782_v42  ;;  %v12277_v61 = vpop.f32.mrb[89].mxu1 }
0x1bb5   :  { %v2785_v63 = vpop.f32.mrb[90].mxu1 }
0x1bb6   :  { %v12278_v1 = vpop.f32.mrb[91].mxu1  ;;  %v2793_v3 = vadd.f32 %v14396_v58, %v2788_v59 }
0x1bb8   :  { %v2794_v4 = vsel %vm370_vm7, %v2793_v3, -inf }
0x1bb9   :  { %2795 = vmax.xlane.f32.xlu0 %v2794_v4 }
0x1bbb   :  { %v2897_v62 = vpop.f32.mrb[92].mxu1 }
0x1bbc   :  { %v2903_v7 = vmul.f32 0.35355338, %v2897_v62  ;;  %v12289_v9 = vpop.f32.mrb[93].mxu1 }
0x1bbd   :  { %v2900_v11 = vpop.f32.mrb[94].mxu1 }
0x1bbe   :  { %v12290_v30 = vpop.f32.mrb[95].mxu1  ;;  %v2908_v12 = vadd.f32 %v14403_v49, %v2903_v7  ;;  %v11058_v7 = vld [vmem:[%s16305_s10 + $0x11] ss:$0 sm:$0xff] }
0x1bc0   :  { %v2909_v17 = vsel %vm370_vm7, %v2908_v12, -inf }
0x1bc1   :  { %2910 = vmax.xlane.f32.xlu1 %v2909_v17 }
0x1bc3   :  { %v3026_v15 = vpop.f32.mrb[96].mxu1 }
0x1bc4   :  { %v12303_v16 = vpop.f32.mrb[97].mxu1  ;;  %v3027_v20 = vadd.f32 %v11050_v13, %v3026_v15 }
0x1bc5   :  { %v3029_v18 = vpop.f32.mrb[98].mxu1 }
0x1bc6   :  { %v3030_v21 = vadd.f32 %v11050_v13, %v3029_v18  ;;  %v12304_v23 = vpop.f32.mrb[99].mxu1 }
0x1bc8   :  { %v14410_v22 = vpack.c.bf16 %v3030_v21, %v3027_v20 }
0x1bcb   :  { %v3154_v26 = vpop.f32.mrb[100].mxu1 }
0x1bcc   :  { %v12319_v10 = vpop.f32.mrb[101].mxu1  ;;  %v3155_v31 = vadd.f32 %v11066_v25, %v3154_v26 }
0x1bcd   :  { %v3157_v27 = vpop.f32.mrb[102].mxu1 }
0x1bce   :  { %v3158_v32 = vadd.f32 %v11066_v25, %v3157_v27  ;;  %v12320_v33 = vpop.f32.mrb[103].mxu1 }
0x1bd0   :  { %v14415_v35 = vpack.c.bf16 %v3158_v32, %v3155_v31 }
0x1bd2   :  { %v3228_v28 = vsel %vm438_vm8, %v14415_v35, 0 }
0x1bd3   :  { %12328 = vmatpush3.bf16.msra.mxu1 %v3228_v28 }
0x1bd4   :  { %12339 = vmatprep.subr.bf16.mxu1 %v13704_v0 }
0x1c46   :  { %v2796_v36 = vpop.xlane.xlu0 %2795 }
0x1c47   :  { %v2797_v40 = vsub.f32 %v2793_v3, %v2796_v36  ;;  %v11070_v36 = vld [vmem:[%s16307_s5 + $0x14] sm:$0xf] }
0x1c49   :  { %v2798_v38 = vmul.f32 1.442695, %v2797_v40  ;;  %v3275_v40 = vsel %vm438_vm8, %v11070_v36, 0  ;;  %v13275_v36 = vld [vmem:[%s16304_s4 + $0xe8] sm:$0xff]  }
0x1c4b   :  { %13409 = vpow2.f32 %v2798_v38 }
0x1c4e   :  { %v2911_v39 = vpop.xlane.xlu1 %2910 }
0x1c4f   :  { %v2912_v34 = vsub.f32 %v2908_v12, %v2911_v39 }
0x1c51   :  { %v2913_v2 = vmul.f32 1.442695, %v2912_v34  ;;  %v11041_v34 = vld [vmem:[%s16307_s5 + $0x10] sm:$0xf] }
0x1c53   :  { %13411 = vpow2.f32 %v2913_v2 }
0x1c55   :  { %v13410_v41 = vpop.eup %13409 }
0x1c56   :  { %v2800_v43 = vsel %vm370_vm7, %v13410_v41, 0.0 }
0x1c57   :  { %2801 = vadd.xlane.f32.xlu0 %v2800_v43  ;;  %v3321_v43 = vsel %vm438_vm8, %v11041_v34, 0 }
0x1c5d   :  { %v13412_v45 = vpop.eup %13411 }
0x1c5e   :  { %v2915_v50 = vsel %vm370_vm7, %v13412_v45, 0.0 }
0x1c5f   :  { %2916 = vadd.xlane.f32.xlu1 %v2915_v50 }
0x1ce4   :  { %v2802_v51 = vpop.xlane.xlu0 %2801 }
0x1ce5   :  { %13413 = vrcp.f32 %v2802_v51 }
0x1cec   :  { %v2917_v6 = vpop.xlane.xlu1 %2916 }
0x1ced   :  { %13415 = vrcp.f32 %v2917_v6 }
0x1cef   :  { %v13414_v24 = vpop.eup %13413 }
0x1cf0   :  { %v2804_v53 = vmul.f32 %v13414_v24, %v13410_v41 }
0x1cf2   :  { %v2805_v52 = vpack.c.bf16 %v2804_v53, %v2804_v53 }
0x1cf4   :  { %12282 = vmatmul.mubr.msk.bf16.vlgmr.msra.gmra.mrb[80].mxu0 %vm370_vm7, %v2805_v52 }
0x1cf5   :  { %12292 = vmatpush3.bf16.msra.mxu0 %v2927_v54  ;;  %12293 = vmatprep.mubr.msk.bf16.mxu0 %vm13705_vm0, %v13704_v0 }
0x1cf6   :  { %12305 = vmatprep.subr.bf16.mxu0 %v13704_v0 }
0x1cf7   :  { %v13416_v57 = vpop.eup %13415 }
0x1cf8   :  { %v2919_v29 = vmul.f32 %v13416_v57, %v13412_v45  ;;  %v3428_v45 = vrot.slane %v14415_v35, 4 }
0x1cfa   :  { %v2920_v42 = vpack.c.bf16 %v2919_v29, %v2919_v29  ;;  %v3433_v51 = vsel %vm438_vm8, %v3428_v45, 0  ;;  %v3364_v29 = vrot.slane %v14410_v22, 4 }
0x1cfc   :  { %12294 = vmatmul.mubr.msk.bf16.vlgmr.msra.gmra.mrb[84].mxu0 %vm370_vm7, %v2920_v42 }
0x1cfd   :  { %12306 = vmatpush3.bf16.msra.mxu0 %v13270_v55  ;;  %12309 = vmatprep.mubr.msk.bf16.mxu0 %vm13705_vm0, %v13704_v0 }
0x1cfe   :  { %12307 = vmatprep.subr.bf16.mxu0 %v13704_v0 }
0x1d01   :  { %12308 = vmatpush3.bf16.msra.mxu0 %v13271_v56 }
0x1d02   :  { %12321 = vmatprep.subr.bf16.mxu0 %v13704_v0 }
0x1d04   :  { %12310 = vmatmul.mubr.msk.bf16.vlgmr.msra.gmra.mrb[88].mxu0 %vm116_vm2, %v14298_v60 }
0x1d05   :  { %12323 = vmatprep.mubr.msk.bf16.mxu0 %vm13705_vm0, %v13704_v0 }
0x1dc7   :  { %v2846_v59 = vpop.f32.mrb[80].mxu0 }
0x1dc8   :  { %v12283_v61 = vpop.f32.mrb[81].mxu0  ;;  %v2852_v50 = vpack.c.bf16 %v2846_v59, %v2846_v59 }
0x1dc9   :  { %v2849_v63 = vpop.f32.mrb[82].mxu0 }
0x1dca   :  { %v12284_v1 = vpop.f32.mrb[83].mxu0 }
0x1dcf   :  { %v14443_v3 = vpop.f32.mrb[84].mxu0 }
0x1dd0   :  { %v12295_v4 = vpop.f32.mrb[85].mxu0 }
0x1dd1   :  { %v2966_v5 = vpop.f32.mrb[86].mxu0 }
0x1dd2   :  { %v12296_v62 = vpop.f32.mrb[87].mxu0 }
0x1dd7   :  { %v3090_v9 = vpop.f32.mrb[88].mxu0 }
0x1dd8   :  { %v12311_v11 = vpop.f32.mrb[89].mxu0  ;;  %v3091_v12 = vadd.f32 %v11058_v7, %v3090_v9 }
0x1dd9   :  { %v3093_v30 = vpop.f32.mrb[90].mxu0 }
0x1dda   :  { %v3094_v17 = vadd.f32 %v11058_v7, %v3093_v30  ;;  %v12312_v13 = vpop.f32.mrb[91].mxu0 }
0x1ddc   :  { %v3097_v15 = vpack.c.bf16 %v3094_v17, %v3091_v12 }
0x1dde   :  { %v3168_v16 = vsel %vm370_vm7, %v3097_v15, 0  ;;  %v3366_v6 = vrot.slane %v3097_v15, 4 }
0x1ddf   :  { %12322 = vmatpush3.bf16.xpose.msra.mxu0 %v3168_v16 }
0x1de0   :  { %12333 = vmatprep.subr.bf16.mxu0 %v13704_v0  ;;  %v3371_v35 = vsel %vm370_vm7, %v3366_v6, 0 }
0x1de6   :  { %12324 = vmatmul.mubr.msk.bf16.vlgmr.msra.gmra.mrb[92].mxu0 %vm370_vm7, %v14410_v22 }
0x1de7   :  { %12335 = vmatprep.mubr.msk.bf16.mxu0 %vm13705_vm0, %v13704_v0  ;;  %12334 = vmatpush3.bf16.msra.mxu0 %v3275_v40 }
0x1de8   :  { %12345 = vmatprep.subr.bf16.mxu0 %v13704_v0 }
0x1eb9   :  { %v3204_v18 = vpop.f32.mrb[92].mxu0 }
0x1eba   :  { %v3210_v20 = vmul.f32 0.35355338, %v3204_v18  ;;  %v12325_v21 = vpop.f32.mrb[93].mxu0 }
0x1ebb   :  { %v3207_v23 = vpop.f32.mrb[94].mxu0 }
0x1ebc   :  { %v12326_v25 = vpop.f32.mrb[95].mxu0  ;;  %v3211_v26 = vadd.f32 %v3210_v20, %v14396_v58 }
0x1ebd   :  { %v13272_v25 = vld [vmem:[%s16304_s4 + $0x120] sm:$0xff]  }
0x1ebe   :  { %v3212_v10 = vsel %vm370_vm7, %v3211_v26, -inf }
0x1ebf   :  { %3213 = vmax.xlane.f32.xlu0 %v3212_v10  ;;  %v13273_v10 = vld [vmem:[%s16304_s4 + $0x128] sm:$0xff]  }
0x1f4c   :  { %v3214_v27 = vpop.xlane.xlu0 %3213 }
0x1f4d   :  { %v3215_v31 = vsub.f32 %v3211_v26, %v3214_v27  ;;  %v2969_v26 = vpack.c.bf16 %v14443_v3, %v14443_v3  ;;  %v13274_v27 = vld [vmem:[%s16304_s4 + $0xe0] sm:$0xff]  }
0x1f4f   :  { %v3216_v32 = vmul.f32 1.442695, %v3215_v31 }
0x1f51   :  { %13417 = vpow2.f32 %v3216_v32 }
0x1f5b   :  { %v13418_v33 = vpop.eup %13417 }
0x1f5c   :  { %v3218_v28 = vsel %vm370_vm7, %v13418_v33, 0.0 }
0x1f5d   :  { %3219 = vadd.xlane.f32.xlu1 %v3218_v28 }
0x1fea   :  { %v3220_v38 = vpop.xlane.xlu1 %3219 }
0x1feb   :  { %13419 = vrcp.f32 %v3220_v38  ;;  %v13276_v38 = vld [vmem:[%s16304_s4 + $0x160] sm:$0xff]  }
0x1ff5   :  { %v13420_v39 = vpop.eup %13419 }
0x1ff6   :  { %v3222_v2 = vmul.f32 %v13420_v39, %v13418_v33 }
0x1ff8   :  { %v3223_v41 = vpack.c.bf16 %v3222_v2, %v3222_v2 }
0x1ffa   :  { %12330 = vmatmul.mubr.msk.bf16.vlgmr.msra.gmra.mrb[104].mxu1 %vm370_vm7, %v3223_v41  ;;  %v13277_v41 = vld [vmem:[%s16304_s4 + $0x168] sm:$0xff]  }
0x1ffb   :  { %12340 = vmatpush3.bf16.msra.mxu1 %v3321_v43  ;;  %12341 = vmatprep.mubr.msk.bf16.mxu1 %vm13705_vm0, %v13704_v0 }
0x1ffc   :  { %12351 = vmatprep.subr.bf16.mxu1 %v13704_v0 }
0x2002   :  { %12342 = vmatmul.mubr.msk.bf16.vlgmr.msra.gmra.mrb[108].mxu1 %vm370_vm7, %v2852_v50 }
0x2003   :  { %12352 = vmatpush3.bf16.msra.mxu1 %v3433_v51  ;;  %12353 = vmatprep.mubr.msk.bf16.mxu1 %vm13705_vm0, %v13704_v0 }
0x2004   :  { %12363 = vmatprep.subr.bf16.mxu1 %v13704_v0 }
0x20cd   :  { %v3264_v24 = vpop.f32.mrb[104].mxu1 }
0x20ce   :  { %v3270_v53 = vpack.c.bf16 %v3264_v24, %v3264_v24  ;;  %v12331_v19 = vpop.f32.mrb[105].mxu1 }
0x20cf   :  { %v3267_v52 = vpop.f32.mrb[106].mxu1 }
0x20d0   :  { %v12332_v54 = vpop.f32.mrb[107].mxu1  ;;  %12336 = vmatmul.mubr.msk.bf16.vlgmr.msra.gmra.mrb[96].mxu0 %vm370_vm7, %v3270_v53 }
0x20d1   :  { %12346 = vmatpush3.bf16.xpose.msra.mxu0 %v3371_v35  ;;  %12347 = vmatprep.mubr.msk.bf16.mxu0 %vm13705_vm0, %v13704_v0 }
0x20d2   :  { %12357 = vmatprep.subr.bf16.mxu0 %v13704_v0 }
0x20d5   :  { %v3357_v57 = vpop.f32.mrb[108].mxu1 }
0x20d6   :  { %v12343_v55 = vpop.f32.mrb[109].mxu1 }
0x20d7   :  { %v3360_v42 = vpop.f32.mrb[110].mxu1 }
0x20d8   :  { %v12344_v56 = vpop.f32.mrb[111].mxu1  ;;  %12348 = vmatmul.mubr.msk.bf16.vlgmr.msra.gmra.mrb[100].mxu0 %vm370_vm7, %v3364_v29  ;;  %v11083_v42 = vld [vmem:[%s16305_s10 + $0xe] ss:$0 sm:$0xff] }
0x20d9   :  { %12358 = vmatpush3.bf16.msra.mxu0 %v3275_v40  ;;  %12359 = vmatprep.mubr.msk.bf16.mxu0 %vm13705_vm0, %v13704_v0 }
0x20da   :  { %12369 = vmatprep.subr.bf16.mxu0 %v13704_v0 }
0x21a3   :  { %v3311_v59 = vpop.f32.mrb[96].mxu0 }
0x21a4   :  { %v12337_v61 = vpop.f32.mrb[97].mxu0  ;;  %v14486_v63 = vadd.f32 %v3357_v57, %v3311_v59 }
0x21a5   :  { %v3314_v1 = vpop.f32.mrb[98].mxu0 }
0x21a6   :  { %v12338_v4 = vpop.f32.mrb[99].mxu0 }
0x21ab   :  { %v3407_v5 = vpop.f32.mrb[100].mxu0 }
0x21ac   :  { %v3413_v62 = vmul.f32 0.35355338, %v3407_v5  ;;  %v12349_v22 = vpop.f32.mrb[101].mxu0 }
0x21ad   :  { %v3410_v7 = vpop.f32.mrb[102].mxu0  ;;  %v11099_v22 = vld [vmem:[%s16305_s10 + $0x16] ss:$0 sm:$0xff] }
0x21ae   :  { %v12350_v9 = vpop.f32.mrb[103].mxu0  ;;  %v3414_v11 = vadd.f32 %v3413_v62, %v14403_v49 }
0x21b0   :  { %v3415_v30 = vsel %vm370_vm7, %v3414_v11, -inf }
0x21b1   :  { %3416 = vmax.xlane.f32.xlu0 %v3415_v30 }
0x223e   :  { %v3417_v12 = vpop.xlane.xlu0 %3416 }
0x223f   :  { %v3418_v17 = vsub.f32 %v3414_v11, %v3417_v12 }
0x2241   :  { %v3419_v13 = vmul.f32 1.442695, %v3418_v17 }
0x2243   :  { %13421 = vpow2.f32 %v3419_v13 }
0x224d   :  { %v13422_v15 = vpop.eup %13421 }
0x224e   :  { %v3421_v16 = vsel %vm370_vm7, %v13422_v15, 0.0 }
0x224f   :  { %3422 = vadd.xlane.f32.xlu1 %v3421_v16 }
0x22dc   :  { %v3423_v18 = vpop.xlane.xlu1 %3422 }
0x22dd   :  { %13423 = vrcp.f32 %v3423_v18 }
0x22e7   :  { %v13424_v20 = vpop.eup %13423 }
0x22e8   :  { %v3425_v21 = vmul.f32 %v13424_v20, %v13422_v15 }
0x22ea   :  { %v3426_v23 = vpack.c.bf16 %v3425_v21, %v3425_v21 }
0x22ec   :  { %12354 = vmatmul.mubr.msk.bf16.vlgmr.msra.gmra.mrb[112].mxu1 %vm370_vm7, %v3426_v23 }
0x22ed   :  { %12364 = vmatpush3.bf16.msra.mxu1 %v3321_v43  ;;  %12365 = vmatprep.mubr.msk.bf16.mxu1 %vm13705_vm0, %v13704_v0  ;;  %v11091_v43 = vld [vmem:[%s16305_s10 + $0x12] ss:$0 sm:$0xff] }
0x22ee   :  { %12377 = vmatprep.subr.bf16.mxu1 %v13704_v0 }
0x22f4   :  { %12366 = vmatmul.mubr.msk.bf16.vlgmr.msra.gmra.mrb[116].mxu1 %vm370_vm7, %v2969_v26 }
0x22f5   :  { %12378 = vmatpush3.bf16.msra.mxu1 %v13272_v25  ;;  %12381 = vmatprep.mubr.msk.bf16.mxu1 %vm13705_vm0, %v13704_v0 }
0x22f6   :  { %12379 = vmatprep.subr.bf16.mxu1 %v13704_v0 }
0x22f9   :  { %12380 = vmatpush3.bf16.msra.mxu1 %v13273_v10 }
0x22fa   :  { %12393 = vmatprep.subr.bf16.mxu1 %v13704_v0 }
0x22fc   :  { %12382 = vmatmul.mubr.msk.bf16.vlgmr.msra.gmra.mrb[120].mxu1 %vm116_vm2, %v14298_v60 }
0x22fd   :  { %12395 = vmatprep.mubr.msk.bf16.mxu1 %vm13705_vm0, %v13704_v0 }
0x23bf   :  { %v3469_v3 = vpop.f32.mrb[112].mxu1 }
0x23c0   :  { %v3475_v31 = vpack.c.bf16 %v3469_v3, %v3469_v3  ;;  %v12355_v32 = vpop.f32.mrb[113].mxu1 }
0x23c1   :  { %v3472_v33 = vpop.f32.mrb[114].mxu1 }
0x23c2   :  { %v12356_v28 = vpop.f32.mrb[115].mxu1  ;;  %12360 = vmatmul.mubr.msk.bf16.vlgmr.msra.gmra.mrb[104].mxu0 %vm370_vm7, %v3475_v31  ;;  %v11103_v33 = vld [vmem:[%s16307_s5 + $0x18] sm:$0xf] }
0x23c3   :  { %12370 = vmatpush3.bf16.msra.mxu0 %v13274_v27  ;;  %12373 = vmatprep.mubr.msk.bf16.mxu0 %vm13705_vm0, %v13704_v0  ;;  %v3867_v28 = vsel %vm438_vm8, %v11103_v33, 0 }
0x23c4   :  { %12371 = vmatprep.subr.bf16.mxu0 %v13704_v0 }
0x23c7   :  { %v3556_v40 = vpop.f32.mrb[116].mxu1  ;;  %12372 = vmatpush3.bf16.msra.mxu0 %v13275_v36 }
0x23c8   :  { %v12367_v39 = vpop.f32.mrb[117].mxu1  ;;  %12385 = vmatprep.subr.bf16.mxu0 %v13704_v0 }
0x23c9   :  { %v3559_v34 = vpop.f32.mrb[118].mxu1 }
0x23ca   :  { %v12368_v2 = vpop.f32.mrb[119].mxu1  ;;  %12374 = vmatmul.mubr.msk.bf16.vlgmr.msra.gmra.mrb[108].mxu0 %vm116_vm2, %v14298_v60 }
0x23cb   :  { %12386 = vmatpush3.bf16.msra.mxu0 %v13276_v38  ;;  %12389 = vmatprep.mubr.msk.bf16.mxu0 %vm13705_vm0, %v13704_v0 }
0x23cc   :  { %12387 = vmatprep.subr.bf16.mxu0 %v13704_v0 }
0x23cf   :  { %v3682_v45 = vpop.f32.mrb[120].mxu1  ;;  %12388 = vmatpush3.bf16.msra.mxu0 %v13277_v41 }
0x23d0   :  { %v12383_v50 = vpop.f32.mrb[121].mxu1  ;;  %12399 = vmatprep.subr.bf16.mxu0 %v13704_v0  ;;  %v3683_v6 = vadd.f32 %v11091_v43, %v3682_v45 }
0x23d1   :  { %v3685_v51 = vpop.f32.mrb[122].mxu1 }
0x23d2   :  { %v3686_v24 = vadd.f32 %v11091_v43, %v3685_v51  ;;  %v12384_v53 = vpop.f32.mrb[123].mxu1  ;;  %12390 = vmatmul.mubr.msk.bf16.vlgmr.msra.gmra.mrb[112].mxu0 %vm116_vm2, %v14298_v60 }
0x23d3   :  { %12401 = vmatprep.mubr.msk.bf16.mxu0 %vm13705_vm0, %v13704_v0 }
0x23d4   :  { %v3689_v19 = vpack.c.bf16 %v3686_v24, %v3683_v6 }
0x23d6   :  { %v3760_v52 = vsel %vm370_vm7, %v3689_v19, 0  ;;  %v3913_v38 = vrot.slane %v3689_v19, 4 }
0x23d7   :  { %12394 = vmatpush3.bf16.xpose.msra.mxu1 %v3760_v52 }
0x23d8   :  { %12405 = vmatprep.subr.bf16.mxu1 %v13704_v0  ;;  %v3918_v2 = vsel %vm370_vm7, %v3913_v38, 0  ;;  %v11130_v38 = vld [vmem:[%s16305_s10 + $0x17] ss:$0 sm:$0xff] }
0x2495   :  { %v3513_v54 = vpop.f32.mrb[104].mxu0 }
0x2496   :  { %v12361_v35 = vpop.f32.mrb[105].mxu0  ;;  %v14544_v57 = vadd.f32 %v3556_v40, %v3513_v54 }
0x2497   :  { %v3516_v29 = vpop.f32.mrb[106].mxu0 }
0x2498   :  { %v12362_v55 = vpop.f32.mrb[107].mxu0 }
0x249d   :  { %v3618_v56 = vpop.f32.mrb[108].mxu0 }
0x249e   :  { %v12375_v59 = vpop.f32.mrb[109].mxu0  ;;  %v3619_v1 = vadd.f32 %v11083_v42, %v3618_v56 }
0x249f   :  { %v3621_v61 = vpop.f32.mrb[110].mxu0 }
0x24a0   :  { %v3622_v4 = vadd.f32 %v11083_v42, %v3621_v61  ;;  %v12376_v5 = vpop.f32.mrb[111].mxu0 }
0x24a2   :  { %v3625_v62 = vpack.c.bf16 %v3622_v4, %v3619_v1 }
0x24a4   :  { %12396 = vmatmul.mubr.msk.bf16.vlgmr.msra.gmra.mrb[124].mxu1 %vm370_vm7, %v3625_v62  ;;  %v3911_v41 = vrot.slane %v3625_v62, 4 }
0x24a5   :  { %v3746_v7 = vpop.f32.mrb[112].mxu0  ;;  %12407 = vmatprep.mubr.msk.bf16.mxu1 %vm13705_vm0, %v13704_v0  ;;  %12406 = vmatpush3.bf16.msra.mxu1 %v3867_v28 }
0x24a6   :  { %v12391_v9 = vpop.f32.mrb[113].mxu0  ;;  %v3747_v30 = vadd.f32 %v11099_v22, %v3746_v7  ;;  %12417 = vmatprep.subr.bf16.mxu1 %v13704_v0 }
0x24a7   :  { %v3749_v11 = vpop.f32.mrb[114].mxu0 }
0x24a8   :  { %v3750_v12 = vadd.f32 %v11099_v22, %v3749_v11  ;;  %v12392_v17 = vpop.f32.mrb[115].mxu0 }
0x24a9   :  { %v13278_v17 = vld [vmem:[%s16304_s4 + $0xf0] sm:$0xff]  }
0x24aa   :  { %v3753_v13 = vpack.c.bf16 %v3750_v12, %v3747_v30 }
0x24ac   :  { %v3820_v15 = vsel %vm438_vm8, %v3753_v13, 0  ;;  %v3975_v43 = vrot.slane %v3753_v13, 4 }
0x24ad   :  { %12400 = vmatpush3.bf16.msra.mxu0 %v3820_v15  ;;  %v13280_v15 = vld [vmem:[%s16304_s4 + $0x170] sm:$0xff]  }
0x24ae   :  { %12411 = vmatprep.subr.bf16.mxu0 %v13704_v0  ;;  %v3980_v53 = vsel %vm438_vm8, %v3975_v43, 0 }
0x2577   :  { %v3796_v16 = vpop.f32.mrb[124].mxu1 }
0x2578   :  { %v3802_v18 = vmul.f32 0.35355338, %v3796_v16  ;;  %v12397_v20 = vpop.f32.mrb[125].mxu1  ;;  %v13281_v16 = vld [vmem:[%s16304_s4 + $0x178] sm:$0xff]  }
0x2579   :  { %v3799_v21 = vpop.f32.mrb[126].mxu1  ;;  %v13282_v20 = vld [vmem:[%s16304_s4 + $0x130] sm:$0xff]  }
0x257a   :  { %v12398_v23 = vpop.f32.mrb[127].mxu1  ;;  %v3803_v25 = vadd.f32 %v3802_v18, %v14396_v58 }
0x257c   :  { %v3804_v26 = vsel %vm370_vm7, %v3803_v25, -inf }
0x257d   :  { %3805 = vmax.xlane.f32.xlu0 %v3804_v26 }
0x260a   :  { %v3806_v10 = vpop.xlane.xlu0 %3805 }
0x260b   :  { %v3807_v3 = vsub.f32 %v3803_v25, %v3806_v10  ;;  %v13283_v10 = vld [vmem:[%s16304_s4 + $0x138] sm:$0xff]  }
0x260d   :  { %v3808_v27 = vmul.f32 1.442695, %v3807_v3  ;;  %v11114_v3 = vld [vmem:[%s16305_s10 + $0xf] ss:$0 sm:$0xff] }
0x260f   :  { %13425 = vpow2.f32 %v3808_v27 }
0x2619   :  { %v13426_v31 = vpop.eup %13425 }
0x261a   :  { %v3810_v32 = vsel %vm370_vm7, %v13426_v31, 0.0 }
0x261b   :  { %3811 = vadd.xlane.f32.xlu1 %v3810_v32 }
0x26a8   :  { %v3812_v36 = vpop.xlane.xlu1 %3811 }
0x26a9   :  { %13427 = vrcp.f32 %v3812_v36 }
0x26b3   :  { %v13428_v40 = vpop.eup %13427 }
0x26b4   :  { %v3814_v39 = vmul.f32 %v13428_v40, %v13426_v31 }
0x26b6   :  { %v3815_v34 = vpack.c.bf16 %v3814_v39, %v3814_v39 }
0x26b8   :  { %12402 = vmatmul.mubr.msk.bf16.vlgmr.msra.gmra.mrb[116].mxu0 %vm370_vm7, %v3815_v34 }
0x26b9   :  { %12412 = vmatpush3.bf16.xpose.msra.mxu0 %v3918_v2  ;;  %12413 = vmatprep.mubr.msk.bf16.mxu0 %vm13705_vm0, %v13704_v0 }
0x26ba   :  { %12423 = vmatprep.subr.bf16.mxu0 %v13704_v0 }
0x26c0   :  { %12414 = vmatmul.mubr.msk.bf16.vlgmr.msra.gmra.mrb[120].mxu0 %vm370_vm7, %v3911_v41 }
0x26c1   :  { %12424 = vmatpush3.bf16.msra.mxu0 %v3867_v28  ;;  %12425 = vmatprep.mubr.msk.bf16.mxu0 %vm13705_vm0, %v13704_v0 }
0x26c2   :  { %12437 = vmatprep.subr.bf16.mxu0 %v13704_v0 }
0x278b   :  { %v3856_v45 = vpop.f32.mrb[116].mxu0 }
0x278c   :  { %v3862_v50 = vpack.c.bf16 %v3856_v45, %v3856_v45  ;;  %v12403_v51 = vpop.f32.mrb[117].mxu0 }
0x278d   :  { %v3859_v6 = vpop.f32.mrb[118].mxu0 }
0x278e   :  { %v12404_v24 = vpop.f32.mrb[119].mxu0  ;;  %12408 = vmatmul.mubr.msk.bf16.vlgmr.msra.gmra.mrb[128].mxu1 %vm370_vm7, %v3862_v50 }
0x278f   :  { %12418 = vmatpush3.bf16.msra.mxu1 %v3980_v53  ;;  %12419 = vmatprep.mubr.msk.bf16.mxu1 %vm13705_vm0, %v13704_v0 }
0x2790   :  { %12429 = vmatprep.subr.bf16.mxu1 %v13704_v0 }
0x2793   :  { %v3954_v19 = vpop.f32.mrb[120].mxu0 }
0x2794   :  { %v3960_v52 = vmul.f32 0.35355338, %v3954_v19  ;;  %v12415_v54 = vpop.f32.mrb[121].mxu0 }
0x2795   :  { %v3957_v35 = vpop.f32.mrb[122].mxu0 }
0x2796   :  { %v12416_v29 = vpop.f32.mrb[123].mxu0  ;;  %v3961_v55 = vadd.f32 %v3960_v52, %v14403_v49  ;;  %v11122_v52 = vld [vmem:[%s16305_s10 + $0x13] ss:$0 sm:$0xff] }
0x2798   :  { %v3962_v42 = vsel %vm370_vm7, %v3961_v55, -inf }
0x2799   :  { %3963 = vmax.xlane.f32.xlu0 %v3962_v42 }
0x2826   :  { %v3964_v56 = vpop.xlane.xlu0 %3963 }
0x2827   :  { %v3965_v59 = vsub.f32 %v3961_v55, %v3964_v56 }
0x2829   :  { %v3966_v61 = vmul.f32 1.442695, %v3965_v59 }
0x282b   :  { %13429 = vpow2.f32 %v3966_v61 }
0x2835   :  { %v13430_v1 = vpop.eup %13429 }
0x2836   :  { %v3968_v4 = vsel %vm370_vm7, %v13430_v1, 0.0 }
0x2837   :  { %3969 = vadd.xlane.f32.xlu1 %v3968_v4 }
0x2861   :  { %v3903_v5 = vpop.f32.mrb[128].mxu1 }
0x2862   :  { %v14583_v62 = vadd.f32 %v3903_v5, %v14486_v63  ;;  %v12409_v22 = vpop.f32.mrb[129].mxu1  ;;  %v13279_v63 = vld [vmem:[%s16304_s4 + $0xf8] sm:$0xff]  }
0x2863   :  { %v3906_v7 = vpop.f32.mrb[130].mxu1 }
0x2864   :  { %v12410_v9 = vpop.f32.mrb[131].mxu1 }
0x28c4   :  { %v3970_v11 = vpop.xlane.xlu1 %3969 }
0x28c5   :  { %13431 = vrcp.f32 %v3970_v11 }
0x28cf   :  { %v13432_v30 = vpop.eup %13431 }
0x28d0   :  { %v3972_v12 = vmul.f32 %v13432_v30, %v13430_v1 }
0x28d2   :  { %v3973_v13 = vpack.c.bf16 %v3972_v12, %v3972_v12 }
0x28d4   :  { %12420 = vmatmul.mubr.msk.bf16.vlgmr.msra.gmra.mrb[132].mxu1 %vm370_vm7, %v3973_v13 }
0x28d5   :  { %12430 = vmatpush3.bf16.msra.mxu1 %v13278_v17  ;;  %12433 = vmatprep.mubr.msk.bf16.mxu1 %vm13705_vm0, %v13704_v0 }
0x28d6   :  { %12431 = vmatprep.subr.bf16.mxu1 %v13704_v0 }
0x28d9   :  { %12432 = vmatpush3.bf16.msra.mxu1 %v13279_v63  ;;  %v11134_v63 = vld [vmem:[%s16307_s5 + $0x1c] sm:$0xf] }
0x28da   :  { %12445 = vmatprep.subr.bf16.mxu1 %v13704_v0 }
0x28dc   :  { %12434 = vmatmul.mubr.msk.bf16.vlgmr.msra.gmra.mrb[136].mxu1 %vm116_vm2, %v14298_v60 }
0x28dd   :  { %12446 = vmatpush3.bf16.msra.mxu1 %v13280_v15  ;;  %12449 = vmatprep.mubr.msk.bf16.mxu1 %vm13705_vm0, %v13704_v0  ;;  %v4372_v15 = vsel %vm438_vm8, %v11134_v63, 0 }
0x28de   :  { %12447 = vmatprep.subr.bf16.mxu1 %v13704_v0 }
0x28e1   :  { %12448 = vmatpush3.bf16.msra.mxu1 %v13281_v16 }
0x28e2   :  { %12459 = vmatprep.subr.bf16.mxu1 %v13704_v0 }
0x28e4   :  { %12450 = vmatmul.mubr.msk.bf16.vlgmr.msra.gmra.mrb[140].mxu1 %vm116_vm2, %v14298_v60 }
0x28e5   :  { %12461 = vmatprep.mubr.msk.bf16.mxu1 %vm13705_vm0, %v13704_v0 }
0x29a7   :  { %v4016_v18 = vpop.f32.mrb[132].mxu1 }
0x29a8   :  { %v4022_v21 = vpack.c.bf16 %v4016_v18, %v4016_v18  ;;  %v12421_v23 = vpop.f32.mrb[133].mxu1 }
0x29a9   :  { %v4019_v25 = vpop.f32.mrb[134].mxu1 }
0x29aa   :  { %v12422_v26 = vpop.f32.mrb[135].mxu1  ;;  %12426 = vmatmul.mubr.msk.bf16.vlgmr.msra.gmra.mrb[124].mxu0 %vm370_vm7, %v4022_v21 }
0x29ab   :  { %12438 = vmatpush3.bf16.msra.mxu0 %v13282_v20  ;;  %12441 = vmatprep.mubr.msk.bf16.mxu0 %vm13705_vm0, %v13704_v0 }
0x29ac   :  { %12439 = vmatprep.subr.bf16.mxu0 %v13704_v0 }
0x29af   :  { %v4123_v27 = vpop.f32.mrb[136].mxu1  ;;  %12440 = vmatpush3.bf16.msra.mxu0 %v13283_v10 }
0x29b0   :  { %v12435_v31 = vpop.f32.mrb[137].mxu1  ;;  %12453 = vmatprep.subr.bf16.mxu0 %v13704_v0  ;;  %v4124_v33 = vadd.f32 %v11114_v3, %v4123_v27 }
0x29b1   :  { %v4126_v32 = vpop.f32.mrb[138].mxu1 }
0x29b2   :  { %v4127_v28 = vadd.f32 %v11114_v3, %v4126_v32  ;;  %v12436_v36 = vpop.f32.mrb[139].mxu1  ;;  %12442 = vmatmul.mubr.msk.bf16.vlgmr.msra.gmra.mrb[128].mxu0 %vm116_vm2, %v14298_v60 }
0x29b3   :  { %12455 = vmatprep.mubr.msk.bf16.mxu0 %vm13705_vm0, %v13704_v0 }
0x29b4   :  { %v4130_v40 = vpack.c.bf16 %v4127_v28, %v4124_v33 }
0x29b6   :  { %v4416_v25 = vrot.slane %v4130_v40, 4 }
0x29b7   :  { %v4251_v39 = vpop.f32.mrb[140].mxu1 }
0x29b8   :  { %v12451_v34 = vpop.f32.mrb[141].mxu1  ;;  %v4252_v41 = vadd.f32 %v11130_v38, %v4251_v39 }
0x29b9   :  { %v4254_v2 = vpop.f32.mrb[142].mxu1 }
0x29ba   :  { %v4255_v43 = vadd.f32 %v11130_v38, %v4254_v2  ;;  %v12452_v45 = vpop.f32.mrb[143].mxu1 }
0x29bc   :  { %v14633_v50 = vpack.c.bf16 %v4255_v43, %v4252_v41 }
0x29be   :  { %v4325_v51 = vsel %vm438_vm8, %v14633_v50, 0  ;;  %v4480_v26 = vrot.slane %v14633_v50, 4 }
0x29bf   :  { %12460 = vmatpush3.bf16.msra.mxu1 %v4325_v51 }
0x29c0   :  { %12471 = vmatprep.subr.bf16.mxu1 %v13704_v0  ;;  %v4485_v33 = vsel %vm438_vm8, %v4480_v26, 0  ;;  %v13288_v26 = vld [vmem:[%s16310_s7 + $0x28] sm:$0xff]  }
0x2a7d   :  { %v4060_v60 = vpop.f32.mrb[124].mxu0 }
0x2a7e   :  { %v14639_v6 = vadd.f32 %v4060_v60, %v14544_v57  ;;  %v12427_v24 = vpop.f32.mrb[125].mxu0 }
0x2a7f   :  { %v4063_v53 = vpop.f32.mrb[126].mxu0 }
0x2a80   :  { %v12428_v19 = vpop.f32.mrb[127].mxu0 }
0x2a81   :  { %v11141_v19 = vld [vmem:[%s16303_s11 + $0xa] ss:$0 sm:$0xff] }
0x2a85   :  { %v4187_v54 = vpop.f32.mrb[128].mxu0 }
0x2a86   :  { %v12443_v35 = vpop.f32.mrb[129].mxu0  ;;  %v4188_v55 = vadd.f32 %v11122_v52, %v4187_v54 }
0x2a87   :  { %v4190_v29 = vpop.f32.mrb[130].mxu0 }
0x2a88   :  { %v4191_v42 = vadd.f32 %v11122_v52, %v4190_v29  ;;  %v12444_v56 = vpop.f32.mrb[131].mxu0 }
0x2a8a   :  { %v4194_v59 = vpack.c.bf16 %v4191_v42, %v4188_v55 }
0x2a8c   :  { %v4265_v61 = vsel %vm370_vm7, %v4194_v59, 0  ;;  %v4418_v18 = vrot.slane %v4194_v59, 4 }
0x2a8d   :  { %12454 = vmatpush3.bf16.xpose.msra.mxu0 %v4265_v61 }
0x2a8e   :  { %12465 = vmatprep.subr.bf16.mxu0 %v13704_v0  ;;  %v4423_v23 = vsel %vm370_vm7, %v4418_v18, 0 }
0x2a94   :  { %12456 = vmatmul.mubr.msk.bf16.vlgmr.msra.gmra.mrb[132].mxu0 %vm370_vm7, %v4130_v40 }
0x2a95   :  { %12467 = vmatprep.mubr.msk.bf16.mxu0 %vm13705_vm0, %v13704_v0  ;;  %12466 = vmatpush3.bf16.msra.mxu0 %v4372_v15 }
0x2a96   :  { %12477 = vmatprep.subr.bf16.mxu0 %v13704_v0 }
0x2b67   :  { %v4301_v57 = vpop.f32.mrb[132].mxu0 }
0x2b68   :  { %v4307_v1 = vmul.f32 0.35355338, %v4301_v57  ;;  %v12457_v4 = vpop.f32.mrb[133].mxu0 }
0x2b69   :  { %v4304_v5 = vpop.f32.mrb[134].mxu0 }
0x2b6a   :  { %v12458_v22 = vpop.f32.mrb[135].mxu0  ;;  %v4308_v7 = vadd.f32 %v4307_v1, %v14396_v58 }
0x2b6c   :  { %v4309_v9 = vsel %vm370_vm7, %v4308_v7, -inf }
0x2b6d   :  { %4310 = vmax.xlane.f32.xlu0 %v4309_v9 }
0x2bfa   :  { %v4311_v11 = vpop.xlane.xlu0 %4310 }
0x2bfb   :  { %v4312_v30 = vsub.f32 %v4308_v7, %v4311_v11 }
0x2bfd   :  { %v4313_v12 = vmul.f32 1.442695, %v4312_v30 }
0x2bff   :  { %13433 = vpow2.f32 %v4313_v12 }
0x2c09   :  { %v13434_v17 = vpop.eup %13433 }
0x2c0a   :  { %v4315_v13 = vsel %vm370_vm7, %v13434_v17, 0.0 }
0x2c0b   :  { %4316 = vadd.xlane.f32.xlu1 %v4315_v13 }
0x2c98   :  { %v4317_v58 = vpop.xlane.xlu1 %4316 }
0x2c99   :  { %13435 = vrcp.f32 %v4317_v58 }
0x2ca3   :  { %v13436_v16 = vpop.eup %13435 }
0x2ca4   :  { %v4319_v20 = vmul.f32 %v13436_v16, %v13434_v17 }
0x2ca6   :  { %v4320_v21 = vpack.c.bf16 %v4319_v20, %v4319_v20 }
0x2ca8   :  { %12462 = vmatmul.mubr.msk.bf16.vlgmr.msra.gmra.mrb[144].mxu1 %vm370_vm7, %v4320_v21 }
0x2ca9   :  { %12472 = vmatpush3.bf16.xpose.msra.mxu1 %v4423_v23  ;;  %12473 = vmatprep.mubr.msk.bf16.mxu1 %vm13705_vm0, %v13704_v0 }
0x2caa   :  { %12483 = vmatprep.subr.bf16.mxu1 %v13704_v0 }
0x2cb0   :  { %12474 = vmatmul.mubr.msk.bf16.vlgmr.msra.gmra.mrb[148].mxu1 %vm370_vm7, %v4416_v25  ;;  %v13287_v25 = vld [vmem:[%s16310_s7 + $0x20] sm:$0xff]  }
0x2cb1   :  { %12484 = vmatpush3.bf16.msra.mxu1 %v4372_v15  ;;  %12485 = vmatprep.mubr.msk.bf16.mxu1 %vm13705_vm0, %v13704_v0 }
0x2cb2   :  { %12497 = vmatprep.subr.bf16.mxu1 %v13704_v0 }
0x2d7b   :  { %v4361_v10 = vpop.f32.mrb[144].mxu1 }
0x2d7c   :  { %v4367_v3 = vpack.c.bf16 %v4361_v10, %v4361_v10  ;;  %v12463_v27 = vpop.f32.mrb[145].mxu1 }
0x2d7d   :  { %v4364_v31 = vpop.f32.mrb[146].mxu1 }
0x2d7e   :  { %v12464_v32 = vpop.f32.mrb[147].mxu1  ;;  %12468 = vmatmul.mubr.msk.bf16.vlgmr.msra.gmra.mrb[136].mxu0 %vm370_vm7, %v4367_v3 }
0x2d7f   :  { %12478 = vmatpush3.bf16.msra.mxu0 %v4485_v33  ;;  %12479 = vmatprep.mubr.msk.bf16.mxu0 %vm13705_vm0, %v13704_v0 }
0x2d80   :  { %12489 = vmatprep.subr.bf16.mxu0 %v13704_v0 }
0x2d83   :  { %v4459_v28 = vpop.f32.mrb[148].mxu1 }
0x2d84   :  { %v4465_v36 = vmul.f32 0.35355338, %v4459_v28  ;;  %v12475_v40 = vpop.f32.mrb[149].mxu1 }
0x2d85   :  { %v4462_v38 = vpop.f32.mrb[150].mxu1 }
0x2d86   :  { %v12476_v39 = vpop.f32.mrb[151].mxu1  ;;  %v4466_v34 = vadd.f32 %v4465_v36, %v14403_v49 }
0x2d88   :  { %v4467_v2 = vsel %vm370_vm7, %v4466_v34, -inf }
0x2d89   :  { %4468 = vmax.xlane.f32.xlu0 %v4467_v2 }
0x2e16   :  { %v4469_v41 = vpop.xlane.xlu0 %4468 }
0x2e17   :  { %v4470_v43 = vsub.f32 %v4466_v34, %v4469_v41 }
0x2e19   :  { %v4471_v45 = vmul.f32 1.442695, %v4470_v43 }
0x2e1b   :  { %13437 = vpow2.f32 %v4471_v45 }
0x2e25   :  { %v13438_v50 = vpop.eup %13437 }
0x2e26   :  { %v4473_v51 = vsel %vm370_vm7, %v13438_v50, 0.0 }
0x2e27   :  { %4474 = vadd.xlane.f32.xlu1 %v4473_v51 }
0x2e51   :  { %v4408_v60 = vpop.f32.mrb[136].mxu0 }
0x2e52   :  { %v4414_v24 = vadd.f32 %v4408_v60, %v14583_v62  ;;  %v12469_v53 = vpop.f32.mrb[137].mxu0  ;;  %v11142_v60 = vld [vmem:[%s16303_s11 + $0x8] ss:$0 sm:$0xff] }
0x2e53   :  { %v4411_v49 = vpop.f32.mrb[138].mxu0 }
0x2e54   :  { %v4572_v52 = vadd.f32 %v4414_v24, %v14206_v14  ;;  %v12470_v54 = vpop.f32.mrb[139].mxu0  ;;  %v11143_v49 = vld [vmem:[%s16303_s11 + $0x9] ss:$0 sm:$0xff] }
0x2e56   :  { %v14680_v35 = vadd.f32 %v11141_v19, %v4572_v52 }
0x2e58   :  { %v4581_v29 = vsel %vm116_vm2, %v14680_v35, 0.0 }
0x2e59   :  { %4582 = vadd.xlane.f32.xlu0 %v4581_v29 }
0x2eb4   :  { %v4475_v55 = vpop.xlane.xlu1 %4474 }
0x2eb5   :  { %13439 = vrcp.f32 %v4475_v55  ;;  %v13286_v55 = vld [vmem:[%s16301_s8 + $0x8] sm:$0xff]  }
0x2ebf   :  { %v13440_v42 = vpop.eup %13439 }
0x2ec0   :  { %v4477_v56 = vmul.f32 %v13440_v42, %v13438_v50 }
0x2ec2   :  { %v4478_v62 = vpack.c.bf16 %v4477_v56, %v4477_v56  ;;  %v4847_v56 = vld [vmem:[%s16311_s2] sm:$0xff] }
0x2ec4   :  { %12480 = vmatmul.mubr.msk.bf16.vlgmr.msra.gmra.mrb[140].mxu0 %vm370_vm7, %v4478_v62  ;;  %v4848_v62 = vld [vmem:[%s16311_s2 + $0x8] sm:$0xff] }
0x2ec5   :  { %12493 = vmatprep.mubr.msk.bf16.mxu0 %vm13705_vm0, %v13704_v0 }
0x2ee6   :  { %v4583_v59 = vpop.xlane.xlu0 %4582 }
0x2ee7   :  { %v4587_v61 = vmul.f32 0.03125, %v4583_v59  ;;  %v4849_v59 = vpack.c.bf16 %v4848_v62, %v4847_v56 }
0x2ee9   :  { %v14688_v14 = vsub.f32 %v14680_v35, %v4587_v61  ;;  %v13289_v61 = vld [vmem:[%s16310_s7 + $0x30] sm:$0xff]  }
0x2eeb   :  { %v4591_v57 = vmul.f32 %v14688_v14, %v14688_v14 }
0x2eed   :  { %v4593_v1 = vsel %vm116_vm2, %v4591_v57, 0.0  ;;  %v11148_v57 = vld [vmem:[%s16303_s11 + $0x26] ss:$0 sm:$0xff] }
0x2eee   :  { %4594 = vadd.xlane.f32.xlu0 %v4593_v1 }
0x2f7b   :  { %v4595_v10 = vpop.xlane.xlu0 %4594 }
0x2f7c   :  { %v4599_v3 = vmul.f32 0.032258064, %v4595_v10 }
0x2f7e   :  { %13441 = vrsqrt.f32 %v4599_v3  ;;  %vm4603_vm5 = vcmp.eq.f32.partialorder %v4599_v3, inf  ;;  %v4606_v36 = vand.u32 2147483648, %v4599_v3  ;;  %vm4605_vm6 = vcmp.eq.f32.partialorder %v4599_v3, 0.0 }
0x2f88   :  { %v13442_v27 = vpop.eup %13441 }
0x2f89   :  { %v4602_v31 = vmul.f32 %v13442_v27, %v4599_v3 }
0x2f8b   :  { %v4604_v28 = vsel %vm4603_vm5, %v4599_v3, %v4602_v31 }
0x2f8c   :  { %v4607_v40 = vsel %vm4605_vm6, %v4606_v36, %v4604_v28 }
0x2f8d   :  { %v4615_v38 = vadd.f32 1e-06, %v4607_v40 }
0x2f97   :  { %v4521_v4 = vpop.f32.mrb[140].mxu0 }
0x2f98   :  { %v4527_v5 = vpack.c.bf16 %v4521_v4, %v4521_v4  ;;  %v12481_v22 = vpop.f32.mrb[141].mxu0 }
0x2f99   :  { %v4524_v7 = vpop.f32.mrb[142].mxu0 }
0x2f9a   :  { %v12482_v9 = vpop.f32.mrb[143].mxu0  ;;  %12486 = vmatmul.mubr.msk.bf16.vlgmr.msra.gmra.mrb[152].mxu1 %vm370_vm7, %v4527_v5 }
0x2f9b   :  { %12505 = vmatprep.mubr.msk.bf16.mxu1 %vm13705_vm0, %v13704_v0  ;;  %12498 = vmatpush3.bf16.msra.mxu1 %v13287_v25 }
0x2f9c   :  { %12499 = vmatprep.subr.bf16.mxu1 %v13704_v0 }
0x2f9f   :  { %12500 = vmatpush3.bf16.msra.mxu1 %v13288_v26 }
0x2fa0   :  { %12501 = vmatprep.subr.bf16.mxu1 %v13704_v0 }
0x2fa3   :  { %12502 = vmatpush3.bf16.msra.mxu1 %v13289_v61 }
0x2fa4   :  { %12503 = vmatprep.subr.bf16.mxu1 %v13704_v0 }
0x306d   :  { %v4565_v11 = vpop.f32.mrb[152].mxu1 }
0x306e   :  { %v4571_v30 = vadd.f32 %v4565_v11, %v14639_v6  ;;  %v12487_v12 = vpop.f32.mrb[153].mxu1  ;;  %v13284_v6 = vld [vmem:[%s16309_s6 + $0x10] sm:$0xff]  }
0x306f   :  { %v4568_v17 = vpop.f32.mrb[154].mxu1  ;;  %12490 = vmatpush3.bf16.msra.mxu0 %v13284_v6  ;;  %v11170_v12 = vld [vmem:[%s16303_s11 + $0x24] ss:$0 sm:$0xff] }
0x3070   :  { %v4573_v13 = vadd.f32 %v4571_v30, %v14235_v47  ;;  %v12488_v63 = vpop.f32.mrb[155].mxu1  ;;  %v13285_v47 = vld [vmem:[%s16309_s6 + $0x18] sm:$0xff]   ;;  %12491 = vmatprep.subr.bf16.mxu0 %v13704_v0  ;;  %v11173_v17 = vld [vmem:[%s16303_s11 + $0x22] ss:$0 sm:$0xff] }
0x3072   :  { %v14698_v15 = vadd.f32 %v11141_v19, %v4573_v13 }
0x3073   :  { %12492 = vmatpush3.bf16.msra.mxu0 %v13285_v47 }
0x3074   :  { %v4584_v58 = vsel %vm116_vm2, %v14698_v15, 0.0  ;;  %12509 = vmatprep.subr.bf16.mxu0 %v13704_v0 }
0x3075   :  { %4585 = vadd.xlane.f32.xlu1 %v4584_v58 }
0x3102   :  { %v4586_v16 = vpop.xlane.xlu1 %4585 }
0x3103   :  { %v4588_v18 = vmul.f32 0.03125, %v4586_v16  ;;  %v13692_v16 = vld [vmem:[%s16303_s11 + $0x2a] sm:$0xff] }
0x3105   :  { %v4590_v20 = vsub.f32 %v14698_v15, %v4588_v18  ;;  %v4913_v18 = vadd.f32 %v13692_v16, %v11173_v17 }
0x3107   :  { %v4592_v21 = vmul.f32 %v4590_v20, %v4590_v20 }
0x3109   :  { %v4596_v23 = vsel %vm116_vm2, %v4592_v21, 0.0 }
0x310a   :  { %4597 = vadd.xlane.f32.xlu1 %v4596_v23 }
0x3197   :  { %v4598_v32 = vpop.xlane.xlu1 %4597 }
0x3198   :  { %v4600_v33 = vmul.f32 0.032258064, %v4598_v32 }
0x319a   :  { %13443 = vrsqrt.f32 %v4600_v33  ;;  %vm4610_vm9 = vcmp.eq.f32.partialorder %v4600_v33, inf  ;;  %v4613_v2 = vand.u32 2147483648, %v4600_v33  ;;  %vm4612_vm10 = vcmp.eq.f32.partialorder %v4600_v33, 0.0 }
0x319b   :  { %13445 = vrcp.f32 %v4615_v38 }
0x31a4   :  { %v13444_v39 = vpop.eup %13443 }
0x31a5   :  { %v4609_v34 = vmul.f32 %v13444_v39, %v4600_v33  ;;  %v13446_v50 = vpop.eup %13445 }
0x31a6   :  { %v4622_v51 = vmul.f32 %v13446_v50, %v14688_v14  ;;  %v13290_v14 = vld [vmem:[%s16310_s7 + $0x38] sm:$0xff]   ;;  %v13294_v50 = vld [vmem:[%s16304_s4 + $0x1c8] sm:$0xff]  }
0x31a7   :  { %v4611_v41 = vsel %vm4610_vm9, %v4600_v33, %v4609_v34  ;;  %12504 = vmatpush3.bf16.msra.mxu1 %v13290_v14 }
0x31a8   :  { %v4614_v43 = vsel %vm4612_vm10, %v4613_v2, %v4611_v41  ;;  %v4628_v19 = vmul.f32 %v11142_v60, %v4622_v51  ;;  %12523 = vmatprep.subr.bf16.mxu1 %v13704_v0  ;;  %v13291_v41 = vld [vmem:[%s16304_s4 + $0x180] sm:$0xff]   ;;  %v11160_v51 = vld [vmem:[%s16303_s11 + $0xb] ss:$0 sm:$0xff] }
0x31a9   :  { %v4616_v45 = vadd.f32 1e-06, %v4614_v43  ;;  %v13292_v43 = vld [vmem:[%s16304_s4 + $0x1c0] sm:$0xff]  }
0x31aa   :  { %v4635_v54 = vadd.f32 %v11143_v49, %v4628_v19 }
0x31ab   :  { %13447 = vrcp.f32 %v4616_v45  ;;  %v13293_v45 = vld [vmem:[%s16304_s4 + $0x188] sm:$0xff]  }
0x31b5   :  { %v13448_v24 = vpop.eup %13447 }
0x31b6   :  { %v4623_v53 = vmul.f32 %v13448_v24, %v4590_v20 }
0x31b8   :  { %v4629_v52 = vmul.f32 %v11142_v60, %v4623_v53 }
0x31ba   :  { %v4636_v29 = vadd.f32 %v11143_v49, %v4629_v52 }
0x31bc   :  { %v4637_v42 = vpack.c.bf16 %v4636_v29, %v4635_v54 }
0x31be   :  { %12494 = vmatmul.mubr.msk.bf16.vlgmr.msra.gmra.mrb[144].mxu0 %vm116_vm2, %v4637_v42 }
0x31bf   :  { %12510 = vmatpush3.bf16.msra.mxu0 %v13286_v55  ;;  %12511 = vmatprep.mubr.msk.bf16.mxu0 %vm13705_vm0, %v13704_v0 }
0x31c0   :  { %12515 = vmatprep.subr.bf16.mxu0 %v13704_v0 }
0x31c6   :  { %12512 = vmatmul.mubr.msk.bf16.vlgmr.msra.gmra.mrb[148].mxu0 %vm60_vm1, %v4849_v59 }
0x31c7   :  { %12519 = vmatprep.mubr.msk.bf16.mxu0 %vm13705_vm0, %v13704_v0  ;;  %12516 = vmatpush3.bf16.msra.mxu0 %v13291_v41 }
0x31c8   :  { %12517 = vmatprep.subr.bf16.mxu0 %v13704_v0 }
0x31cb   :  { %12518 = vmatpush3.bf16.msra.mxu0 %v13293_v45  ;;  %v11196_v45 = vld [vmem:[%s16305_s10 + $0x20] ss:$0 sm:$0xff] }
0x31cc   :  { %12531 = vmatprep.subr.bf16.mxu0 %v13704_v0 }
0x3291   :  { %v4697_v1 = vpop.f32.mrb[144].mxu0 }
0x3292   :  { %v4698_v4 = vadd.f32 %v11148_v57, %v4697_v1  ;;  %v12495_v5 = vpop.f32.mrb[145].mxu0 }
0x3293   :  { %v4700_v22 = vpop.f32.mrb[146].mxu0 }
0x3294   :  { %v4701_v7 = vadd.f32 %v11148_v57, %v4700_v22  ;;  %v12496_v9 = vpop.f32.mrb[147].mxu0  ;;  %v4704_v11 = vmax.f32 %v4698_v4, 0.0 }
0x3296   :  { %v4705_v30 = vmax.f32 %v4701_v7, 0.0 }
0x3298   :  { %v4706_v13 = vpack.c.bf16 %v4705_v30, %v4704_v11  ;;  %v11174_v11 = vld [vmem:[%s16303_s11 + $0xc] ss:$0 sm:$0xff] }
0x3299   :  { %v4901_v63 = vpop.f32.mrb[148].mxu0 }
0x329a   :  { %v4902_v58 = vadd.f32 %v11170_v12, %v4901_v63  ;;  %12506 = vmatmul.mubr.msk.bf16.vlgmr.msra.gmra.mrb[156].mxu1 %vm2373_vm4, %v4706_v13  ;;  %v12513_v20 = vpop.f32.mrb[149].mxu0  ;;  %v11175_v63 = vld [vmem:[%s16303_s11 + $0xd] ss:$0 sm:$0xff] }
0x329b   :  { %v4904_v21 = vpop.f32.mrb[150].mxu0  ;;  %12527 = vmatprep.mubr.msk.bf16.mxu1 %vm13705_vm0, %v13704_v0  ;;  %12524 = vmatpush3.bf16.msra.mxu1 %v13292_v43  ;;  %v13295_v20 = vld [vmem:[%s16304_s4 + $0x200] sm:$0xff]  }
0x329c   :  { %v4914_v23 = vmul.f32 5.656854, %v4902_v58  ;;  %v4905_v6 = vadd.f32 %v11170_v12, %v4904_v21  ;;  %v12514_v47 = vpop.f32.mrb[151].mxu0  ;;  %12525 = vmatprep.subr.bf16.mxu1 %v13704_v0 }
0x329e   :  { %v14766_v25 = vadd.f32 %v4914_v23, %v4913_v18  ;;  %v4915_v26 = vmul.f32 5.656854, %v4905_v6  ;;  %v13296_v23 = vld [vmem:[%s16304_s4 + $0x208] sm:$0xff]   ;;  %v11180_v6 = vld [vmem:[%s16305_s10 + $0x18] ss:$0 sm:$0xff] }
0x329f   :  { %12526 = vmatpush3.bf16.msra.mxu1 %v13294_v50 }
0x32a0   :  { %v14768_v10 = vadd.f32 %v4915_v26, %v4913_v18  ;;  %v4918_v3 = vsel %vm116_vm2, %v14766_v25, 0.0  ;;  %12539 = vmatprep.subr.bf16.mxu1 %v13704_v0  ;;  %v11188_v26 = vld [vmem:[%s16305_s10 + $0x1c] ss:$0 sm:$0xff] }
0x32a1   :  { %4919 = vadd.xlane.f32.xlu0 %v4918_v3 }
0x32a2   :  { %v4921_v27 = vsel %vm116_vm2, %v14768_v10, 0.0 }
0x32a3   :  { %4922 = vadd.xlane.f32.xlu1 %v4921_v27 }
0x332e   :  { %v4920_v31 = vpop.xlane.xlu0 %4919 }
0x332f   :  { %v4924_v32 = vmul.f32 0.03125, %v4920_v31 }
0x3330   :  { %v4923_v33 = vpop.xlane.xlu1 %4922 }
0x3331   :  { %v4926_v28 = vsub.f32 %v14766_v25, %v4924_v32  ;;  %v4925_v36 = vmul.f32 0.03125, %v4923_v33 }
0x3333   :  { %v4927_v40 = vsub.f32 %v14768_v10, %v4925_v36  ;;  %v4928_v38 = vmul.f32 %v4926_v28, %v4926_v28 }
0x3335   :  { %v4930_v39 = vsel %vm116_vm2, %v4928_v38, 0.0  ;;  %v4929_v34 = vmul.f32 %v4927_v40, %v4927_v40 }
0x3336   :  { %4931 = vadd.xlane.f32.xlu0 %v4930_v39 }
0x3337   :  { %v4933_v2 = vsel %vm116_vm2, %v4929_v34, 0.0 }
0x3338   :  { %4934 = vadd.xlane.f32.xlu1 %v4933_v2 }
0x336d   :  { %v4782_v60 = vpop.f32.mrb[156].mxu1 }
0x336e   :  { %v14797_v24 = vadd.f32 %v11160_v51, %v4782_v60  ;;  %v12507_v53 = vpop.f32.mrb[157].mxu1 }
0x336f   :  { %v14799_v19 = vpop.f32.mrb[158].mxu1 }
0x3370   :  { %v12508_v49 = vpop.f32.mrb[159].mxu1 }
0x33c3   :  { %v4932_v52 = vpop.xlane.xlu0 %4931 }
0x33c4   :  { %v4936_v54 = vmul.f32 0.032258064, %v4932_v52 }
0x33c5   :  { %v4935_v29 = vpop.xlane.xlu1 %4934 }
0x33c6   :  { %13449 = vrsqrt.f32 %v4936_v54  ;;  %v4937_v55 = vmul.f32 0.032258064, %v4935_v29  ;;  %vm4940_vm1 = vcmp.eq.f32.partialorder %v4936_v54, inf  ;;  %v4943_v62 = vand.u32 2147483648, %v4936_v54 }
0x33c7   :  { %vm4942_vm11 = vcmp.eq.f32.partialorder %v4936_v54, 0.0 }
0x33c8   :  { %13451 = vrsqrt.f32 %v4937_v55  ;;  %vm4947_vm12 = vcmp.eq.f32.partialorder %v4937_v55, inf  ;;  %v4950_v4 = vand.u32 2147483648, %v4937_v55  ;;  %vm4949_vm13 = vcmp.eq.f32.partialorder %v4937_v55, 0.0 }
0x33d0   :  { %v13450_v42 = vpop.eup %13449 }
0x33d1   :  { %v4939_v56 = vmul.f32 %v13450_v42, %v4936_v54 }
0x33d2   :  { %v13452_v59 = vpop.eup %13451 }
0x33d3   :  { %v4941_v61 = vsel %vm4940_vm1, %v4936_v54, %v4939_v56  ;;  %v4946_v57 = vmul.f32 %v13452_v59, %v4937_v55  ;;  %v13297_v56 = vld [vmem:[%s16304_s4 + $0x190] sm:$0xff]   ;;  %v13298_v59 = vld [vmem:[%s16304_s4 + $0x198] sm:$0xff]  }
0x33d4   :  { %v4944_v14 = vsel %vm4942_vm11, %v4943_v62, %v4941_v61  ;;  %v13299_v61 = vld [vmem:[%s16304_s4 + $0x210] sm:$0xff]  }
0x33d5   :  { %v4952_v1 = vadd.f32 1e-06, %v4944_v14  ;;  %v4948_v5 = vsel %vm4947_vm12, %v4937_v55, %v4946_v57  ;;  %v13300_v14 = vld [vmem:[%s16304_s4 + $0x218] sm:$0xff]   ;;  %v5221_v57 = vsub.s32 2, %v13903_v37 }
0x33d6   :  { %v4951_v22 = vsel %vm4949_vm13, %v4950_v4, %v4948_v5 }
0x33d7   :  { %13453 = vrcp.f32 %v4952_v1  ;;  %v4953_v7 = vadd.f32 1e-06, %v4951_v22  ;;  %v13693_v1 = vld [vmem:[%s16306_s3] sm:$0xff] }
0x33d8   :  { %v14881_v4 = vrot.slane %v13693_v1, %v5221_v57 }
0x33d9   :  { %13455 = vrcp.f32 %v4953_v7 }
0x33e1   :  { %v13454_v9 = vpop.eup %13453 }
0x33e2   :  { %v4959_v30 = vmul.f32 %v13454_v9, %v4926_v28 }
0x33e3   :  { %v13456_v12 = vpop.eup %13455 }
0x33e4   :  { %v4965_v17 = vmul.f32 %v11174_v11, %v4959_v30  ;;  %v4960_v13 = vmul.f32 %v13456_v12, %v4927_v40 }
0x33e6   :  { %v4966_v58 = vmul.f32 %v11174_v11, %v4960_v13  ;;  %v4972_v16 = vadd.f32 %v11175_v63, %v4965_v17  ;;  %v13694_v17 = vld [vmem:[%s16306_s3 + $0x8] sm:$0xff] }
0x33e7   :  { %v14888_v13 = vrot.slane %v13694_v17, %v5221_v57 }
0x33e8   :  { %v4973_v18 = vadd.f32 %v11175_v63, %v4966_v58 }
0x33ea   :  { %v14810_v21 = vpack.c.bf16 %v4973_v18, %v4972_v16 }
0x33ec   :  { %12520 = vmatmul.mubr.msk.bf16.vlgmr.msra.gmra.mrb[152].mxu0 %vm116_vm2, %v14810_v21  ;;  %12528 = vmatmul.mubr.msk.bf16.vlgmr.msra.gmra.mrb[160].mxu1 %vm116_vm2, %v14810_v21 }
0x33ed   :  { %12532 = vmatpush3.bf16.msra.mxu0 %v13295_v20  ;;  %12535 = vmatprep.mubr.msk.bf16.mxu0 %vm13705_vm0, %v13704_v0 }
0x33ee   :  { %12533 = vmatprep.subr.bf16.mxu0 %v13704_v0  ;;  %12541 = vmatprep.mubr.msk.bf16.mxu1 %vm13705_vm0, %v13704_v0 }
0x33f1   :  { %12534 = vmatpush3.bf16.msra.mxu0 %v13296_v23 }
0x33f2   :  { %12545 = vmatprep.subr.bf16.mxu0 %v13704_v0 }
0x33f4   :  { %12536 = vmatmul.mubr.msk.bf16.vlgmr.msra.gmra.mrb[156].mxu0 %vm116_vm2, %v14810_v21 }
0x33f5   :  { %12547 = vmatprep.mubr.msk.bf16.mxu0 %vm13705_vm0, %v13704_v0 }
0x34bf   :  { %v5034_v47 = vpop.f32.mrb[152].mxu0  ;;  %v5098_v3 = vpop.f32.mrb[160].mxu1 }
0x34c0   :  { %v12521_v27 = vpop.f32.mrb[153].mxu0  ;;  %v12529_v31 = vpop.f32.mrb[161].mxu1  ;;  %v5035_v28 = vadd.f32 %v11180_v6, %v5034_v47  ;;  %v5099_v36 = vadd.f32 %v11188_v26, %v5098_v3  ;;  %v11209_v47 = vld [vmem:[%s16305_s10 + $0x19] ss:$0 sm:$0xff] }
0x34c1   :  { %v5037_v32 = vpop.f32.mrb[154].mxu0  ;;  %v5101_v33 = vpop.f32.mrb[162].mxu1 }
0x34c2   :  { %v5038_v40 = vadd.f32 %v11180_v6, %v5037_v32  ;;  %v5102_v38 = vadd.f32 %v11188_v26, %v5101_v33  ;;  %v12522_v39 = vpop.f32.mrb[155].mxu0  ;;  %v12530_v34 = vpop.f32.mrb[163].mxu1 }
0x34c4   :  { %v5041_v2 = vpack.c.bf16 %v5038_v40, %v5035_v28  ;;  %v5105_v41 = vpack.c.bf16 %v5102_v38, %v5099_v36  ;;  %v11225_v36 = vld [vmem:[%s16305_s10 + $0x21] ss:$0 sm:$0xff] }
0x34c6   :  { %v5176_v43 = vsel %vm370_vm7, %v5105_v41, 0  ;;  %v5286_v53 = vrot.slane %v5105_v41, 4  ;;  %v5284_v62 = vrot.slane %v5041_v2, 4 }
0x34c7   :  { %v5162_v50 = vpop.f32.mrb[156].mxu0  ;;  %12540 = vmatpush3.bf16.xpose.msra.mxu1 %v5176_v43 }
0x34c8   :  { %v12537_v51 = vpop.f32.mrb[157].mxu0  ;;  %12551 = vmatprep.subr.bf16.mxu1 %v13704_v0  ;;  %v5163_v49 = vadd.f32 %v11196_v45, %v5162_v50  ;;  %v5291_v42 = vsel %vm370_vm7, %v5286_v53, 0 }
0x34c9   :  { %v5165_v60 = vpop.f32.mrb[158].mxu0 }
0x34ca   :  { %v5166_v52 = vadd.f32 %v11196_v45, %v5165_v60  ;;  %v12538_v54 = vpop.f32.mrb[159].mxu0 }
0x34cc   :  { %v14840_v29 = vpack.c.bf16 %v5166_v52, %v5163_v49 }
0x34ce   :  { %12542 = vmatmul.mubr.msk.bf16.vlgmr.msra.gmra.mrb[164].mxu1 %vm370_vm7, %v5041_v2  ;;  %v5240_v55 = vsel %vm438_vm8, %v14840_v29, 0 }
0x34cf   :  { %12546 = vmatpush3.bf16.msra.mxu0 %v5240_v55  ;;  %12552 = vmatpush3.bf16.xpose.msra.mxu1 %v5291_v42 }
0x34d0   :  { %12553 = vmatprep.mubr.msk.bf16.mxu1 %vm13705_vm0, %v13704_v0  ;;  %12563 = vmatprep.subr.bf16.mxu1 %v13704_v0 }
0x34d1   :  { %12557 = vmatprep.subr.bf16.mxu0 %v13704_v0 }
0x34d6   :  { %12554 = vmatmul.mubr.msk.bf16.vlgmr.msra.gmra.mrb[168].mxu1 %vm370_vm7, %v5284_v62 }
0x34d7   :  { %12564 = vmatpush3.bf16.msra.mxu1 %v13297_v56  ;;  %12567 = vmatprep.mubr.msk.bf16.mxu1 %vm13705_vm0, %v13704_v0 }
0x34d8   :  { %12565 = vmatprep.subr.bf16.mxu1 %v13704_v0 }
0x34db   :  { %12566 = vmatpush3.bf16.msra.mxu1 %v13298_v59 }
0x34dc   :  { %12579 = vmatprep.subr.bf16.mxu1 %v13704_v0 }
0x34de   :  { %12568 = vmatmul.mubr.msk.bf16.vlgmr.msra.gmra.mrb[172].mxu1 %vm116_vm2, %v14810_v21 }
0x34df   :  { %12580 = vmatpush3.bf16.msra.mxu1 %v13299_v61  ;;  %12583 = vmatprep.mubr.msk.bf16.mxu1 %vm13705_vm0, %v13704_v0 }
0x34e0   :  { %12581 = vmatprep.subr.bf16.mxu1 %v13704_v0 }
0x34e3   :  { %12582 = vmatpush3.bf16.msra.mxu1 %v13300_v14  ;;  %v5352_v14 = vrot.slane %v14840_v29, 4  ;;  %v13302_v29 = vld [vmem:[%s16304_s4 + $0x1d8] sm:$0xff]  }
0x34e4   :  { %12593 = vmatprep.subr.bf16.mxu1 %v13704_v0 }
0x34e6   :  { %12584 = vmatmul.mubr.msk.bf16.vlgmr.msra.gmra.mrb[176].mxu1 %vm116_vm2, %v14810_v21 }
0x34e7   :  { %12595 = vmatprep.mubr.msk.bf16.mxu1 %vm13705_vm0, %v13704_v0 }
0x35a1   :  { %v5212_v5 = vpop.f32.mrb[164].mxu1 }
0x35a2   :  { %v5218_v22 = vmul.f32 0.35355338, %v5212_v5  ;;  %v12543_v7 = vpop.f32.mrb[165].mxu1  ;;  %v5357_v5 = vsel %vm438_vm8, %v5352_v14, 0 }
0x35a3   :  { %v5215_v9 = vpop.f32.mrb[166].mxu1 }
0x35a4   :  { %v12544_v11 = vpop.f32.mrb[167].mxu1  ;;  %v5223_v30 = vadd.f32 %v14881_v4, %v5218_v22  ;;  %v13301_v9 = vld [vmem:[%s16304_s4 + $0x1d0] sm:$0xff]  }
0x35a6   :  { %v5224_v12 = vsel %vm370_vm7, %v5223_v30, -inf }
0x35a7   :  { %5225 = vmax.xlane.f32.xlu0 %v5224_v12 }
0x35a9   :  { %v5327_v63 = vpop.f32.mrb[168].mxu1 }
0x35aa   :  { %v5333_v58 = vmul.f32 0.35355338, %v5327_v63  ;;  %v12555_v16 = vpop.f32.mrb[169].mxu1 }
0x35ab   :  { %v5330_v18 = vpop.f32.mrb[170].mxu1 }
0x35ac   :  { %v12556_v20 = vpop.f32.mrb[171].mxu1  ;;  %v5338_v23 = vadd.f32 %v14888_v13, %v5333_v58 }
0x35ae   :  { %v5339_v6 = vsel %vm370_vm7, %v5338_v23, -inf }
0x35af   :  { %5340 = vmax.xlane.f32.xlu1 %v5339_v6 }
0x35b1   :  { %v5456_v26 = vpop.f32.mrb[172].mxu1 }
0x35b2   :  { %v12569_v3 = vpop.f32.mrb[173].mxu1  ;;  %v5457_v31 = vadd.f32 %v11209_v47, %v5456_v26 }
0x35b3   :  { %v5459_v27 = vpop.f32.mrb[174].mxu1 }
0x35b4   :  { %v5460_v32 = vadd.f32 %v11209_v47, %v5459_v27  ;;  %v12570_v33 = vpop.f32.mrb[175].mxu1 }
0x35b6   :  { %v14895_v28 = vpack.c.bf16 %v5460_v32, %v5457_v31 }
0x35b9   :  { %v5584_v40 = vpop.f32.mrb[176].mxu1 }
0x35ba   :  { %v12585_v38 = vpop.f32.mrb[177].mxu1  ;;  %v5585_v34 = vadd.f32 %v11225_v36, %v5584_v40 }
0x35bb   :  { %v5587_v39 = vpop.f32.mrb[178].mxu1 }
0x35bc   :  { %v5588_v2 = vadd.f32 %v11225_v36, %v5587_v39  ;;  %v12586_v41 = vpop.f32.mrb[179].mxu1 }
0x35be   :  { %v14900_v43 = vpack.c.bf16 %v5588_v2, %v5585_v34 }
0x35c0   :  { %v5658_v45 = vsel %vm438_vm8, %v14900_v43, 0 }
0x35c1   :  { %12594 = vmatpush3.bf16.msra.mxu1 %v5658_v45 }
0x35c2   :  { %12605 = vmatprep.subr.bf16.mxu1 %v13704_v0 }
0x3634   :  { %v5226_v50 = vpop.xlane.xlu0 %5225 }
0x3635   :  { %v5227_v51 = vsub.f32 %v5223_v30, %v5226_v50 }
0x3637   :  { %v5228_v60 = vmul.f32 1.442695, %v5227_v51 }
0x3639   :  { %13457 = vpow2.f32 %v5228_v60 }
0x363c   :  { %v5341_v53 = vpop.xlane.xlu1 %5340 }
0x363d   :  { %v5342_v49 = vsub.f32 %v5338_v23, %v5341_v53  ;;  %v11217_v23 = vld [vmem:[%s16305_s10 + $0x1d] ss:$0 sm:$0xff] }
0x363f   :  { %v5343_v52 = vmul.f32 1.442695, %v5342_v49  ;;  %v11229_v49 = vld [vmem:[%s16307_s5 + $0x24] sm:$0xf] }
0x3641   :  { %13459 = vpow2.f32 %v5343_v52  ;;  %v5705_v52 = vsel %vm438_vm8, %v11229_v49, 0 }
0x3643   :  { %v13458_v54 = vpop.eup %13457 }
0x3644   :  { %v5230_v55 = vsel %vm370_vm7, %v13458_v54, 0.0 }
0x3645   :  { %5231 = vadd.xlane.f32.xlu0 %v5230_v55 }
0x364b   :  { %v13460_v42 = vpop.eup %13459 }
0x364c   :  { %v5345_v56 = vsel %vm370_vm7, %v13460_v42, 0.0 }
0x364d   :  { %5346 = vadd.xlane.f32.xlu1 %v5345_v56 }
0x36d2   :  { %v5232_v62 = vpop.xlane.xlu0 %5231 }
0x36d3   :  { %13461 = vrcp.f32 %v5232_v62 }
0x36da   :  { %v5347_v59 = vpop.xlane.xlu1 %5346 }
0x36db   :  { %13463 = vrcp.f32 %v5347_v59 }
0x36dd   :  { %v13462_v61 = vpop.eup %13461 }
0x36de   :  { %v5234_v57 = vmul.f32 %v13462_v61, %v13458_v54  ;;  %v5858_v61 = vrot.slane %v14900_v43, 4 }
0x36e0   :  { %v5235_v1 = vpack.c.bf16 %v5234_v57, %v5234_v57  ;;  %v5863_v57 = vsel %vm438_vm8, %v5858_v61, 0 }
0x36e2   :  { %12548 = vmatmul.mubr.msk.bf16.vlgmr.msra.gmra.mrb[160].mxu0 %vm370_vm7, %v5235_v1 }
0x36e3   :  { %12558 = vmatpush3.bf16.msra.mxu0 %v5357_v5  ;;  %12559 = vmatprep.mubr.msk.bf16.mxu0 %vm13705_vm0, %v13704_v0 }
0x36e4   :  { %12571 = vmatprep.subr.bf16.mxu0 %v13704_v0 }
0x36e5   :  { %v13464_v22 = vpop.eup %13463 }
0x36e6   :  { %v5349_v7 = vmul.f32 %v13464_v22, %v13460_v42  ;;  %v11200_v42 = vld [vmem:[%s16307_s5 + $0x20] sm:$0xf] }
0x36e7   :  { %v5751_v59 = vsel %vm438_vm8, %v11200_v42, 0  ;;  %v13306_v42 = vld [vmem:[%s16304_s4 + $0x1a8] sm:$0xff]  }
0x36e8   :  { %v5350_v11 = vpack.c.bf16 %v5349_v7, %v5349_v7 }
0x36ea   :  { %12560 = vmatmul.mubr.msk.bf16.vlgmr.msra.gmra.mrb[164].mxu0 %vm370_vm7, %v5350_v11 }
0x36eb   :  { %12572 = vmatpush3.bf16.msra.mxu0 %v13301_v9  ;;  %12575 = vmatprep.mubr.msk.bf16.mxu0 %vm13705_vm0, %v13704_v0 }
0x36ec   :  { %12573 = vmatprep.subr.bf16.mxu0 %v13704_v0 }
0x36ef   :  { %12574 = vmatpush3.bf16.msra.mxu0 %v13302_v29 }
0x36f0   :  { %12587 = vmatprep.subr.bf16.mxu0 %v13704_v0 }
0x36f2   :  { %12576 = vmatmul.mubr.msk.bf16.vlgmr.msra.gmra.mrb[168].mxu0 %vm116_vm2, %v14810_v21 }
0x36f3   :  { %12589 = vmatprep.mubr.msk.bf16.mxu0 %vm13705_vm0, %v13704_v0 }
0x37b5   :  { %v5276_v30 = vpop.f32.mrb[160].mxu0 }
0x37b6   :  { %v12549_v12 = vpop.f32.mrb[161].mxu0  ;;  %v5282_v14 = vpack.c.bf16 %v5276_v30, %v5276_v30  ;;  %v5794_v30 = vrot.slane %v14895_v28, 4 }
0x37b7   :  { %v5279_v17 = vpop.f32.mrb[162].mxu0 }
0x37b8   :  { %v12550_v63 = vpop.f32.mrb[163].mxu0 }
0x37bd   :  { %v14928_v58 = vpop.f32.mrb[164].mxu0 }
0x37be   :  { %v12561_v16 = vpop.f32.mrb[165].mxu0 }
0x37bf   :  { %v5396_v18 = vpop.f32.mrb[166].mxu0 }
0x37c0   :  { %v12562_v20 = vpop.f32.mrb[167].mxu0 }
0x37c5   :  { %v5520_v6 = vpop.f32.mrb[168].mxu0 }
0x37c6   :  { %v12577_v47 = vpop.f32.mrb[169].mxu0  ;;  %v5521_v3 = vadd.f32 %v11217_v23, %v5520_v6 }
0x37c7   :  { %v5523_v26 = vpop.f32.mrb[170].mxu0 }
0x37c8   :  { %v5524_v27 = vadd.f32 %v11217_v23, %v5523_v26  ;;  %v12578_v31 = vpop.f32.mrb[171].mxu0 }
0x37ca   :  { %v5527_v32 = vpack.c.bf16 %v5524_v27, %v5521_v3 }
0x37cc   :  { %v5598_v33 = vsel %vm370_vm7, %v5527_v32, 0  ;;  %v5796_v1 = vrot.slane %v5527_v32, 4 }
0x37cd   :  { %12588 = vmatpush3.bf16.xpose.msra.mxu0 %v5598_v33 }
0x37ce   :  { %12599 = vmatprep.subr.bf16.mxu0 %v13704_v0  ;;  %v5801_v43 = vsel %vm370_vm7, %v5796_v1, 0  ;;  %v11250_v1 = vld [vmem:[%s16305_s10 + $0x1e] ss:$0 sm:$0xff] }
0x37d4   :  { %12590 = vmatmul.mubr.msk.bf16.vlgmr.msra.gmra.mrb[172].mxu0 %vm370_vm7, %v14895_v28 }
0x37d5   :  { %12601 = vmatprep.mubr.msk.bf16.mxu0 %vm13705_vm0, %v13704_v0  ;;  %12600 = vmatpush3.bf16.msra.mxu0 %v5705_v52 }
0x37d6   :  { %12611 = vmatprep.subr.bf16.mxu0 %v13704_v0 }
0x38a7   :  { %v5634_v36 = vpop.f32.mrb[172].mxu0 }
0x38a8   :  { %v5640_v40 = vmul.f32 0.35355338, %v5634_v36  ;;  %v12591_v38 = vpop.f32.mrb[173].mxu0 }
0x38a9   :  { %v5637_v39 = vpop.f32.mrb[174].mxu0 }
0x38aa   :  { %v12592_v34 = vpop.f32.mrb[175].mxu0  ;;  %v5641_v2 = vadd.f32 %v5640_v40, %v14881_v4 }
0x38ac   :  { %v5642_v41 = vsel %vm370_vm7, %v5641_v2, -inf }
0x38ad   :  { %5643 = vmax.xlane.f32.xlu0 %v5642_v41 }
0x393a   :  { %v5644_v45 = vpop.xlane.xlu0 %5643 }
0x393b   :  { %v5645_v50 = vsub.f32 %v5641_v2, %v5644_v45 }
0x393d   :  { %v5646_v51 = vmul.f32 1.442695, %v5645_v50  ;;  %v13303_v50 = vld [vmem:[%s16304_s4 + $0x1e0] sm:$0xff]  }
0x393f   :  { %13465 = vpow2.f32 %v5646_v51  ;;  %v5399_v51 = vpack.c.bf16 %v14928_v58, %v14928_v58 }
0x3949   :  { %v13466_v60 = vpop.eup %13465 }
0x394a   :  { %v5648_v53 = vsel %vm370_vm7, %v13466_v60, 0.0 }
0x394b   :  { %5649 = vadd.xlane.f32.xlu1 %v5648_v53  ;;  %v13305_v53 = vld [vmem:[%s16304_s4 + $0x1a0] sm:$0xff]  }
0x39d8   :  { %v5650_v54 = vpop.xlane.xlu1 %5649 }
0x39d9   :  { %13467 = vrcp.f32 %v5650_v54 }
0x39e3   :  { %v13468_v55 = vpop.eup %13467 }
0x39e4   :  { %v5652_v56 = vmul.f32 %v13468_v55, %v13466_v60  ;;  %v13304_v60 = vld [vmem:[%s16304_s4 + $0x1e8] sm:$0xff]  }
0x39e6   :  { %v5653_v62 = vpack.c.bf16 %v5652_v56, %v5652_v56 }
0x39e8   :  { %12596 = vmatmul.mubr.msk.bf16.vlgmr.msra.gmra.mrb[180].mxu1 %vm370_vm7, %v5653_v62  ;;  %v13307_v62 = vld [vmem:[%s16304_s4 + $0x220] sm:$0xff]  }
0x39e9   :  { %12606 = vmatpush3.bf16.msra.mxu1 %v5751_v59  ;;  %12607 = vmatprep.mubr.msk.bf16.mxu1 %vm13705_vm0, %v13704_v0 }
0x39ea   :  { %12617 = vmatprep.subr.bf16.mxu1 %v13704_v0 }
0x39f0   :  { %12608 = vmatmul.mubr.msk.bf16.vlgmr.msra.gmra.mrb[184].mxu1 %vm370_vm7, %v5282_v14 }
0x39f1   :  { %12618 = vmatpush3.bf16.msra.mxu1 %v5863_v57  ;;  %12619 = vmatprep.mubr.msk.bf16.mxu1 %vm13705_vm0, %v13704_v0  ;;  %v13308_v57 = vld [vmem:[%s16304_s4 + $0x228] sm:$0xff]  }
0x39f2   :  { %12629 = vmatprep.subr.bf16.mxu1 %v13704_v0 }
0x3abb   :  { %v5694_v5 = vpop.f32.mrb[180].mxu1 }
0x3abc   :  { %v5700_v22 = vpack.c.bf16 %v5694_v5, %v5694_v5  ;;  %v12597_v7 = vpop.f32.mrb[181].mxu1 }
0x3abd   :  { %v5697_v9 = vpop.f32.mrb[182].mxu1 }
0x3abe   :  { %v12598_v11 = vpop.f32.mrb[183].mxu1  ;;  %12602 = vmatmul.mubr.msk.bf16.vlgmr.msra.gmra.mrb[176].mxu0 %vm370_vm7, %v5700_v22 }
0x3abf   :  { %12612 = vmatpush3.bf16.xpose.msra.mxu0 %v5801_v43  ;;  %12613 = vmatprep.mubr.msk.bf16.mxu0 %vm13705_vm0, %v13704_v0 }
0x3ac0   :  { %12623 = vmatprep.subr.bf16.mxu0 %v13704_v0 }
0x3ac3   :  { %v5787_v29 = vpop.f32.mrb[184].mxu1 }
0x3ac4   :  { %v12609_v12 = vpop.f32.mrb[185].mxu1 }
0x3ac5   :  { %v5790_v17 = vpop.f32.mrb[186].mxu1 }
0x3ac6   :  { %v12610_v63 = vpop.f32.mrb[187].mxu1  ;;  %12614 = vmatmul.mubr.msk.bf16.vlgmr.msra.gmra.mrb[180].mxu0 %vm370_vm7, %v5794_v30 }
0x3ac7   :  { %12624 = vmatpush3.bf16.msra.mxu0 %v5705_v52  ;;  %12625 = vmatprep.mubr.msk.bf16.mxu0 %vm13705_vm0, %v13704_v0 }
0x3ac8   :  { %12635 = vmatprep.subr.bf16.mxu0 %v13704_v0 }
0x3b91   :  { %v5741_v16 = vpop.f32.mrb[176].mxu0 }
0x3b92   :  { %v14971_v18 = vadd.f32 %v5787_v29, %v5741_v16  ;;  %v12603_v20 = vpop.f32.mrb[177].mxu0 }
0x3b93   :  { %v5744_v23 = vpop.f32.mrb[178].mxu0 }
0x3b94   :  { %v12604_v6 = vpop.f32.mrb[179].mxu0  ;;  %v11242_v23 = vld [vmem:[%s16305_s10 + $0x1a] ss:$0 sm:$0xff] }
0x3b99   :  { %v5837_v47 = vpop.f32.mrb[180].mxu0 }
0x3b9a   :  { %v5843_v26 = vmul.f32 0.35355338, %v5837_v47  ;;  %v12615_v28 = vpop.f32.mrb[181].mxu0 }
0x3b9b   :  { %v5840_v3 = vpop.f32.mrb[182].mxu0 }
0x3b9c   :  { %v12616_v27 = vpop.f32.mrb[183].mxu0  ;;  %v5844_v31 = vadd.f32 %v5843_v26, %v14888_v13 }
0x3b9e   :  { %v5845_v32 = vsel %vm370_vm7, %v5844_v31, -inf }
0x3b9f   :  { %5846 = vmax.xlane.f32.xlu0 %v5845_v32  ;;  %v11258_v32 = vld [vmem:[%s16305_s10 + $0x22] ss:$0 sm:$0xff] }
0x3c2c   :  { %v5847_v33 = vpop.xlane.xlu0 %5846 }
0x3c2d   :  { %v5848_v36 = vsub.f32 %v5844_v31, %v5847_v33 }
0x3c2f   :  { %v5849_v40 = vmul.f32 1.442695, %v5848_v36 }
0x3c31   :  { %13469 = vpow2.f32 %v5849_v40 }
0x3c3b   :  { %v13470_v38 = vpop.eup %13469 }
0x3c3c   :  { %v5851_v39 = vsel %vm370_vm7, %v13470_v38, 0.0 }
0x3c3d   :  { %5852 = vadd.xlane.f32.xlu1 %v5851_v39 }
0x3cca   :  { %v5853_v34 = vpop.xlane.xlu1 %5852 }
0x3ccb   :  { %13471 = vrcp.f32 %v5853_v34 }
0x3cd5   :  { %v13472_v2 = vpop.eup %13471 }
0x3cd6   :  { %v5855_v41 = vmul.f32 %v13472_v2, %v13470_v38 }
0x3cd8   :  { %v5856_v45 = vpack.c.bf16 %v5855_v41, %v5855_v41 }
0x3cda   :  { %12620 = vmatmul.mubr.msk.bf16.vlgmr.msra.gmra.mrb[188].mxu1 %vm370_vm7, %v5856_v45 }
0x3cdb   :  { %12630 = vmatpush3.bf16.msra.mxu1 %v5751_v59  ;;  %12631 = vmatprep.mubr.msk.bf16.mxu1 %vm13705_vm0, %v13704_v0 }
0x3cdc   :  { %12643 = vmatprep.subr.bf16.mxu1 %v13704_v0 }
0x3ce2   :  { %12632 = vmatmul.mubr.msk.bf16.vlgmr.msra.gmra.mrb[192].mxu1 %vm370_vm7, %v5399_v51 }
0x3ce3   :  { %12644 = vmatpush3.bf16.msra.mxu1 %v13303_v50  ;;  %12647 = vmatprep.mubr.msk.bf16.mxu1 %vm13705_vm0, %v13704_v0 }
0x3ce4   :  { %12645 = vmatprep.subr.bf16.mxu1 %v13704_v0 }
0x3ce7   :  { %12646 = vmatpush3.bf16.msra.mxu1 %v13304_v60 }
0x3ce8   :  { %12659 = vmatprep.subr.bf16.mxu1 %v13704_v0 }
0x3cea   :  { %12648 = vmatmul.mubr.msk.bf16.vlgmr.msra.gmra.mrb[196].mxu1 %vm116_vm2, %v14810_v21 }
0x3ceb   :  { %12661 = vmatprep.mubr.msk.bf16.mxu1 %vm13705_vm0, %v13704_v0 }
0x3dad   :  { %v5899_v58 = vpop.f32.mrb[188].mxu1 }
0x3dae   :  { %v5905_v49 = vpack.c.bf16 %v5899_v58, %v5899_v58  ;;  %v12621_v52 = vpop.f32.mrb[189].mxu1 }
0x3daf   :  { %v5902_v54 = vpop.f32.mrb[190].mxu1 }
0x3db0   :  { %v12622_v55 = vpop.f32.mrb[191].mxu1  ;;  %12626 = vmatmul.mubr.msk.bf16.vlgmr.msra.gmra.mrb[184].mxu0 %vm370_vm7, %v5905_v49 }
0x3db1   :  { %12636 = vmatpush3.bf16.msra.mxu0 %v13305_v53  ;;  %12639 = vmatprep.mubr.msk.bf16.mxu0 %vm13705_vm0, %v13704_v0 }
0x3db2   :  { %12637 = vmatprep.subr.bf16.mxu0 %v13704_v0 }
0x3db5   :  { %v5986_v56 = vpop.f32.mrb[192].mxu1  ;;  %12638 = vmatpush3.bf16.msra.mxu0 %v13306_v42 }
0x3db6   :  { %v12633_v59 = vpop.f32.mrb[193].mxu1  ;;  %12651 = vmatprep.subr.bf16.mxu0 %v13704_v0 }
0x3db7   :  { %v5989_v61 = vpop.f32.mrb[194].mxu1 }
0x3db8   :  { %v12634_v14 = vpop.f32.mrb[195].mxu1  ;;  %12640 = vmatmul.mubr.msk.bf16.vlgmr.msra.gmra.mrb[188].mxu0 %vm116_vm2, %v14810_v21 }
0x3db9   :  { %12652 = vmatpush3.bf16.msra.mxu0 %v13307_v62  ;;  %12655 = vmatprep.mubr.msk.bf16.mxu0 %vm13705_vm0, %v13704_v0  ;;  %v11262_v62 = vld [vmem:[%s16307_s5 + $0x28] sm:$0xf] }
0x3dba   :  { %12653 = vmatprep.subr.bf16.mxu0 %v13704_v0  ;;  %v6297_v59 = vsel %vm438_vm8, %v11262_v62, 0  ;;  %v11273_v62 = vld [vmem:[%s16305_s10 + $0x1b] ss:$0 sm:$0xff] }
0x3dbd   :  { %v6112_v5 = vpop.f32.mrb[196].mxu1  ;;  %12654 = vmatpush3.bf16.msra.mxu0 %v13308_v57 }
0x3dbe   :  { %v12649_v22 = vpop.f32.mrb[197].mxu1  ;;  %12665 = vmatprep.subr.bf16.mxu0 %v13704_v0  ;;  %v6113_v9 = vadd.f32 %v11250_v1, %v6112_v5 }
0x3dbf   :  { %v6115_v7 = vpop.f32.mrb[198].mxu1 }
0x3dc0   :  { %v6116_v11 = vadd.f32 %v11250_v1, %v6115_v7  ;;  %v12650_v43 = vpop.f32.mrb[199].mxu1  ;;  %12656 = vmatmul.mubr.msk.bf16.vlgmr.msra.gmra.mrb[192].mxu0 %vm116_vm2, %v14810_v21 }
0x3dc1   :  { %12667 = vmatprep.mubr.msk.bf16.mxu0 %vm13705_vm0, %v13704_v0 }
0x3dc2   :  { %v6119_v29 = vpack.c.bf16 %v6116_v11, %v6113_v9 }
0x3dc4   :  { %v6190_v30 = vsel %vm370_vm7, %v6119_v29, 0  ;;  %v6343_v57 = vrot.slane %v6119_v29, 4 }
0x3dc5   :  { %12660 = vmatpush3.bf16.xpose.msra.mxu1 %v6190_v30 }
0x3dc6   :  { %12671 = vmatprep.subr.bf16.mxu1 %v13704_v0  ;;  %v6348_v22 = vsel %vm370_vm7, %v6343_v57, 0 }
0x3e83   :  { %v5943_v12 = vpop.f32.mrb[184].mxu0 }
0x3e84   :  { %v15029_v17 = vadd.f32 %v5986_v56, %v5943_v12  ;;  %v12627_v63 = vpop.f32.mrb[185].mxu0 }
0x3e85   :  { %v5946_v16 = vpop.f32.mrb[186].mxu0 }
0x3e86   :  { %v12628_v20 = vpop.f32.mrb[187].mxu0 }
0x3e8b   :  { %v6048_v6 = vpop.f32.mrb[188].mxu0 }
0x3e8c   :  { %v12641_v47 = vpop.f32.mrb[189].mxu0  ;;  %v6049_v28 = vadd.f32 %v11242_v23, %v6048_v6 }
0x3e8d   :  { %v6051_v26 = vpop.f32.mrb[190].mxu0 }
0x3e8e   :  { %v6052_v3 = vadd.f32 %v11242_v23, %v6051_v26  ;;  %v12642_v27 = vpop.f32.mrb[191].mxu0 }
0x3e90   :  { %v6055_v31 = vpack.c.bf16 %v6052_v3, %v6049_v28 }
0x3e92   :  { %12662 = vmatmul.mubr.msk.bf16.vlgmr.msra.gmra.mrb[200].mxu1 %vm370_vm7, %v6055_v31  ;;  %v6341_v7 = vrot.slane %v6055_v31, 4 }
0x3e93   :  { %v6176_v33 = vpop.f32.mrb[192].mxu0  ;;  %12673 = vmatprep.mubr.msk.bf16.mxu1 %vm13705_vm0, %v13704_v0  ;;  %12672 = vmatpush3.bf16.msra.mxu1 %v6297_v59 }
0x3e94   :  { %v12657_v36 = vpop.f32.mrb[193].mxu0  ;;  %v6177_v38 = vadd.f32 %v11258_v32, %v6176_v33  ;;  %12683 = vmatprep.subr.bf16.mxu1 %v13704_v0 }
0x3e95   :  { %v6179_v40 = vpop.f32.mrb[194].mxu0 }
0x3e96   :  { %v6180_v39 = vadd.f32 %v11258_v32, %v6179_v40  ;;  %v12658_v34 = vpop.f32.mrb[195].mxu0 }
0x3e98   :  { %v6183_v2 = vpack.c.bf16 %v6180_v39, %v6177_v38 }
0x3e9a   :  { %v6250_v41 = vsel %vm438_vm8, %v6183_v2, 0  ;;  %v6405_v9 = vrot.slane %v6183_v2, 4 }
0x3e9b   :  { %12666 = vmatpush3.bf16.msra.mxu0 %v6250_v41 }
0x3e9c   :  { %12677 = vmatprep.subr.bf16.mxu0 %v13704_v0  ;;  %v6410_v63 = vsel %vm438_vm8, %v6405_v9, 0 }
0x3f65   :  { %v6226_v45 = vpop.f32.mrb[200].mxu1 }
0x3f66   :  { %v6232_v50 = vmul.f32 0.35355338, %v6226_v45  ;;  %v12663_v51 = vpop.f32.mrb[201].mxu1 }
0x3f67   :  { %v6229_v60 = vpop.f32.mrb[202].mxu1 }
0x3f68   :  { %v12664_v58 = vpop.f32.mrb[203].mxu1  ;;  %v6233_v53 = vadd.f32 %v6232_v50, %v14881_v4  ;;  %v13309_v50 = vld [vmem:[%s16304_s4 + $0x1b0] sm:$0xff]  }
0x3f69   :  { %v13311_v60 = vld [vmem:[%s16304_s4 + $0x230] sm:$0xff]   ;;  %v13312_v58 = vld [vmem:[%s16304_s4 + $0x238] sm:$0xff]  }
0x3f6a   :  { %v6234_v49 = vsel %vm370_vm7, %v6233_v53, -inf }
0x3f6b   :  { %6235 = vmax.xlane.f32.xlu0 %v6234_v49  ;;  %v13313_v49 = vld [vmem:[%s16304_s4 + $0x1f0] sm:$0xff]  }
0x3ff8   :  { %v6236_v52 = vpop.xlane.xlu0 %6235 }
0x3ff9   :  { %v6237_v54 = vsub.f32 %v6233_v53, %v6236_v52 }
0x3ffb   :  { %v6238_v55 = vmul.f32 1.442695, %v6237_v54 }
0x3ffd   :  { %13473 = vpow2.f32 %v6238_v55 }
0x4007   :  { %v13474_v42 = vpop.eup %13473 }
0x4008   :  { %v6240_v56 = vsel %vm370_vm7, %v13474_v42, 0.0 }
0x4009   :  { %6241 = vadd.xlane.f32.xlu1 %v6240_v56  ;;  %v13314_v56 = vld [vmem:[%s16304_s4 + $0x1f8] sm:$0xff]  }
0x4096   :  { %v6242_v61 = vpop.xlane.xlu1 %6241 }
0x4097   :  { %13475 = vrcp.f32 %v6242_v61 }
0x40a1   :  { %v13476_v14 = vpop.eup %13475 }
0x40a2   :  { %v6244_v1 = vmul.f32 %v13476_v14, %v13474_v42 }
0x40a4   :  { %v6245_v5 = vpack.c.bf16 %v6244_v1, %v6244_v1 }
0x40a6   :  { %12668 = vmatmul.mubr.msk.bf16.vlgmr.msra.gmra.mrb[196].mxu0 %vm370_vm7, %v6245_v5 }
0x40a7   :  { %12678 = vmatpush3.bf16.xpose.msra.mxu0 %v6348_v22  ;;  %12679 = vmatprep.mubr.msk.bf16.mxu0 %vm13705_vm0, %v13704_v0 }
0x40a8   :  { %12689 = vmatprep.subr.bf16.mxu0 %v13704_v0 }
0x40ae   :  { %12680 = vmatmul.mubr.msk.bf16.vlgmr.msra.gmra.mrb[200].mxu0 %vm370_vm7, %v6341_v7  ;;  %v11289_v7 = vld [vmem:[%s16305_s10 + $0x23] ss:$0 sm:$0xff] }
0x40af   :  { %12690 = vmatpush3.bf16.msra.mxu0 %v6297_v59  ;;  %12691 = vmatprep.mubr.msk.bf16.mxu0 %vm13705_vm0, %v13704_v0 }
0x40b0   :  { %12703 = vmatprep.subr.bf16.mxu0 %v13704_v0 }
0x4179   :  { %v6286_v11 = vpop.f32.mrb[196].mxu0 }
0x417a   :  { %v6292_v43 = vpack.c.bf16 %v6286_v11, %v6286_v11  ;;  %v12669_v29 = vpop.f32.mrb[197].mxu0 }
0x417b   :  { %v6289_v30 = vpop.f32.mrb[198].mxu0 }
0x417c   :  { %v12670_v12 = vpop.f32.mrb[199].mxu0  ;;  %12674 = vmatmul.mubr.msk.bf16.vlgmr.msra.gmra.mrb[204].mxu1 %vm370_vm7, %v6292_v43 }
0x417d   :  { %12684 = vmatpush3.bf16.msra.mxu1 %v6410_v63  ;;  %12685 = vmatprep.mubr.msk.bf16.mxu1 %vm13705_vm0, %v13704_v0 }
0x417e   :  { %12695 = vmatprep.subr.bf16.mxu1 %v13704_v0 }
0x4181   :  { %v6384_v16 = vpop.f32.mrb[200].mxu0 }
0x4182   :  { %v6390_v20 = vmul.f32 0.35355338, %v6384_v16  ;;  %v12681_v23 = vpop.f32.mrb[201].mxu0 }
0x4183   :  { %v6387_v6 = vpop.f32.mrb[202].mxu0 }
0x4184   :  { %v12682_v47 = vpop.f32.mrb[203].mxu0  ;;  %v6391_v26 = vadd.f32 %v6390_v20, %v14888_v13 }
0x4186   :  { %v6392_v28 = vsel %vm370_vm7, %v6391_v26, -inf }
0x4187   :  { %6393 = vmax.xlane.f32.xlu0 %v6392_v28 }
0x4214   :  { %v6394_v3 = vpop.xlane.xlu0 %6393 }
0x4215   :  { %v6395_v27 = vsub.f32 %v6391_v26, %v6394_v3  ;;  %v11281_v26 = vld [vmem:[%s16305_s10 + $0x1f] ss:$0 sm:$0xff] }
0x4217   :  { %v6396_v31 = vmul.f32 1.442695, %v6395_v27 }
0x4219   :  { %13477 = vpow2.f32 %v6396_v31 }
0x4223   :  { %v13478_v32 = vpop.eup %13477 }
0x4224   :  { %v6398_v33 = vsel %vm370_vm7, %v13478_v32, 0.0 }
0x4225   :  { %6399 = vadd.xlane.f32.xlu1 %v6398_v33 }
0x424f   :  { %v6333_v36 = vpop.f32.mrb[204].mxu1 }
0x4250   :  { %v15068_v40 = vadd.f32 %v6333_v36, %v14971_v18  ;;  %v12675_v38 = vpop.f32.mrb[205].mxu1  ;;  %v13310_v18 = vld [vmem:[%s16304_s4 + $0x1b8] sm:$0xff]  }
0x4251   :  { %v6336_v39 = vpop.f32.mrb[206].mxu1 }
0x4252   :  { %v12676_v34 = vpop.f32.mrb[207].mxu1 }
0x42b2   :  { %v6400_v2 = vpop.xlane.xlu1 %6399 }
0x42b3   :  { %13479 = vrcp.f32 %v6400_v2 }
0x42bd   :  { %v13480_v41 = vpop.eup %13479 }
0x42be   :  { %v6402_v45 = vmul.f32 %v13480_v41, %v13478_v32 }
0x42c0   :  { %v6403_v51 = vpack.c.bf16 %v6402_v45, %v6402_v45 }
0x42c2   :  { %12686 = vmatmul.mubr.msk.bf16.vlgmr.msra.gmra.mrb[208].mxu1 %vm370_vm7, %v6403_v51 }
0x42c3   :  { %12696 = vmatpush3.bf16.msra.mxu1 %v13309_v50  ;;  %12699 = vmatprep.mubr.msk.bf16.mxu1 %vm13705_vm0, %v13704_v0 }
0x42c4   :  { %12697 = vmatprep.subr.bf16.mxu1 %v13704_v0 }
0x42c7   :  { %12698 = vmatpush3.bf16.msra.mxu1 %v13310_v18 }
0x42c8   :  { %12711 = vmatprep.subr.bf16.mxu1 %v13704_v0 }
0x42ca   :  { %12700 = vmatmul.mubr.msk.bf16.vlgmr.msra.gmra.mrb[212].mxu1 %vm116_vm2, %v14810_v21 }
0x42cb   :  { %12712 = vmatpush3.bf16.msra.mxu1 %v13311_v60  ;;  %12715 = vmatprep.mubr.msk.bf16.mxu1 %vm13705_vm0, %v13704_v0 }
0x42cc   :  { %12713 = vmatprep.subr.bf16.mxu1 %v13704_v0 }
0x42cf   :  { %12714 = vmatpush3.bf16.msra.mxu1 %v13312_v58 }
0x42d0   :  { %12725 = vmatprep.subr.bf16.mxu1 %v13704_v0 }
0x42d2   :  { %12716 = vmatmul.mubr.msk.bf16.vlgmr.msra.gmra.mrb[216].mxu1 %vm116_vm2, %v14810_v21 }
0x42d3   :  { %12727 = vmatprep.mubr.msk.bf16.mxu1 %vm13705_vm0, %v13704_v0 }
0x4395   :  { %v6446_v53 = vpop.f32.mrb[208].mxu1 }
0x4396   :  { %v6452_v52 = vpack.c.bf16 %v6446_v53, %v6446_v53  ;;  %v12687_v54 = vpop.f32.mrb[209].mxu1 }
0x4397   :  { %v6449_v55 = vpop.f32.mrb[210].mxu1 }
0x4398   :  { %v12688_v42 = vpop.f32.mrb[211].mxu1  ;;  %12692 = vmatmul.mubr.msk.bf16.vlgmr.msra.gmra.mrb[204].mxu0 %vm370_vm7, %v6452_v52 }
0x4399   :  { %12704 = vmatpush3.bf16.msra.mxu0 %v13313_v49  ;;  %12707 = vmatprep.mubr.msk.bf16.mxu0 %vm13705_vm0, %v13704_v0  ;;  %v11293_v49 = vld [vmem:[%s16307_s5 + $0x2c] sm:$0xf] }
0x439a   :  { %12705 = vmatprep.subr.bf16.mxu0 %v13704_v0  ;;  %v6802_v52 = vsel %vm438_vm8, %v11293_v49, 0 }
0x439d   :  { %v6553_v59 = vpop.f32.mrb[212].mxu1  ;;  %12706 = vmatpush3.bf16.msra.mxu0 %v13314_v56 }
0x439e   :  { %v12701_v61 = vpop.f32.mrb[213].mxu1  ;;  %12719 = vmatprep.subr.bf16.mxu0 %v13704_v0  ;;  %v6554_v57 = vadd.f32 %v11273_v62, %v6553_v59 }
0x439f   :  { %v6556_v14 = vpop.f32.mrb[214].mxu1 }
0x43a0   :  { %v6557_v1 = vadd.f32 %v11273_v62, %v6556_v14  ;;  %v12702_v5 = vpop.f32.mrb[215].mxu1  ;;  %12708 = vmatmul.mubr.msk.bf16.vlgmr.msra.gmra.mrb[208].mxu0 %vm116_vm2, %v14810_v21 }
0x43a1   :  { %12721 = vmatprep.mubr.msk.bf16.mxu0 %vm13705_vm0, %v13704_v0 }
0x43a2   :  { %v6560_v22 = vpack.c.bf16 %v6557_v1, %v6554_v57 }
0x43a4   :  { %v6846_v59 = vrot.slane %v6560_v22, 4 }
0x43a5   :  { %v6681_v9 = vpop.f32.mrb[216].mxu1 }
0x43a6   :  { %v12717_v11 = vpop.f32.mrb[217].mxu1  ;;  %v6682_v29 = vadd.f32 %v11289_v7, %v6681_v9 }
0x43a7   :  { %v6684_v43 = vpop.f32.mrb[218].mxu1 }
0x43a8   :  { %v6685_v30 = vadd.f32 %v11289_v7, %v6684_v43  ;;  %v12718_v12 = vpop.f32.mrb[219].mxu1 }
0x43aa   :  { %v15118_v63 = vpack.c.bf16 %v6685_v30, %v6682_v29 }
0x43ac   :  { %v6755_v16 = vsel %vm438_vm8, %v15118_v63, 0  ;;  %v6910_v61 = vrot.slane %v15118_v63, 4 }
0x43ad   :  { %12726 = vmatpush3.bf16.msra.mxu1 %v6755_v16 }
0x43ae   :  { %12737 = vmatprep.subr.bf16.mxu1 %v13704_v0  ;;  %v6915_v9 = vsel %vm438_vm8, %v6910_v61, 0 }
0x446b   :  { %v6490_v21 = vpop.f32.mrb[204].mxu0 }
0x446c   :  { %v15124_v20 = vadd.f32 %v6490_v21, %v15029_v17  ;;  %v12693_v23 = vpop.f32.mrb[205].mxu0 }
0x446d   :  { %v6493_v6 = vpop.f32.mrb[206].mxu0 }
0x446e   :  { %v12694_v47 = vpop.f32.mrb[207].mxu0 }
0x4473   :  { %v6617_v28 = vpop.f32.mrb[208].mxu0 }
0x4474   :  { %v12709_v3 = vpop.f32.mrb[209].mxu0  ;;  %v6618_v31 = vadd.f32 %v11281_v26, %v6617_v28 }
0x4475   :  { %v6620_v27 = vpop.f32.mrb[210].mxu0 }
0x4476   :  { %v6621_v32 = vadd.f32 %v11281_v26, %v6620_v27  ;;  %v12710_v33 = vpop.f32.mrb[211].mxu0  ;;  %v15164_v27 = vld [vmem:[%s16303_s11 + $0x10] ss:$0 sm:$0xff] }
0x4478   :  { %v6624_v36 = vpack.c.bf16 %v6621_v32, %v6618_v31 }
0x447a   :  { %v6695_v38 = vsel %vm370_vm7, %v6624_v36, 0  ;;  %v6848_v55 = vrot.slane %v6624_v36, 4 }
0x447b   :  { %12720 = vmatpush3.bf16.xpose.msra.mxu0 %v6695_v38 }
0x447c   :  { %12731 = vmatprep.subr.bf16.mxu0 %v13704_v0  ;;  %v6853_v62 = vsel %vm370_vm7, %v6848_v55, 0 }
0x4482   :  { %12722 = vmatmul.mubr.msk.bf16.vlgmr.msra.gmra.mrb[212].mxu0 %vm370_vm7, %v6560_v22 }
0x4483   :  { %12733 = vmatprep.mubr.msk.bf16.mxu0 %vm13705_vm0, %v13704_v0  ;;  %12732 = vmatpush3.bf16.msra.mxu0 %v6802_v52 }
0x4484   :  { %12743 = vmatprep.subr.bf16.mxu0 %v13704_v0 }
0x4555   :  { %v6731_v17 = vpop.f32.mrb[212].mxu0 }
0x4556   :  { %v6737_v39 = vmul.f32 0.35355338, %v6731_v17  ;;  %v12723_v34 = vpop.f32.mrb[213].mxu0 }
0x4557   :  { %v6734_v2 = vpop.f32.mrb[214].mxu0 }
0x4558   :  { %v12724_v41 = vpop.f32.mrb[215].mxu0  ;;  %v6738_v45 = vadd.f32 %v6737_v39, %v14881_v4 }
0x455a   :  { %v6739_v50 = vsel %vm370_vm7, %v6738_v45, -inf }
0x455b   :  { %6740 = vmax.xlane.f32.xlu0 %v6739_v50 }
0x45e8   :  { %v6741_v51 = vpop.xlane.xlu0 %6740 }
0x45e9   :  { %v6742_v18 = vsub.f32 %v6738_v45, %v6741_v51 }
0x45eb   :  { %v6743_v60 = vmul.f32 1.442695, %v6742_v18 }
0x45ed   :  { %13481 = vpow2.f32 %v6743_v60 }
0x45f7   :  { %v13482_v58 = vpop.eup %13481 }
0x45f8   :  { %v6745_v53 = vsel %vm370_vm7, %v13482_v58, 0.0 }
0x45f9   :  { %6746 = vadd.xlane.f32.xlu1 %v6745_v53 }
0x4686   :  { %v6747_v4 = vpop.xlane.xlu1 %6746 }
0x4687   :  { %13483 = vrcp.f32 %v6747_v4 }
0x4691   :  { %v13484_v54 = vpop.eup %13483 }
0x4692   :  { %v6749_v42 = vmul.f32 %v13484_v54, %v13482_v58  ;;  %v13695_v58 = vld [vmem:[%s16303_s11 + $0xb] ss:$0 sm:$0xff] }
0x4693   :  { %v4786_v53 = vadd.f32 %v13695_v58, %v14799_v19  ;;  %v11013_v58 = vld [vmem:[%s16303_s11 + $0x19] ss:$0 sm:$0xff] }
0x4694   :  { %v6750_v56 = vpack.c.bf16 %v6749_v42, %v6749_v42 }
0x4696   :  { %12728 = vmatmul.mubr.msk.bf16.vlgmr.msra.gmra.mrb[220].mxu1 %vm370_vm7, %v6750_v56 }
0x4697   :  { %12738 = vmatpush3.bf16.xpose.msra.mxu1 %v6853_v62  ;;  %12739 = vmatprep.mubr.msk.bf16.mxu1 %vm13705_vm0, %v13704_v0 }
0x4698   :  { %12749 = vmatprep.subr.bf16.mxu1 %v13704_v0 }
0x469e   :  { %12740 = vmatmul.mubr.msk.bf16.vlgmr.msra.gmra.mrb[224].mxu1 %vm370_vm7, %v6846_v59 }
0x469f   :  { %12750 = vmatpush3.bf16.msra.mxu1 %v6802_v52  ;;  %12751 = vmatprep.mubr.msk.bf16.mxu1 %vm13705_vm0, %v13704_v0 }
0x46a0   :  { %12763 = vmatprep.subr.bf16.mxu1 %v13704_v0 }
0x4769   :  { %v6791_v14 = vpop.f32.mrb[220].mxu1 }
0x476a   :  { %v6797_v57 = vpack.c.bf16 %v6791_v14, %v6791_v14  ;;  %v12729_v1 = vpop.f32.mrb[221].mxu1 }
0x476b   :  { %v6794_v5 = vpop.f32.mrb[222].mxu1 }
0x476c   :  { %v12730_v7 = vpop.f32.mrb[223].mxu1  ;;  %12734 = vmatmul.mubr.msk.bf16.vlgmr.msra.gmra.mrb[216].mxu0 %vm370_vm7, %v6797_v57 }
0x476d   :  { %12744 = vmatpush3.bf16.msra.mxu0 %v6915_v9  ;;  %12745 = vmatprep.mubr.msk.bf16.mxu0 %vm13705_vm0, %v13704_v0 }
0x476e   :  { %12755 = vmatprep.subr.bf16.mxu0 %v13704_v0 }
0x4771   :  { %v6889_v22 = vpop.f32.mrb[224].mxu1 }
0x4772   :  { %v6895_v11 = vmul.f32 0.35355338, %v6889_v22  ;;  %v12741_v43 = vpop.f32.mrb[225].mxu1 }
0x4773   :  { %v6892_v29 = vpop.f32.mrb[226].mxu1 }
0x4774   :  { %v12742_v30 = vpop.f32.mrb[227].mxu1  ;;  %v6896_v12 = vadd.f32 %v6895_v11, %v14888_v13 }
0x4776   :  { %v6897_v63 = vsel %vm370_vm7, %v6896_v12, -inf }
0x4777   :  { %6898 = vmax.xlane.f32.xlu0 %v6897_v63 }
0x4804   :  { %v6899_v16 = vpop.xlane.xlu0 %6898 }
0x4805   :  { %v6900_v21 = vsub.f32 %v6896_v12, %v6899_v16 }
0x4807   :  { %v6901_v23 = vmul.f32 1.442695, %v6900_v21 }
0x4809   :  { %13485 = vpow2.f32 %v6901_v23 }
0x4813   :  { %v13486_v6 = vpop.eup %13485 }
0x4814   :  { %v6903_v47 = vsel %vm370_vm7, %v13486_v6, 0.0 }
0x4815   :  { %6904 = vadd.xlane.f32.xlu1 %v6903_v47 }
0x483f   :  { %v6838_v26 = vpop.f32.mrb[216].mxu0 }
0x4840   :  { %v6844_v28 = vadd.f32 %v6838_v26, %v15068_v40  ;;  %v12735_v3 = vpop.f32.mrb[217].mxu0 }
0x4841   :  { %v6841_v13 = vpop.f32.mrb[218].mxu0 }
0x4842   :  { %v7002_v31 = vadd.f32 %v6844_v28, %v14766_v25  ;;  %v12736_v32 = vpop.f32.mrb[219].mxu0  ;;  %v11006_v25 = vld [vmem:[%s16303_s11 + $0x5] ss:$0 sm:$0xff] }
0x4843   :  { %v2412_v41 = vadd.f32 %v11006_v25, %v14380_v44  ;;  %v2415_v51 = vadd.f32 %v11006_v25, %v14382_v48  ;;  %v4790_v48 = vadd.f32 %v4786_v53, %v14698_v15 }
0x4844   :  { %v15168_v33 = vadd.f32 %v15164_v27, %v7002_v31 }
0x4845   :  { %v2418_v60 = vadd.f32 %v2412_v41, %v14193_v8  ;;  %v2419_v49 = vadd.f32 %v2415_v51, %v14233_v46  ;;  %v4794_v4 = vsel %vm116_vm2, %v4790_v48, 0.0 }
0x4846   :  { %v7011_v36 = vsel %vm116_vm2, %v15168_v33, 0.0 }
0x4847   :  { %7012 = vadd.xlane.f32.xlu0 %v7011_v36  ;;  %v2420_v44 = vsel %vm116_vm2, %v2418_v60, 0.0  ;;  %v2423_v52 = vsel %vm116_vm2, %v2419_v49, 0.0 }
0x48a2   :  { %v6905_v38 = vpop.xlane.xlu1 %6904 }
0x48a3   :  { %13487 = vrcp.f32 %v6905_v38 }
0x48ad   :  { %v13488_v40 = vpop.eup %13487 }
0x48ae   :  { %v6907_v17 = vmul.f32 %v13488_v40, %v13486_v6 }
0x48b0   :  { %v6908_v39 = vpack.c.bf16 %v6907_v17, %v6907_v17 }
0x48b2   :  { %12746 = vmatmul.mubr.msk.bf16.vlgmr.msra.gmra.mrb[220].mxu0 %vm370_vm7, %v6908_v39 }
0x48b3   :  { %12759 = vmatprep.mubr.msk.bf16.mxu0 %vm13705_vm0, %v13704_v0 }
0x48d4   :  { %v7013_v34 = vpop.xlane.xlu0 %7012 }
0x48d5   :  { %v7017_v2 = vmul.f32 0.03125, %v7013_v34 }
0x48d7   :  { %v15180_v45 = vsub.f32 %v15168_v33, %v7017_v2 }
0x48d9   :  { %v7021_v50 = vmul.f32 %v15180_v45, %v15180_v45 }
0x48db   :  { %v7023_v18 = vsel %vm116_vm2, %v7021_v50, 0.0 }
0x48dc   :  { %7024 = vadd.xlane.f32.xlu0 %v7023_v18  ;;  %v11012_v18 = vld [vmem:[%s16303_s11 + $0x18] ss:$0 sm:$0xff] }
0x48e0   :  { %2421 = vadd.xlane.f32.xlu0 %v2420_v44 }
0x48e4   :  { %2424 = vadd.xlane.f32.xlu0 %v2423_v52 }
0x48e8   :  { %4795 = vadd.xlane.f32.xlu0 %v4794_v4 }
0x4969   :  { %v15196_v8 = vpop.xlane.xlu0 %7024 }
0x496d   :  { %v2422_v54 = vpop.xlane.xlu0 %2421 }
0x496e   :  { %v2426_v55 = vmul.f32 0.03125, %v2422_v54  ;;  %v15214_v54 = vld [vmem:[%s16303_s11 + $0x1a] ss:$0 sm:$0xff] }
0x4970   :  { %v2428_v42 = vsub.f32 %v2418_v60, %v2426_v55 }
0x4971   :  { %v2425_v56 = vpop.xlane.xlu0 %2424 }
0x4972   :  { %v2427_v19 = vmul.f32 0.03125, %v2425_v56  ;;  %v2430_v62 = vmul.f32 %v2428_v42, %v2428_v42 }
0x4974   :  { %v2429_v59 = vsub.f32 %v2419_v49, %v2427_v19  ;;  %v2432_v46 = vsel %vm116_vm2, %v2430_v62, 0.0 }
0x4975   :  { %2433 = vadd.xlane.f32.xlu0 %v2432_v46  ;;  %v4796_v61 = vpop.xlane.xlu0 %4795 }
0x4976   :  { %v4798_v14 = vmul.f32 0.03125, %v4796_v61  ;;  %v2431_v57 = vmul.f32 %v2429_v59, %v2429_v59 }
0x4978   :  { %v4800_v15 = vsub.f32 %v4790_v48, %v4798_v14  ;;  %v2435_v1 = vsel %vm116_vm2, %v2431_v57, 0.0 }
0x4979   :  { %2436 = vadd.xlane.f32.xlu0 %v2435_v1 }
0x497a   :  { %v4802_v5 = vmul.f32 %v4800_v15, %v4800_v15 }
0x497c   :  { %v4806_v7 = vsel %vm116_vm2, %v4802_v5, 0.0 }
0x497d   :  { %4807 = vadd.xlane.f32.xlu0 %v4806_v7 }
0x4985   :  { %v6951_v9 = vpop.f32.mrb[220].mxu0 }
0x4986   :  { %v6957_v22 = vpack.c.bf16 %v6951_v9, %v6951_v9  ;;  %v12747_v11 = vpop.f32.mrb[221].mxu0 }
0x4987   :  { %v6954_v43 = vpop.f32.mrb[222].mxu0 }
0x4988   :  { %v12748_v29 = vpop.f32.mrb[223].mxu0  ;;  %12752 = vmatmul.mubr.msk.bf16.vlgmr.msra.gmra.mrb[228].mxu1 %vm370_vm7, %v6957_v22 }
0x4989   :  { %12771 = vmatprep.mubr.msk.bf16.mxu1 %vm13705_vm0, %v13704_v0 }
0x4a02   :  { %v2434_v30 = vpop.xlane.xlu0 %2433 }
0x4a03   :  { %v2438_v12 = vmul.f32 0.032258064, %v2434_v30 }
0x4a05   :  { %13489 = vrsqrt.f32 %v2438_v12  ;;  %vm2442_vm14 = vcmp.eq.f32.partialorder %v2438_v12, inf  ;;  %v2445_v26 = vand.u32 2147483648, %v2438_v12  ;;  %vm2444_vm15 = vcmp.eq.f32.partialorder %v2438_v12, 0.0 }
0x4a06   :  { %v2437_v63 = vpop.xlane.xlu0 %2436 }
0x4a07   :  { %v2439_v16 = vmul.f32 0.032258064, %v2437_v63  ;;  %v7029_v63 = vmul.f32 0.032258064, %v15196_v8 }
0x4a09   :  { %13491 = vrsqrt.f32 %v2439_v16  ;;  %vm2449_vm3 = vcmp.eq.f32.partialorder %v2439_v16, inf  ;;  %v2452_v36 = vand.u32 2147483648, %v2439_v16  ;;  %vm2451_vm5 = vcmp.eq.f32.partialorder %v2439_v16, 0.0 }
0x4a0a   :  { %v4808_v21 = vpop.xlane.xlu0 %4807  ;;  %vm7033_vm10 = vcmp.eq.f32.partialorder %v7029_v63, inf  ;;  %vm7035_vm1 = vcmp.eq.f32.partialorder %v7029_v63, 0.0 }
0x4a0b   :  { %v4810_v23 = vmul.f32 0.032258064, %v4808_v21 }
0x4a0d   :  { %13493 = vrsqrt.f32 %v4810_v23  ;;  %vm4820_vm6 = vcmp.eq.f32.partialorder %v4810_v23, inf  ;;  %v4823_v34 = vand.u32 2147483648, %v4810_v23  ;;  %vm4822_vm9 = vcmp.eq.f32.partialorder %v4810_v23, 0.0 }
0x4a0f   :  { %v13490_v6 = vpop.eup %13489 }
0x4a10   :  { %v2441_v47 = vmul.f32 %v13490_v6, %v2438_v12 }
0x4a12   :  { %v2443_v28 = vsel %vm2442_vm14, %v2438_v12, %v2441_v47  ;;  %v13318_v12 = vld [vmem:[%s16310_s7 + $0x48] sm:$0xff]  }
0x4a13   :  { %v13492_v3 = vpop.eup %13491  ;;  %v2446_v13 = vsel %vm2444_vm15, %v2445_v26, %v2443_v28  ;;  %v7036_v26 = vand.u32 2147483648, %v7029_v63 }
0x4a14   :  { %v2454_v31 = vadd.f32 1e-06, %v2446_v13  ;;  %v2448_v32 = vmul.f32 %v13492_v3, %v2439_v16 }
0x4a16   :  { %13495 = vrcp.f32 %v2454_v31  ;;  %v2450_v38 = vsel %vm2449_vm3, %v2439_v16, %v2448_v32 }
0x4a17   :  { %v13494_v40 = vpop.eup %13493  ;;  %v2453_v17 = vsel %vm2451_vm5, %v2452_v36, %v2450_v38 }
0x4a18   :  { %v2455_v39 = vadd.f32 1e-06, %v2453_v17  ;;  %v4819_v25 = vmul.f32 %v13494_v40, %v4810_v23 }
0x4a1a   :  { %13497 = vrcp.f32 %v2455_v39  ;;  %v4821_v2 = vsel %vm4820_vm6, %v4810_v23, %v4819_v25  ;;  %v11301_v39 = vld [vmem:[%s16303_s11 + $0xe] ss:$0 sm:$0xff] }
0x4a1b   :  { %v4824_v41 = vsel %vm4822_vm9, %v4823_v34, %v4821_v2 }
0x4a1c   :  { %v4826_v50 = vadd.f32 1e-06, %v4824_v41  ;;  %v11302_v41 = vld [vmem:[%s16303_s11 + $0xf] ss:$0 sm:$0xff] }
0x4a1e   :  { %13499 = vrcp.f32 %v4826_v50 }
0x4a1f   :  { %13501 = vrsqrt.f32 %v7029_v63 }
0x4a20   :  { %v13496_v51 = vpop.eup %13495 }
0x4a21   :  { %v2461_v60 = vmul.f32 %v13496_v51, %v2428_v42  ;;  %v15219_v42 = vld [vmem:[%s16303_s11 + $0x1b] ss:$0 sm:$0xff] }
0x4a23   :  { %v2467_v53 = vmul.f32 %v11012_v18, %v2461_v60 }
0x4a24   :  { %v13498_v44 = vpop.eup %13497 }
0x4a25   :  { %v2474_v49 = vadd.f32 %v11013_v58, %v2467_v53  ;;  %v2462_v52 = vmul.f32 %v13498_v44, %v2429_v59  ;;  %v11307_v53 = vld [vmem:[%s16303_s11 + $0x27] ss:$0 sm:$0xff] }
0x4a27   :  { %7277 = vst.msk [vmem:[#allocation2] sm:$0xff] %vm116_vm2, %v2474_v49  ;;  %v2468_v48 = vmul.f32 %v11012_v18, %v2462_v52 }
0x4a28   :  { %v13500_v4 = vpop.eup %13499 }
0x4a29   :  { %v2475_v55 = vadd.f32 %v11013_v58, %v2468_v48  ;;  %v4833_v56 = vmul.f32 %v13500_v4, %v4800_v15  ;;  %v13502_v16 = vpop.eup %13501  ;;  %v13320_v58 = vld [vmem:[%s16310_s7 + $0x58] sm:$0xff]  }
0x4a2a   :  { %v7032_v21 = vmul.f32 %v13502_v16, %v7029_v63 }
0x4a2b   :  { %7280 = vst.msk [vmem:[#allocation2 + $0x18] sm:$0xff] %vm116_vm2, %v2475_v55  ;;  %v4839_v19 = vmul.f32 %v15214_v54, %v4833_v56 }
0x4a2c   :  { %v7034_v47 = vsel %vm7033_vm10, %v7029_v63, %v7032_v21 }
0x4a2d   :  { %v4846_v62 = vadd.f32 %v15219_v42, %v4839_v19  ;;  %v7037_v28 = vsel %vm7035_vm1, %v7036_v26, %v7034_v47 }
0x4a2e   :  { %v15224_v59 = vld [vmem:[#allocation2] sm:$0xff]  ;;  %v7045_v3 = vadd.f32 1e-06, %v7037_v28 }
0x4a2f   :  { %7282 = vst.msk [vmem:[#allocation2 + $0x28] sm:$0xff] %vm116_vm2, %v4846_v62  ;;  %v7289_v46 = vsel %vm116_vm2, %v15224_v59, 0.0 }
0x4a30   :  { %7290 = vadd.xlane.f32.xlu0 %v7289_v46  ;;  %v11319_v46 = vld [vmem:[%s16303_s11 + $0x11] ss:$0 sm:$0xff] }
0x4a5b   :  { %v6995_v61 = vpop.f32.mrb[228].mxu1 }
0x4a5c   :  { %v7001_v14 = vadd.f32 %v6995_v61, %v15124_v20  ;;  %v12753_v57 = vpop.f32.mrb[229].mxu1  ;;  %v13316_v20 = vld [vmem:[%s16309_s6 + $0x28] sm:$0xff]  }
0x4a5d   :  { %v6998_v15 = vpop.f32.mrb[230].mxu1 }
0x4a5e   :  { %v7003_v1 = vadd.f32 %v7001_v14, %v14768_v10  ;;  %v12754_v5 = vpop.f32.mrb[231].mxu1  ;;  %v13315_v10 = vld [vmem:[%s16309_s6 + $0x20] sm:$0xff]  }
0x4a5f   :  { %12756 = vmatpush3.bf16.msra.mxu0 %v13315_v10 }
0x4a60   :  { %v15232_v7 = vadd.f32 %v15164_v27, %v7003_v1  ;;  %12757 = vmatprep.subr.bf16.mxu0 %v13704_v0  ;;  %v13317_v27 = vld [vmem:[%s16310_s7 + $0x40] sm:$0xff]  }
0x4a61   :  { %12764 = vmatpush3.bf16.msra.mxu1 %v13317_v27 }
0x4a62   :  { %v7014_v9 = vsel %vm116_vm2, %v15232_v7, 0.0  ;;  %12765 = vmatprep.subr.bf16.mxu1 %v13704_v0 }
0x4a63   :  { %7015 = vadd.xlane.f32.xlu1 %v7014_v9  ;;  %12758 = vmatpush3.bf16.msra.mxu0 %v13316_v20 }
0x4a64   :  { %12775 = vmatprep.subr.bf16.mxu0 %v13704_v0 }
0x4a65   :  { %12766 = vmatpush3.bf16.msra.mxu1 %v13318_v12 }
0x4a66   :  { %12767 = vmatprep.subr.bf16.mxu1 %v13704_v0 }
0x4af0   :  { %v7016_v22 = vpop.xlane.xlu1 %7015 }
0x4af1   :  { %v7018_v11 = vmul.f32 0.03125, %v7016_v22 }
0x4af3   :  { %v7020_v43 = vsub.f32 %v15232_v7, %v7018_v11  ;;  %v4789_v11 = vadd.f32 %v14797_v24, %v14680_v35 }
0x4af5   :  { %v7022_v29 = vmul.f32 %v7020_v43, %v7020_v43 }
0x4af7   :  { %v7026_v30 = vsel %vm116_vm2, %v7022_v29, 0.0 }
0x4af8   :  { %7027 = vadd.xlane.f32.xlu1 %v7026_v30 }
0x4b85   :  { %v7028_v23 = vpop.xlane.xlu1 %7027 }
0x4b86   :  { %v7030_v6 = vmul.f32 0.032258064, %v7028_v23 }
0x4b88   :  { %13503 = vrsqrt.f32 %v7030_v6  ;;  %vm7040_vm11 = vcmp.eq.f32.partialorder %v7030_v6, inf  ;;  %v7043_v32 = vand.u32 2147483648, %v7030_v6  ;;  %vm7042_vm12 = vcmp.eq.f32.partialorder %v7030_v6, 0.0 }
0x4b89   :  { %13505 = vrcp.f32 %v7045_v3 }
0x4b92   :  { %v13504_v13 = vpop.eup %13503 }
0x4b93   :  { %v7039_v31 = vmul.f32 %v13504_v13, %v7030_v6  ;;  %v13506_v40 = vpop.eup %13505 }
0x4b94   :  { %v7052_v17 = vmul.f32 %v13506_v40, %v15180_v45  ;;  %v13319_v45 = vld [vmem:[%s16310_s7 + $0x50] sm:$0xff]  }
0x4b95   :  { %v7041_v36 = vsel %vm7040_vm11, %v7030_v6, %v7039_v31  ;;  %12768 = vmatpush3.bf16.msra.mxu1 %v13319_v45 }
0x4b96   :  { %v7044_v8 = vsel %vm7042_vm12, %v7043_v32, %v7041_v36  ;;  %v7058_v2 = vmul.f32 %v11301_v39, %v7052_v17  ;;  %12769 = vmatprep.subr.bf16.mxu1 %v13704_v0 }
0x4b97   :  { %v7046_v38 = vadd.f32 1e-06, %v7044_v8 }
0x4b98   :  { %v7065_v51 = vadd.f32 %v11302_v41, %v7058_v2 }
0x4b99   :  { %13507 = vrcp.f32 %v7046_v38  ;;  %12770 = vmatpush3.bf16.msra.mxu1 %v13320_v58 }
0x4b9a   :  { %12791 = vmatprep.subr.bf16.mxu1 %v13704_v0 }
0x4ba3   :  { %v13508_v25 = vpop.eup %13507 }
0x4ba4   :  { %v7053_v34 = vmul.f32 %v13508_v25, %v7020_v43  ;;  %v4791_v43 = vsel %vm116_vm2, %v4789_v11, 0.0 }
0x4ba6   :  { %v7059_v50 = vmul.f32 %v11301_v39, %v7053_v34 }
0x4ba8   :  { %v7066_v18 = vadd.f32 %v11302_v41, %v7059_v50 }
0x4baa   :  { %v7067_v60 = vpack.c.bf16 %v7066_v18, %v7065_v51 }
0x4bac   :  { %12760 = vmatmul.mubr.msk.bf16.vlgmr.msra.gmra.mrb[224].mxu0 %vm116_vm2, %v7067_v60 }
0x4bad   :  { %12779 = vmatprep.mubr.msk.bf16.mxu0 %vm13705_vm0, %v13704_v0 }
0x4c7f   :  { %v7127_v44 = vpop.f32.mrb[224].mxu0 }
0x4c80   :  { %v7128_v49 = vadd.f32 %v11307_v53, %v7127_v44  ;;  %v12761_v52 = vpop.f32.mrb[225].mxu0 }
0x4c81   :  { %v7130_v48 = vpop.f32.mrb[226].mxu0 }
0x4c82   :  { %v7131_v4 = vadd.f32 %v11307_v53, %v7130_v48  ;;  %v12762_v55 = vpop.f32.mrb[227].mxu0  ;;  %v7134_v56 = vmax.f32 %v7128_v49, 0.0  ;;  %v11325_v48 = vld [vmem:[%s16303_s11 + $0x1c] ss:$0 sm:$0xff] }
0x4c83   :  { %v11326_v55 = vld [vmem:[%s16303_s11 + $0x1d] ss:$0 sm:$0xff] }
0x4c84   :  { %v7135_v19 = vmax.f32 %v7131_v4, 0.0 }
0x4c86   :  { %v7136_v62 = vpack.c.bf16 %v7135_v19, %v7134_v56 }
0x4c88   :  { %12772 = vmatmul.mubr.msk.bf16.vlgmr.msra.gmra.mrb[232].mxu1 %vm2373_vm4, %v7136_v62 }
0x4c89   :  { %12795 = vmatprep.mubr.msk.bf16.mxu1 %vm13705_vm0, %v13704_v0 }
0x4d5b   :  { %v7212_v61 = vpop.f32.mrb[232].mxu1 }
0x4d5c   :  { %v7213_v14 = vadd.f32 %v11319_v46, %v7212_v61  ;;  %v12773_v57 = vpop.f32.mrb[233].mxu1 }
0x4d5d   :  { %v7215_v15 = vpop.f32.mrb[234].mxu1 }
0x4d5e   :  { %v12774_v1 = vpop.f32.mrb[235].mxu1  ;;  %v7219_v5 = vadd.f32 %v7213_v14, %v15168_v33  ;;  %v7216_v9 = vadd.f32 %v11319_v46, %v7215_v15 }
0x4d60   :  { %v7221_v22 = vsel %vm116_vm2, %v7219_v5, 0.0  ;;  %v7220_v29 = vadd.f32 %v7216_v9, %v15232_v7 }
0x4d61   :  { %7222 = vadd.xlane.f32.xlu1 %v7221_v22 }
0x4d62   :  { %v7224_v30 = vsel %vm116_vm2, %v7220_v29, 0.0 }
0x4d65   :  { %4792 = vadd.xlane.f32.xlu1 %v4791_v43 }
0x4d69   :  { %7225 = vadd.xlane.f32.xlu1 %v7224_v30 }
0x4dee   :  { %v7223_v10 = vpop.xlane.xlu1 %7222 }
0x4def   :  { %v7227_v20 = vmul.f32 0.03125, %v7223_v10 }
0x4df1   :  { %v7229_v27 = vsub.f32 %v7219_v5, %v7227_v20  ;;  %v7291_v5 = vpop.xlane.xlu0 %7290  ;;  %v7288_v20 = vld [vmem:[#allocation2 + $0x28] sm:$0xff] }
0x4df2   :  { %v4793_v12 = vpop.xlane.xlu1 %4792 }
0x4df3   :  { %v4797_v33 = vmul.f32 0.03125, %v4793_v12  ;;  %v7231_v63 = vmul.f32 %v7229_v27, %v7229_v27  ;;  %v7304_v12 = vsel %vm116_vm2, %v7288_v20, 0.0 }
0x4df5   :  { %v4799_v16 = vsub.f32 %v4789_v11, %v4797_v33  ;;  %v7233_v21 = vsel %vm116_vm2, %v7231_v63, 0.0  ;;  %v7307_v11 = vmul.f32 0.03125, %v7291_v5 }
0x4df6   :  { %7234 = vadd.xlane.f32.xlu1 %v7233_v21  ;;  %v7226_v35 = vpop.xlane.xlu1 %7225 }
0x4df7   :  { %v7228_v24 = vmul.f32 0.03125, %v7226_v35  ;;  %v4801_v23 = vmul.f32 %v4799_v16, %v4799_v16 }
0x4df9   :  { %v7230_v6 = vsub.f32 %v7220_v29, %v7228_v24  ;;  %v4803_v7 = vsel %vm116_vm2, %v4801_v23, 0.0  ;;  %v7286_v29 = vld [vmem:[#allocation2 + $0x18] sm:$0xff] }
0x4dfa   :  { %4804 = vadd.xlane.f32.xlu1 %v4803_v7 }
0x4dfb   :  { %v7232_v47 = vmul.f32 %v7230_v6, %v7230_v6 }
0x4dfd   :  { %v7236_v26 = vsel %vm116_vm2, %v7232_v47, 0.0 }
0x4dfe   :  { %7237 = vadd.xlane.f32.xlu1 %v7236_v26 }
0x4e83   :  { %v7235_v28 = vpop.xlane.xlu1 %7234 }
0x4e84   :  { %v7239_v3 = vmul.f32 0.032258064, %v7235_v28 }
0x4e86   :  { %13509 = vrsqrt.f32 %v7239_v3  ;;  %vm7243_vm13 = vcmp.eq.f32.partialorder %v7239_v3, inf  ;;  %v7246_v40 = vand.u32 2147483648, %v7239_v3  ;;  %vm7245_vm14 = vcmp.eq.f32.partialorder %v7239_v3, 0.0 }
0x4e87   :  { %v4805_v13 = vpop.xlane.xlu1 %4804 }
0x4e88   :  { %v4809_v31 = vmul.f32 0.032258064, %v4805_v13 }
0x4e8a   :  { %13511 = vrsqrt.f32 %v4809_v31  ;;  %vm4813_vm15 = vcmp.eq.f32.partialorder %v4809_v31, inf  ;;  %v4816_v41 = vand.u32 2147483648, %v4809_v31  ;;  %vm4815_vm3 = vcmp.eq.f32.partialorder %v4809_v31, 0.0 }
0x4e8b   :  { %v7238_v32 = vpop.xlane.xlu1 %7237 }
0x4e8c   :  { %v7240_v36 = vmul.f32 0.032258064, %v7238_v32 }
0x4e8e   :  { %13513 = vrsqrt.f32 %v7240_v36  ;;  %vm7250_vm5 = vcmp.eq.f32.partialorder %v7240_v36, inf  ;;  %v7253_v58 = vand.u32 2147483648, %v7240_v36  ;;  %vm7252_vm6 = vcmp.eq.f32.partialorder %v7240_v36, 0.0 }
0x4e90   :  { %v13510_v8 = vpop.eup %13509 }
0x4e91   :  { %v7242_v38 = vmul.f32 %v13510_v8, %v7239_v3 }
0x4e93   :  { %v7244_v17 = vsel %vm7243_vm13, %v7239_v3, %v7242_v38 }
0x4e94   :  { %v13512_v39 = vpop.eup %13511  ;;  %v7247_v25 = vsel %vm7245_vm14, %v7246_v40, %v7244_v17 }
0x4e95   :  { %v7255_v34 = vadd.f32 1e-06, %v7247_v25  ;;  %v4812_v2 = vmul.f32 %v13512_v39, %v4809_v31 }
0x4e97   :  { %13515 = vrcp.f32 %v7255_v34  ;;  %v4814_v50 = vsel %vm4813_vm15, %v4809_v31, %v4812_v2 }
0x4e98   :  { %v13514_v51 = vpop.eup %13513  ;;  %v4817_v18 = vsel %vm4815_vm3, %v4816_v41, %v4814_v50 }
0x4e99   :  { %v4825_v60 = vadd.f32 1e-06, %v4817_v18  ;;  %v7249_v45 = vmul.f32 %v13514_v51, %v7240_v36  ;;  %v13321_v51 = vld [vmem:[%s16304_s4 + $0x240] sm:$0xff]  }
0x4e9a   :  { %v13322_v18 = vld [vmem:[%s16304_s4 + $0x280] sm:$0xff]   ;;  %12776 = vmatpush3.bf16.msra.mxu0 %v13321_v51 }
0x4e9b   :  { %13517 = vrcp.f32 %v4825_v60  ;;  %v7251_v53 = vsel %vm7250_vm5, %v7240_v36, %v7249_v45  ;;  %12792 = vmatpush3.bf16.msra.mxu1 %v13322_v18  ;;  %12777 = vmatprep.subr.bf16.mxu0 %v13704_v0  ;;  %v13323_v60 = vld [vmem:[%s16304_s4 + $0x248] sm:$0xff]  }
0x4e9c   :  { %v7254_v44 = vsel %vm7252_vm6, %v7253_v58, %v7251_v53  ;;  %12793 = vmatprep.subr.bf16.mxu1 %v13704_v0  ;;  %v13324_v45 = vld [vmem:[%s16304_s4 + $0x288] sm:$0xff]  }
0x4e9d   :  { %v7256_v49 = vadd.f32 1e-06, %v7254_v44 }
0x4e9e   :  { %12778 = vmatpush3.bf16.msra.mxu0 %v13323_v60  ;;  %v11328_v60 = vld [vmem:[%s16303_s11 + $0x13] ss:$0 sm:$0xff] }
0x4e9f   :  { %13519 = vrcp.f32 %v7256_v49  ;;  %12794 = vmatpush3.bf16.msra.mxu1 %v13324_v45  ;;  %12807 = vmatprep.subr.bf16.mxu0 %v13704_v0 }
0x4ea1   :  { %v13516_v52 = vpop.eup %13515 }
0x4ea2   :  { %v7262_v4 = vmul.f32 %v13516_v52, %v7229_v27 }
0x4ea4   :  { %v7268_v56 = vmul.f32 %v11325_v48, %v7262_v4 }
0x4ea5   :  { %v13518_v19 = vpop.eup %13517 }
0x4ea6   :  { %v7275_v62 = vadd.f32 %v11326_v55, %v7268_v56  ;;  %v4832_v46 = vmul.f32 %v13518_v19, %v4799_v16 }
0x4ea8   :  { %7278 = vst.msk [vmem:[#allocation2 + $0x8] sm:$0xff] %vm116_vm2, %v7275_v62  ;;  %v4838_v61 = vmul.f32 %v15214_v54, %v4832_v46  ;;  %v15305_v54 = vsub.f32 %v15224_v59, %v7307_v11 }
0x4ea9   :  { %v13520_v14 = vpop.eup %13519 }
0x4eaa   :  { %v4845_v57 = vadd.f32 %v15219_v42, %v4838_v61  ;;  %v7263_v15 = vmul.f32 %v13520_v14, %v7230_v6  ;;  %v7298_v42 = vsel %vm116_vm2, %v7286_v29, 0.0  ;;  %v7319_v63 = vmul.f32 %v15305_v54, %v15305_v54 }
0x4eac   :  { %7279 = vst.msk [vmem:[#allocation2 + $0x10] sm:$0xff] %vm116_vm2, %v4845_v57  ;;  %v7269_v1 = vmul.f32 %v11325_v48, %v7263_v15  ;;  %v7325_v59 = vsel %vm116_vm2, %v7319_v63, 0.0 }
0x4eae   :  { %v7276_v9 = vadd.f32 %v11326_v55, %v7269_v1 }
0x4eaf   :  { %v7284_v22 = vld [vmem:[#allocation2 + $0x8] sm:$0xff] }
0x4eb0   :  { %7281 = vst.msk [vmem:[#allocation2 + $0x20] sm:$0xff] %vm116_vm2, %v7276_v9  ;;  %v7292_v43 = vsel %vm116_vm2, %v7284_v22, 0.0 }
0x4eb1   :  { %7293 = vadd.xlane.f32.xlu1 %v7292_v43 }
0x4eb3   :  { %v7285_v30 = vld [vmem:[#allocation2 + $0x10] sm:$0xff] }
0x4eb4   :  { %v7295_v10 = vsel %vm116_vm2, %v7285_v30, 0.0 }
0x4eb5   :  { %7299 = vadd.xlane.f32.xlu1 %v7298_v42  ;;  %7296 = vadd.xlane.f32.xlu0 %v7295_v10 }
0x4eb7   :  { %v7287_v27 = vld [vmem:[#allocation2 + $0x20] sm:$0xff] }
0x4eb8   :  { %v7301_v33 = vsel %vm116_vm2, %v7287_v27, 0.0 }
0x4eb9   :  { %7305 = vadd.xlane.f32.xlu1 %v7304_v12  ;;  %7302 = vadd.xlane.f32.xlu0 %v7301_v33 }
0x4ebd   :  { %7326 = vadd.xlane.f32.xlu0 %v7325_v59 }
0x4f3e   :  { %v7294_v16 = vpop.xlane.xlu1 %7293 }
0x4f3f   :  { %v7308_v21 = vmul.f32 0.03125, %v7294_v16 }
0x4f41   :  { %v15314_v35 = vsub.f32 %v7284_v22, %v7308_v21 }
0x4f42   :  { %v7297_v24 = vpop.xlane.xlu0 %7296  ;;  %v7300_v23 = vpop.xlane.xlu1 %7299 }
0x4f43   :  { %v7309_v6 = vmul.f32 0.03125, %v7297_v24  ;;  %v7310_v7 = vmul.f32 0.03125, %v7300_v23  ;;  %v7320_v47 = vmul.f32 %v15314_v35, %v15314_v35 }
0x4f45   :  { %v15318_v26 = vsub.f32 %v7285_v30, %v7309_v6  ;;  %v15320_v28 = vsub.f32 %v7286_v29, %v7310_v7  ;;  %v7328_v3 = vsel %vm116_vm2, %v7320_v47, 0.0 }
0x4f46   :  { %v7303_v13 = vpop.xlane.xlu0 %7302  ;;  %7329 = vadd.xlane.f32.xlu1 %v7328_v3  ;;  %v7306_v31 = vpop.xlane.xlu1 %7305 }
0x4f47   :  { %v7311_v32 = vmul.f32 0.03125, %v7303_v13  ;;  %v7312_v36 = vmul.f32 0.03125, %v7306_v31  ;;  %v7321_v8 = vmul.f32 %v15318_v26, %v15318_v26  ;;  %v7322_v38 = vmul.f32 %v15320_v28, %v15320_v28 }
0x4f49   :  { %v15327_v40 = vsub.f32 %v7287_v27, %v7311_v32  ;;  %v15329_v17 = vsub.f32 %v7288_v20, %v7312_v36  ;;  %v7331_v39 = vsel %vm116_vm2, %v7321_v8, 0.0  ;;  %v7334_v25 = vsel %vm116_vm2, %v7322_v38, 0.0 }
0x4f4a   :  { %7332 = vadd.xlane.f32.xlu0 %v7331_v39  ;;  %7335 = vadd.xlane.f32.xlu1 %v7334_v25  ;;  %v7327_v58 = vpop.xlane.xlu0 %7326 }
0x4f4b   :  { %v7323_v34 = vmul.f32 %v15327_v40, %v15327_v40  ;;  %v7324_v2 = vmul.f32 %v15329_v17, %v15329_v17  ;;  %v7343_v53 = vmul.f32 0.032258064, %v7327_v58 }
0x4f4d   :  { %v7337_v41 = vsel %vm116_vm2, %v7323_v34, 0.0  ;;  %v7340_v50 = vsel %vm116_vm2, %v7324_v2, 0.0  ;;  %13521 = vrsqrt.f32 %v7343_v53  ;;  %vm7351_vm9 = vcmp.eq.f32.partialorder %v7343_v53, inf  ;;  %v11327_v2 = vld [vmem:[%s16303_s11 + $0x12] ss:$0 sm:$0xff] }
0x4f4e   :  { %7338 = vadd.xlane.f32.xlu0 %v7337_v41  ;;  %7341 = vadd.xlane.f32.xlu1 %v7340_v50  ;;  %v7354_v19 = vand.u32 2147483648, %v7343_v53  ;;  %vm7353_vm10 = vcmp.eq.f32.partialorder %v7343_v53, 0.0 }
0x4f57   :  { %v13522_v44 = vpop.eup %13521 }
0x4f58   :  { %v7350_v49 = vmul.f32 %v13522_v44, %v7343_v53 }
0x4f5a   :  { %v7352_v4 = vsel %vm7351_vm9, %v7343_v53, %v7350_v49 }
0x4f5b   :  { %v7355_v61 = vsel %vm7353_vm10, %v7354_v19, %v7352_v4  ;;  %vm7767_vm10 = vcmask 195584  }
0x4f5c   :  { %v7391_v15 = vadd.f32 1e-06, %v7355_v61  ;;  %v13326_v61 = vld [vmem:[%s16304_s4 + $0x2c8] sm:$0xff]  }
0x4fd3   :  { %v7330_v52 = vpop.xlane.xlu1 %7329 }
0x4fd4   :  { %v7344_v48 = vmul.f32 0.032258064, %v7330_v52 }
0x4fd6   :  { %13523 = vrsqrt.f32 %v7344_v48  ;;  %vm7358_vm1 = vcmp.eq.f32.partialorder %v7344_v48, inf  ;;  %v7361_v11 = vand.u32 2147483648, %v7344_v48  ;;  %vm7360_vm11 = vcmp.eq.f32.partialorder %v7344_v48, 0.0 }
0x4fd7   :  { %v7333_v55 = vpop.xlane.xlu0 %7332  ;;  %v7336_v56 = vpop.xlane.xlu1 %7335 }
0x4fd8   :  { %v7345_v62 = vmul.f32 0.032258064, %v7333_v55  ;;  %v7346_v46 = vmul.f32 0.032258064, %v7336_v56 }
0x4fda   :  { %13525 = vrsqrt.f32 %v7345_v62  ;;  %vm7365_vm12 = vcmp.eq.f32.partialorder %v7345_v62, inf  ;;  %vm7367_vm13 = vcmp.eq.f32.partialorder %v7345_v62, 0.0  ;;  %v7368_v27 = vand.u32 2147483648, %v7345_v62 }
0x4fdb   :  { %13527 = vrsqrt.f32 %v7346_v46  ;;  %v7339_v14 = vpop.xlane.xlu0 %7338  ;;  %v7342_v57 = vpop.xlane.xlu1 %7341  ;;  %vm7372_vm14 = vcmp.eq.f32.partialorder %v7346_v46, inf  ;;  %v7375_v63 = vand.u32 2147483648, %v7346_v46  ;;  %vm7374_vm15 = vcmp.eq.f32.partialorder %v7346_v46, 0.0 }
0x4fdc   :  { %v7347_v1 = vmul.f32 0.032258064, %v7339_v14  ;;  %v7348_v5 = vmul.f32 0.032258064, %v7342_v57 }
0x4fde   :  { %13529 = vrsqrt.f32 %v7347_v1  ;;  %vm7379_vm3 = vcmp.eq.f32.partialorder %v7347_v1, inf  ;;  %vm7381_vm5 = vcmp.eq.f32.partialorder %v7347_v1, 0.0  ;;  %v7382_v13 = vand.u32 2147483648, %v7347_v1 }
0x4fdf   :  { %13531 = vrsqrt.f32 %v7348_v5  ;;  %vm7386_vm6 = vcmp.eq.f32.partialorder %v7348_v5, inf  ;;  %v7389_v36 = vand.u32 2147483648, %v7348_v5  ;;  %vm7388_vm9 = vcmp.eq.f32.partialorder %v7348_v5, 0.0 }
0x4fe0   :  { %v13524_v9 = vpop.eup %13523  ;;  %13533 = vrcp.f32 %v7391_v15 }
0x4fe1   :  { %v7357_v22 = vmul.f32 %v13524_v9, %v7344_v48 }
0x4fe3   :  { %v7359_v43 = vsel %vm7358_vm1, %v7344_v48, %v7357_v22  ;;  %v11343_v22 = vld [vmem:[%s16305_s10 + $0x28] ss:$0 sm:$0xff] }
0x4fe4   :  { %v13526_v29 = vpop.eup %13525  ;;  %v7362_v30 = vsel %vm7360_vm11, %v7361_v11, %v7359_v43 }
0x4fe5   :  { %v13528_v42 = vpop.eup %13527  ;;  %v7392_v10 = vadd.f32 1e-06, %v7362_v30  ;;  %v7364_v20 = vmul.f32 %v13526_v29, %v7345_v62 }
0x4fe6   :  { %v7371_v12 = vmul.f32 %v13528_v42, %v7346_v46 }
0x4fe7   :  { %13535 = vrcp.f32 %v7392_v10  ;;  %v7366_v33 = vsel %vm7365_vm12, %v7345_v62, %v7364_v20 }
0x4fe8   :  { %v7369_v59 = vsel %vm7367_vm13, %v7368_v27, %v7366_v33  ;;  %v7373_v16 = vsel %vm7372_vm14, %v7346_v46, %v7371_v12  ;;  %v13530_v21 = vpop.eup %13529 }
0x4fe9   :  { %v7393_v24 = vadd.f32 1e-06, %v7369_v59  ;;  %v7376_v23 = vsel %vm7374_vm15, %v7375_v63, %v7373_v16  ;;  %v13532_v6 = vpop.eup %13531  ;;  %v7378_v47 = vmul.f32 %v13530_v21, %v7347_v1 }
0x4fea   :  { %v7394_v7 = vadd.f32 1e-06, %v7376_v23  ;;  %v13534_v3 = vpop.eup %13533  ;;  %v7385_v31 = vmul.f32 %v13532_v6, %v7348_v5 }
0x4feb   :  { %13537 = vrcp.f32 %v7393_v24  ;;  %v7380_v32 = vsel %vm7379_vm3, %v7347_v1, %v7378_v47  ;;  %v7410_v39 = vmul.f32 %v13534_v3, %v15305_v54 }
0x4fec   :  { %13539 = vrcp.f32 %v7394_v7  ;;  %v7383_v8 = vsel %vm7381_vm5, %v7382_v13, %v7380_v32  ;;  %v7387_v38 = vsel %vm7386_vm6, %v7348_v5, %v7385_v31  ;;  %v11333_v5 = vld [vmem:[%s16305_s10 + $0x24] ss:$0 sm:$0xff] }
0x4fed   :  { %v7395_v25 = vadd.f32 1e-06, %v7383_v8  ;;  %v7390_v34 = vsel %vm7388_vm9, %v7389_v36, %v7387_v38  ;;  %v7420_v51 = vmul.f32 %v11327_v2, %v7410_v39 }
0x4fee   :  { %v7396_v41 = vadd.f32 1e-06, %v7390_v34 }
0x4fef   :  { %13541 = vrcp.f32 %v7395_v25  ;;  %v7431_v53 = vadd.f32 %v11328_v60, %v7420_v51 }
0x4ff0   :  { %13543 = vrcp.f32 %v7396_v41 }
0x4ff1   :  { %v13536_v50 = vpop.eup %13535 }
0x4ff2   :  { %v7411_v18 = vmul.f32 %v13536_v50, %v15314_v35  ;;  %v13325_v35 = vld [vmem:[%s16304_s4 + $0x2c0] sm:$0xff]  }
0x4ff4   :  { %v7421_v45 = vmul.f32 %v11327_v2, %v7411_v18 }
0x4ff5   :  { %v13538_v58 = vpop.eup %13537 }
0x4ff6   :  { %v13540_v54 = vpop.eup %13539  ;;  %v7432_v44 = vadd.f32 %v11328_v60, %v7421_v45  ;;  %v7412_v49 = vmul.f32 %v13538_v58, %v15318_v26 }
0x4ff7   :  { %v7413_v52 = vmul.f32 %v13540_v54, %v15320_v28 }
0x4ff8   :  { %v15364_v48 = vpack.c.bf16 %v7432_v44, %v7431_v53  ;;  %v7422_v4 = vmul.f32 %v11327_v2, %v7412_v49 }
0x4ff9   :  { %v7423_v55 = vmul.f32 %v11327_v2, %v7413_v52  ;;  %v13542_v56 = vpop.eup %13541 }
0x4ffa   :  { %12780 = vmatmul.mubr.msk.bf16.vlgmr.msra.gmra.mrb[228].mxu0 %vm116_vm2, %v15364_v48  ;;  %12796 = vmatmul.mubr.msk.bf16.vlgmr.msra.gmra.mrb[236].mxu1 %vm116_vm2, %v15364_v48  ;;  %v13544_v19 = vpop.eup %13543  ;;  %v7433_v26 = vadd.f32 %v11328_v60, %v7422_v4  ;;  %v7414_v62 = vmul.f32 %v13542_v56, %v15327_v40 }
0x4ffb   :  { %12783 = vmatprep.mubr.msk.bf16.mxu0 %vm13705_vm0, %v13704_v0  ;;  %12799 = vmatprep.mubr.msk.bf16.mxu1 %vm13705_vm0, %v13704_v0  ;;  %v7434_v28 = vadd.f32 %v11328_v60, %v7423_v55  ;;  %v7415_v46 = vmul.f32 %v13544_v19, %v15329_v17 }
0x4ffc   :  { %12808 = vmatpush3.bf16.msra.mxu0 %v13325_v35  ;;  %v7424_v57 = vmul.f32 %v11327_v2, %v7414_v62 }
0x4ffd   :  { %12809 = vmatprep.subr.bf16.mxu0 %v13704_v0  ;;  %v15383_v14 = vpack.c.bf16 %v7434_v28, %v7433_v26  ;;  %v7425_v15 = vmul.f32 %v11327_v2, %v7415_v46  ;;  %v11353_v26 = vld [vmem:[%s16305_s10 + $0x2c] ss:$0 sm:$0xff] }
0x4ffe   :  { %v7435_v40 = vadd.f32 %v11328_v60, %v7424_v57 }
0x4fff   :  { %v7436_v17 = vadd.f32 %v11328_v60, %v7425_v15 }
0x5000   :  { %12810 = vmatpush3.bf16.msra.mxu0 %v13326_v61 }
0x5001   :  { %v15393_v1 = vpack.c.bf16 %v7436_v17, %v7435_v40 }
0x5002   :  { %12784 = vmatmul.mubr.msk.bf16.gmra.mrb[232].mxu0 %vm116_vm2, %v15383_v14  ;;  %12800 = vmatmul.mubr.msk.bf16.gmra.mrb[240].mxu1 %vm116_vm2, %v15383_v14 }
0x5003   :  { %12787 = vmatprep.mubr.msk.bf16.mxu0 %vm13705_vm0, %v13704_v0  ;;  %12803 = vmatprep.mubr.msk.bf16.mxu1 %vm13705_vm0, %v13704_v0 }
0x500a   :  { %12788 = vmatmul.mubr.msk.bf16.gmra.mrb[236].mxu0 %vm116_vm2, %v15393_v1  ;;  %12804 = vmatmul.mubr.msk.bf16.gmra.mrb[244].mxu1 %vm116_vm2, %v15393_v1 }
0x500b   :  { %12811 = vmatprep.mubr.msk.bf16.mxu0 %vm13705_vm0, %v13704_v0 }
0x5012   :  { %12812 = vmatmul.mubr.msk.bf16.vlgmr.msra.gmra.mrb[240].mxu0 %vm116_vm2, %v15364_v48 }
0x5013   :  { %12815 = vmatprep.mubr.msk.bf16.mxu0 %vm13705_vm0, %v13704_v0 }
0x501a   :  { %12816 = vmatmul.mubr.msk.bf16.gmra.mrb[244].mxu0 %vm116_vm2, %v15383_v14 }
0x501b   :  { %12819 = vmatprep.mubr.msk.bf16.mxu0 %vm13705_vm0, %v13704_v0 }
0x5022   :  { %12820 = vmatmul.mubr.msk.bf16.gmra.mrb[248].mxu0 %vm116_vm2, %v15393_v1 }
0x50cd   :  { %v7505_v9 = vpop.f32.mrb[228].mxu0  ;;  %v7587_v11 = vpop.f32.mrb[236].mxu1 }
0x50ce   :  { %v12781_v43 = vpop.f32.mrb[229].mxu0  ;;  %v12797_v29 = vpop.f32.mrb[237].mxu1  ;;  %v7506_v10 = vadd.f32 %v11333_v5, %v7505_v9  ;;  %v7588_v20 = vadd.f32 %v11343_v22, %v7587_v11 }
0x50cf   :  { %v7508_v30 = vpop.f32.mrb[230].mxu0  ;;  %v7590_v42 = vpop.f32.mrb[238].mxu1 }
0x50d0   :  { %v7509_v27 = vadd.f32 %v11333_v5, %v7508_v30  ;;  %v7591_v12 = vadd.f32 %v11343_v22, %v7590_v42  ;;  %v12782_v33 = vpop.f32.mrb[231].mxu0  ;;  %v12798_v63 = vpop.f32.mrb[239].mxu1 }
0x50d2   :  { %v7528_v59 = vpack.c.bf16 %v7509_v27, %v7506_v10  ;;  %v7610_v16 = vpack.c.bf16 %v7591_v12, %v7588_v20  ;;  %v13327_v12 = vld [vmem:[%s16304_s4 + $0x250] sm:$0xff]  }
0x50d4   :  { %13195 = vmatprep.subr.msk.bf16.mxu1 %vm370_vm7, %v7610_v16  ;;  %12827 = vmatprep.mubr.msk.bf16.mxu1 %vm370_vm7, %v7528_v59  ;;  %v7704_v21 = vsel %vm370_vm7, %v7610_v16, 0 }
0x50d5   :  { %v7513_v24 = vpop.f32.mrb[232].mxu0  ;;  %v7595_v23 = vpop.f32.mrb[240].mxu1  ;;  %12824 = vmatpush3.bf16.xpose.msra.mxu1 %v7704_v21 }
0x50d6   :  { %v12785_v6 = vpop.f32.mrb[233].mxu0  ;;  %v12801_v7 = vpop.f32.mrb[241].mxu1  ;;  %v7514_v13 = vadd.f32 %v11333_v5, %v7513_v24  ;;  %v7596_v31 = vadd.f32 %v11343_v22, %v7595_v23  ;;  %v13328_v23 = vld [vmem:[%s16304_s4 + $0x258] sm:$0xff]  }
0x50d7   :  { %v7516_v47 = vpop.f32.mrb[234].mxu0  ;;  %v7598_v3 = vpop.f32.mrb[242].mxu1 }
0x50d8   :  { %v7517_v32 = vadd.f32 %v11333_v5, %v7516_v47  ;;  %v7599_v36 = vadd.f32 %v11343_v22, %v7598_v3  ;;  %v12786_v8 = vpop.f32.mrb[235].mxu0  ;;  %v12802_v38 = vpop.f32.mrb[243].mxu1  ;;  %v13329_v3 = vld [vmem:[%s16304_s4 + $0x2d0] sm:$0xff]  }
0x50d9   :  { %v7762_v8 = vsub.s32 3, %v13903_v37  ;;  %v13696_v38 = vld [vmem:[%s16306_s3] sm:$0xff] }
0x50da   :  { %v7529_v39 = vpack.c.bf16 %v7517_v32, %v7514_v13  ;;  %v7611_v25 = vpack.c.bf16 %v7599_v36, %v7596_v31  ;;  %v13330_v31 = vld [vmem:[%s16304_s4 + $0x2d8] sm:$0xff]   ;;  %v15486_v32 = vld [vmem:[%s16307_s5 + $0x30] sm:$0xf] }
0x50db   :  { %v15492_v36 = vsel %vm438_vm8, %v15486_v32, 0 }
0x50dc   :  { %13196 = vmatprep.subr.msk.bf16.mxu1 %vm370_vm7, %v7611_v25  ;;  %v7707_v34 = vsel %vm370_vm7, %v7611_v25, 0  ;;  %v7865_v35 = vrot.slane %v7529_v39, 4  ;;  %v7870_v55 = vrot.slane %v7611_v25, 4 }
0x50dd   :  { %v7521_v2 = vpop.f32.mrb[236].mxu0  ;;  %v7603_v41 = vpop.f32.mrb[244].mxu1  ;;  %12826 = vmatpush3.bf16.xpose.msra.mxu1 %v7707_v34 }
0x50de   :  { %v12789_v50 = vpop.f32.mrb[237].mxu0  ;;  %v12805_v51 = vpop.f32.mrb[245].mxu1  ;;  %v7522_v45 = vadd.f32 %v11333_v5, %v7521_v2  ;;  %v7604_v58 = vadd.f32 %v11343_v22, %v7603_v41 }
0x50df   :  { %v7524_v18 = vpop.f32.mrb[238].mxu0  ;;  %v7606_v60 = vpop.f32.mrb[246].mxu1 }
0x50e0   :  { %v7525_v54 = vadd.f32 %v11333_v5, %v7524_v18  ;;  %v7607_v53 = vadd.f32 %v11343_v22, %v7606_v60  ;;  %v12790_v44 = vpop.f32.mrb[239].mxu0  ;;  %v12806_v49 = vpop.f32.mrb[247].mxu1 }
0x50e1   :  { %v13697_v44 = vld [vmem:[%s16306_s3 + $0x8] sm:$0xff] }
0x50e2   :  { %v7530_v52 = vpack.c.bf16 %v7525_v54, %v7522_v45  ;;  %v7612_v4 = vpack.c.bf16 %v7607_v53, %v7604_v58  ;;  %v15519_v49 = vrot.slane %v13697_v44, %v7762_v8 }
0x50e4   :  { %v7866_v56 = vrot.slane %v7530_v52, 4  ;;  %v7871_v19 = vrot.slane %v7612_v4, 4  ;;  %12828 = vmatmul.mubr.msk.bf16.vlgmr.msra.gmra.mrb[248].mxu1 %vm370_vm7, %v7529_v39  ;;  %v15499_v39 = vrot.slane %v13696_v38, %v7762_v8 }
0x50e5   :  { %v7669_v28 = vpop.f32.mrb[240].mxu0 }
0x50e6   :  { %v12813_v62 = vpop.f32.mrb[241].mxu0  ;;  %v7872_v46 = vsel %vm438_vm8, %v7870_v55, %v7871_v19  ;;  %v7867_v61 = vsel %vm438_vm8, %v7865_v35, %v7866_v56  ;;  %v7670_v40 = vadd.f32 %v11353_v26, %v7669_v28  ;;  %v7883_v29 = vsel %vm370_vm7, %v7871_v19, 0 }
0x50e7   :  { %v7672_v57 = vpop.f32.mrb[242].mxu0  ;;  %13198 = vmatprep.subr.msk.bf16.mxu0 %vm370_vm7, %v7872_v46  ;;  %12843 = vmatprep.mubr.msk.bf16.mxu0 %vm370_vm7, %v7867_v61  ;;  %v7880_v15 = vsel %vm370_vm7, %v7872_v46, 0 }
0x50e8   :  { %v7673_v17 = vadd.f32 %v11353_v26, %v7672_v57  ;;  %v12814_v5 = vpop.f32.mrb[243].mxu0  ;;  %12840 = vmatpush3.bf16.xpose.msra.mxu0 %v7880_v15  ;;  %v11372_v57 = vld [vmem:[%s16305_s10 + $0x25] ss:$0 sm:$0xff] }
0x50e9   :  { %13199 = vmatprep.subr.msk.bf16.mxu0 %vm370_vm7, %v7871_v19 }
0x50ea   :  { %v7692_v9 = vpack.c.bf16 %v7673_v17, %v7670_v40 }
0x50ec   :  { %12831 = vmatprep.subr.bf16.mxu1 %v7692_v9 }
0x50ed   :  { %v7677_v22 = vpop.f32.mrb[244].mxu0  ;;  %12832 = vmatpush3.bf16.msra.mxu1 %v7692_v9 }
0x50ee   :  { %v12817_v11 = vpop.f32.mrb[245].mxu0  ;;  %v7678_v30 = vadd.f32 %v11353_v26, %v7677_v22 }
0x50ef   :  { %v7680_v43 = vpop.f32.mrb[246].mxu0 }
0x50f0   :  { %v7681_v42 = vadd.f32 %v11353_v26, %v7680_v43  ;;  %v12818_v10 = vpop.f32.mrb[247].mxu0  ;;  %12842 = vmatpush3.bf16.xpose.msra.mxu0 %v7883_v29 }
0x50f1   :  { %12855 = vmatprep.subr.bf16.mxu0 %v13704_v0 }
0x50f2   :  { %v7693_v20 = vpack.c.bf16 %v7681_v42, %v7678_v30 }
0x50f4   :  { %13197 = vmatprep.subr.msk.bf16.mxu1 %vm438_vm8, %v7693_v20  ;;  %v7810_v27 = vsel %vm438_vm8, %v7693_v20, 0  ;;  %v7980_v47 = vrot.slane %v7693_v20, 4 }
0x50f5   :  { %v7685_v33 = vpop.f32.mrb[248].mxu0  ;;  %12834 = vmatpush3.bf16.msra.mxu1 %v7810_v27 }
0x50f6   :  { %v12821_v63 = vpop.f32.mrb[249].mxu0  ;;  %v7686_v16 = vadd.f32 %v11353_v26, %v7685_v33 }
0x50f7   :  { %v7688_v59 = vpop.f32.mrb[250].mxu0  ;;  %12844 = vmatmul.mubr.msk.bf16.vlgmr.msra.gmra.mrb[252].mxu0 %vm370_vm7, %v7866_v56 }
0x50f8   :  { %v7689_v21 = vadd.f32 %v11353_v26, %v7688_v59  ;;  %v12822_v24 = vpop.f32.mrb[251].mxu0  ;;  %12856 = vmatpush3.bf16.msra.mxu0 %v13327_v12  ;;  %12859 = vmatprep.mubr.msk.bf16.mxu0 %vm13705_vm0, %v13704_v0 }
0x50f9   :  { %12857 = vmatprep.subr.bf16.mxu0 %v13704_v0 }
0x50fa   :  { %v7694_v6 = vpack.c.bf16 %v7689_v21, %v7686_v16 }
0x50fc   :  { %v15446_v7 = vrot.slane %v7694_v6, 4  ;;  %12858 = vmatpush3.bf16.msra.mxu0 %v13328_v23 }
0x50fd   :  { %12887 = vmatprep.subr.bf16.mxu0 %v13704_v0 }
0x50fe   :  { %v15454_v13 = vsel %vm438_vm8, %v7980_v47, %v15446_v7  ;;  %v11392_v47 = vld [vmem:[%s16305_s10 + $0x2d] ss:$0 sm:$0xff] }
0x50ff   :  { %12847 = vmatprep.subr.bf16.mxu1 %v15454_v13  ;;  %12860 = vmatmul.mubr.msk.bf16.vlgmr.msra.gmra.mrb[0].mxu0 %vm116_vm2, %v15364_v48 }
0x5100   :  { %12863 = vmatprep.mubr.msk.bf16.mxu0 %vm13705_vm0, %v13704_v0  ;;  %12888 = vmatpush3.bf16.msra.mxu0 %v13329_v3 }
0x5101   :  { %12889 = vmatprep.subr.bf16.mxu0 %v13704_v0 }
0x5104   :  { %12890 = vmatpush3.bf16.msra.mxu0 %v13330_v31 }
0x5105   :  { %13205 = vmatprep.subr.msk.bf16.mxu0 %vm438_vm8, %v15486_v32 }
0x5107   :  { %12864 = vmatmul.mubr.msk.bf16.gmra.mrb[4].mxu0 %vm116_vm2, %v15383_v14 }
0x5108   :  { %12867 = vmatprep.mubr.msk.bf16.mxu0 %vm13705_vm0, %v13704_v0 }
0x510f   :  { %12868 = vmatmul.mubr.msk.bf16.gmra.mrb[8].mxu0 %vm116_vm2, %v15393_v1 }
0x5110   :  { %12891 = vmatprep.mubr.msk.bf16.mxu0 %vm13705_vm0, %v13704_v0 }
0x5117   :  { %12892 = vmatmul.mubr.msk.bf16.vlgmr.msra.gmra.mrb[12].mxu0 %vm116_vm2, %v15364_v48 }
0x5118   :  { %12895 = vmatprep.mubr.msk.bf16.mxu0 %vm13705_vm0, %v13704_v0  ;;  %12926 = vmatpush3.bf16.msra.mxu0 %v15492_v36 }
0x511f   :  { %12896 = vmatmul.mubr.msk.bf16.gmra.mrb[16].mxu0 %vm116_vm2, %v15383_v14 }
0x5120   :  { %12899 = vmatprep.mubr.msk.bf16.mxu0 %vm13705_vm0, %v13704_v0 }
0x5127   :  { %12900 = vmatmul.mubr.msk.bf16.gmra.mrb[20].mxu0 %vm116_vm2, %v15393_v1 }
0x51b7   :  { %v12829_v25 = vpop.f32.mrb[248].mxu1 }
0x51b8   :  { %v7743_v34 = vpop.f32.mrb[249].mxu1  ;;  %v7759_v2 = vmul.f32 0.35355338, %v12829_v25 }
0x51b9   :  { %v7757_v41 = vmul.f32 0.35355338, %v7743_v34  ;;  %v12830_v50 = vpop.f32.mrb[250].mxu1 }
0x51ba   :  { %v7746_v51 = vpop.f32.mrb[251].mxu1  ;;  %v15505_v45 = vadd.f32 %v15499_v39, %v7759_v2 }
0x51bb   :  { %v7758_v18 = vmul.f32 0.35355338, %v7746_v51  ;;  %v15502_v60 = vadd.f32 %v15499_v39, %v7757_v41 }
0x51bc   :  { %v7774_v53 = vsel %vm7767_vm10, %v15505_v45, -inf }
0x51bd   :  { %v7768_v37 = vsel %vm7767_vm10, %v15502_v60, -inf  ;;  %v15510_v58 = vadd.f32 %v15499_v39, %v7758_v18 }
0x51be   :  { %7769 = vmax.xlane.f32.xlu0 %v7768_v37 }
0x51bf   :  { %v7771_v54 = vsel %vm7767_vm10, %v15510_v58, -inf }
0x51c0   :  { %7772 = vmax.xlane.f32.xlu1 %v7771_v54 }
0x51c2   :  { %7775 = vmax.xlane.f32.xlu0 %v7774_v53 }
0x51ca   :  { %v12845_v52 = vpop.f32.mrb[252].mxu0 }
0x51cb   :  { %v7919_v4 = vpop.f32.mrb[253].mxu0  ;;  %v7935_v35 = vmul.f32 0.35355338, %v12845_v52 }
0x51cc   :  { %v7933_v55 = vmul.f32 0.35355338, %v7919_v4  ;;  %v12846_v56 = vpop.f32.mrb[254].mxu0 }
0x51cd   :  { %v7922_v19 = vpop.f32.mrb[255].mxu0  ;;  %v15525_v62 = vadd.f32 %v15519_v49, %v7935_v35 }
0x51ce   :  { %v15522_v26 = vadd.f32 %v15519_v49, %v7933_v55  ;;  %v7934_v28 = vmul.f32 0.35355338, %v7922_v19 }
0x51cf   :  { %v7949_v9 = vsel %vm7767_vm10, %v15525_v62, -inf }
0x51d0   :  { %v15528_v46 = vadd.f32 %v15519_v49, %v7934_v28  ;;  %v7943_v61 = vsel %vm7767_vm10, %v15522_v26, -inf }
0x51d1   :  { %7944 = vmax.xlane.f32.xlu1 %v7943_v61 }
0x51d2   :  { %v8099_v15 = vpop.f32.mrb[0].mxu0  ;;  %v7946_v40 = vsel %vm7767_vm10, %v15528_v46, -inf }
0x51d3   :  { %v12861_v17 = vpop.f32.mrb[1].mxu0  ;;  %7947 = vmax.xlane.f32.xlu0 %v7946_v40  ;;  %v15539_v22 = vadd.f32 %v11372_v57, %v8099_v15 }
0x51d4   :  { %v8102_v5 = vpop.f32.mrb[2].mxu0 }
0x51d5   :  { %v15541_v11 = vadd.f32 %v11372_v57, %v8102_v5  ;;  %v12862_v43 = vpop.f32.mrb[3].mxu0  ;;  %7950 = vmax.xlane.f32.xlu1 %v7949_v9 }
0x51d7   :  { %v8122_v29 = vpack.c.bf16 %v15541_v11, %v15539_v22 }
0x51da   :  { %v8107_v30 = vpop.f32.mrb[4].mxu0 }
0x51db   :  { %v8108_v42 = vadd.f32 %v11372_v57, %v8107_v30  ;;  %v12865_v10 = vpop.f32.mrb[5].mxu0 }
0x51dc   :  { %v8110_v20 = vpop.f32.mrb[6].mxu0 }
0x51dd   :  { %v8111_v27 = vadd.f32 %v11372_v57, %v8110_v20  ;;  %v12866_v12 = vpop.f32.mrb[7].mxu0 }
0x51df   :  { %v15545_v33 = vpack.c.bf16 %v8111_v27, %v8108_v42 }
0x51e2   :  { %v8115_v63 = vpop.f32.mrb[8].mxu0 }
0x51e3   :  { %v15547_v59 = vadd.f32 %v11372_v57, %v8115_v63  ;;  %v12869_v16 = vpop.f32.mrb[9].mxu0 }
0x51e4   :  { %v8118_v21 = vpop.f32.mrb[10].mxu0 }
0x51e5   :  { %v15549_v24 = vadd.f32 %v11372_v57, %v8118_v21  ;;  %v12870_v23 = vpop.f32.mrb[11].mxu0 }
0x51e7   :  { %v8124_v6 = vpack.c.bf16 %v15549_v24, %v15547_v59 }
0x51ea   :  { %v8263_v3 = vpop.f32.mrb[12].mxu0 }
0x51eb   :  { %v8264_v31 = vadd.f32 %v11392_v47, %v8263_v3  ;;  %v12893_v8 = vpop.f32.mrb[13].mxu0 }
0x51ec   :  { %v8266_v38 = vpop.f32.mrb[14].mxu0 }
0x51ed   :  { %v8267_v25 = vadd.f32 %v11392_v47, %v8266_v38  ;;  %v12894_v34 = vpop.f32.mrb[15].mxu0 }
0x51ef   :  { %v15556_v2 = vpack.c.bf16 %v8267_v25, %v8264_v31 }
0x51f2   :  { %v8271_v41 = vpop.f32.mrb[16].mxu0 }
0x51f3   :  { %v12897_v50 = vpop.f32.mrb[17].mxu0  ;;  %v8272_v18 = vadd.f32 %v11392_v47, %v8271_v41 }
0x51f4   :  { %v8274_v51 = vpop.f32.mrb[18].mxu0 }
0x51f5   :  { %v8275_v37 = vadd.f32 %v11392_v47, %v8274_v51  ;;  %v12898_v54 = vpop.f32.mrb[19].mxu0 }
0x51f7   :  { %v15558_v53 = vpack.c.bf16 %v8275_v37, %v8272_v18 }
0x51f9   :  { %v8678_v61 = vrot.slane %v15558_v53, 4 }
0x51fa   :  { %v8279_v44 = vpop.f32.mrb[20].mxu0 }
0x51fb   :  { %v12901_v52 = vpop.f32.mrb[21].mxu0  ;;  %v8280_v35 = vadd.f32 %v11392_v47, %v8279_v44 }
0x51fc   :  { %v8282_v4 = vpop.f32.mrb[22].mxu0 }
0x51fd   :  { %v8283_v55 = vadd.f32 %v11392_v47, %v8282_v4  ;;  %v12902_v56 = vpop.f32.mrb[23].mxu0 }
0x51ff   :  { %v8288_v19 = vpack.c.bf16 %v8283_v55, %v8280_v35 }
0x5201   :  { %v15560_v28 = vrot.slane %v8288_v19, 4 }
0x5203   :  { %v15565_v57 = vsel %vm438_vm8, %v8678_v61, %v15560_v28  ;;  %v8689_v22 = vsel %vm438_vm8, %v15560_v28, 0 }
0x5204   :  { %12939 = vmatprep.subr.bf16.mxu0 %v15565_v57 }
0x524b   :  { %v7770_v15 = vpop.xlane.xlu0 %7769 }
0x524c   :  { %v7777_v40 = vsub.f32 %v15502_v60, %v7770_v15 }
0x524d   :  { %v7773_v17 = vpop.xlane.xlu1 %7772 }
0x524e   :  { %v7780_v5 = vmul.f32 1.442695, %v7777_v40  ;;  %v7778_v9 = vsub.f32 %v15510_v58, %v7773_v17  ;;  %v7991_v40 = vsel %vm438_vm8, %v15446_v7, 0 }
0x524f   :  { %v7776_v43 = vpop.xlane.xlu0 %7775 }
0x5250   :  { %13545 = vpow2.f32 %v7780_v5  ;;  %v7782_v30 = vmul.f32 1.442695, %v7778_v9  ;;  %v7779_v42 = vsub.f32 %v15505_v45, %v7776_v43 }
0x5252   :  { %13547 = vpow2.f32 %v7782_v30  ;;  %v7784_v10 = vmul.f32 1.442695, %v7779_v42 }
0x5254   :  { %13549 = vpow2.f32 %v7784_v10  ;;  %v13331_v10 = vld [vmem:[%s16304_s4 + $0x290] sm:$0xff]  }
0x525a   :  { %v13546_v20 = vpop.eup %13545 }
0x525b   :  { %v7786_v27 = vsel %vm7767_vm10, %v13546_v20, 0.0 }
0x525c   :  { %v13548_v12 = vpop.eup %13547  ;;  %7787 = vadd.xlane.f32.xlu0 %v7786_v27 }
0x525d   :  { %v7789_v63 = vsel %vm7767_vm10, %v13548_v12, 0.0 }
0x525e   :  { %v13550_v60 = vpop.eup %13549  ;;  %7790 = vadd.xlane.f32.xlu1 %v7789_v63  ;;  %v7945_v16 = vpop.xlane.xlu1 %7944 }
0x525f   :  { %v7952_v58 = vsub.f32 %v15522_v26, %v7945_v16  ;;  %v7792_v21 = vsel %vm7767_vm10, %v13550_v60, 0.0 }
0x5260   :  { %7793 = vadd.xlane.f32.xlu0 %v7792_v21  ;;  %v7948_v23 = vpop.xlane.xlu0 %7947 }
0x5261   :  { %v7955_v45 = vmul.f32 1.442695, %v7952_v58  ;;  %v7953_v47 = vsub.f32 %v15528_v46, %v7948_v23 }
0x5262   :  { %v7951_v3 = vpop.xlane.xlu1 %7950 }
0x5263   :  { %13551 = vpow2.f32 %v7955_v45  ;;  %v7957_v31 = vmul.f32 1.442695, %v7953_v47  ;;  %v7954_v8 = vsub.f32 %v15525_v62, %v7951_v3 }
0x5265   :  { %13553 = vpow2.f32 %v7957_v31  ;;  %v7959_v38 = vmul.f32 1.442695, %v7954_v8 }
0x5267   :  { %13555 = vpow2.f32 %v7959_v38 }
0x526d   :  { %v13552_v25 = vpop.eup %13551 }
0x526e   :  { %v7961_v34 = vsel %vm7767_vm10, %v13552_v25, 0.0 }
0x526f   :  { %v13554_v41 = vpop.eup %13553  ;;  %7962 = vadd.xlane.f32.xlu1 %v7961_v34 }
0x5270   :  { %v7964_v26 = vsel %vm7767_vm10, %v13554_v41, 0.0 }
0x5271   :  { %v13556_v50 = vpop.eup %13555  ;;  %7965 = vadd.xlane.f32.xlu0 %v7964_v26 }
0x5272   :  { %v7967_v51 = vsel %vm7767_vm10, %v13556_v50, 0.0 }
0x5273   :  { %7968 = vadd.xlane.f32.xlu1 %v7967_v51 }
0x52e9   :  { %v7788_v46 = vpop.xlane.xlu0 %7787 }
0x52ea   :  { %13557 = vrcp.f32 %v7788_v46 }
0x52eb   :  { %v7791_v18 = vpop.xlane.xlu1 %7790 }
0x52ec   :  { %13559 = vrcp.f32 %v7791_v18 }
0x52ed   :  { %v7794_v62 = vpop.xlane.xlu0 %7793 }
0x52ee   :  { %13561 = vrcp.f32 %v7794_v62 }
0x52f4   :  { %v13558_v37 = vpop.eup %13557 }
0x52f5   :  { %v7798_v44 = vmul.f32 %v13558_v37, %v13546_v20 }
0x52f6   :  { %v13560_v54 = vpop.eup %13559 }
0x52f7   :  { %v7799_v52 = vmul.f32 %v13560_v54, %v13548_v12 }
0x52f8   :  { %v13562_v4 = vpop.eup %13561 }
0x52f9   :  { %v7800_v35 = vmul.f32 %v13562_v4, %v13550_v60  ;;  %v7801_v55 = vpack.c.bf16 %v7799_v52, %v7798_v44 }
0x52fb   :  { %12835 = vmatprep.mubr.msk.bf16.mxu1 %vm7767_vm10, %v7801_v55  ;;  %v7802_v56 = vpack.c.bf16 %v7800_v35, %v7800_v35 }
0x52fc   :  { %v7963_v19 = vpop.xlane.xlu1 %7962 }
0x52fd   :  { %13563 = vrcp.f32 %v7963_v19  ;;  %12836 = vmatmul.mubr.msk.bf16.vlgmr.msra.gmra.mrb[252].mxu1 %vm7767_vm10, %v7802_v56  ;;  %v8399_v19 = vsel %vm438_vm8, %v15558_v53, 0 }
0x52fe   :  { %12848 = vmatpush3.bf16.msra.mxu1 %v15454_v13  ;;  %v7966_v61 = vpop.xlane.xlu0 %7965 }
0x52ff   :  { %13565 = vrcp.f32 %v7966_v61  ;;  %13200 = vmatprep.subr.msk.bf16.mxu1 %vm438_vm8, %v15446_v7  ;;  %v13332_v7 = vld [vmem:[%s16304_s4 + $0x298] sm:$0xff]  }
0x5300   :  { %v7969_v15 = vpop.xlane.xlu1 %7968 }
0x5301   :  { %13567 = vrcp.f32 %v7969_v15 }
0x5302   :  { %12850 = vmatpush3.bf16.msra.mxu1 %v7991_v40 }
0x5303   :  { %12871 = vmatprep.subr.bf16.mxu1 %v13704_v0 }
0x5307   :  { %v13564_v17 = vpop.eup %13563 }
0x5308   :  { %v7973_v9 = vmul.f32 %v13564_v17, %v13552_v25 }
0x5309   :  { %v13566_v5 = vpop.eup %13565 }
0x530a   :  { %v7974_v43 = vmul.f32 %v13566_v5, %v13554_v41 }
0x530b   :  { %v13568_v30 = vpop.eup %13567 }
0x530c   :  { %v7975_v42 = vmul.f32 %v13568_v30, %v13556_v50  ;;  %v7976_v13 = vpack.c.bf16 %v7974_v43, %v7973_v9 }
0x530e   :  { %v7977_v20 = vpack.c.bf16 %v7975_v42, %v7975_v42  ;;  %12851 = vmatprep.mubr.msk.bf16.mxu1 %vm7767_vm10, %v7976_v13 }
0x5310   :  { %12852 = vmatmul.mubr.msk.bf16.vlgmr.msra.gmra.mrb[0].mxu1 %vm7767_vm10, %v7977_v20 }
0x5311   :  { %12872 = vmatpush3.bf16.msra.mxu1 %v13331_v10  ;;  %12875 = vmatprep.mubr.msk.bf16.mxu1 %vm13705_vm0, %v13704_v0 }
0x5312   :  { %12873 = vmatprep.subr.bf16.mxu1 %v13704_v0 }
0x5315   :  { %12874 = vmatpush3.bf16.msra.mxu1 %v13332_v7 }
0x5318   :  { %12876 = vmatmul.mubr.msk.bf16.vlgmr.msra.gmra.mrb[4].mxu1 %vm116_vm2, %v15364_v48 }
0x5319   :  { %12879 = vmatprep.mubr.msk.bf16.mxu1 %vm13705_vm0, %v13704_v0 }
0x5320   :  { %12880 = vmatmul.mubr.msk.bf16.gmra.mrb[8].mxu1 %vm116_vm2, %v15383_v14 }
0x5321   :  { %12883 = vmatprep.mubr.msk.bf16.mxu1 %vm13705_vm0, %v13704_v0 }
0x5328   :  { %12884 = vmatmul.mubr.msk.bf16.gmra.mrb[12].mxu1 %vm116_vm2, %v15393_v1 }
0x5329   :  { %12907 = vmatprep.mubr.msk.bf16.mxu1 %vm370_vm7, %v8122_v29 }
0x53d0   :  { %v12837_v27 = vpop.f32.mrb[252].mxu1 }
0x53d1   :  { %v7846_v12 = vpop.f32.mrb[253].mxu1  ;;  %v7861_v58 = vpack.c.bf16 %v12837_v27, %v12837_v27 }
0x53d2   :  { %v12838_v63 = vpop.f32.mrb[254].mxu1 }
0x53d3   :  { %v7849_v60 = vpop.f32.mrb[255].mxu1 }
0x53d4   :  { %v7860_v16 = vpack.c.bf16 %v7849_v60, %v7846_v12 }
0x53d6   :  { %12927 = vmatprep.mubr.msk.bf16.mxu0 %vm370_vm7, %v7860_v16 }
0x53d7   :  { %12928 = vmatmul.mubr.msk.bf16.vlgmr.msra.gmra.mrb[24].mxu0 %vm370_vm7, %v7861_v58 }
0x53d8   :  { %12940 = vmatpush3.bf16.msra.mxu0 %v15565_v57  ;;  %v11382_v57 = vld [vmem:[%s16305_s10 + $0x29] ss:$0 sm:$0xff] }
0x53d9   :  { %13208 = vmatprep.subr.msk.bf16.mxu0 %vm438_vm8, %v15560_v28 }
0x53dc   :  { %12942 = vmatpush3.bf16.msra.mxu0 %v8689_v22 }
0x53e3   :  { %v15620_v11 = vpop.f32.mrb[0].mxu1 }
0x53e4   :  { %v15622_v29 = vpop.f32.mrb[1].mxu1  ;;  %v8042_v24 = vpack.c.bf16 %v15620_v11, %v15620_v11 }
0x53e5   :  { %v12854_v21 = vpop.f32.mrb[2].mxu1 }
0x53e6   :  { %v15624_v23 = vpop.f32.mrb[3].mxu1 }
0x53e7   :  { %v8041_v45 = vpack.c.bf16 %v15624_v23, %v15622_v29 }
0x53eb   :  { %v8181_v47 = vpop.f32.mrb[4].mxu1 }
0x53ec   :  { %v12877_v3 = vpop.f32.mrb[5].mxu1  ;;  %v8182_v8 = vadd.f32 %v11382_v57, %v8181_v47 }
0x53ed   :  { %v8184_v31 = vpop.f32.mrb[6].mxu1 }
0x53ee   :  { %v8185_v28 = vadd.f32 %v11382_v57, %v8184_v31  ;;  %v12878_v38 = vpop.f32.mrb[7].mxu1 }
0x53f0   :  { %v8204_v25 = vpack.c.bf16 %v8185_v28, %v8182_v8 }
0x53f2   :  { %13201 = vmatprep.subr.msk.bf16.mxu1 %vm370_vm7, %v8204_v25  ;;  %v8298_v34 = vsel %vm370_vm7, %v8204_v25, 0 }
0x53f3   :  { %v8189_v41 = vpop.f32.mrb[8].mxu1  ;;  %12904 = vmatpush3.bf16.xpose.msra.mxu1 %v8298_v34 }
0x53f4   :  { %v12881_v26 = vpop.f32.mrb[9].mxu1  ;;  %v8190_v51 = vadd.f32 %v11382_v57, %v8189_v41  ;;  %v11398_v41 = vld [vmem:[%s16307_s5 + $0x34] sm:$0xf] }
0x53f5   :  { %v8192_v50 = vpop.f32.mrb[10].mxu1  ;;  %13209 = vmatprep.subr.msk.bf16.mxu0 %vm438_vm8, %v11398_v41 }
0x53f6   :  { %v8193_v46 = vadd.f32 %v11382_v57, %v8192_v50  ;;  %v12882_v18 = vpop.f32.mrb[11].mxu1 }
0x53f8   :  { %v15633_v62 = vpack.c.bf16 %v8193_v46, %v8190_v51 }
0x53fa   :  { %13202 = vmatprep.subr.msk.bf16.mxu1 %vm370_vm7, %v15633_v62  ;;  %v8301_v37 = vsel %vm370_vm7, %v15633_v62, 0 }
0x53fb   :  { %v8197_v54 = vpop.f32.mrb[12].mxu1  ;;  %12906 = vmatpush3.bf16.xpose.msra.mxu1 %v8301_v37 }
0x53fc   :  { %v15639_v44 = vadd.f32 %v11382_v57, %v8197_v54  ;;  %v12885_v52 = vpop.f32.mrb[13].mxu1  ;;  %12911 = vmatprep.subr.bf16.mxu1 %v15556_v2 }
0x53fd   :  { %v8200_v4 = vpop.f32.mrb[14].mxu1 }
0x53fe   :  { %v15642_v35 = vadd.f32 %v11382_v57, %v8200_v4  ;;  %v12886_v55 = vpop.f32.mrb[15].mxu1 }
0x5400   :  { %v8206_v56 = vpack.c.bf16 %v15642_v35, %v15639_v44  ;;  %v8568_v35 = vrot.slane %v8124_v6, 4 }
0x5402   :  { %12908 = vmatmul.mubr.msk.bf16.vlgmr.msra.gmra.mrb[16].mxu1 %vm370_vm7, %v15545_v33 }
0x5403   :  { %12912 = vmatpush3.bf16.msra.mxu1 %v15556_v2 }
0x5404   :  { %13203 = vmatprep.subr.msk.bf16.mxu1 %vm438_vm8, %v15558_v53 }
0x5407   :  { %12914 = vmatpush3.bf16.msra.mxu1 %v8399_v19  ;;  %v8573_v19 = vrot.slane %v8206_v56, 4 }
0x5408   :  { %13204 = vmatprep.subr.msk.bf16.mxu1 %vm438_vm8, %v11398_v41 }
0x5409   :  { %v8585_v59 = vsel %vm370_vm7, %v8573_v19, 0 }
0x54aa   :  { %v15653_v61 = vpop.f32.mrb[24].mxu0 }
0x54ab   :  { %v15655_v15 = vpop.f32.mrb[25].mxu0 }
0x54ac   :  { %v12930_v40 = vpop.f32.mrb[26].mxu0 }
0x54ad   :  { %v15657_v17 = vpop.f32.mrb[27].mxu0 }
0x54d5   :  { %v12909_v5 = vpop.f32.mrb[16].mxu1 }
0x54d6   :  { %v8337_v9 = vpop.f32.mrb[17].mxu1  ;;  %v8353_v43 = vmul.f32 0.35355338, %v12909_v5  ;;  %v15678_v5 = vsel %vm438_vm8, %v11398_v41, 0 }
0x54d7   :  { %v8351_v30 = vmul.f32 0.35355338, %v8337_v9  ;;  %v12910_v42 = vpop.f32.mrb[18].mxu1  ;;  %v8572_v9 = vrot.slane %v15633_v62, 4 }
0x54d8   :  { %v8340_v2 = vpop.f32.mrb[19].mxu1  ;;  %v8356_v20 = vadd.f32 %v8353_v43, %v15499_v39 }
0x54d9   :  { %v8354_v13 = vadd.f32 %v8351_v30, %v15499_v39  ;;  %v8352_v10 = vmul.f32 0.35355338, %v8340_v2  ;;  %v8574_v43 = vsel %vm438_vm8, %v8572_v9, %v8573_v19 }
0x54da   :  { %v8363_v12 = vsel %vm7767_vm10, %v8356_v20, -inf }
0x54db   :  { %v8355_v53 = vadd.f32 %v8352_v10, %v15499_v39  ;;  %v8357_v7 = vsel %vm7767_vm10, %v8354_v13, -inf  ;;  %v8582_v10 = vsel %vm370_vm7, %v8574_v43, 0 }
0x54dc   :  { %8358 = vmax.xlane.f32.xlu0 %v8357_v7 }
0x54dd   :  { %v8360_v27 = vsel %vm7767_vm10, %v8355_v53, -inf }
0x54de   :  { %8361 = vmax.xlane.f32.xlu1 %v8360_v27 }
0x54e0   :  { %8364 = vmax.xlane.f32.xlu0 %v8363_v12 }
0x5569   :  { %v8359_v63 = vpop.xlane.xlu0 %8358 }
0x556a   :  { %v8366_v60 = vsub.f32 %v8354_v13, %v8359_v63  ;;  %v8567_v13 = vrot.slane %v15545_v33, 4  ;;  %v13333_v33 = vld [vmem:[%s16304_s4 + $0x2a0] sm:$0xff]  }
0x556b   :  { %v8362_v16 = vpop.xlane.xlu1 %8361 }
0x556c   :  { %v8369_v58 = vmul.f32 1.442695, %v8366_v60  ;;  %v8367_v22 = vsub.f32 %v8355_v53, %v8362_v16 }
0x556d   :  { %v8365_v21 = vpop.xlane.xlu0 %8364 }
0x556e   :  { %13569 = vpow2.f32 %v8369_v58  ;;  %v8371_v57 = vmul.f32 1.442695, %v8367_v22  ;;  %v8368_v47 = vsub.f32 %v8356_v20, %v8365_v21  ;;  %v8569_v20 = vsel %vm438_vm8, %v8567_v13, %v8568_v35 }
0x5570   :  { %13571 = vpow2.f32 %v8371_v57  ;;  %v8373_v3 = vmul.f32 1.442695, %v8368_v47 }
0x5572   :  { %13573 = vpow2.f32 %v8373_v3 }
0x5578   :  { %v13570_v31 = vpop.eup %13569 }
0x5579   :  { %v8375_v8 = vsel %vm7767_vm10, %v13570_v31, 0.0 }
0x557a   :  { %v13572_v28 = vpop.eup %13571  ;;  %8376 = vadd.xlane.f32.xlu1 %v8375_v8 }
0x557b   :  { %v8378_v38 = vsel %vm7767_vm10, %v13572_v28, 0.0 }
0x557c   :  { %v13574_v25 = vpop.eup %13573  ;;  %8379 = vadd.xlane.f32.xlu0 %v8378_v38 }
0x557d   :  { %v8381_v34 = vsel %vm7767_vm10, %v13574_v25, 0.0 }
0x557e   :  { %8382 = vadd.xlane.f32.xlu1 %v8381_v34 }
0x5607   :  { %v8377_v26 = vpop.xlane.xlu1 %8376 }
0x5608   :  { %13575 = vrcp.f32 %v8377_v26 }
0x5609   :  { %v8380_v50 = vpop.xlane.xlu0 %8379 }
0x560a   :  { %13577 = vrcp.f32 %v8380_v50 }
0x560b   :  { %v8383_v51 = vpop.xlane.xlu1 %8382 }
0x560c   :  { %13579 = vrcp.f32 %v8383_v51 }
0x5612   :  { %v13576_v46 = vpop.eup %13575 }
0x5613   :  { %v8387_v37 = vmul.f32 %v13576_v46, %v13570_v31 }
0x5614   :  { %v13578_v18 = vpop.eup %13577 }
0x5615   :  { %v8388_v54 = vmul.f32 %v13578_v18, %v13572_v28  ;;  %v11429_v28 = vld [vmem:[%s16305_s10 + $0x2a] ss:$0 sm:$0xff] }
0x5616   :  { %v13580_v52 = vpop.eup %13579 }
0x5617   :  { %v8389_v4 = vmul.f32 %v13580_v52, %v13574_v25  ;;  %v8390_v55 = vpack.c.bf16 %v8388_v54, %v8387_v37 }
0x5619   :  { %v8391_v40 = vpack.c.bf16 %v8389_v4, %v8389_v4  ;;  %12915 = vmatprep.mubr.msk.bf16.mxu1 %vm7767_vm10, %v8390_v55 }
0x561b   :  { %12916 = vmatmul.mubr.msk.bf16.vlgmr.msra.gmra.mrb[20].mxu1 %vm7767_vm10, %v8391_v40 }
0x561c   :  { %12920 = vmatpush3.bf16.msra.mxu1 %v15678_v5 }
0x561d   :  { %13206 = vmatprep.subr.msk.bf16.mxu1 %vm370_vm7, %v8574_v43 }
0x56ee   :  { %v12917_v30 = vpop.f32.mrb[20].mxu1 }
0x56ef   :  { %v8435_v42 = vpop.f32.mrb[21].mxu1  ;;  %v8450_v62 = vpack.c.bf16 %v12917_v30, %v12917_v30 }
0x56f0   :  { %v12918_v44 = vpop.f32.mrb[22].mxu1 }
0x56f1   :  { %v8438_v56 = vpop.f32.mrb[23].mxu1 }
0x56f2   :  { %v8449_v2 = vpack.c.bf16 %v8438_v56, %v8435_v42 }
0x56f4   :  { %12921 = vmatprep.mubr.msk.bf16.mxu1 %vm370_vm7, %v8449_v2 }
0x56f5   :  { %12922 = vmatmul.mubr.msk.bf16.vlgmr.msra.gmra.mrb[24].mxu1 %vm370_vm7, %v8450_v62 }
0x56f6   :  { %12932 = vmatpush3.bf16.xpose.msra.mxu1 %v8582_v10  ;;  %12935 = vmatprep.mubr.msk.bf16.mxu1 %vm370_vm7, %v8569_v20 }
0x56f7   :  { %13207 = vmatprep.subr.msk.bf16.mxu1 %vm370_vm7, %v8573_v19 }
0x56fe   :  { %12934 = vmatpush3.bf16.xpose.msra.mxu1 %v8585_v59 }
0x56ff   :  { %13210 = vmatprep.subr.msk.bf16.mxu1 %vm438_vm8, %v15486_v32  ;;  %v13334_v32 = vld [vmem:[%s16304_s4 + $0x2a8] sm:$0xff]  }
0x5705   :  { %12936 = vmatmul.mubr.msk.bf16.vlgmr.msra.gmra.mrb[28].mxu1 %vm370_vm7, %v8568_v35 }
0x5706   :  { %12955 = vmatprep.mubr.msk.bf16.mxu1 %vm370_vm7, %v8041_v45  ;;  %12954 = vmatpush3.bf16.msra.mxu1 %v15492_v36 }
0x5707   :  { %12975 = vmatprep.subr.bf16.mxu1 %v13704_v0 }
0x570d   :  { %12956 = vmatmul.mubr.msk.bf16.vlgmr.msra.gmra.mrb[32].mxu1 %vm370_vm7, %v8042_v24 }
0x570e   :  { %12976 = vmatpush3.bf16.msra.mxu1 %v13333_v33  ;;  %12979 = vmatprep.mubr.msk.bf16.mxu1 %vm13705_vm0, %v13704_v0 }
0x570f   :  { %12977 = vmatprep.subr.bf16.mxu1 %v13704_v0 }
0x5712   :  { %12978 = vmatpush3.bf16.msra.mxu1 %v13334_v32 }
0x5715   :  { %12980 = vmatmul.mubr.msk.bf16.vlgmr.msra.gmra.mrb[36].mxu1 %vm116_vm2, %v15364_v48 }
0x5716   :  { %12983 = vmatprep.mubr.msk.bf16.mxu1 %vm13705_vm0, %v13704_v0 }
0x571d   :  { %12984 = vmatmul.mubr.msk.bf16.gmra.mrb[40].mxu1 %vm116_vm2, %v15383_v14 }
0x571e   :  { %12987 = vmatprep.mubr.msk.bf16.mxu1 %vm13705_vm0, %v13704_v0 }
0x5725   :  { %12988 = vmatmul.mubr.msk.bf16.gmra.mrb[44].mxu1 %vm116_vm2, %v15393_v1 }
0x57c8   :  { %v12923_v36 = vpop.f32.mrb[24].mxu1 }
0x57c9   :  { %v15728_v6 = vadd.f32 %v15653_v61, %v12923_v36  ;;  %v8494_v11 = vpop.f32.mrb[25].mxu1 }
0x57ca   :  { %v15731_v29 = vadd.f32 %v15655_v15, %v8494_v11  ;;  %v12924_v23 = vpop.f32.mrb[26].mxu1 }
0x57cb   :  { %v8497_v45 = vpop.f32.mrb[27].mxu1 }
0x57cc   :  { %v15734_v53 = vadd.f32 %v15657_v17, %v8497_v45 }
0x57d8   :  { %v12937_v7 = vpop.f32.mrb[28].mxu1 }
0x57d9   :  { %v8621_v27 = vpop.f32.mrb[29].mxu1  ;;  %v8637_v12 = vmul.f32 0.35355338, %v12937_v7 }
0x57da   :  { %v8635_v63 = vmul.f32 0.35355338, %v8621_v27  ;;  %v12938_v60 = vpop.f32.mrb[30].mxu1 }
0x57db   :  { %v8624_v16 = vpop.f32.mrb[31].mxu1  ;;  %v8640_v61 = vadd.f32 %v8637_v12, %v15519_v49 }
0x57dc   :  { %v8638_v58 = vadd.f32 %v8635_v63, %v15519_v49  ;;  %v8636_v22 = vmul.f32 0.35355338, %v8624_v16 }
0x57dd   :  { %v8647_v31 = vsel %vm7767_vm10, %v8640_v61, -inf }
0x57de   :  { %v8639_v21 = vadd.f32 %v8636_v22, %v15519_v49  ;;  %v8641_v15 = vsel %vm7767_vm10, %v8638_v58, -inf }
0x57df   :  { %8642 = vmax.xlane.f32.xlu0 %v8641_v15 }
0x57e0   :  { %v15740_v57 = vpop.f32.mrb[32].mxu1  ;;  %v8644_v17 = vsel %vm7767_vm10, %v8639_v21, -inf }
0x57e1   :  { %8645 = vmax.xlane.f32.xlu1 %v8644_v17  ;;  %v15743_v47 = vpop.f32.mrb[33].mxu1 }
0x57e2   :  { %v12958_v3 = vpop.f32.mrb[34].mxu1 }
0x57e3   :  { %8648 = vmax.xlane.f32.xlu0 %v8647_v31  ;;  %v15746_v8 = vpop.f32.mrb[35].mxu1 }
0x57e8   :  { %v8987_v38 = vpop.f32.mrb[36].mxu1 }
0x57e9   :  { %v12981_v25 = vpop.f32.mrb[37].mxu1  ;;  %v8988_v41 = vadd.f32 %v11429_v28, %v8987_v38 }
0x57ea   :  { %v8990_v34 = vpop.f32.mrb[38].mxu1 }
0x57eb   :  { %v8991_v26 = vadd.f32 %v11429_v28, %v8990_v34  ;;  %v12982_v50 = vpop.f32.mrb[39].mxu1 }
0x57ed   :  { %v9010_v51 = vpack.c.bf16 %v8991_v26, %v8988_v41 }
0x57ef   :  { %13211 = vmatprep.subr.msk.bf16.mxu1 %vm370_vm7, %v9010_v51  ;;  %v9104_v46 = vsel %vm370_vm7, %v9010_v51, 0  ;;  %v13335_v51 = vld [vmem:[%s16304_s4 + $0x260] sm:$0xff]  }
0x57f0   :  { %v8995_v18 = vpop.f32.mrb[40].mxu1  ;;  %13008 = vmatpush3.bf16.xpose.msra.mxu1 %v9104_v46 }
0x57f1   :  { %v12985_v37 = vpop.f32.mrb[41].mxu1  ;;  %v8996_v52 = vadd.f32 %v11429_v28, %v8995_v18  ;;  %v13337_v18 = vld [vmem:[%s16304_s4 + $0x2e0] sm:$0xff]  }
0x57f2   :  { %v8998_v54 = vpop.f32.mrb[42].mxu1  ;;  %v13338_v37 = vld [vmem:[%s16304_s4 + $0x2e8] sm:$0xff]  }
0x57f3   :  { %v8999_v4 = vadd.f32 %v11429_v28, %v8998_v54  ;;  %v12986_v55 = vpop.f32.mrb[43].mxu1 }
0x57f5   :  { %v9011_v19 = vpack.c.bf16 %v8999_v4, %v8996_v52 }
0x57f7   :  { %13212 = vmatprep.subr.msk.bf16.mxu1 %vm370_vm7, %v9011_v19  ;;  %v9107_v40 = vsel %vm370_vm7, %v9011_v19, 0  ;;  %v9324_v2 = vrot.slane %v9011_v19, 4 }
0x57f8   :  { %v9003_v9 = vpop.f32.mrb[44].mxu1  ;;  %13010 = vmatpush3.bf16.xpose.msra.mxu1 %v9107_v40 }
0x57f9   :  { %v9004_v43 = vadd.f32 %v11429_v28, %v9003_v9  ;;  %v12989_v30 = vpop.f32.mrb[45].mxu1 }
0x57fa   :  { %v9006_v42 = vpop.f32.mrb[46].mxu1 }
0x57fb   :  { %v9007_v44 = vadd.f32 %v11429_v28, %v9006_v42  ;;  %v12990_v35 = vpop.f32.mrb[47].mxu1  ;;  %v11419_v42 = vld [vmem:[%s16305_s10 + $0x26] ss:$0 sm:$0xff] }
0x57fd   :  { %v9012_v56 = vpack.c.bf16 %v9007_v44, %v9004_v43 }
0x57ff   :  { %v15755_v13 = vrot.slane %v9012_v56, 4 }
0x5801   :  { %v15759_v62 = vsel %vm438_vm8, %v9324_v2, %v15755_v13  ;;  %v9337_v52 = vsel %vm370_vm7, %v15755_v13, 0 }
0x5802   :  { %v9334_v54 = vsel %vm370_vm7, %v15759_v62, 0 }
0x586c   :  { %v8643_v10 = vpop.xlane.xlu0 %8642 }
0x586d   :  { %v8650_v20 = vsub.f32 %v8638_v58, %v8643_v10 }
0x586e   :  { %v8646_v59 = vpop.xlane.xlu1 %8645 }
0x586f   :  { %v8653_v33 = vmul.f32 1.442695, %v8650_v20  ;;  %v8651_v24 = vsub.f32 %v8639_v21, %v8646_v59 }
0x5870   :  { %v8649_v32 = vpop.xlane.xlu0 %8648 }
0x5871   :  { %13581 = vpow2.f32 %v8653_v33  ;;  %v8655_v36 = vmul.f32 1.442695, %v8651_v24  ;;  %v8652_v11 = vsub.f32 %v8640_v61, %v8649_v32 }
0x5873   :  { %13583 = vpow2.f32 %v8655_v36  ;;  %v8657_v23 = vmul.f32 1.442695, %v8652_v11 }
0x5875   :  { %13585 = vpow2.f32 %v8657_v23 }
0x587b   :  { %v13582_v45 = vpop.eup %13581 }
0x587c   :  { %v8659_v7 = vsel %vm7767_vm10, %v13582_v45, 0.0 }
0x587d   :  { %v13584_v27 = vpop.eup %13583  ;;  %8660 = vadd.xlane.f32.xlu1 %v8659_v7 }
0x587e   :  { %v8662_v12 = vsel %vm7767_vm10, %v13584_v27, 0.0 }
0x587f   :  { %v13586_v63 = vpop.eup %13585  ;;  %8663 = vadd.xlane.f32.xlu0 %v8662_v12 }
0x5880   :  { %v8665_v60 = vsel %vm7767_vm10, %v13586_v63, 0.0 }
0x5881   :  { %8666 = vadd.xlane.f32.xlu1 %v8665_v60  ;;  %v11439_v60 = vld [vmem:[%s16305_s10 + $0x2e] ss:$0 sm:$0xff] }
0x590a   :  { %v8661_v16 = vpop.xlane.xlu1 %8660 }
0x590b   :  { %13587 = vrcp.f32 %v8661_v16 }
0x590c   :  { %v8664_v58 = vpop.xlane.xlu0 %8663 }
0x590d   :  { %13589 = vrcp.f32 %v8664_v58 }
0x590e   :  { %v8667_v22 = vpop.xlane.xlu1 %8666 }
0x590f   :  { %13591 = vrcp.f32 %v8667_v22 }
0x5915   :  { %v13588_v61 = vpop.eup %13587 }
0x5916   :  { %v8671_v15 = vmul.f32 %v13588_v61, %v13582_v45 }
0x5917   :  { %v13590_v21 = vpop.eup %13589 }
0x5918   :  { %v8672_v17 = vmul.f32 %v13590_v21, %v13584_v27 }
0x5919   :  { %v13592_v3 = vpop.eup %13591 }
0x591a   :  { %v8673_v31 = vmul.f32 %v13592_v3, %v13586_v63  ;;  %v8674_v28 = vpack.c.bf16 %v8672_v17, %v8671_v15 }
0x591c   :  { %v8675_v38 = vpack.c.bf16 %v8673_v31, %v8673_v31  ;;  %12943 = vmatprep.mubr.msk.bf16.mxu0 %vm7767_vm10, %v8674_v28 }
0x591e   :  { %12944 = vmatmul.mubr.msk.bf16.vlgmr.msra.gmra.mrb[28].mxu0 %vm7767_vm10, %v8675_v38 }
0x591f   :  { %12948 = vmatpush3.bf16.msra.mxu0 %v15678_v5  ;;  %v13336_v5 = vld [vmem:[%s16304_s4 + $0x268] sm:$0xff]  }
0x5920   :  { %12959 = vmatprep.subr.bf16.mxu0 %v13704_v0 }
0x59f1   :  { %v12945_v25 = vpop.f32.mrb[28].mxu0 }
0x59f2   :  { %v8725_v34 = vpop.f32.mrb[29].mxu0  ;;  %v8740_v46 = vpack.c.bf16 %v12945_v25, %v12945_v25 }
0x59f3   :  { %v12946_v41 = vpop.f32.mrb[30].mxu0 }
0x59f4   :  { %v8728_v26 = vpop.f32.mrb[31].mxu0 }
0x59f5   :  { %v8739_v50 = vpack.c.bf16 %v8728_v26, %v8725_v34 }
0x59f7   :  { %12949 = vmatprep.mubr.msk.bf16.mxu0 %vm370_vm7, %v8739_v50 }
0x59f8   :  { %12950 = vmatmul.mubr.msk.bf16.vlgmr.msra.gmra.mrb[32].mxu0 %vm370_vm7, %v8740_v46 }
0x59f9   :  { %12960 = vmatpush3.bf16.msra.mxu0 %v13335_v51  ;;  %12963 = vmatprep.mubr.msk.bf16.mxu0 %vm13705_vm0, %v13704_v0 }
0x59fa   :  { %12961 = vmatprep.subr.bf16.mxu0 %v13704_v0 }
0x59fd   :  { %12962 = vmatpush3.bf16.msra.mxu0 %v13336_v5 }
0x59fe   :  { %12991 = vmatprep.subr.bf16.mxu0 %v13704_v0 }
0x5a00   :  { %12964 = vmatmul.mubr.msk.bf16.vlgmr.msra.gmra.mrb[36].mxu0 %vm116_vm2, %v15364_v48 }
0x5a01   :  { %12992 = vmatpush3.bf16.msra.mxu0 %v13337_v18  ;;  %12967 = vmatprep.mubr.msk.bf16.mxu0 %vm13705_vm0, %v13704_v0 }
0x5a02   :  { %12993 = vmatprep.subr.bf16.mxu0 %v13704_v0 }
0x5a05   :  { %12994 = vmatpush3.bf16.msra.mxu0 %v13338_v37 }
0x5a06   :  { %13215 = vmatprep.subr.msk.bf16.mxu0 %vm370_vm7, %v15759_v62 }
0x5a08   :  { %12968 = vmatmul.mubr.msk.bf16.gmra.mrb[40].mxu0 %vm116_vm2, %v15383_v14 }
0x5a09   :  { %12971 = vmatprep.mubr.msk.bf16.mxu0 %vm13705_vm0, %v13704_v0 }
0x5a10   :  { %12972 = vmatmul.mubr.msk.bf16.gmra.mrb[44].mxu0 %vm116_vm2, %v15393_v1 }
0x5a11   :  { %12995 = vmatprep.mubr.msk.bf16.mxu0 %vm13705_vm0, %v13704_v0 }
0x5a18   :  { %12996 = vmatmul.mubr.msk.bf16.vlgmr.msra.gmra.mrb[48].mxu0 %vm116_vm2, %v15364_v48 }
0x5a19   :  { %13030 = vmatpush3.bf16.xpose.msra.mxu0 %v9334_v54  ;;  %12999 = vmatprep.mubr.msk.bf16.mxu0 %vm13705_vm0, %v13704_v0 }
0x5a1a   :  { %13216 = vmatprep.subr.msk.bf16.mxu0 %vm370_vm7, %v15755_v13 }
0x5a20   :  { %13000 = vmatmul.mubr.msk.bf16.gmra.mrb[52].mxu0 %vm116_vm2, %v15383_v14 }
0x5a21   :  { %13032 = vmatpush3.bf16.xpose.msra.mxu0 %v9337_v52  ;;  %13003 = vmatprep.mubr.msk.bf16.mxu0 %vm13705_vm0, %v13704_v0 }
0x5a28   :  { %13004 = vmatmul.mubr.msk.bf16.gmra.mrb[56].mxu0 %vm116_vm2, %v15393_v1 }
0x5acb   :  { %v12951_v4 = vpop.f32.mrb[32].mxu0 }
0x5acc   :  { %v15818_v55 = vadd.f32 %v15740_v57, %v12951_v4  ;;  %v8781_v19 = vpop.f32.mrb[33].mxu0 }
0x5acd   :  { %v15821_v40 = vadd.f32 %v15743_v47, %v8781_v19  ;;  %v12952_v9 = vpop.f32.mrb[34].mxu0 }
0x5ace   :  { %v8784_v43 = vpop.f32.mrb[35].mxu0 }
0x5acf   :  { %v15824_v30 = vadd.f32 %v15746_v8, %v8784_v43 }
0x5ad3   :  { %v8905_v44 = vpop.f32.mrb[36].mxu0 }
0x5ad4   :  { %v12965_v35 = vpop.f32.mrb[37].mxu0  ;;  %v8906_v2 = vadd.f32 %v11419_v42, %v8905_v44 }
0x5ad5   :  { %v8908_v56 = vpop.f32.mrb[38].mxu0 }
0x5ad6   :  { %v8909_v13 = vadd.f32 %v11419_v42, %v8908_v56  ;;  %v12966_v57 = vpop.f32.mrb[39].mxu0 }
0x5ad8   :  { %v8928_v62 = vpack.c.bf16 %v8909_v13, %v8906_v2 }
0x5ada   :  { %13011 = vmatprep.mubr.msk.bf16.mxu1 %vm370_vm7, %v8928_v62 }
0x5adb   :  { %v8913_v47 = vpop.f32.mrb[40].mxu0 }
0x5adc   :  { %v12969_v10 = vpop.f32.mrb[41].mxu0  ;;  %v8914_v59 = vadd.f32 %v11419_v42, %v8913_v47 }
0x5add   :  { %v8916_v20 = vpop.f32.mrb[42].mxu0 }
0x5ade   :  { %v8917_v33 = vadd.f32 %v11419_v42, %v8916_v20  ;;  %v12970_v8 = vpop.f32.mrb[43].mxu0 }
0x5ae0   :  { %v8929_v24 = vpack.c.bf16 %v8917_v33, %v8914_v59 }
0x5ae2   :  { %13012 = vmatmul.mubr.msk.bf16.vlgmr.msra.gmra.mrb[48].mxu1 %vm370_vm7, %v8929_v24  ;;  %v9319_v12 = vrot.slane %v8929_v24, 4 }
0x5ae3   :  { %v8921_v32 = vpop.f32.mrb[44].mxu0 }
0x5ae4   :  { %v12973_v36 = vpop.f32.mrb[45].mxu0  ;;  %v8922_v23 = vadd.f32 %v11419_v42, %v8921_v32 }
0x5ae5   :  { %v8924_v11 = vpop.f32.mrb[46].mxu0 }
0x5ae6   :  { %v8925_v45 = vadd.f32 %v11419_v42, %v8924_v11  ;;  %v12974_v7 = vpop.f32.mrb[47].mxu0 }
0x5ae8   :  { %v8930_v27 = vpack.c.bf16 %v8925_v45, %v8922_v23 }
0x5aea   :  { %v9320_v63 = vrot.slane %v8930_v27, 4 }
0x5aeb   :  { %v9069_v16 = vpop.f32.mrb[48].mxu0 }
0x5aec   :  { %v12997_v58 = vpop.f32.mrb[49].mxu0  ;;  %v9321_v22 = vsel %vm438_vm8, %v9319_v12, %v9320_v63  ;;  %v9070_v21 = vadd.f32 %v11439_v60, %v9069_v16 }
0x5aed   :  { %v9072_v61 = vpop.f32.mrb[50].mxu0  ;;  %13033 = vmatprep.mubr.msk.bf16.mxu0 %vm370_vm7, %v9321_v22 }
0x5aee   :  { %v9073_v15 = vadd.f32 %v11439_v60, %v9072_v61  ;;  %v12998_v17 = vpop.f32.mrb[51].mxu0  ;;  %13034 = vmatmul.mubr.msk.bf16.vlgmr.msra.gmra.mrb[60].mxu0 %vm370_vm7, %v9320_v63 }
0x5af0   :  { %v9092_v3 = vpack.c.bf16 %v9073_v15, %v9070_v21 }
0x5af2   :  { %13015 = vmatprep.subr.bf16.mxu1 %v9092_v3 }
0x5af3   :  { %v9077_v31 = vpop.f32.mrb[52].mxu0  ;;  %13016 = vmatpush3.bf16.msra.mxu1 %v9092_v3 }
0x5af4   :  { %v13001_v28 = vpop.f32.mrb[53].mxu0  ;;  %v9078_v25 = vadd.f32 %v11439_v60, %v9077_v31 }
0x5af5   :  { %v9080_v38 = vpop.f32.mrb[54].mxu0 }
0x5af6   :  { %v9081_v34 = vadd.f32 %v11439_v60, %v9080_v38  ;;  %v13002_v41 = vpop.f32.mrb[55].mxu0 }
0x5af8   :  { %v15837_v26 = vpack.c.bf16 %v9081_v34, %v9078_v25  ;;  %v11445_v34 = vld [vmem:[%s16307_s5 + $0x38] sm:$0xf] }
0x5af9   :  { %13218 = vmatprep.subr.msk.bf16.mxu0 %vm438_vm8, %v11445_v34  ;;  %v9264_v41 = vsel %vm438_vm8, %v11445_v34, 0 }
0x5afa   :  { %13213 = vmatprep.subr.msk.bf16.mxu1 %vm438_vm8, %v15837_v26  ;;  %v9205_v50 = vsel %vm438_vm8, %v15837_v26, 0  ;;  %13046 = vmatpush3.bf16.msra.mxu0 %v9264_v41 }
0x5afb   :  { %v9085_v51 = vpop.f32.mrb[56].mxu0  ;;  %13018 = vmatpush3.bf16.msra.mxu1 %v9205_v50  ;;  %13067 = vmatprep.subr.bf16.mxu0 %v13704_v0 }
0x5afc   :  { %v15843_v46 = vadd.f32 %v11439_v60, %v9085_v51  ;;  %v13005_v5 = vpop.f32.mrb[57].mxu0  ;;  %13214 = vmatprep.subr.msk.bf16.mxu1 %vm438_vm8, %v11445_v34  ;;  %v13342_v34 = vld [vmem:[%s16304_s4 + $0x2f8] sm:$0xff]  }
0x5afd   :  { %v9088_v18 = vpop.f32.mrb[58].mxu0 }
0x5afe   :  { %v15845_v37 = vadd.f32 %v11439_v60, %v9088_v18  ;;  %v13006_v54 = vpop.f32.mrb[59].mxu0 }
0x5b00   :  { %v9094_v52 = vpack.c.bf16 %v15845_v37, %v15843_v46 }
0x5bb5   :  { %v13013_v4 = vpop.f32.mrb[48].mxu1 }
0x5bb6   :  { %v9143_v19 = vpop.f32.mrb[49].mxu1  ;;  %v9159_v9 = vmul.f32 0.35355338, %v13013_v4 }
0x5bb7   :  { %v9157_v43 = vmul.f32 0.35355338, %v9143_v19  ;;  %v13014_v42 = vpop.f32.mrb[50].mxu1 }
0x5bb8   :  { %v9146_v44 = vpop.f32.mrb[51].mxu1  ;;  %v9162_v2 = vadd.f32 %v9159_v9, %v15499_v39 }
0x5bb9   :  { %v9160_v35 = vadd.f32 %v9157_v43, %v15499_v39  ;;  %v9158_v56 = vmul.f32 0.35355338, %v9146_v44 }
0x5bba   :  { %v9169_v47 = vsel %vm7767_vm10, %v9162_v2, -inf }
0x5bbb   :  { %v9161_v13 = vadd.f32 %v9158_v56, %v15499_v39  ;;  %v9163_v57 = vsel %vm7767_vm10, %v9160_v35, -inf }
0x5bbc   :  { %9164 = vmax.xlane.f32.xlu0 %v9163_v57 }
0x5bbd   :  { %v9166_v62 = vsel %vm7767_vm10, %v9161_v13, -inf }
0x5bbe   :  { %9167 = vmax.xlane.f32.xlu1 %v9166_v62 }
0x5bc0   :  { %9170 = vmax.xlane.f32.xlu0 %v9169_v47 }
0x5bc1   :  { %v13035_v10 = vpop.f32.mrb[60].mxu0 }
0x5bc2   :  { %v9373_v20 = vpop.f32.mrb[61].mxu0  ;;  %v9389_v22 = vmul.f32 0.35355338, %v13035_v10 }
0x5bc3   :  { %v13036_v59 = vpop.f32.mrb[62].mxu0  ;;  %v9387_v12 = vmul.f32 0.35355338, %v9373_v20  ;;  %v9431_v20 = vrot.slane %v9094_v52, 4 }
0x5bc4   :  { %v9376_v33 = vpop.f32.mrb[63].mxu0  ;;  %v9392_v31 = vadd.f32 %v9389_v22, %v15519_v49 }
0x5bc5   :  { %v9388_v60 = vmul.f32 0.35355338, %v9376_v33  ;;  %v9390_v61 = vadd.f32 %v9387_v12, %v15519_v49  ;;  %v9430_v33 = vrot.slane %v15837_v26, 4 }
0x5bc6   :  { %v9399_v25 = vsel %vm7767_vm10, %v9392_v31, -inf }
0x5bc7   :  { %v9391_v17 = vadd.f32 %v9388_v60, %v15519_v49  ;;  %v9393_v28 = vsel %vm7767_vm10, %v9390_v61, -inf }
0x5bc9   :  { %v9396_v38 = vsel %vm7767_vm10, %v9391_v17, -inf }
0x5c49   :  { %v9165_v8 = vpop.xlane.xlu0 %9164 }
0x5c4a   :  { %v9172_v24 = vsub.f32 %v9160_v35, %v9165_v8 }
0x5c4b   :  { %v9168_v32 = vpop.xlane.xlu1 %9167 }
0x5c4c   :  { %v9175_v36 = vmul.f32 1.442695, %v9172_v24  ;;  %v9173_v11 = vsub.f32 %v9161_v13, %v9168_v32  ;;  %v9432_v24 = vsel %vm438_vm8, %v9430_v33, %v9431_v20 }
0x5c4d   :  { %v9171_v23 = vpop.xlane.xlu0 %9170 }
0x5c4e   :  { %13593 = vpow2.f32 %v9175_v36  ;;  %v9177_v45 = vmul.f32 1.442695, %v9173_v11  ;;  %v9174_v7 = vsub.f32 %v9162_v2, %v9171_v23 }
0x5c50   :  { %13595 = vpow2.f32 %v9177_v45  ;;  %v9179_v27 = vmul.f32 1.442695, %v9174_v7 }
0x5c52   :  { %13597 = vpow2.f32 %v9179_v27 }
0x5c58   :  { %v13594_v63 = vpop.eup %13593 }
0x5c59   :  { %v9181_v16 = vsel %vm7767_vm10, %v13594_v63, 0.0 }
0x5c5a   :  { %v13596_v58 = vpop.eup %13595  ;;  %9182 = vadd.xlane.f32.xlu1 %v9181_v16 }
0x5c5b   :  { %v9184_v21 = vsel %vm7767_vm10, %v13596_v58, 0.0 }
0x5c5c   :  { %v13598_v15 = vpop.eup %13597  ;;  %9185 = vadd.xlane.f32.xlu0 %v9184_v21 }
0x5c5d   :  { %v9187_v3 = vsel %vm7767_vm10, %v13598_v15, 0.0 }
0x5c5e   :  { %9188 = vadd.xlane.f32.xlu1 %v9187_v3  ;;  %v9441_v3 = vsel %vm438_vm8, %v9431_v20, 0 }
0x5c60   :  { %9394 = vmax.xlane.f32.xlu0 %v9393_v28 }
0x5c62   :  { %9397 = vmax.xlane.f32.xlu1 %v9396_v38  ;;  %v13340_v38 = vld [vmem:[%s16304_s4 + $0x278] sm:$0xff]  }
0x5c64   :  { %9400 = vmax.xlane.f32.xlu0 %v9399_v25  ;;  %v13341_v25 = vld [vmem:[%s16304_s4 + $0x2f0] sm:$0xff]  }
0x5ce7   :  { %v9183_v50 = vpop.xlane.xlu1 %9182 }
0x5ce8   :  { %13599 = vrcp.f32 %v9183_v50 }
0x5ce9   :  { %v9186_v51 = vpop.xlane.xlu0 %9185 }
0x5cea   :  { %13601 = vrcp.f32 %v9186_v51 }
0x5ceb   :  { %v9189_v5 = vpop.xlane.xlu1 %9188 }
0x5cec   :  { %13603 = vrcp.f32 %v9189_v5 }
0x5ced   :  { %v9395_v18 = vpop.xlane.xlu0 %9394 }
0x5cee   :  { %v9402_v54 = vsub.f32 %v9390_v61, %v9395_v18 }
0x5cef   :  { %v9398_v4 = vpop.xlane.xlu1 %9397 }
0x5cf0   :  { %v9405_v19 = vmul.f32 1.442695, %v9402_v54  ;;  %v9403_v9 = vsub.f32 %v9391_v17, %v9398_v4 }
0x5cf1   :  { %v9401_v43 = vpop.xlane.xlu0 %9400 }
0x5cf2   :  { %v13600_v42 = vpop.eup %13599  ;;  %13605 = vpow2.f32 %v9405_v19  ;;  %v9407_v44 = vmul.f32 1.442695, %v9403_v9  ;;  %v9404_v35 = vsub.f32 %v9392_v31, %v9401_v43  ;;  %v13339_v31 = vld [vmem:[%s16304_s4 + $0x270] sm:$0xff]  }
0x5cf3   :  { %v9193_v13 = vmul.f32 %v13600_v42, %v13594_v63 }
0x5cf4   :  { %v13602_v56 = vpop.eup %13601  ;;  %13607 = vpow2.f32 %v9407_v44  ;;  %v9409_v2 = vmul.f32 1.442695, %v9404_v35  ;;  %v13343_v35 = vld [vmem:[%s16304_s4 + $0x2b0] sm:$0xff]  }
0x5cf5   :  { %v9194_v57 = vmul.f32 %v13602_v56, %v13596_v58  ;;  %v13344_v56 = vld [vmem:[%s16304_s4 + $0x2b8] sm:$0xff]  }
0x5cf6   :  { %v13604_v62 = vpop.eup %13603  ;;  %13609 = vpow2.f32 %v9409_v2 }
0x5cf7   :  { %v9195_v47 = vmul.f32 %v13604_v62, %v13598_v15  ;;  %v9196_v10 = vpack.c.bf16 %v9194_v57, %v9193_v13 }
0x5cf9   :  { %v9197_v59 = vpack.c.bf16 %v9195_v47, %v9195_v47  ;;  %13019 = vmatprep.mubr.msk.bf16.mxu1 %vm7767_vm10, %v9196_v10 }
0x5cfb   :  { %13020 = vmatmul.mubr.msk.bf16.vlgmr.msra.gmra.mrb[52].mxu1 %vm7767_vm10, %v9197_v59 }
0x5cfc   :  { %v13606_v8 = vpop.eup %13605  ;;  %13024 = vmatpush3.bf16.msra.mxu1 %v9264_v41 }
0x5cfd   :  { %13037 = vmatprep.subr.bf16.mxu1 %v9432_v24  ;;  %v9411_v32 = vsel %vm7767_vm10, %v13606_v8, 0.0 }
0x5cfe   :  { %v13608_v36 = vpop.eup %13607  ;;  %9412 = vadd.xlane.f32.xlu1 %v9411_v32 }
0x5cff   :  { %v9414_v11 = vsel %vm7767_vm10, %v13608_v36, 0.0 }
0x5d00   :  { %v13610_v46 = vpop.eup %13609  ;;  %9415 = vadd.xlane.f32.xlu0 %v9414_v11 }
0x5d01   :  { %v9417_v37 = vsel %vm7767_vm10, %v13610_v46, 0.0 }
0x5d02   :  { %9418 = vadd.xlane.f32.xlu1 %v9417_v37 }
0x5d8b   :  { %v9413_v26 = vpop.xlane.xlu1 %9412 }
0x5d8d   :  { %v9416_v52 = vpop.xlane.xlu0 %9415 }
0x5d8e   :  { %13611 = vrcp.f32 %v9416_v52 }
0x5d8f   :  { %13613 = vrcp.f32 %v9413_v26  ;;  %v9419_v23 = vpop.xlane.xlu1 %9418 }
0x5d90   :  { %13615 = vrcp.f32 %v9419_v23 }
0x5d98   :  { %v13612_v45 = vpop.eup %13611 }
0x5d99   :  { %v13614_v27 = vpop.eup %13613  ;;  %v9424_v60 = vmul.f32 %v13612_v45, %v13608_v36 }
0x5d9a   :  { %v9423_v22 = vmul.f32 %v13614_v27, %v13606_v8  ;;  %v13616_v21 = vpop.eup %13615 }
0x5d9b   :  { %v9425_v17 = vmul.f32 %v13616_v21, %v13610_v46 }
0x5d9c   :  { %v9426_v15 = vpack.c.bf16 %v9424_v60, %v9423_v22 }
0x5d9d   :  { %v9427_v28 = vpack.c.bf16 %v9425_v17, %v9425_v17 }
0x5dce   :  { %v13021_v7 = vpop.f32.mrb[52].mxu1 }
0x5dcf   :  { %v9241_v12 = vpop.f32.mrb[53].mxu1  ;;  %v9256_v61 = vpack.c.bf16 %v13021_v7, %v13021_v7 }
0x5dd0   :  { %v13022_v63 = vpop.f32.mrb[54].mxu1 }
0x5dd1   :  { %v9244_v16 = vpop.f32.mrb[55].mxu1 }
0x5dd2   :  { %v9255_v58 = vpack.c.bf16 %v9244_v16, %v9241_v12 }
0x5dd4   :  { %13025 = vmatprep.mubr.msk.bf16.mxu1 %vm370_vm7, %v9255_v58 }
0x5dd5   :  { %13026 = vmatmul.mubr.msk.bf16.vlgmr.msra.gmra.mrb[56].mxu1 %vm370_vm7, %v9256_v61 }
0x5dd6   :  { %13038 = vmatpush3.bf16.msra.mxu1 %v9432_v24  ;;  %13041 = vmatprep.mubr.msk.bf16.mxu1 %vm7767_vm10, %v9426_v15 }
0x5dd7   :  { %13217 = vmatprep.subr.msk.bf16.mxu1 %vm438_vm8, %v9431_v20 }
0x5dda   :  { %13040 = vmatpush3.bf16.msra.mxu1 %v9441_v3 }
0x5ddb   :  { %13051 = vmatprep.subr.bf16.mxu1 %v13704_v0 }
0x5ddd   :  { %13042 = vmatmul.mubr.msk.bf16.vlgmr.msra.gmra.mrb[60].mxu1 %vm7767_vm10, %v9427_v28 }
0x5dde   :  { %13052 = vmatpush3.bf16.msra.mxu1 %v13339_v31  ;;  %13055 = vmatprep.mubr.msk.bf16.mxu1 %vm13705_vm0, %v13704_v0 }
0x5ddf   :  { %13053 = vmatprep.subr.bf16.mxu1 %v13704_v0 }
0x5de2   :  { %13054 = vmatpush3.bf16.msra.mxu1 %v13340_v38 }
0x5de3   :  { %13083 = vmatprep.subr.bf16.mxu1 %v13704_v0 }
0x5de5   :  { %13056 = vmatmul.mubr.msk.bf16.vlgmr.msra.gmra.mrb[64].mxu1 %vm116_vm2, %v15364_v48 }
0x5de6   :  { %13059 = vmatprep.mubr.msk.bf16.mxu1 %vm13705_vm0, %v13704_v0  ;;  %13084 = vmatpush3.bf16.msra.mxu1 %v13341_v25 }
0x5de7   :  { %13085 = vmatprep.subr.bf16.mxu1 %v13704_v0 }
0x5dea   :  { %13086 = vmatpush3.bf16.msra.mxu1 %v13342_v34 }
0x5ded   :  { %13060 = vmatmul.mubr.msk.bf16.gmra.mrb[68].mxu1 %vm116_vm2, %v15383_v14 }
0x5dee   :  { %13063 = vmatprep.mubr.msk.bf16.mxu1 %vm13705_vm0, %v13704_v0 }
0x5df5   :  { %13064 = vmatmul.mubr.msk.bf16.gmra.mrb[72].mxu1 %vm116_vm2, %v15393_v1 }
0x5df6   :  { %13087 = vmatprep.mubr.msk.bf16.mxu1 %vm13705_vm0, %v13704_v0 }
0x5dfd   :  { %13088 = vmatmul.mubr.msk.bf16.vlgmr.msra.gmra.mrb[76].mxu1 %vm116_vm2, %v15364_v48 }
0x5dfe   :  { %13091 = vmatprep.mubr.msk.bf16.mxu1 %vm13705_vm0, %v13704_v0 }
0x5e05   :  { %13092 = vmatmul.mubr.msk.bf16.gmra.mrb[80].mxu1 %vm116_vm2, %v15383_v14 }
0x5e06   :  { %13095 = vmatprep.mubr.msk.bf16.mxu1 %vm13705_vm0, %v13704_v0 }
0x5e0d   :  { %13096 = vmatmul.mubr.msk.bf16.gmra.mrb[84].mxu1 %vm116_vm2, %v15393_v1 }
0x5ea8   :  { %v13027_v41 = vpop.f32.mrb[56].mxu1 }
0x5ea9   :  { %v15928_v50 = vadd.f32 %v13027_v41, %v15728_v6  ;;  %v9300_v51 = vpop.f32.mrb[57].mxu1 }
0x5eaa   :  { %v15931_v5 = vadd.f32 %v9300_v51, %v15731_v29  ;;  %v13028_v18 = vpop.f32.mrb[58].mxu1  ;;  %v11462_v29 = vld [vmem:[%s16305_s10 + $0x27] ss:$0 sm:$0xff] }
0x5eab   :  { %v9303_v54 = vpop.f32.mrb[59].mxu1 }
0x5eac   :  { %v15934_v4 = vadd.f32 %v9303_v54, %v15734_v53 }
0x5eb0   :  { %v13043_v19 = vpop.f32.mrb[60].mxu1 }
0x5eb1   :  { %v9477_v9 = vpop.f32.mrb[61].mxu1  ;;  %v9492_v6 = vpack.c.bf16 %v13043_v19, %v13043_v19 }
0x5eb2   :  { %v13044_v43 = vpop.f32.mrb[62].mxu1 }
0x5eb3   :  { %v9480_v42 = vpop.f32.mrb[63].mxu1 }
0x5eb4   :  { %v9491_v44 = vpack.c.bf16 %v9480_v42, %v9477_v9 }
0x5eb6   :  { %13047 = vmatprep.mubr.msk.bf16.mxu0 %vm370_vm7, %v9491_v44 }
0x5eb7   :  { %13048 = vmatmul.mubr.msk.bf16.vlgmr.msra.gmra.mrb[64].mxu0 %vm370_vm7, %v9492_v6 }
0x5eb8   :  { %v9606_v53 = vpop.f32.mrb[64].mxu1  ;;  %13068 = vmatpush3.bf16.msra.mxu0 %v13343_v35  ;;  %13071 = vmatprep.mubr.msk.bf16.mxu0 %vm13705_vm0, %v13704_v0 }
0x5eb9   :  { %v13057_v2 = vpop.f32.mrb[65].mxu1  ;;  %13069 = vmatprep.subr.bf16.mxu0 %v13704_v0  ;;  %v9607_v57 = vadd.f32 %v11462_v29, %v9606_v53 }
0x5eba   :  { %v9609_v13 = vpop.f32.mrb[66].mxu1 }
0x5ebb   :  { %v9610_v62 = vadd.f32 %v11462_v29, %v9609_v13  ;;  %v13058_v47 = vpop.f32.mrb[67].mxu1 }
0x5ebc   :  { %13070 = vmatpush3.bf16.msra.mxu0 %v13344_v56 }
0x5ebd   :  { %v9629_v10 = vpack.c.bf16 %v9610_v62, %v9607_v57 }
0x5ebf   :  { %13072 = vmatmul.mubr.msk.bf16.vlgmr.msra.gmra.mrb[68].mxu0 %vm116_vm2, %v15364_v48 }
0x5ec0   :  { %v9614_v20 = vpop.f32.mrb[68].mxu1  ;;  %13075 = vmatprep.mubr.msk.bf16.mxu0 %vm13705_vm0, %v13704_v0 }
0x5ec1   :  { %v13061_v59 = vpop.f32.mrb[69].mxu1  ;;  %v9615_v8 = vadd.f32 %v11462_v29, %v9614_v20 }
0x5ec2   :  { %v9617_v33 = vpop.f32.mrb[70].mxu1 }
0x5ec3   :  { %v9618_v24 = vadd.f32 %v11462_v29, %v9617_v33  ;;  %v13062_v32 = vpop.f32.mrb[71].mxu1 }
0x5ec5   :  { %v15954_v36 = vpack.c.bf16 %v9618_v24, %v9615_v8 }
0x5ec7   :  { %13076 = vmatmul.mubr.msk.bf16.gmra.mrb[72].mxu0 %vm116_vm2, %v15383_v14  ;;  %v10020_v45 = vrot.slane %v15954_v36, 4  ;;  %v11482_v14 = vld [vmem:[%s16305_s10 + $0x2f] ss:$0 sm:$0xff] }
0x5ec8   :  { %v9622_v11 = vpop.f32.mrb[72].mxu1  ;;  %13079 = vmatprep.mubr.msk.bf16.mxu0 %vm13705_vm0, %v13704_v0 }
0x5ec9   :  { %v13065_v46 = vpop.f32.mrb[73].mxu1  ;;  %v9623_v37 = vadd.f32 %v11462_v29, %v9622_v11 }
0x5eca   :  { %v9625_v48 = vpop.f32.mrb[74].mxu1 }
0x5ecb   :  { %v9626_v52 = vadd.f32 %v11462_v29, %v9625_v48  ;;  %v13066_v26 = vpop.f32.mrb[75].mxu1  ;;  %v11472_v29 = vld [vmem:[%s16305_s10 + $0x2b] ss:$0 sm:$0xff] }
0x5ecd   :  { %v9631_v23 = vpack.c.bf16 %v9626_v52, %v9623_v37 }
0x5ecf   :  { %v15961_v7 = vrot.slane %v9631_v23, 4  ;;  %13080 = vmatmul.mubr.msk.bf16.gmra.mrb[76].mxu0 %vm116_vm2, %v15393_v1 }
0x5ed0   :  { %v9770_v27 = vpop.f32.mrb[76].mxu1  ;;  %13103 = vmatprep.mubr.msk.bf16.mxu0 %vm370_vm7, %v9629_v10 }
0x5ed1   :  { %v13089_v12 = vpop.f32.mrb[77].mxu1  ;;  %v10022_v63 = vsel %vm438_vm8, %v10020_v45, %v15961_v7  ;;  %v9771_v16 = vadd.f32 %v11482_v14, %v9770_v27 }
0x5ed2   :  { %v9773_v60 = vpop.f32.mrb[78].mxu1  ;;  %13125 = vmatprep.mubr.msk.bf16.mxu1 %vm370_vm7, %v10022_v63 }
0x5ed3   :  { %v9774_v58 = vadd.f32 %v11482_v14, %v9773_v60  ;;  %v13090_v22 = vpop.f32.mrb[79].mxu1 }
0x5ed5   :  { %v9793_v61 = vpack.c.bf16 %v9774_v58, %v9771_v16 }
0x5ed8   :  { %v9778_v21 = vpop.f32.mrb[80].mxu1 }
0x5ed9   :  { %v13093_v1 = vpop.f32.mrb[81].mxu1  ;;  %v9779_v17 = vadd.f32 %v11482_v14, %v9778_v21 }
0x5eda   :  { %v9781_v15 = vpop.f32.mrb[82].mxu1 }
0x5edb   :  { %v9782_v3 = vadd.f32 %v11482_v14, %v9781_v15  ;;  %v13094_v31 = vpop.f32.mrb[83].mxu1 }
0x5edd   :  { %v15972_v28 = vpack.c.bf16 %v9782_v3, %v9779_v17 }
0x5edf   :  { %v9906_v12 = vsel %vm438_vm8, %v15972_v28, 0 }
0x5ee0   :  { %v9786_v38 = vpop.f32.mrb[84].mxu1 }
0x5ee1   :  { %v15974_v25 = vadd.f32 %v11482_v14, %v9786_v38  ;;  %v13097_v34 = vpop.f32.mrb[85].mxu1 }
0x5ee2   :  { %v9789_v41 = vpop.f32.mrb[86].mxu1 }
0x5ee3   :  { %v15976_v51 = vadd.f32 %v11482_v14, %v9789_v41  ;;  %v13098_v18 = vpop.f32.mrb[87].mxu1 }
0x5ee5   :  { %v9795_v54 = vpack.c.bf16 %v15976_v51, %v15974_v25 }
0x5f8a   :  { %v13049_v19 = vpop.f32.mrb[64].mxu0 }
0x5f8b   :  { %v15981_v9 = vadd.f32 %v13049_v19, %v15818_v55  ;;  %v9533_v43 = vpop.f32.mrb[65].mxu0 }
0x5f8c   :  { %v15984_v42 = vadd.f32 %v9533_v43, %v15821_v40  ;;  %v13050_v44 = vpop.f32.mrb[66].mxu0 }
0x5f8d   :  { %v9536_v35 = vpop.f32.mrb[67].mxu0 }
0x5f8e   :  { %v15987_v6 = vadd.f32 %v9536_v35, %v15824_v30 }
0x5f92   :  { %v9688_v53 = vpop.f32.mrb[68].mxu0 }
0x5f93   :  { %v13073_v56 = vpop.f32.mrb[69].mxu0  ;;  %v9689_v13 = vadd.f32 %v11472_v29, %v9688_v53 }
0x5f94   :  { %v9691_v2 = vpop.f32.mrb[70].mxu0 }
0x5f95   :  { %v9692_v57 = vadd.f32 %v11472_v29, %v9691_v2  ;;  %v13074_v55 = vpop.f32.mrb[71].mxu0 }
0x5f97   :  { %v9711_v62 = vpack.c.bf16 %v9692_v57, %v9689_v13 }
0x5f99   :  { %13219 = vmatprep.subr.msk.bf16.mxu0 %vm370_vm7, %v9711_v62  ;;  %v9805_v40 = vsel %vm370_vm7, %v9711_v62, 0 }
0x5f9a   :  { %v9696_v47 = vpop.f32.mrb[72].mxu0  ;;  %13100 = vmatpush3.bf16.xpose.msra.mxu0 %v9805_v40 }
0x5f9b   :  { %v13077_v10 = vpop.f32.mrb[73].mxu0  ;;  %v9697_v20 = vadd.f32 %v11472_v29, %v9696_v47 }
0x5f9c   :  { %v9699_v30 = vpop.f32.mrb[74].mxu0 }
0x5f9d   :  { %v9700_v59 = vadd.f32 %v11472_v29, %v9699_v30  ;;  %v13078_v33 = vpop.f32.mrb[75].mxu0 }
0x5f9f   :  { %v9712_v8 = vpack.c.bf16 %v9700_v59, %v9697_v20 }
0x5fa1   :  { %13220 = vmatprep.subr.msk.bf16.mxu0 %vm370_vm7, %v9712_v8  ;;  %v9808_v24 = vsel %vm370_vm7, %v9712_v8, 0  ;;  %v10025_v23 = vrot.slane %v9712_v8, 4 }
0x5fa2   :  { %v9704_v32 = vpop.f32.mrb[76].mxu0  ;;  %13102 = vmatpush3.bf16.xpose.msra.mxu0 %v9808_v24 }
0x5fa3   :  { %v13081_v11 = vpop.f32.mrb[77].mxu0  ;;  %13107 = vmatprep.subr.bf16.mxu0 %v9793_v61  ;;  %v9705_v48 = vadd.f32 %v11472_v29, %v9704_v32 }
0x5fa4   :  { %v9707_v46 = vpop.f32.mrb[78].mxu0 }
0x5fa5   :  { %v9708_v37 = vadd.f32 %v11472_v29, %v9707_v46  ;;  %v13082_v52 = vpop.f32.mrb[79].mxu0  ;;  %v11488_v46 = vld [vmem:[%s16307_s5 + $0x3c] sm:$0xf] }
0x5fa7   :  { %v9713_v26 = vpack.c.bf16 %v9708_v37, %v9705_v48  ;;  %v9965_v48 = vsel %vm438_vm8, %v11488_v46, 0 }
0x5fa9   :  { %v10026_v45 = vrot.slane %v9713_v26, 4  ;;  %13104 = vmatmul.mubr.msk.bf16.vlgmr.msra.gmra.mrb[80].mxu0 %vm370_vm7, %v15954_v36 }
0x5faa   :  { %13108 = vmatpush3.bf16.msra.mxu0 %v9793_v61 }
0x5fab   :  { %13221 = vmatprep.subr.msk.bf16.mxu0 %vm438_vm8, %v15972_v28  ;;  %v10027_v14 = vsel %vm438_vm8, %v10025_v23, %v10026_v45  ;;  %v10038_v63 = vsel %vm370_vm7, %v10026_v45, 0 }
0x5fac   :  { %13223 = vmatprep.subr.msk.bf16.mxu1 %vm370_vm7, %v10027_v14  ;;  %v10035_v27 = vsel %vm370_vm7, %v10027_v14, 0 }
0x5fad   :  { %13122 = vmatpush3.bf16.xpose.msra.mxu1 %v10035_v27 }
0x5fae   :  { %13110 = vmatpush3.bf16.msra.mxu0 %v9906_v12  ;;  %13224 = vmatprep.subr.msk.bf16.mxu1 %vm370_vm7, %v10026_v45 }
0x5faf   :  { %13222 = vmatprep.subr.msk.bf16.mxu0 %vm438_vm8, %v11488_v46 }
0x5fb5   :  { %13124 = vmatpush3.bf16.xpose.msra.mxu1 %v10038_v63 }
0x5fb6   :  { %13226 = vmatprep.subr.msk.bf16.mxu1 %vm438_vm8, %v11488_v46 }
0x5fbc   :  { %13126 = vmatmul.mubr.msk.bf16.vlgmr.msra.gmra.mrb[88].mxu1 %vm370_vm7, %v15961_v7 }
0x5fbd   :  { %13138 = vmatpush3.bf16.msra.mxu1 %v9965_v48 }
0x5fbe   :  { %13159 = vmatprep.subr.bf16.mxu1 %v13704_v0 }
0x607c   :  { %v13105_v36 = vpop.f32.mrb[80].mxu0 }
0x607d   :  { %v9844_v60 = vpop.f32.mrb[81].mxu0  ;;  %v9860_v16 = vmul.f32 0.35355338, %v13105_v36 }
0x607e   :  { %v9858_v58 = vmul.f32 0.35355338, %v9844_v60  ;;  %v13106_v22 = vpop.f32.mrb[82].mxu0 }
0x607f   :  { %v9847_v61 = vpop.f32.mrb[83].mxu0  ;;  %v9863_v15 = vadd.f32 %v9860_v16, %v15499_v39 }
0x6080   :  { %v9861_v21 = vadd.f32 %v9858_v58, %v15499_v39  ;;  %v9859_v1 = vmul.f32 0.35355338, %v9847_v61 }
0x6081   :  { %v9870_v7 = vsel %vm7767_vm10, %v9863_v15, -inf }
0x6082   :  { %v9862_v17 = vadd.f32 %v9859_v1, %v15499_v39  ;;  %v9864_v3 = vsel %vm7767_vm10, %v9861_v21, -inf }
0x6083   :  { %9865 = vmax.xlane.f32.xlu0 %v9864_v3 }
0x6084   :  { %v9867_v31 = vsel %vm7767_vm10, %v9862_v17, -inf }
0x6085   :  { %9868 = vmax.xlane.f32.xlu1 %v9867_v31  ;;  %v10131_v31 = vrot.slane %v15972_v28, 4 }
0x6087   :  { %9871 = vmax.xlane.f32.xlu0 %v9870_v7 }
0x608f   :  { %v13127_v38 = vpop.f32.mrb[88].mxu1 }
0x6090   :  { %v10074_v34 = vpop.f32.mrb[89].mxu1  ;;  %v10090_v47 = vmul.f32 0.35355338, %v13127_v38 }
0x6091   :  { %v13128_v41 = vpop.f32.mrb[90].mxu1  ;;  %v10088_v13 = vmul.f32 0.35355338, %v10074_v34 }
0x6092   :  { %v10077_v18 = vpop.f32.mrb[91].mxu1  ;;  %v10093_v8 = vadd.f32 %v10090_v47, %v15519_v49 }
0x6093   :  { %v10089_v55 = vmul.f32 0.35355338, %v10077_v18  ;;  %v10091_v10 = vadd.f32 %v10088_v13, %v15519_v49 }
0x6094   :  { %v10100_v11 = vsel %vm7767_vm10, %v10093_v8, -inf }
0x6095   :  { %v10092_v59 = vadd.f32 %v10089_v55, %v15519_v49  ;;  %v10094_v24 = vsel %vm7767_vm10, %v10091_v10, -inf }
0x6097   :  { %v10097_v32 = vsel %vm7767_vm10, %v10092_v59, -inf }
0x6110   :  { %v9866_v19 = vpop.xlane.xlu0 %9865 }
0x6111   :  { %v9873_v43 = vsub.f32 %v9861_v21, %v9866_v19 }
0x6112   :  { %v9869_v44 = vpop.xlane.xlu1 %9868 }
0x6113   :  { %v9876_v35 = vmul.f32 1.442695, %v9873_v43  ;;  %v9874_v29 = vsub.f32 %v9862_v17, %v9869_v44  ;;  %v10132_v17 = vrot.slane %v9795_v54, 4 }
0x6114   :  { %v9872_v53 = vpop.xlane.xlu0 %9871 }
0x6115   :  { %13617 = vpow2.f32 %v9876_v35  ;;  %v9878_v39 = vmul.f32 1.442695, %v9874_v29  ;;  %v9875_v56 = vsub.f32 %v9863_v15, %v9872_v53  ;;  %v10133_v38 = vsel %vm438_vm8, %v10131_v31, %v10132_v17 }
0x6116   :  { %v10142_v47 = vsel %vm438_vm8, %v10132_v17, 0 }
0x6117   :  { %13619 = vpow2.f32 %v9878_v39  ;;  %v9880_v2 = vmul.f32 1.442695, %v9875_v56 }
0x6119   :  { %13621 = vpow2.f32 %v9880_v2 }
0x611f   :  { %v13618_v57 = vpop.eup %13617 }
0x6120   :  { %v9882_v62 = vsel %vm7767_vm10, %v13618_v57, 0.0 }
0x6121   :  { %v13620_v40 = vpop.eup %13619  ;;  %9883 = vadd.xlane.f32.xlu1 %v9882_v62 }
0x6122   :  { %v9885_v30 = vsel %vm7767_vm10, %v13620_v40, 0.0 }
0x6123   :  { %v13622_v20 = vpop.eup %13621  ;;  %9886 = vadd.xlane.f32.xlu0 %v9885_v30 }
0x6124   :  { %v9888_v33 = vsel %vm7767_vm10, %v13622_v20, 0.0 }
0x6125   :  { %9889 = vadd.xlane.f32.xlu1 %v9888_v33 }
0x6127   :  { %10095 = vmax.xlane.f32.xlu0 %v10094_v24  ;;  %v11501_v24 = vld [vmem:[%s16303_s11 + $0x16] ss:$0 sm:$0xff] }
0x6129   :  { %10098 = vmax.xlane.f32.xlu1 %v10097_v32 }
0x612b   :  { %10101 = vmax.xlane.f32.xlu0 %v10100_v11  ;;  %v13698_v11 = vld [vmem:[#allocation2 + $0x10] sm:$0xff] }
0x61ae   :  { %v9884_v49 = vpop.xlane.xlu1 %9883 }
0x61af   :  { %13623 = vrcp.f32 %v9884_v49 }
0x61b0   :  { %v9887_v37 = vpop.xlane.xlu0 %9886 }
0x61b1   :  { %13625 = vrcp.f32 %v9887_v37 }
0x61b2   :  { %v9890_v52 = vpop.xlane.xlu1 %9889 }
0x61b3   :  { %13627 = vrcp.f32 %v9890_v52 }
0x61b4   :  { %v10096_v26 = vpop.xlane.xlu0 %10095 }
0x61b5   :  { %v10103_v23 = vsub.f32 %v10091_v10, %v10096_v26  ;;  %v13700_v26 = vld [vmem:[#allocation2 + $0x8] sm:$0xff] }
0x61b6   :  { %v10099_v45 = vpop.xlane.xlu1 %10098 }
0x61b7   :  { %v10106_v14 = vmul.f32 1.442695, %v10103_v23  ;;  %v10104_v27 = vsub.f32 %v10092_v59, %v10099_v45 }
0x61b8   :  { %v10102_v12 = vpop.xlane.xlu0 %10101 }
0x61b9   :  { %v13624_v63 = vpop.eup %13623  ;;  %13629 = vpow2.f32 %v10106_v14  ;;  %v10108_v36 = vmul.f32 1.442695, %v10104_v27  ;;  %v10105_v60 = vsub.f32 %v10093_v8, %v10102_v12 }
0x61ba   :  { %v9894_v22 = vmul.f32 %v13624_v63, %v13618_v57 }
0x61bb   :  { %v13626_v16 = vpop.eup %13625  ;;  %13631 = vpow2.f32 %v10108_v36  ;;  %v10110_v58 = vmul.f32 1.442695, %v10105_v60 }
0x61bc   :  { %v9895_v61 = vmul.f32 %v13626_v16, %v13620_v40 }
0x61bd   :  { %v13628_v21 = vpop.eup %13627  ;;  %13633 = vpow2.f32 %v10110_v58 }
0x61be   :  { %v9896_v1 = vmul.f32 %v13628_v21, %v13622_v20  ;;  %v9897_v15 = vpack.c.bf16 %v9895_v61, %v9894_v22 }
0x61c0   :  { %v9898_v3 = vpack.c.bf16 %v9896_v1, %v9896_v1  ;;  %13111 = vmatprep.mubr.msk.bf16.mxu0 %vm7767_vm10, %v9897_v15 }
0x61c2   :  { %13112 = vmatmul.mubr.msk.bf16.vlgmr.msra.gmra.mrb[84].mxu0 %vm7767_vm10, %v9898_v3 }
0x61c3   :  { %v13630_v7 = vpop.eup %13629  ;;  %13116 = vmatpush3.bf16.msra.mxu0 %v9965_v48  ;;  %v13699_v48 = vld [vmem:[#allocation2] sm:$0xff] }
0x61c4   :  { %13129 = vmatprep.subr.bf16.mxu0 %v10133_v38  ;;  %v10112_v34 = vsel %vm7767_vm10, %v13630_v7, 0.0 }
0x61c5   :  { %v13632_v41 = vpop.eup %13631  ;;  %10113 = vadd.xlane.f32.xlu1 %v10112_v34  ;;  %v13701_v34 = vld [vmem:[#allocation2 + $0x28] sm:$0xff] }
0x61c6   :  { %v10115_v18 = vsel %vm7767_vm10, %v13632_v41, 0.0 }
0x61c7   :  { %v13634_v25 = vpop.eup %13633  ;;  %10116 = vadd.xlane.f32.xlu0 %v10115_v18  ;;  %v13702_v18 = vld [vmem:[#allocation2 + $0x18] sm:$0xff] }
0x61c8   :  { %v10118_v51 = vsel %vm7767_vm10, %v13634_v25, 0.0 }
0x61c9   :  { %10119 = vadd.xlane.f32.xlu1 %v10118_v51 }
0x6252   :  { %v10114_v28 = vpop.xlane.xlu1 %10113 }
0x6254   :  { %v10117_v54 = vpop.xlane.xlu0 %10116 }
0x6255   :  { %13635 = vrcp.f32 %v10117_v54 }
0x6256   :  { %13637 = vrcp.f32 %v10114_v28  ;;  %v10120_v19 = vpop.xlane.xlu1 %10119 }
0x6257   :  { %13639 = vrcp.f32 %v10120_v19 }
0x625f   :  { %v13636_v43 = vpop.eup %13635 }
0x6260   :  { %v13638_v35 = vpop.eup %13637  ;;  %v10125_v39 = vmul.f32 %v13636_v43, %v13632_v41 }
0x6261   :  { %v10124_v13 = vmul.f32 %v13638_v35, %v13630_v7  ;;  %v13640_v55 = vpop.eup %13639 }
0x6262   :  { %v10126_v40 = vmul.f32 %v13640_v55, %v13634_v25 }
0x6263   :  { %v10127_v62 = vpack.c.bf16 %v10125_v39, %v10124_v13 }
0x6264   :  { %v10128_v10 = vpack.c.bf16 %v10126_v40, %v10126_v40  ;;  %v13345_v40 = vld [vmem:[%s16309_s6 + $0x30] sm:$0xff]  }
0x6295   :  { %v13113_v44 = vpop.f32.mrb[84].mxu0 }
0x6296   :  { %v9942_v29 = vpop.f32.mrb[85].mxu0  ;;  %v9957_v57 = vpack.c.bf16 %v13113_v44, %v13113_v44 }
0x6297   :  { %v13114_v53 = vpop.f32.mrb[86].mxu0 }
0x6298   :  { %v9945_v56 = vpop.f32.mrb[87].mxu0 }
0x6299   :  { %v9956_v2 = vpack.c.bf16 %v9945_v56, %v9942_v29 }
0x629b   :  { %13117 = vmatprep.mubr.msk.bf16.mxu0 %vm370_vm7, %v9956_v2 }
0x629c   :  { %13118 = vmatmul.mubr.msk.bf16.vlgmr.msra.gmra.mrb[88].mxu0 %vm370_vm7, %v9957_v57 }
0x629d   :  { %13130 = vmatpush3.bf16.msra.mxu0 %v10133_v38  ;;  %13133 = vmatprep.mubr.msk.bf16.mxu0 %vm7767_vm10, %v10127_v62 }
0x629e   :  { %13225 = vmatprep.subr.msk.bf16.mxu0 %vm438_vm8, %v10132_v17 }
0x62a1   :  { %13132 = vmatpush3.bf16.msra.mxu0 %v10142_v47  ;;  %v13346_v47 = vld [vmem:[%s16309_s6 + $0x38] sm:$0xff]  }
0x62a2   :  { %13143 = vmatprep.subr.bf16.mxu0 %v13704_v0 }
0x62a4   :  { %13134 = vmatmul.mubr.msk.bf16.vlgmr.msra.gmra.mrb[92].mxu0 %vm7767_vm10, %v10128_v10 }
0x62a5   :  { %13147 = vmatprep.mubr.msk.bf16.mxu0 %vm13705_vm0, %v13704_v0  ;;  %13144 = vmatpush3.bf16.msra.mxu0 %v13345_v40 }
0x62a6   :  { %13145 = vmatprep.subr.bf16.mxu0 %v13704_v0 }
0x62a9   :  { %13146 = vmatpush3.bf16.msra.mxu0 %v13346_v47 }
0x62aa   :  { %13179 = vmatprep.subr.bf16.mxu0 %v13704_v0 }
0x636f   :  { %v13119_v30 = vpop.f32.mrb[88].mxu0 }
0x6370   :  { %v10017_v20 = vadd.f32 %v13119_v30, %v15928_v50  ;;  %v10001_v59 = vpop.f32.mrb[89].mxu0 }
0x6371   :  { %v10015_v33 = vadd.f32 %v10001_v59, %v15931_v5  ;;  %v13120_v8 = vpop.f32.mrb[90].mxu0 }
0x6372   :  { %v10004_v32 = vpop.f32.mrb[91].mxu0  ;;  %v10253_v46 = vadd.f32 %v13698_v11, %v10017_v20 }
0x6373   :  { %v10251_v49 = vadd.f32 %v13699_v48, %v10015_v33  ;;  %v10016_v37 = vadd.f32 %v10004_v32, %v15934_v4 }
0x6374   :  { %v16058_v50 = vadd.f32 %v11501_v24, %v10253_v46 }
0x6375   :  { %v16056_v52 = vadd.f32 %v11501_v24, %v10251_v49  ;;  %v10252_v23 = vadd.f32 %v13700_v26, %v10016_v37 }
0x6376   :  { %v10274_v60 = vsel %vm116_vm2, %v16058_v50, 0.0 }
0x6377   :  { %v16060_v45 = vadd.f32 %v11501_v24, %v10252_v23  ;;  %v13135_v5 = vpop.f32.mrb[92].mxu0  ;;  %v10268_v14 = vsel %vm116_vm2, %v16056_v52, 0.0 }
0x6378   :  { %10269 = vadd.xlane.f32.xlu0 %v10268_v14  ;;  %v10178_v27 = vpop.f32.mrb[93].mxu0  ;;  %v10193_v16 = vpack.c.bf16 %v13135_v5, %v13135_v5 }
0x6379   :  { %v13136_v12 = vpop.f32.mrb[94].mxu0  ;;  %v10271_v63 = vsel %vm116_vm2, %v16060_v45, 0.0 }
0x637a   :  { %10272 = vadd.xlane.f32.xlu1 %v10271_v63  ;;  %v10181_v4 = vpop.f32.mrb[95].mxu0 }
0x637b   :  { %v10192_v36 = vpack.c.bf16 %v10181_v4, %v10178_v27 }
0x637c   :  { %10275 = vadd.xlane.f32.xlu0 %v10274_v60 }
0x637d   :  { %13139 = vmatprep.mubr.msk.bf16.mxu1 %vm370_vm7, %v10192_v36 }
0x637e   :  { %13140 = vmatmul.mubr.msk.bf16.vlgmr.msra.gmra.mrb[92].mxu1 %vm370_vm7, %v10193_v16 }
0x637f   :  { %13167 = vmatprep.mubr.msk.bf16.mxu1 %vm13705_vm0, %v13704_v0 }
0x6405   :  { %v10270_v58 = vpop.xlane.xlu0 %10269 }
0x6406   :  { %v10286_v15 = vmul.f32 0.03125, %v10270_v58 }
0x6407   :  { %v10273_v61 = vpop.xlane.xlu1 %10272 }
0x6408   :  { %v10287_v38 = vmul.f32 0.03125, %v10273_v61  ;;  %v16076_v54 = vsub.f32 %v16056_v52, %v10286_v15 }
0x6409   :  { %v10276_v31 = vpop.xlane.xlu0 %10275 }
0x640a   :  { %v10288_v28 = vmul.f32 0.03125, %v10276_v31  ;;  %v10298_v39 = vmul.f32 %v16076_v54, %v16076_v54  ;;  %v16134_v31 = vld [vmem:[%s16303_s11 + $0x14] ss:$0 sm:$0xff] }
0x640c   :  { %v10304_v13 = vsel %vm116_vm2, %v10298_v39, 0.0  ;;  %v13350_v39 = vld [vmem:[%s16310_s7 + $0x78] sm:$0xff]  }
0x6451   :  { %v13141_v22 = vpop.f32.mrb[92].mxu1 }
0x6452   :  { %v10250_v21 = vadd.f32 %v13141_v22, %v15981_v9  ;;  %v10234_v1 = vpop.f32.mrb[93].mxu1  ;;  %v13703_v9 = vld [vmem:[#allocation2 + $0x20] sm:$0xff] }
0x6453   :  { %v10248_v17 = vadd.f32 %v10234_v1, %v15984_v42  ;;  %v13142_v3 = vpop.f32.mrb[94].mxu1  ;;  %v16081_v42 = vsub.f32 %v16060_v45, %v10287_v38 }
0x6454   :  { %v10237_v7 = vpop.f32.mrb[95].mxu1  ;;  %v10256_v41 = vadd.f32 %v13701_v34, %v10250_v21 }
0x6455   :  { %v10254_v25 = vadd.f32 %v13702_v18, %v10248_v17  ;;  %v10249_v51 = vadd.f32 %v10237_v7, %v15987_v6  ;;  %v16090_v6 = vsub.f32 %v16058_v50, %v10288_v28  ;;  %v10299_v2 = vmul.f32 %v16081_v42, %v16081_v42  ;;  %v16142_v18 = vld [vmem:[%s16303_s11 + $0x15] ss:$0 sm:$0xff] }
0x6456   :  { %v16083_v44 = vadd.f32 %v11501_v24, %v10256_v41 }
0x6457   :  { %v16078_v19 = vadd.f32 %v11501_v24, %v10254_v25  ;;  %v10255_v43 = vadd.f32 %v13703_v9, %v10249_v51  ;;  %v10300_v57 = vmul.f32 %v16090_v6, %v16090_v6  ;;  %v10307_v55 = vsel %vm116_vm2, %v10299_v2, 0.0 }
0x6458   :  { %v10283_v56 = vsel %vm116_vm2, %v16083_v44, 0.0 }
0x6459   :  { %v16085_v35 = vadd.f32 %v11501_v24, %v10255_v43  ;;  %v10277_v29 = vsel %vm116_vm2, %v16078_v19, 0.0  ;;  %v10310_v62 = vsel %vm116_vm2, %v10300_v57, 0.0  ;;  %v13348_v43 = vld [vmem:[%s16310_s7 + $0x68] sm:$0xff]  }
0x645a   :  { %10278 = vadd.xlane.f32.xlu1 %v10277_v29 }
0x645b   :  { %v10280_v53 = vsel %vm116_vm2, %v16085_v35, 0.0 }
0x645c   :  { %10281 = vadd.xlane.f32.xlu0 %v10280_v53  ;;  %v13349_v53 = vld [vmem:[%s16310_s7 + $0x70] sm:$0xff]  }
0x645e   :  { %10284 = vadd.xlane.f32.xlu1 %v10283_v56 }
0x6460   :  { %10305 = vadd.xlane.f32.xlu0 %v10304_v13 }
0x6462   :  { %10308 = vadd.xlane.f32.xlu1 %v10307_v55 }
0x6464   :  { %10311 = vadd.xlane.f32.xlu0 %v10310_v62 }
0x64e7   :  { %v10279_v10 = vpop.xlane.xlu1 %10278 }
0x64e8   :  { %v10289_v30 = vmul.f32 0.03125, %v10279_v10 }
0x64e9   :  { %v10282_v20 = vpop.xlane.xlu0 %10281 }
0x64ea   :  { %v16114_v59 = vsub.f32 %v16078_v19, %v10289_v30  ;;  %v10290_v33 = vmul.f32 0.03125, %v10282_v20 }
0x64eb   :  { %v10285_v8 = vpop.xlane.xlu1 %10284 }
0x64ec   :  { %v16117_v24 = vsub.f32 %v16085_v35, %v10290_v33  ;;  %v10291_v32 = vmul.f32 0.03125, %v10285_v8  ;;  %v10301_v11 = vmul.f32 %v16114_v59, %v16114_v59 }
0x64ed   :  { %v10306_v46 = vpop.xlane.xlu0 %10305 }
0x64ee   :  { %v16122_v48 = vsub.f32 %v16083_v44, %v10291_v32  ;;  %v10322_v49 = vmul.f32 0.032258064, %v10306_v46  ;;  %v10313_v37 = vsel %vm116_vm2, %v10301_v11, 0.0  ;;  %v10302_v26 = vmul.f32 %v16117_v24, %v16117_v24 }
0x64ef   :  { %10314 = vadd.xlane.f32.xlu1 %v10313_v37  ;;  %v10309_v23 = vpop.xlane.xlu1 %10308 }
0x64f0   :  { %13641 = vrsqrt.f32 %v10322_v49  ;;  %v10323_v5 = vmul.f32 0.032258064, %v10309_v23  ;;  %v10316_v14 = vsel %vm116_vm2, %v10302_v26, 0.0  ;;  %v10303_v27 = vmul.f32 %v16122_v48, %v16122_v48 }
0x64f1   :  { %10317 = vadd.xlane.f32.xlu0 %v10316_v14  ;;  %vm10330_vm7 = vcmp.eq.f32.partialorder %v10322_v49, inf  ;;  %v10333_v36 = vand.u32 2147483648, %v10322_v49  ;;  %vm10332_vm8 = vcmp.eq.f32.partialorder %v10322_v49, 0.0 }
0x64f2   :  { %13643 = vrsqrt.f32 %v10323_v5  ;;  %v10319_v12 = vsel %vm116_vm2, %v10303_v27, 0.0  ;;  %vm10337_vm1 = vcmp.eq.f32.partialorder %v10323_v5, inf  ;;  %v10340_v21 = vand.u32 2147483648, %v10323_v5 }
0x64f3   :  { %10320 = vadd.xlane.f32.xlu1 %v10319_v12  ;;  %vm10339_vm11 = vcmp.eq.f32.partialorder %v10323_v5, 0.0 }
0x64fa   :  { %v13642_v63 = vpop.eup %13641 }
0x64fb   :  { %v10329_v4 = vmul.f32 %v13642_v63, %v10322_v49 }
0x64fc   :  { %v13644_v60 = vpop.eup %13643 }
0x64fd   :  { %v10331_v16 = vsel %vm10330_vm7, %v10322_v49, %v10329_v4  ;;  %v10336_v22 = vmul.f32 %v13644_v60, %v10323_v5 }
0x64fe   :  { %v10334_v58 = vsel %vm10332_vm8, %v10333_v36, %v10331_v16 }
0x64ff   :  { %v10370_v61 = vadd.f32 1e-06, %v10334_v58  ;;  %v10338_v1 = vsel %vm10337_vm1, %v10323_v5, %v10336_v22 }
0x6500   :  { %v10341_v15 = vsel %vm10339_vm11, %v10340_v21, %v10338_v1 }
0x6501   :  { %13645 = vrcp.f32 %v10370_v61  ;;  %v10371_v17 = vadd.f32 1e-06, %v10341_v15 }
0x6503   :  { %13647 = vrcp.f32 %v10371_v17 }
0x650b   :  { %v13646_v3 = vpop.eup %13645 }
0x650c   :  { %v10389_v7 = vmul.f32 %v13646_v3, %v16076_v54  ;;  %v13347_v54 = vld [vmem:[%s16310_s7 + $0x60] sm:$0xff]  }
0x650d   :  { %v13648_v38 = vpop.eup %13647  ;;  %13160 = vmatpush3.bf16.msra.mxu1 %v13347_v54 }
0x650e   :  { %v10399_v34 = vmul.f32 %v16134_v31, %v10389_v7  ;;  %v10390_v41 = vmul.f32 %v13648_v38, %v16081_v42  ;;  %13161 = vmatprep.subr.bf16.mxu1 %v13704_v0  ;;  %v10312_v42 = vpop.xlane.xlu0 %10311 }
0x650f   :  { %v10324_v29 = vmul.f32 0.032258064, %v10312_v42 }
0x6510   :  { %v10400_v25 = vmul.f32 %v16134_v31, %v10390_v41  ;;  %v10410_v51 = vadd.f32 %v16142_v18, %v10399_v34 }
0x6511   :  { %13162 = vmatpush3.bf16.msra.mxu1 %v13348_v43  ;;  %13649 = vrsqrt.f32 %v10324_v29  ;;  %vm10344_vm12 = vcmp.eq.f32.partialorder %v10324_v29, inf  ;;  %v10347_v47 = vand.u32 2147483648, %v10324_v29  ;;  %vm10346_vm13 = vcmp.eq.f32.partialorder %v10324_v29, 0.0 }
0x6512   :  { %v10411_v28 = vadd.f32 %v16142_v18, %v10400_v25  ;;  %13163 = vmatprep.subr.bf16.mxu1 %v13704_v0 }
0x6514   :  { %v10416_v9 = vpack.c.bf16 %v10411_v28, %v10410_v51 }
0x6515   :  { %13164 = vmatpush3.bf16.msra.mxu1 %v13349_v53 }
0x6516   :  { %13148 = vmatmul.mubr.msk.bf16.vlgmr.msra.gmra.mrb[96].mxu0 %vm116_vm2, %v10416_v9  ;;  %13165 = vmatprep.subr.bf16.mxu1 %v13704_v0 }
0x6517   :  { %13151 = vmatprep.mubr.msk.bf16.mxu0 %vm13705_vm0, %v13704_v0 }
0x6519   :  { %13166 = vmatpush3.bf16.msra.mxu1 %v13350_v39 }
0x651b   :  { %v13650_v56 = vpop.eup %13649 }
0x651c   :  { %v10343_v2 = vmul.f32 %v13650_v56, %v10324_v29 }
0x651e   :  { %v10345_v62 = vsel %vm10344_vm12, %v10324_v29, %v10343_v2 }
0x651f   :  { %v10348_v10 = vsel %vm10346_vm13, %v10347_v47, %v10345_v62 }
0x6520   :  { %v10372_v33 = vadd.f32 1e-06, %v10348_v10 }
0x657c   :  { %v10315_v13 = vpop.xlane.xlu1 %10314 }
0x657d   :  { %v10325_v57 = vmul.f32 0.032258064, %v10315_v13 }
0x657e   :  { %v10318_v55 = vpop.xlane.xlu0 %10317 }
0x657f   :  { %13651 = vrsqrt.f32 %v10325_v57  ;;  %v10326_v40 = vmul.f32 0.032258064, %v10318_v55  ;;  %vm10351_vm14 = vcmp.eq.f32.partialorder %v10325_v57, inf  ;;  %v10354_v11 = vand.u32 2147483648, %v10325_v57 }
0x6580   :  { %v10321_v30 = vpop.xlane.xlu1 %10320  ;;  %vm10353_vm15 = vcmp.eq.f32.partialorder %v10325_v57, 0.0 }
0x6581   :  { %13653 = vrsqrt.f32 %v10326_v40  ;;  %v10327_v20 = vmul.f32 0.032258064, %v10321_v30  ;;  %vm10358_vm3 = vcmp.eq.f32.partialorder %v10326_v40, inf  ;;  %v10361_v5 = vand.u32 2147483648, %v10326_v40 }
0x6582   :  { %vm10360_vm5 = vcmp.eq.f32.partialorder %v10326_v40, 0.0 }
0x6583   :  { %13655 = vrsqrt.f32 %v10327_v20  ;;  %vm10365_vm6 = vcmp.eq.f32.partialorder %v10327_v20, inf  ;;  %v10368_v36 = vand.u32 2147483648, %v10327_v20  ;;  %vm10367_vm9 = vcmp.eq.f32.partialorder %v10327_v20, 0.0 }
0x6584   :  { %13657 = vrcp.f32 %v10372_v33 }
0x6589   :  { %v13652_v8 = vpop.eup %13651 }
0x658a   :  { %v10350_v32 = vmul.f32 %v13652_v8, %v10325_v57 }
0x658b   :  { %v13654_v46 = vpop.eup %13653 }
0x658c   :  { %v10352_v49 = vsel %vm10351_vm14, %v10325_v57, %v10350_v32  ;;  %v10357_v26 = vmul.f32 %v13654_v46, %v10326_v40 }
0x658d   :  { %v10355_v37 = vsel %vm10353_vm15, %v10354_v11, %v10352_v49  ;;  %v13656_v27 = vpop.eup %13655 }
0x658e   :  { %v10373_v23 = vadd.f32 1e-06, %v10355_v37  ;;  %v10359_v14 = vsel %vm10358_vm3, %v10326_v40, %v10357_v26  ;;  %v10364_v4 = vmul.f32 %v13656_v27, %v10327_v20  ;;  %v13658_v16 = vpop.eup %13657 }
0x658f   :  { %v10362_v12 = vsel %vm10360_vm5, %v10361_v5, %v10359_v14  ;;  %v10391_v61 = vmul.f32 %v13658_v16, %v16090_v6 }
0x6590   :  { %13659 = vrcp.f32 %v10373_v23  ;;  %v10374_v63 = vadd.f32 1e-06, %v10362_v12  ;;  %v10366_v60 = vsel %vm10365_vm6, %v10327_v20, %v10364_v4  ;;  %v11522_v23 = vld [vmem:[%s16303_s11 + $0x17] ss:$0 sm:$0xff] }
0x6591   :  { %v10369_v58 = vsel %vm10367_vm9, %v10368_v36, %v10366_v60  ;;  %v10401_v1 = vmul.f32 %v16134_v31, %v10391_v61 }
0x6592   :  { %13661 = vrcp.f32 %v10374_v63  ;;  %v10375_v22 = vadd.f32 1e-06, %v10369_v58 }
0x6593   :  { %v10412_v38 = vadd.f32 %v16142_v18, %v10401_v1 }
0x6594   :  { %13663 = vrcp.f32 %v10375_v22 }
0x659a   :  { %v13660_v21 = vpop.eup %13659 }
0x659b   :  { %v10392_v15 = vmul.f32 %v13660_v21, %v16114_v59 }
0x659c   :  { %v13662_v17 = vpop.eup %13661 }
0x659d   :  { %v10402_v3 = vmul.f32 %v16134_v31, %v10392_v15  ;;  %v10393_v7 = vmul.f32 %v13662_v17, %v16117_v24 }
0x659e   :  { %v13664_v41 = vpop.eup %13663 }
0x659f   :  { %v10413_v34 = vadd.f32 %v16142_v18, %v10402_v3  ;;  %v10394_v51 = vmul.f32 %v13664_v41, %v16122_v48  ;;  %v10403_v6 = vmul.f32 %v16134_v31, %v10393_v7  ;;  %v11508_v48 = vld [vmem:[%s16303_s11 + $0x28] ss:$0 sm:$0xff] }
0x65a1   :  { %v10417_v25 = vpack.c.bf16 %v10413_v34, %v10412_v38  ;;  %v10404_v28 = vmul.f32 %v16134_v31, %v10394_v51  ;;  %v10414_v24 = vadd.f32 %v16142_v18, %v10403_v6 }
0x65a3   :  { %13152 = vmatmul.mubr.msk.bf16.gmra.mrb[100].mxu0 %vm116_vm2, %v10417_v25  ;;  %v10415_v59 = vadd.f32 %v16142_v18, %v10404_v28 }
0x65a4   :  { %13155 = vmatprep.mubr.msk.bf16.mxu0 %vm13705_vm0, %v13704_v0 }
0x65a5   :  { %v10418_v9 = vpack.c.bf16 %v10415_v59, %v10414_v24 }
0x65ab   :  { %13156 = vmatmul.mubr.msk.bf16.gmra.mrb[104].mxu0 %vm116_vm2, %v10418_v9 }
0x65ac   :  { %13183 = vmatprep.mubr.msk.bf16.mxu0 %vm13705_vm0, %v13704_v0 }
0x65e9   :  { %v10484_v54 = vpop.f32.mrb[96].mxu0 }
0x65ea   :  { %v10485_v43 = vadd.f32 %v11508_v48, %v10484_v54  ;;  %v13149_v31 = vpop.f32.mrb[97].mxu0 }
0x65eb   :  { %v10487_v42 = vpop.f32.mrb[98].mxu0 }
0x65ec   :  { %v10488_v29 = vadd.f32 %v11508_v48, %v10487_v42  ;;  %v13150_v53 = vpop.f32.mrb[99].mxu0  ;;  %v10507_v39 = vmax.f32 %v10485_v43, 0.0 }
0x65ee   :  { %v10508_v56 = vmax.f32 %v10488_v29, 0.0 }
0x65f0   :  { %v10513_v2 = vpack.c.bf16 %v10508_v56, %v10507_v39  ;;  %v13352_v39 = vld [vmem:[%s16312_s9 + $0x8] sm:$0xff]  }
0x65f2   :  { %13168 = vmatmul.mubr.msk.bf16.vlgmr.msra.gmra.mrb[96].mxu1 %vm2373_vm4, %v10513_v2 }
0x65f3   :  { %13171 = vmatprep.mubr.msk.bf16.mxu1 %vm13705_vm0, %v13704_v0 }
0x6676   :  { %v10492_v18 = vpop.f32.mrb[100].mxu0 }
0x6677   :  { %v10493_v13 = vadd.f32 %v11508_v48, %v10492_v18  ;;  %v13153_v57 = vpop.f32.mrb[101].mxu0 }
0x6678   :  { %v10495_v55 = vpop.f32.mrb[102].mxu0 }
0x6679   :  { %v10496_v62 = vadd.f32 %v11508_v48, %v10495_v55  ;;  %v13154_v40 = vpop.f32.mrb[103].mxu0  ;;  %v10509_v47 = vmax.f32 %v10493_v13, 0.0 }
0x667b   :  { %v10510_v10 = vmax.f32 %v10496_v62, 0.0 }
0x667d   :  { %v10514_v30 = vpack.c.bf16 %v10510_v10, %v10509_v47 }
0x667e   :  { %v10500_v20 = vpop.f32.mrb[104].mxu0 }
0x667f   :  { %v10501_v33 = vadd.f32 %v11508_v48, %v10500_v20  ;;  %v13157_v8 = vpop.f32.mrb[105].mxu0  ;;  %13172 = vmatmul.mubr.msk.bf16.gmra.mrb[100].mxu1 %vm2373_vm4, %v10514_v30 }
0x6680   :  { %v10503_v32 = vpop.f32.mrb[106].mxu0  ;;  %13175 = vmatprep.mubr.msk.bf16.mxu1 %vm13705_vm0, %v13704_v0 }
0x6681   :  { %v10504_v11 = vadd.f32 %v11508_v48, %v10503_v32  ;;  %v13158_v46 = vpop.f32.mrb[107].mxu0  ;;  %v10511_v49 = vmax.f32 %v10501_v33, 0.0 }
0x6683   :  { %v10512_v37 = vmax.f32 %v10504_v11, 0.0 }
0x6685   :  { %v10515_v26 = vpack.c.bf16 %v10512_v37, %v10511_v49 }
0x6687   :  { %13176 = vmatmul.mubr.msk.bf16.gmra.mrb[104].mxu1 %vm2373_vm4, %v10515_v26 }
0x66c5   :  { %v10597_v5 = vpop.f32.mrb[96].mxu1 }
0x66c6   :  { %v10598_v14 = vadd.f32 %v11522_v23, %v10597_v5  ;;  %v13169_v27 = vpop.f32.mrb[97].mxu1 }
0x66c7   :  { %v10600_v12 = vpop.f32.mrb[98].mxu1 }
0x66c8   :  { %v10620_v63 = vadd.f32 %v10598_v14, %v16056_v52  ;;  %v10601_v4 = vadd.f32 %v11522_v23, %v10600_v12  ;;  %v13170_v36 = vpop.f32.mrb[99].mxu1 }
0x66ca   :  { %v10621_v60 = vadd.f32 %v10601_v4, %v16060_v45  ;;  %v10626_v16 = vsel %vm116_vm2, %v10620_v63, 0.0 }
0x66cb   :  { %10627 = vadd.xlane.f32.xlu0 %v10626_v16 }
0x66cc   :  { %v10629_v58 = vsel %vm116_vm2, %v10621_v60, 0.0 }
0x66cd   :  { %10630 = vadd.xlane.f32.xlu1 %v10629_v58 }
0x6752   :  { %v10605_v22 = vpop.f32.mrb[100].mxu1 }
0x6753   :  { %v10606_v61 = vadd.f32 %v11522_v23, %v10605_v22  ;;  %v13173_v21 = vpop.f32.mrb[101].mxu1 }
0x6754   :  { %v10608_v1 = vpop.f32.mrb[102].mxu1 }
0x6755   :  { %v10622_v15 = vadd.f32 %v10606_v61, %v16058_v50  ;;  %v10609_v17 = vadd.f32 %v11522_v23, %v10608_v1  ;;  %v13174_v3 = vpop.f32.mrb[103].mxu1 }
0x6756   :  { %v16248_v3 = vld [vmem:[%s16303_s11 + $0x1e] ss:$0 sm:$0xff] }
0x6757   :  { %v10623_v52 = vadd.f32 %v10609_v17, %v16078_v19  ;;  %v10632_v7 = vsel %vm116_vm2, %v10622_v15, 0.0 }
0x6758   :  { %10633 = vadd.xlane.f32.xlu0 %v10632_v7  ;;  %v10628_v45 = vpop.xlane.xlu0 %10627 }
0x6759   :  { %v10635_v38 = vsel %vm116_vm2, %v10623_v52, 0.0  ;;  %v10644_v34 = vmul.f32 0.03125, %v10628_v45 }
0x675a   :  { %10636 = vadd.xlane.f32.xlu1 %v10635_v38  ;;  %v10613_v41 = vpop.f32.mrb[104].mxu1  ;;  %v10631_v51 = vpop.xlane.xlu1 %10630 }
0x675b   :  { %v10614_v25 = vadd.f32 %v11522_v23, %v10613_v41  ;;  %v13177_v6 = vpop.f32.mrb[105].mxu1  ;;  %v16204_v28 = vsub.f32 %v10620_v63, %v10644_v34  ;;  %v10645_v59 = vmul.f32 0.03125, %v10631_v51  ;;  %v16256_v34 = vld [vmem:[%s16303_s11 + $0x1f] ss:$0 sm:$0xff] }
0x675c   :  { %v10616_v50 = vpop.f32.mrb[106].mxu1 }
0x675d   :  { %v10624_v24 = vadd.f32 %v10614_v25, %v16085_v35  ;;  %v10617_v9 = vadd.f32 %v11522_v23, %v10616_v50  ;;  %v13178_v19 = vpop.f32.mrb[107].mxu1  ;;  %v16207_v48 = vsub.f32 %v10621_v60, %v10645_v59  ;;  %v10656_v31 = vmul.f32 %v16204_v28, %v16204_v28 }
0x675f   :  { %v10625_v54 = vadd.f32 %v10617_v9, %v16083_v44  ;;  %v10638_v43 = vsel %vm116_vm2, %v10624_v24, 0.0  ;;  %v10657_v29 = vmul.f32 %v16207_v48, %v16207_v48  ;;  %v10662_v35 = vsel %vm116_vm2, %v10656_v31, 0.0  ;;  %v13351_v44 = vld [vmem:[%s16312_s9] sm:$0xff]  }
0x6760   :  { %10639 = vadd.xlane.f32.xlu0 %v10638_v43  ;;  %13180 = vmatpush3.bf16.msra.mxu0 %v13351_v44 }
0x6761   :  { %v10641_v42 = vsel %vm116_vm2, %v10625_v54, 0.0  ;;  %v10665_v53 = vsel %vm116_vm2, %v10657_v29, 0.0  ;;  %13181 = vmatprep.subr.bf16.mxu0 %v13704_v0 }
0x6762   :  { %10642 = vadd.xlane.f32.xlu1 %v10641_v42 }
0x6764   :  { %10663 = vadd.xlane.f32.xlu0 %v10662_v35  ;;  %13182 = vmatpush3.bf16.msra.mxu0 %v13352_v39 }
0x6766   :  { %10666 = vadd.xlane.f32.xlu1 %v10665_v53 }
0x67e5   :  { %v10634_v56 = vpop.xlane.xlu0 %10633 }
0x67e6   :  { %v10646_v2 = vmul.f32 0.03125, %v10634_v56 }
0x67e7   :  { %v10637_v18 = vpop.xlane.xlu1 %10636 }
0x67e8   :  { %v16225_v13 = vsub.f32 %v10622_v15, %v10646_v2  ;;  %v10647_v57 = vmul.f32 0.03125, %v10637_v18 }
0x67ea   :  { %v16227_v55 = vsub.f32 %v10623_v52, %v10647_v57  ;;  %v10658_v62 = vmul.f32 %v16225_v13, %v16225_v13 }
0x67ec   :  { %v10668_v40 = vsel %vm116_vm2, %v10658_v62, 0.0  ;;  %v10659_v47 = vmul.f32 %v16227_v55, %v16227_v55 }
0x67ed   :  { %10669 = vadd.xlane.f32.xlu0 %v10668_v40  ;;  %v10640_v10 = vpop.xlane.xlu0 %10639 }
0x67ee   :  { %v10648_v30 = vmul.f32 0.03125, %v10640_v10  ;;  %v10671_v20 = vsel %vm116_vm2, %v10659_v47, 0.0 }
0x67ef   :  { %10672 = vadd.xlane.f32.xlu1 %v10671_v20  ;;  %v10643_v33 = vpop.xlane.xlu1 %10642 }
0x67f0   :  { %v16235_v8 = vsub.f32 %v10624_v24, %v10648_v30  ;;  %v10649_v32 = vmul.f32 0.03125, %v10643_v33 }
0x67f1   :  { %v10664_v11 = vpop.xlane.xlu0 %10663 }
0x67f2   :  { %v16237_v46 = vsub.f32 %v10625_v54, %v10649_v32  ;;  %v10680_v49 = vmul.f32 0.032258064, %v10664_v11  ;;  %v10660_v37 = vmul.f32 %v16235_v8, %v16235_v8 }
0x67f3   :  { %v10667_v26 = vpop.xlane.xlu1 %10666 }
0x67f4   :  { %13665 = vrsqrt.f32 %v10680_v49  ;;  %v10681_v23 = vmul.f32 0.032258064, %v10667_v26  ;;  %v10674_v5 = vsel %vm116_vm2, %v10660_v37, 0.0  ;;  %v10661_v14 = vmul.f32 %v16237_v46, %v16237_v46 }
0x67f5   :  { %10675 = vadd.xlane.f32.xlu0 %v10674_v5  ;;  %vm10688_vm4 = vcmp.eq.f32.partialorder %v10680_v49, inf  ;;  %v10691_v4 = vand.u32 2147483648, %v10680_v49  ;;  %vm10690_vm10 = vcmp.eq.f32.partialorder %v10680_v49, 0.0 }
0x67f6   :  { %13667 = vrsqrt.f32 %v10681_v23  ;;  %v10677_v27 = vsel %vm116_vm2, %v10661_v14, 0.0  ;;  %vm10695_vm7 = vcmp.eq.f32.partialorder %v10681_v23, inf  ;;  %v10698_v61 = vand.u32 2147483648, %v10681_v23 }
0x67f7   :  { %10678 = vadd.xlane.f32.xlu1 %v10677_v27  ;;  %vm10697_vm8 = vcmp.eq.f32.partialorder %v10681_v23, 0.0 }
0x67fe   :  { %v13666_v12 = vpop.eup %13665 }
0x67ff   :  { %v10687_v63 = vmul.f32 %v13666_v12, %v10680_v49 }
0x6800   :  { %v13668_v36 = vpop.eup %13667 }
0x6801   :  { %v10689_v60 = vsel %vm10688_vm4, %v10680_v49, %v10687_v63  ;;  %v10694_v58 = vmul.f32 %v13668_v36, %v10681_v23 }
0x6802   :  { %v10692_v16 = vsel %vm10690_vm10, %v10691_v4, %v10689_v60 }
0x6803   :  { %v10728_v22 = vadd.f32 1e-06, %v10692_v16  ;;  %v10696_v21 = vsel %vm10695_vm7, %v10681_v23, %v10694_v58 }
0x6804   :  { %v10699_v1 = vsel %vm10697_vm8, %v10698_v61, %v10696_v21 }
0x6805   :  { %13669 = vrcp.f32 %v10728_v22  ;;  %v10729_v15 = vadd.f32 1e-06, %v10699_v1 }
0x6807   :  { %13671 = vrcp.f32 %v10729_v15 }
0x680f   :  { %v13670_v17 = vpop.eup %13669 }
0x6810   :  { %v10747_v52 = vmul.f32 %v13670_v17, %v16204_v28 }
0x6811   :  { %v13672_v7 = vpop.eup %13671 }
0x6812   :  { %v10757_v45 = vmul.f32 %v16248_v3, %v10747_v52  ;;  %v10748_v38 = vmul.f32 %v13672_v7, %v16207_v48 }
0x6814   :  { %v10758_v41 = vmul.f32 %v16248_v3, %v10748_v38  ;;  %v10768_v25 = vadd.f32 %v16256_v34, %v10757_v45 }
0x6816   :  { %v10769_v51 = vadd.f32 %v16256_v34, %v10758_v41 }
0x6818   :  { %v10774_v6 = vpack.c.bf16 %v10769_v51, %v10768_v25 }
0x681a   :  { %13184 = vmatmul.mubr.msk.bf16.vlgmr.msra.gmra.mrb[108].mxu0 %vm116_vm2, %v10774_v6 }
0x681b   :  { %13187 = vmatprep.mubr.msk.bf16.mxu0 %vm13705_vm0, %v13704_v0 }
0x687a   :  { %v10670_v28 = vpop.xlane.xlu0 %10669 }
0x687b   :  { %v10682_v59 = vmul.f32 0.032258064, %v10670_v28 }
0x687c   :  { %v10673_v50 = vpop.xlane.xlu1 %10672 }
0x687d   :  { %13673 = vrsqrt.f32 %v10682_v59  ;;  %v10683_v24 = vmul.f32 0.032258064, %v10673_v50  ;;  %vm10702_vm1 = vcmp.eq.f32.partialorder %v10682_v59, inf  ;;  %v10705_v42 = vand.u32 2147483648, %v10682_v59 }
0x687e   :  { %vm10704_vm11 = vcmp.eq.f32.partialorder %v10682_v59, 0.0 }
0x687f   :  { %13675 = vrsqrt.f32 %v10683_v24  ;;  %vm10709_vm12 = vcmp.eq.f32.partialorder %v10683_v24, inf  ;;  %v10712_v56 = vand.u32 2147483648, %v10683_v24  ;;  %vm10711_vm13 = vcmp.eq.f32.partialorder %v10683_v24, 0.0 }
0x6882   :  { %v10676_v9 = vpop.xlane.xlu0 %10675 }
0x6883   :  { %v10684_v19 = vmul.f32 0.032258064, %v10676_v9 }
0x6884   :  { %v10679_v48 = vpop.xlane.xlu1 %10678 }
0x6885   :  { %13677 = vrsqrt.f32 %v10684_v19  ;;  %v10685_v43 = vmul.f32 0.032258064, %v10679_v48  ;;  %vm10716_vm14 = vcmp.eq.f32.partialorder %v10684_v19, inf  ;;  %v10719_v47 = vand.u32 2147483648, %v10684_v19 }
0x6886   :  { %vm10718_vm15 = vcmp.eq.f32.partialorder %v10684_v19, 0.0 }
0x6887   :  { %v13674_v54 = vpop.eup %13673  ;;  %13679 = vrsqrt.f32 %v10685_v43  ;;  %vm10723_vm3 = vcmp.eq.f32.partialorder %v10685_v43, inf  ;;  %v10726_v11 = vand.u32 2147483648, %v10685_v43  ;;  %vm10725_vm5 = vcmp.eq.f32.partialorder %v10685_v43, 0.0 }
0x6888   :  { %v10701_v31 = vmul.f32 %v13674_v54, %v10682_v59 }
0x6889   :  { %v13676_v29 = vpop.eup %13675 }
0x688a   :  { %v10703_v35 = vsel %vm10702_vm1, %v10682_v59, %v10701_v31  ;;  %v10708_v44 = vmul.f32 %v13676_v29, %v10683_v24 }
0x688b   :  { %v10706_v53 = vsel %vm10704_vm11, %v10705_v42, %v10703_v35 }
0x688c   :  { %v10730_v39 = vadd.f32 1e-06, %v10706_v53  ;;  %v10710_v2 = vsel %vm10709_vm12, %v10683_v24, %v10708_v44 }
0x688d   :  { %v10713_v18 = vsel %vm10711_vm13, %v10712_v56, %v10710_v2 }
0x688e   :  { %13681 = vrcp.f32 %v10730_v39  ;;  %v10731_v57 = vadd.f32 1e-06, %v10713_v18 }
0x688f   :  { %v13678_v62 = vpop.eup %13677 }
0x6890   :  { %13683 = vrcp.f32 %v10731_v57  ;;  %v10715_v40 = vmul.f32 %v13678_v62, %v10684_v19 }
0x6891   :  { %v13680_v10 = vpop.eup %13679 }
0x6892   :  { %v10717_v30 = vsel %vm10716_vm14, %v10684_v19, %v10715_v40  ;;  %v10722_v33 = vmul.f32 %v13680_v10, %v10685_v43 }
0x6893   :  { %v10720_v20 = vsel %vm10718_vm15, %v10719_v47, %v10717_v30 }
0x6894   :  { %v10732_v32 = vadd.f32 1e-06, %v10720_v20  ;;  %v10724_v49 = vsel %vm10723_vm3, %v10685_v43, %v10722_v33 }
0x6895   :  { %v10727_v37 = vsel %vm10725_vm5, %v10726_v11, %v10724_v49 }
0x6896   :  { %13685 = vrcp.f32 %v10732_v32  ;;  %v10733_v23 = vadd.f32 1e-06, %v10727_v37 }
0x6898   :  { %v13682_v26 = vpop.eup %13681  ;;  %13687 = vrcp.f32 %v10733_v23 }
0x6899   :  { %v10749_v5 = vmul.f32 %v13682_v26, %v16225_v13 }
0x689a   :  { %v13684_v14 = vpop.eup %13683 }
0x689b   :  { %v10759_v27 = vmul.f32 %v16248_v3, %v10749_v5  ;;  %v10750_v12 = vmul.f32 %v13684_v14, %v16227_v55 }
0x689d   :  { %v10760_v63 = vmul.f32 %v16248_v3, %v10750_v12  ;;  %v10770_v4 = vadd.f32 %v16256_v34, %v10759_v27 }
0x689f   :  { %v10771_v36 = vadd.f32 %v16256_v34, %v10760_v63 }
0x68a0   :  { %v13686_v60 = vpop.eup %13685 }
0x68a1   :  { %v10751_v16 = vmul.f32 %v13686_v60, %v16235_v8  ;;  %v10775_v58 = vpack.c.bf16 %v10771_v36, %v10770_v4  ;;  %v11532_v8 = vld [vmem:[%s16303_s11 + $0x29] ss:$0 sm:$0xff] }
0x68a2   :  { %v13688_v22 = vpop.eup %13687 }
0x68a3   :  { %13188 = vmatmul.mubr.msk.bf16.gmra.mrb[112].mxu0 %vm116_vm2, %v10775_v58  ;;  %v10761_v13 = vmul.f32 %v16248_v3, %v10751_v16  ;;  %v10752_v61 = vmul.f32 %v13688_v22, %v16237_v46 }
0x68a4   :  { %13191 = vmatprep.mubr.msk.bf16.mxu0 %vm13705_vm0, %v13704_v0 }
0x68a5   :  { %v10762_v55 = vmul.f32 %v16248_v3, %v10752_v61  ;;  %v10772_v21 = vadd.f32 %v16256_v34, %v10761_v13 }
0x68a7   :  { %v10773_v1 = vadd.f32 %v16256_v34, %v10762_v55 }
0x68a9   :  { %v10776_v15 = vpack.c.bf16 %v10773_v1, %v10772_v21 }
0x68ab   :  { %13192 = vmatmul.mubr.msk.bf16.gmra.mrb[116].mxu0 %vm116_vm2, %v10776_v15 }
0x68ed   :  { %v10841_v17 = vpop.f32.mrb[108].mxu0 }
0x68ee   :  { %v10842_v52 = vadd.f32 %v11532_v8, %v10841_v17  ;;  %v13185_v7 = vpop.f32.mrb[109].mxu0 }
0x68ef   :  { %v10844_v46 = vpop.f32.mrb[110].mxu0 }
0x68f0   :  { %10864 = vst [vmem:[%s16313_s12] sm:$0xff] %v10842_v52  ;;  %v10845_v0 = vadd.f32 %v11532_v8, %v10844_v46  ;;  %v13186_v3 = vpop.f32.mrb[111].mxu0 }
0x68f2   :  { %10865 = vst [vmem:[%s16313_s12 + $0x8] sm:$0xff] %v10845_v0 }
0x6976   :  { %v10849_v45 = vpop.f32.mrb[112].mxu0 }
0x6977   :  { %v10850_v38 = vadd.f32 %v11532_v8, %v10849_v45  ;;  %v13189_v34 = vpop.f32.mrb[113].mxu0 }
0x6978   :  { %v10852_v41 = vpop.f32.mrb[114].mxu0 }
0x6979   :  { %10866 = vst [vmem:[%s16313_s12 + $0x10] sm:$0xff] %v10850_v38  ;;  %v10853_v25 = vadd.f32 %v11532_v8, %v10852_v41  ;;  %v13190_v51 = vpop.f32.mrb[115].mxu0 }
0x697b   :  { %10867 = vst [vmem:[%s16313_s12 + $0x18] sm:$0xff] %v10853_v25 }
0x697e   :  { %v10857_v6 = vpop.f32.mrb[116].mxu0 }
0x697f   :  { %v10858_v28 = vadd.f32 %v11532_v8, %v10857_v6  ;;  %v13193_v59 = vpop.f32.mrb[117].mxu0 }
0x6980   :  { %v10860_v50 = vpop.f32.mrb[118].mxu0 }
0x6981   :  { %10868 = vst [vmem:[%s16313_s12 + $0x20] sm:$0xff] %v10858_v28  ;;  %v10861_v24 = vadd.f32 %v11532_v8, %v10860_v50  ;;  %v13194_v9 = vpop.f32.mrb[119].mxu0 }
0x6983   :  { %10869 = vst [vmem:[%s16313_s12 + $0x28] sm:$0xff] %v10861_v24 }

</bundles_post_ra>
